<compile_context>
chip_gen: v7x
topology: tpu7x:2x2x1
jax: 0.10.0
libtpu: 0.0.40
codegen_flags: <defaults>
</compile_context>

<pallas_src>
import functools

import jax
import jax.numpy as jnp
from jax.experimental import pallas as pl
from jax.experimental.pallas import tpu as pltpu


# ----------------------------- Pallas kernel --------------------------------

def _conv7x7_kernel(xt_ref, w_ref, b_ref, o_ref, *, relu, tile_h, width):
    """One (batch, row-tile) grid step of a 7x7 / stride-1 / pad-3 convolution.

    xt_ref: (1, 1, Cin, tile_h + 6, width + 6)  bf16   haloed input row tile
    w_ref : (Cout, 49 * Cin)                    bf16   (co | kh, kw, ci) layout
    b_ref : (Cout, 1)                           f32
    o_ref : (1, Cout, 1, tile_h, width)
    """
    w = w_ref[...]
    b = b_ref[...]
    # Static unroll over the rows of the tile (tile_h <= _MAX_TILE_ROWS).
    for r in range(tile_h):
        # In-VMEM im2col for this output row: 49 shifted (Cin, width) slices,
        # stacked along the contraction axis in (kh, kw, ci) order.
        taps = [xt_ref[0, 0, :, r + kh, kw:kw + width]
                for kh in range(7) for kw in range(7)]
        patches = jnp.concatenate(taps, axis=0)              # (49*Cin, width)
        # Transposed GEMM: spatial width rides the MXU N / lane axis.
        acc = jnp.dot(w, patches, preferred_element_type=jnp.float32)
        acc = acc + b
        if relu:
            acc = jnp.maximum(acc, 0.0)
        o_ref[0, :, 0, r, :] = acc.astype(o_ref.dtype)


_MAX_TILE_ROWS = 8          # static unroll bound inside the kernel
_VMEM_BUDGET = 28 << 20     # per-step working-set target (fits v7x's 64 MiB VMEM)


def _pick_row_tile(H, W, Cin, Cout, out_itemsize):
    """Largest divisor of H (<= _MAX_TILE_ROWS) whose working set fits the budget."""
    best = 1
    for th in range(1, min(H, _MAX_TILE_ROWS) + 1):
        if H % th:
            continue
        in_blk = 2 * Cin * (th + 6) * (W + 6) * 2      # double-buffered bf16 input tile
        w_blk = 2 * Cout * 49 * Cin * 2                # bf16 weights
        out_blk = 2 * Cout * th * W * out_itemsize     # double-buffered output tile
        patches = 49 * Cin * W * 2                     # one row's im2col (bf16)
        acc = Cout * W * 4
        if in_blk + w_blk + out_blk + patches + acc <= _VMEM_BUDGET:
            best = th
    return best


def conv7x7(x, w, b, relu, out_dtype=jnp.bfloat16):
    """7x7 conv, stride 1, padding 3 on NCHW input.

    x: (B, Cin, H, W);  w: HWIO (7, 7, Cin, Cout);  b: (Cout,).
    """
    B, Cin, H, W = x.shape
    Cout = w.shape[-1]
    out_itemsize = jnp.dtype(out_dtype).itemsize
    TH = _pick_row_tile(H, W, Cin, Cout, out_itemsize)
    NT = H // TH
    K = 49 * Cin

    # Zero-pad 3 px all around, cast to bf16 and cut haloed row tiles.
    # TODO(synk): the (TH+6)/TH halo duplication in HBM could be removed entirely
    # with a manual HBM->VMEM DMA (memory_space=pl.ANY) or an Element-indexed window.
    xp = jnp.pad(x.astype(jnp.bfloat16), ((0, 0), (0, 0), (3, 3), (3, 3)))
    tiles = jnp.stack(
        [xp[:, :, t * TH:t * TH + TH + 6, :] for t in range(NT)], axis=1)

    w2 = jnp.transpose(w, (3, 0, 1, 2)).reshape(Cout, K).astype(jnp.bfloat16)
    b2 = b.reshape(Cout, 1).astype(jnp.float32)

    kernel = functools.partial(_conv7x7_kernel, relu=relu, tile_h=TH, width=W)
    cost = pl.CostEstimate(
        flops=2 * B * H * W * K * Cout,
        transcendentals=0,
        bytes_accessed=int(tiles.size * 2 + w2.size * 2 + b2.size * 4
                           + B * Cout * H * W * out_itemsize))

    out = pl.pallas_call(
        kernel,
        out_shape=jax.ShapeDtypeStruct((B, Cout, NT, TH, W), out_dtype),
        grid=(B, NT),
        in_specs=[
            pl.BlockSpec((1, 1, Cin, TH + 6, W + 6),
                         lambda bi, ti: (bi, ti, 0, 0, 0)),
            pl.BlockSpec((Cout, K), lambda bi, ti: (0, 0)),
            pl.BlockSpec((Cout, 1), lambda bi, ti: (0, 0)),
        ],
        out_specs=pl.BlockSpec((1, Cout, 1, TH, W),
                               lambda bi, ti: (bi, 0, ti, 0, 0)),
        compiler_params=pltpu.CompilerParams(
            dimension_semantics=("parallel", "parallel"),
            vmem_limit_bytes=48 * 1024 * 1024),
        cost_estimate=cost,
    )(tiles, w2, b2)
    return out.reshape(B, Cout, H, W)


def conv7x7_ref(x, w, b, relu, out_dtype=jnp.bfloat16):
    """XLA reference for conv7x7 with matching bf16-in / f32-accumulate numerics."""
    y = jax.lax.conv_general_dilated(
        x.astype(jnp.bfloat16), w.astype(jnp.bfloat16),
        window_strides=(1, 1), padding=((3, 3), (3, 3)),
        dimension_numbers=("NCHW", "HWIO", "NCHW"),
        preferred_element_type=jnp.float32)
    y = y + b.reshape(1, -1, 1, 1)
    if relu:
        y = jnp.maximum(y, 0.0)
    return y.astype(out_dtype)


# ------------------------------ JAX glue ops ---------------------------------

def avg_pool2(x):
    # F.avg_pool2d(kernel_size=2, stride=2) on NCHW.
    B, C, H, W = x.shape
    return x.reshape(B, C, H // 2, 2, W // 2, 2).mean(axis=(3, 5))


def bilinear_up2x(x):
    # F.interpolate(scale_factor=2, mode='bilinear', align_corners=False), NCHW.
    B, C, H, W = x.shape
    Ho, Wo = 2 * H, 2 * W

    def src_idx(out_size, in_size):
        d = jnp.arange(out_size, dtype=jnp.float32)
        src = (d + 0.5) * (in_size / out_size) - 0.5
        src = jnp.maximum(src, 0.0)
        i0f = jnp.floor(src)
        frac = src - i0f
        i0 = jnp.minimum(i0f.astype(jnp.int32), in_size - 1)
        i1 = jnp.minimum(i0 + 1, in_size - 1)
        return i0, i1, frac

    y0, y1, wy = src_idx(Ho, H)
    x0, x1, wx = src_idx(Wo, W)
    top = (x[:, :, y0, :] * (1.0 - wy)[None, None, :, None]
           + x[:, :, y1, :] * wy[None, None, :, None])
    out = (top[:, :, :, x0] * (1.0 - wx)[None, None, None, :]
           + top[:, :, :, x1] * wx[None, None, None, :])
    return out


def flow_warp(im, flow):
    # grid_sample(mode='bilinear', padding_mode='border', align_corners=True) on
    # NCHW; flow[:, 0] = horizontal displacement (px), flow[:, 1] = vertical.
    # TODO(synk): data-dependent gather kept in plain JAX (no clean Pallas equivalent).
    B, C, H, W = im.shape
    base_x = jnp.arange(W, dtype=im.dtype)[None, None, :]
    base_y = jnp.arange(H, dtype=im.dtype)[None, :, None]
    px = jnp.clip(base_x + flow[:, 0], 0.0, float(W - 1))
    py = jnp.clip(base_y + flow[:, 1], 0.0, float(H - 1))
    x0f = jnp.floor(px)
    y0f = jnp.floor(py)
    wx = (px - x0f)[:, None]          # (B, 1, H, W)
    wy = (py - y0f)[:, None]
    x0 = x0f.astype(jnp.int32)
    y0 = y0f.astype(jnp.int32)
    x1 = jnp.minimum(x0 + 1, W - 1)
    y1 = jnp.minimum(y0 + 1, H - 1)

    b_idx = jnp.arange(B)[:, None, None, None]
    c_idx = jnp.arange(C)[None, :, None, None]

    def gather(yy, xx):
        return im[b_idx, c_idx, yy[:, None], xx[:, None]]

    v00 = gather(y0, x0)
    v01 = gather(y0, x1)
    v10 = gather(y1, x0)
    v11 = gather(y1, x1)
    return (v00 * (1 - wx) * (1 - wy) + v01 * wx * (1 - wy)
            + v10 * (1 - wx) * wy + v11 * wx * wy)


# ------------------------------ ME_Spynet ------------------------------------

_ME_BASIC_SHAPES = [(8, 32), (32, 64), (64, 32), (32, 16), (16, 2)]
_NUM_LEVELS = 4


def init_params(key):
    """Deterministic synthetic weights: 4 levels x 5 (w, b) pairs, HWIO layout."""
    params = []
    for _ in range(_NUM_LEVELS):
        layer_params = []
        for cin, cout in _ME_BASIC_SHAPES:
            key, kw_key, kb_key = jax.random.split(key, 3)
            fan_in = 7 * 7 * cin
            w = (jax.random.normal(kw_key, (7, 7, cin, cout), jnp.float32)
                 * (2.0 / fan_in) ** 0.5 * 0.1)
            b = 0.01 * jax.random.normal(kb_key, (cout,), jnp.float32)
            layer_params.append((w, b))
        params.append(layer_params)
    return params


def me_basic(x, layer_params, conv_fn):
    # TODO(synk): the 5 conv layers are still separate pallas_calls; fusing them
    # per row tile (halo grows 3 rows/layer) would keep intermediates in VMEM.
    n = len(layer_params)
    for i, (w, b) in enumerate(layer_params):
        last = (i == n - 1)
        x = conv_fn(x, w, b, relu=not last,
                    out_dtype=jnp.float32 if last else jnp.bfloat16)
    return x


def me_spynet(im1, im2, params, conv_fn=conv7x7):
    """im1, im2: NCHW (B, 3, H, W) float; returns flow NCHW (B, 2, H, W) f32."""
    im1 = im1.astype(jnp.float32)
    im2 = im2.astype(jnp.float32)
    L = _NUM_LEVELS
    im1_list = [im1]
    im2_list = [im2]
    for level in range(L - 1):
        im1_list.append(avg_pool2(im1_list[level]))
        im2_list.append(avg_pool2(im2_list[level]))

    B, _, Hc, Wc = im1_list[L - 1].shape
    flow = jnp.zeros((B, 2, Hc // 2, Wc // 2), jnp.float32)
    for level in range(L):
        flow_up = bilinear_up2x(flow) * 2.0
        idx = L - 1 - level
        warped = flow_warp(im2_list[idx], flow_up)
        inp = jnp.concatenate([im1_list[idx], warped, flow_up], axis=1)  # 8 channels
        flow = flow_up + me_basic(inp, params[level], conv_fn)
    return flow


if __name__ == "__main__":
    key = jax.random.PRNGKey(0)
    kp, k1, k2, k3 = jax.random.split(key, 4)
    params = init_params(kp)

    B, C, H, W = 2, 3, 32, 32      # H, W divisible by 2**(_NUM_LEVELS)
    im1 = jax.random.uniform(k1, (B, C, H, W), jnp.float32)
    im2 = jax.random.uniform(k2, (B, C, H, W), jnp.float32)

    # Unit check of the Pallas conv (exercises the multi-row-tile path, NT > 1)
    # against the XLA conv with matched bf16 operands / f32 accumulation.
    x_test = jax.random.uniform(k3, (B, 8, H, W), jnp.float32) - 0.5
    w0, b0 = params[0][0]
    y_pal = conv7x7(x_test, w0, b0, relu=True, out_dtype=jnp.float32)
    y_ref = conv7x7_ref(x_test, w0, b0, relu=True, out_dtype=jnp.float32)
    conv_err = float(jnp.max(jnp.abs(y_pal - y_ref)))
    assert conv_err < 1e-3, f"conv7x7 mismatch vs XLA reference: {conv_err}"

    # Full forward pass.
    fwd = jax.jit(me_spynet)
    flow = fwd(im1, im2, params)
    jax.block_until_ready(flow)
    assert flow.shape == (B, 2, H, W)
    assert bool(jnp.all(jnp.isfinite(flow)))

    # End-to-end check against the bf16-matched XLA reference pipeline.
    ref_fwd = jax.jit(functools.partial(me_spynet, conv_fn=conv7x7_ref))
    flow_ref = ref_fwd(im1, im2, params)
    e2e_err = float(jnp.max(jnp.abs(flow - flow_ref)))
    assert e2e_err < 5e-2, f"ME_Spynet mismatch vs XLA reference: {e2e_err}"

    print("KERNEL_OK")
</pallas_src>

<mosaic_0001>
module attributes {stable_mosaic.version = 11 : i64} {
  func.func @_conv7x7_kernel(%arg0: i32, %arg1: i32, %arg2: memref<1x1x8x14x38xbf16, #tpu.memory_space<vmem>>, %arg3: memref<32x392xbf16, #tpu.memory_space<vmem>>, %arg4: memref<32x1xf32, #tpu.memory_space<vmem>>, %arg5: memref<1x32x1x8x32xf32, #tpu.memory_space<vmem>>) attributes {dimension_semantics = [#tpu.dimension_semantics<parallel>, #tpu.dimension_semantics<parallel>], iteration_bounds = array<i64: 2, 4>, scalar_prefetch = 0 : i64, scratch_operands = 0 : i64, tpu.core_type = #tpu.core_type<tc>, window_params = [{transform_indices = @transform_0, window_bounds = array<i64: 1, 1, 8, 14, 38>}, {pipeline_mode = #tpu.pipeline_mode<synchronous>, transform_indices = @transform_1, window_bounds = array<i64: 32, 392>}, {pipeline_mode = #tpu.pipeline_mode<synchronous>, transform_indices = @transform_2, window_bounds = array<i64: 32, 1>}, {transform_indices = @transform_3, window_bounds = array<i64: 1, 32, 1, 8, 32>}]} {
    %c0 = arith.constant 0 : index
    %c0_0 = arith.constant 0 : index
    %0 = vector.load %arg3[%c0, %c0_0] : memref<32x392xbf16, #tpu.memory_space<vmem>>, vector<32x392xbf16>
    %c0_1 = arith.constant 0 : index
    %c0_2 = arith.constant 0 : index
    %1 = vector.load %arg4[%c0_1, %c0_2] : memref<32x1xf32, #tpu.memory_space<vmem>>, vector<32x1xf32>
    %c0_3 = arith.constant 0 : index
    %c0_4 = arith.constant 0 : index
    %c0_5 = arith.constant 0 : index
    %c0_6 = arith.constant 0 : index
    %c0_7 = arith.constant 0 : index
    %2 = vector.load %arg2[%c0_3, %c0_4, %c0_5, %c0_6, %c0_7] : memref<1x1x8x14x38xbf16, #tpu.memory_space<vmem>>, vector<1x1x8x1x32xbf16>
    %3 = vector.shape_cast %2 : vector<1x1x8x1x32xbf16> to vector<8x32xbf16>
    %c0_8 = arith.constant 0 : index
    %c0_9 = arith.constant 0 : index
    %c0_10 = arith.constant 0 : index
    %c0_11 = arith.constant 0 : index
    %c1 = arith.constant 1 : index
    %4 = vector.load %arg2[%c0_8, %c0_9, %c0_10, %c0_11, %c1] : memref<1x1x8x14x38xbf16, #tpu.memory_space<vmem>>, vector<1x1x8x1x32xbf16>
    %5 = vector.shape_cast %4 : vector<1x1x8x1x32xbf16> to vector<8x32xbf16>
    %c0_12 = arith.constant 0 : index
    %c0_13 = arith.constant 0 : index
    %c0_14 = arith.constant 0 : index
    %c0_15 = arith.constant 0 : index
    %c2 = arith.constant 2 : index
    %6 = vector.load %arg2[%c0_12, %c0_13, %c0_14, %c0_15, %c2] : memref<1x1x8x14x38xbf16, #tpu.memory_space<vmem>>, vector<1x1x8x1x32xbf16>
    %7 = vector.shape_cast %6 : vector<1x1x8x1x32xbf16> to vector<8x32xbf16>
    %c0_16 = arith.constant 0 : index
    %c0_17 = arith.constant 0 : index
    %c0_18 = arith.constant 0 : index
    %c0_19 = arith.constant 0 : index
    %c3 = arith.constant 3 : index
    %8 = vector.load %arg2[%c0_16, %c0_17, %c0_18, %c0_19, %c3] : memref<1x1x8x14x38xbf16, #tpu.memory_space<vmem>>, vector<1x1x8x1x32xbf16>
    %9 = vector.shape_cast %8 : vector<1x1x8x1x32xbf16> to vector<8x32xbf16>
    %c0_20 = arith.constant 0 : index
    %c0_21 = arith.constant 0 : index
    %c0_22 = arith.constant 0 : index
    %c0_23 = arith.constant 0 : index
    %c4 = arith.constant 4 : index
    %10 = vector.load %arg2[%c0_20, %c0_21, %c0_22, %c0_23, %c4] : memref<1x1x8x14x38xbf16, #tpu.memory_space<vmem>>, vector<1x1x8x1x32xbf16>
    %11 = vector.shape_cast %10 : vector<1x1x8x1x32xbf16> to vector<8x32xbf16>
    %c0_24 = arith.constant 0 : index
    %c0_25 = arith.constant 0 : index
    %c0_26 = arith.constant 0 : index
    %c0_27 = arith.constant 0 : index
    %c5 = arith.constant 5 : index
    %12 = vector.load %arg2[%c0_24, %c0_25, %c0_26, %c0_27, %c5] : memref<1x1x8x14x38xbf16, #tpu.memory_space<vmem>>, vector<1x1x8x1x32xbf16>
    %13 = vector.shape_cast %12 : vector<1x1x8x1x32xbf16> to vector<8x32xbf16>
    %c0_28 = arith.constant 0 : index
    %c0_29 = arith.constant 0 : index
    %c0_30 = arith.constant 0 : index
    %c0_31 = arith.constant 0 : index
    %c6 = arith.constant 6 : index
    %14 = vector.load %arg2[%c0_28, %c0_29, %c0_30, %c0_31, %c6] : memref<1x1x8x14x38xbf16, #tpu.memory_space<vmem>>, vector<1x1x8x1x32xbf16>
    %15 = vector.shape_cast %14 : vector<1x1x8x1x32xbf16> to vector<8x32xbf16>
    %c0_32 = arith.constant 0 : index
    %c0_33 = arith.constant 0 : index
    %c0_34 = arith.constant 0 : index
    %c1_35 = arith.constant 1 : index
    %c0_36 = arith.constant 0 : index
    %16 = vector.load %arg2[%c0_32, %c0_33, %c0_34, %c1_35, %c0_36] : memref<1x1x8x14x38xbf16, #tpu.memory_space<vmem>>, vector<1x1x8x1x32xbf16>
    %17 = vector.shape_cast %16 : vector<1x1x8x1x32xbf16> to vector<8x32xbf16>
    %c0_37 = arith.constant 0 : index
    %c0_38 = arith.constant 0 : index
    %c0_39 = arith.constant 0 : index
    %c1_40 = arith.constant 1 : index
    %c1_41 = arith.constant 1 : index
    %18 = vector.load %arg2[%c0_37, %c0_38, %c0_39, %c1_40, %c1_41] : memref<1x1x8x14x38xbf16, #tpu.memory_space<vmem>>, vector<1x1x8x1x32xbf16>
    %19 = vector.shape_cast %18 : vector<1x1x8x1x32xbf16> to vector<8x32xbf16>
    %c0_42 = arith.constant 0 : index
    %c0_43 = arith.constant 0 : index
    %c0_44 = arith.constant 0 : index
    %c1_45 = arith.constant 1 : index
    %c2_46 = arith.constant 2 : index
    %20 = vector.load %arg2[%c0_42, %c0_43, %c0_44, %c1_45, %c2_46] : memref<1x1x8x14x38xbf16, #tpu.memory_space<vmem>>, vector<1x1x8x1x32xbf16>
    %21 = vector.shape_cast %20 : vector<1x1x8x1x32xbf16> to vector<8x32xbf16>
    %c0_47 = arith.constant 0 : index
    %c0_48 = arith.constant 0 : index
    %c0_49 = arith.constant 0 : index
    %c1_50 = arith.constant 1 : index
    %c3_51 = arith.constant 3 : index
    %22 = vector.load %arg2[%c0_47, %c0_48, %c0_49, %c1_50, %c3_51] : memref<1x1x8x14x38xbf16, #tpu.memory_space<vmem>>, vector<1x1x8x1x32xbf16>
    %23 = vector.shape_cast %22 : vector<1x1x8x1x32xbf16> to vector<8x32xbf16>
    %c0_52 = arith.constant 0 : index
    %c0_53 = arith.constant 0 : index
    %c0_54 = arith.constant 0 : index
    %c1_55 = arith.constant 1 : index
    %c4_56 = arith.constant 4 : index
    %24 = vector.load %arg2[%c0_52, %c0_53, %c0_54, %c1_55, %c4_56] : memref<1x1x8x14x38xbf16, #tpu.memory_space<vmem>>, vector<1x1x8x1x32xbf16>
    %25 = vector.shape_cast %24 : vector<1x1x8x1x32xbf16> to vector<8x32xbf16>
    %c0_57 = arith.constant 0 : index
    %c0_58 = arith.constant 0 : index
    %c0_59 = arith.constant 0 : index
    %c1_60 = arith.constant 1 : index
    %c5_61 = arith.constant 5 : index
    %26 = vector.load %arg2[%c0_57, %c0_58, %c0_59, %c1_60, %c5_61] : memref<1x1x8x14x38xbf16, #tpu.memory_space<vmem>>, vector<1x1x8x1x32xbf16>
    %27 = vector.shape_cast %26 : vector<1x1x8x1x32xbf16> to vector<8x32xbf16>
    %c0_62 = arith.constant 0 : index
    %c0_63 = arith.constant 0 : index
    %c0_64 = arith.constant 0 : index
    %c1_65 = arith.constant 1 : index
    %c6_66 = arith.constant 6 : index
    %28 = vector.load %arg2[%c0_62, %c0_63, %c0_64, %c1_65, %c6_66] : memref<1x1x8x14x38xbf16, #tpu.memory_space<vmem>>, vector<1x1x8x1x32xbf16>
    %29 = vector.shape_cast %28 : vector<1x1x8x1x32xbf16> to vector<8x32xbf16>
    %c0_67 = arith.constant 0 : index
    %c0_68 = arith.constant 0 : index
    %c0_69 = arith.constant 0 : index
    %c2_70 = arith.constant 2 : index
    %c0_71 = arith.constant 0 : index
    %30 = vector.load %arg2[%c0_67, %c0_68, %c0_69, %c2_70, %c0_71] : memref<1x1x8x14x38xbf16, #tpu.memory_space<vmem>>, vector<1x1x8x1x32xbf16>
    %31 = vector.shape_cast %30 : vector<1x1x8x1x32xbf16> to vector<8x32xbf16>
    %c0_72 = arith.constant 0 : index
    %c0_73 = arith.constant 0 : index
    %c0_74 = arith.constant 0 : index
    %c2_75 = arith.constant 2 : index
    %c1_76 = arith.constant 1 : index
    %32 = vector.load %arg2[%c0_72, %c0_73, %c0_74, %c2_75, %c1_76] : memref<1x1x8x14x38xbf16, #tpu.memory_space<vmem>>, vector<1x1x8x1x32xbf16>
    %33 = vector.shape_cast %32 : vector<1x1x8x1x32xbf16> to vector<8x32xbf16>
    %c0_77 = arith.constant 0 : index
    %c0_78 = arith.constant 0 : index
    %c0_79 = arith.constant 0 : index
    %c2_80 = arith.constant 2 : index
    %c2_81 = arith.constant 2 : index
    %34 = vector.load %arg2[%c0_77, %c0_78, %c0_79, %c2_80, %c2_81] : memref<1x1x8x14x38xbf16, #tpu.memory_space<vmem>>, vector<1x1x8x1x32xbf16>
    %35 = vector.shape_cast %34 : vector<1x1x8x1x32xbf16> to vector<8x32xbf16>
    %c0_82 = arith.constant 0 : index
    %c0_83 = arith.constant 0 : index
    %c0_84 = arith.constant 0 : index
    %c2_85 = arith.constant 2 : index
    %c3_86 = arith.constant 3 : index
    %36 = vector.load %arg2[%c0_82, %c0_83, %c0_84, %c2_85, %c3_86] : memref<1x1x8x14x38xbf16, #tpu.memory_space<vmem>>, vector<1x1x8x1x32xbf16>
    %37 = vector.shape_cast %36 : vector<1x1x8x1x32xbf16> to vector<8x32xbf16>
    %c0_87 = arith.constant 0 : index
    %c0_88 = arith.constant 0 : index
    %c0_89 = arith.constant 0 : index
    %c2_90 = arith.constant 2 : index
    %c4_91 = arith.constant 4 : index
    %38 = vector.load %arg2[%c0_87, %c0_88, %c0_89, %c2_90, %c4_91] : memref<1x1x8x14x38xbf16, #tpu.memory_space<vmem>>, vector<1x1x8x1x32xbf16>
    %39 = vector.shape_cast %38 : vector<1x1x8x1x32xbf16> to vector<8x32xbf16>
    %c0_92 = arith.constant 0 : index
    %c0_93 = arith.constant 0 : index
    %c0_94 = arith.constant 0 : index
    %c2_95 = arith.constant 2 : index
    %c5_96 = arith.constant 5 : index
    %40 = vector.load %arg2[%c0_92, %c0_93, %c0_94, %c2_95, %c5_96] : memref<1x1x8x14x38xbf16, #tpu.memory_space<vmem>>, vector<1x1x8x1x32xbf16>
    %41 = vector.shape_cast %40 : vector<1x1x8x1x32xbf16> to vector<8x32xbf16>
    %c0_97 = arith.constant 0 : index
    %c0_98 = arith.constant 0 : index
    %c0_99 = arith.constant 0 : index
    %c2_100 = arith.constant 2 : index
    %c6_101 = arith.constant 6 : index
    %42 = vector.load %arg2[%c0_97, %c0_98, %c0_99, %c2_100, %c6_101] : memref<1x1x8x14x38xbf16, #tpu.memory_space<vmem>>, vector<1x1x8x1x32xbf16>
    %43 = vector.shape_cast %42 : vector<1x1x8x1x32xbf16> to vector<8x32xbf16>
    %c0_102 = arith.constant 0 : index
    %c0_103 = arith.constant 0 : index
    %c0_104 = arith.constant 0 : index
    %c3_105 = arith.constant 3 : index
    %c0_106 = arith.constant 0 : index
    %44 = vector.load %arg2[%c0_102, %c0_103, %c0_104, %c3_105, %c0_106] : memref<1x1x8x14x38xbf16, #tpu.memory_space<vmem>>, vector<1x1x8x1x32xbf16>
    %45 = vector.shape_cast %44 : vector<1x1x8x1x32xbf16> to vector<8x32xbf16>
    %c0_107 = arith.constant 0 : index
    %c0_108 = arith.constant 0 : index
    %c0_109 = arith.constant 0 : index
    %c3_110 = arith.constant 3 : index
    %c1_111 = arith.constant 1 : index
    %46 = vector.load %arg2[%c0_107, %c0_108, %c0_109, %c3_110, %c1_111] : memref<1x1x8x14x38xbf16, #tpu.memory_space<vmem>>, vector<1x1x8x1x32xbf16>
    %47 = vector.shape_cast %46 : vector<1x1x8x1x32xbf16> to vector<8x32xbf16>
    %c0_112 = arith.constant 0 : index
    %c0_113 = arith.constant 0 : index
    %c0_114 = arith.constant 0 : index
    %c3_115 = arith.constant 3 : index
    %c2_116 = arith.constant 2 : index
    %48 = vector.load %arg2[%c0_112, %c0_113, %c0_114, %c3_115, %c2_116] : memref<1x1x8x14x38xbf16, #tpu.memory_space<vmem>>, vector<1x1x8x1x32xbf16>
    %49 = vector.shape_cast %48 : vector<1x1x8x1x32xbf16> to vector<8x32xbf16>
    %c0_117 = arith.constant 0 : index
    %c0_118 = arith.constant 0 : index
    %c0_119 = arith.constant 0 : index
    %c3_120 = arith.constant 3 : index
    %c3_121 = arith.constant 3 : index
    %50 = vector.load %arg2[%c0_117, %c0_118, %c0_119, %c3_120, %c3_121] : memref<1x1x8x14x38xbf16, #tpu.memory_space<vmem>>, vector<1x1x8x1x32xbf16>
    %51 = vector.shape_cast %50 : vector<1x1x8x1x32xbf16> to vector<8x32xbf16>
    %c0_122 = arith.constant 0 : index
    %c0_123 = arith.constant 0 : index
    %c0_124 = arith.constant 0 : index
    %c3_125 = arith.constant 3 : index
    %c4_126 = arith.constant 4 : index
    %52 = vector.load %arg2[%c0_122, %c0_123, %c0_124, %c3_125, %c4_126] : memref<1x1x8x14x38xbf16, #tpu.memory_space<vmem>>, vector<1x1x8x1x32xbf16>
    %53 = vector.shape_cast %52 : vector<1x1x8x1x32xbf16> to vector<8x32xbf16>
    %c0_127 = arith.constant 0 : index
    %c0_128 = arith.constant 0 : index
    %c0_129 = arith.constant 0 : index
    %c3_130 = arith.constant 3 : index
    %c5_131 = arith.constant 5 : index
    %54 = vector.load %arg2[%c0_127, %c0_128, %c0_129, %c3_130, %c5_131] : memref<1x1x8x14x38xbf16, #tpu.memory_space<vmem>>, vector<1x1x8x1x32xbf16>
    %55 = vector.shape_cast %54 : vector<1x1x8x1x32xbf16> to vector<8x32xbf16>
    %c0_132 = arith.constant 0 : index
    %c0_133 = arith.constant 0 : index
    %c0_134 = arith.constant 0 : index
    %c3_135 = arith.constant 3 : index
    %c6_136 = arith.constant 6 : index
    %56 = vector.load %arg2[%c0_132, %c0_133, %c0_134, %c3_135, %c6_136] : memref<1x1x8x14x38xbf16, #tpu.memory_space<vmem>>, vector<1x1x8x1x32xbf16>
    %57 = vector.shape_cast %56 : vector<1x1x8x1x32xbf16> to vector<8x32xbf16>
    %c0_137 = arith.constant 0 : index
    %c0_138 = arith.constant 0 : index
    %c0_139 = arith.constant 0 : index
    %c4_140 = arith.constant 4 : index
    %c0_141 = arith.constant 0 : index
    %58 = vector.load %arg2[%c0_137, %c0_138, %c0_139, %c4_140, %c0_141] : memref<1x1x8x14x38xbf16, #tpu.memory_space<vmem>>, vector<1x1x8x1x32xbf16>
    %59 = vector.shape_cast %58 : vector<1x1x8x1x32xbf16> to vector<8x32xbf16>
    %c0_142 = arith.constant 0 : index
    %c0_143 = arith.constant 0 : index
    %c0_144 = arith.constant 0 : index
    %c4_145 = arith.constant 4 : index
    %c1_146 = arith.constant 1 : index
    %60 = vector.load %arg2[%c0_142, %c0_143, %c0_144, %c4_145, %c1_146] : memref<1x1x8x14x38xbf16, #tpu.memory_space<vmem>>, vector<1x1x8x1x32xbf16>
    %61 = vector.shape_cast %60 : vector<1x1x8x1x32xbf16> to vector<8x32xbf16>
    %c0_147 = arith.constant 0 : index
    %c0_148 = arith.constant 0 : index
    %c0_149 = arith.constant 0 : index
    %c4_150 = arith.constant 4 : index
    %c2_151 = arith.constant 2 : index
    %62 = vector.load %arg2[%c0_147, %c0_148, %c0_149, %c4_150, %c2_151] : memref<1x1x8x14x38xbf16, #tpu.memory_space<vmem>>, vector<1x1x8x1x32xbf16>
    %63 = vector.shape_cast %62 : vector<1x1x8x1x32xbf16> to vector<8x32xbf16>
    %c0_152 = arith.constant 0 : index
    %c0_153 = arith.constant 0 : index
    %c0_154 = arith.constant 0 : index
    %c4_155 = arith.constant 4 : index
    %c3_156 = arith.constant 3 : index
    %64 = vector.load %arg2[%c0_152, %c0_153, %c0_154, %c4_155, %c3_156] : memref<1x1x8x14x38xbf16, #tpu.memory_space<vmem>>, vector<1x1x8x1x32xbf16>
    %65 = vector.shape_cast %64 : vector<1x1x8x1x32xbf16> to vector<8x32xbf16>
    %c0_157 = arith.constant 0 : index
    %c0_158 = arith.constant 0 : index
    %c0_159 = arith.constant 0 : index
    %c4_160 = arith.constant 4 : index
    %c4_161 = arith.constant 4 : index
    %66 = vector.load %arg2[%c0_157, %c0_158, %c0_159, %c4_160, %c4_161] : memref<1x1x8x14x38xbf16, #tpu.memory_space<vmem>>, vector<1x1x8x1x32xbf16>
    %67 = vector.shape_cast %66 : vector<1x1x8x1x32xbf16> to vector<8x32xbf16>
    %c0_162 = arith.constant 0 : index
    %c0_163 = arith.constant 0 : index
    %c0_164 = arith.constant 0 : index
    %c4_165 = arith.constant 4 : index
    %c5_166 = arith.constant 5 : index
    %68 = vector.load %arg2[%c0_162, %c0_163, %c0_164, %c4_165, %c5_166] : memref<1x1x8x14x38xbf16, #tpu.memory_space<vmem>>, vector<1x1x8x1x32xbf16>
    %69 = vector.shape_cast %68 : vector<1x1x8x1x32xbf16> to vector<8x32xbf16>
    %c0_167 = arith.constant 0 : index
    %c0_168 = arith.constant 0 : index
    %c0_169 = arith.constant 0 : index
    %c4_170 = arith.constant 4 : index
    %c6_171 = arith.constant 6 : index
    %70 = vector.load %arg2[%c0_167, %c0_168, %c0_169, %c4_170, %c6_171] : memref<1x1x8x14x38xbf16, #tpu.memory_space<vmem>>, vector<1x1x8x1x32xbf16>
    %71 = vector.shape_cast %70 : vector<1x1x8x1x32xbf16> to vector<8x32xbf16>
    %c0_172 = arith.constant 0 : index
    %c0_173 = arith.constant 0 : index
    %c0_174 = arith.constant 0 : index
    %c5_175 = arith.constant 5 : index
    %c0_176 = arith.constant 0 : index
    %72 = vector.load %arg2[%c0_172, %c0_173, %c0_174, %c5_175, %c0_176] : memref<1x1x8x14x38xbf16, #tpu.memory_space<vmem>>, vector<1x1x8x1x32xbf16>
    %73 = vector.shape_cast %72 : vector<1x1x8x1x32xbf16> to vector<8x32xbf16>
    %c0_177 = arith.constant 0 : index
    %c0_178 = arith.constant 0 : index
    %c0_179 = arith.constant 0 : index
    %c5_180 = arith.constant 5 : index
    %c1_181 = arith.constant 1 : index
    %74 = vector.load %arg2[%c0_177, %c0_178, %c0_179, %c5_180, %c1_181] : memref<1x1x8x14x38xbf16, #tpu.memory_space<vmem>>, vector<1x1x8x1x32xbf16>
    %75 = vector.shape_cast %74 : vector<1x1x8x1x32xbf16> to vector<8x32xbf16>
    %c0_182 = arith.constant 0 : index
    %c0_183 = arith.constant 0 : index
    %c0_184 = arith.constant 0 : index
    %c5_185 = arith.constant 5 : index
    %c2_186 = arith.constant 2 : index
    %76 = vector.load %arg2[%c0_182, %c0_183, %c0_184, %c5_185, %c2_186] : memref<1x1x8x14x38xbf16, #tpu.memory_space<vmem>>, vector<1x1x8x1x32xbf16>
    %77 = vector.shape_cast %76 : vector<1x1x8x1x32xbf16> to vector<8x32xbf16>
    %c0_187 = arith.constant 0 : index
    %c0_188 = arith.constant 0 : index
    %c0_189 = arith.constant 0 : index
    %c5_190 = arith.constant 5 : index
    %c3_191 = arith.constant 3 : index
    %78 = vector.load %arg2[%c0_187, %c0_188, %c0_189, %c5_190, %c3_191] : memref<1x1x8x14x38xbf16, #tpu.memory_space<vmem>>, vector<1x1x8x1x32xbf16>
    %79 = vector.shape_cast %78 : vector<1x1x8x1x32xbf16> to vector<8x32xbf16>
    %c0_192 = arith.constant 0 : index
    %c0_193 = arith.constant 0 : index
    %c0_194 = arith.constant 0 : index
    %c5_195 = arith.constant 5 : index
    %c4_196 = arith.constant 4 : index
    %80 = vector.load %arg2[%c0_192, %c0_193, %c0_194, %c5_195, %c4_196] : memref<1x1x8x14x38xbf16, #tpu.memory_space<vmem>>, vector<1x1x8x1x32xbf16>
    %81 = vector.shape_cast %80 : vector<1x1x8x1x32xbf16> to vector<8x32xbf16>
    %c0_197 = arith.constant 0 : index
    %c0_198 = arith.constant 0 : index
    %c0_199 = arith.constant 0 : index
    %c5_200 = arith.constant 5 : index
    %c5_201 = arith.constant 5 : index
    %82 = vector.load %arg2[%c0_197, %c0_198, %c0_199, %c5_200, %c5_201] : memref<1x1x8x14x38xbf16, #tpu.memory_space<vmem>>, vector<1x1x8x1x32xbf16>
    %83 = vector.shape_cast %82 : vector<1x1x8x1x32xbf16> to vector<8x32xbf16>
    %c0_202 = arith.constant 0 : index
    %c0_203 = arith.constant 0 : index
    %c0_204 = arith.constant 0 : index
    %c5_205 = arith.constant 5 : index
    %c6_206 = arith.constant 6 : index
    %84 = vector.load %arg2[%c0_202, %c0_203, %c0_204, %c5_205, %c6_206] : memref<1x1x8x14x38xbf16, #tpu.memory_space<vmem>>, vector<1x1x8x1x32xbf16>
    %85 = vector.shape_cast %84 : vector<1x1x8x1x32xbf16> to vector<8x32xbf16>
    %c0_207 = arith.constant 0 : index
    %c0_208 = arith.constant 0 : index
    %c0_209 = arith.constant 0 : index
    %c6_210 = arith.constant 6 : index
    %c0_211 = arith.constant 0 : index
    %86 = vector.load %arg2[%c0_207, %c0_208, %c0_209, %c6_210, %c0_211] : memref<1x1x8x14x38xbf16, #tpu.memory_space<vmem>>, vector<1x1x8x1x32xbf16>
    %87 = vector.shape_cast %86 : vector<1x1x8x1x32xbf16> to vector<8x32xbf16>
    %c0_212 = arith.constant 0 : index
    %c0_213 = arith.constant 0 : index
    %c0_214 = arith.constant 0 : index
    %c6_215 = arith.constant 6 : index
    %c1_216 = arith.constant 1 : index
    %88 = vector.load %arg2[%c0_212, %c0_213, %c0_214, %c6_215, %c1_216] : memref<1x1x8x14x38xbf16, #tpu.memory_space<vmem>>, vector<1x1x8x1x32xbf16>
    %89 = vector.shape_cast %88 : vector<1x1x8x1x32xbf16> to vector<8x32xbf16>
    %c0_217 = arith.constant 0 : index
    %c0_218 = arith.constant 0 : index
    %c0_219 = arith.constant 0 : index
    %c6_220 = arith.constant 6 : index
    %c2_221 = arith.constant 2 : index
    %90 = vector.load %arg2[%c0_217, %c0_218, %c0_219, %c6_220, %c2_221] : memref<1x1x8x14x38xbf16, #tpu.memory_space<vmem>>, vector<1x1x8x1x32xbf16>
    %91 = vector.shape_cast %90 : vector<1x1x8x1x32xbf16> to vector<8x32xbf16>
    %c0_222 = arith.constant 0 : index
    %c0_223 = arith.constant 0 : index
    %c0_224 = arith.constant 0 : index
    %c6_225 = arith.constant 6 : index
    %c3_226 = arith.constant 3 : index
    %92 = vector.load %arg2[%c0_222, %c0_223, %c0_224, %c6_225, %c3_226] : memref<1x1x8x14x38xbf16, #tpu.memory_space<vmem>>, vector<1x1x8x1x32xbf16>
    %93 = vector.shape_cast %92 : vector<1x1x8x1x32xbf16> to vector<8x32xbf16>
    %c0_227 = arith.constant 0 : index
    %c0_228 = arith.constant 0 : index
    %c0_229 = arith.constant 0 : index
    %c6_230 = arith.constant 6 : index
    %c4_231 = arith.constant 4 : index
    %94 = vector.load %arg2[%c0_227, %c0_228, %c0_229, %c6_230, %c4_231] : memref<1x1x8x14x38xbf16, #tpu.memory_space<vmem>>, vector<1x1x8x1x32xbf16>
    %95 = vector.shape_cast %94 : vector<1x1x8x1x32xbf16> to vector<8x32xbf16>
    %c0_232 = arith.constant 0 : index
    %c0_233 = arith.constant 0 : index
    %c0_234 = arith.constant 0 : index
    %c6_235 = arith.constant 6 : index
    %c5_236 = arith.constant 5 : index
    %96 = vector.load %arg2[%c0_232, %c0_233, %c0_234, %c6_235, %c5_236] : memref<1x1x8x14x38xbf16, #tpu.memory_space<vmem>>, vector<1x1x8x1x32xbf16>
    %97 = vector.shape_cast %96 : vector<1x1x8x1x32xbf16> to vector<8x32xbf16>
    %c0_237 = arith.constant 0 : index
    %c0_238 = arith.constant 0 : index
    %c0_239 = arith.constant 0 : index
    %c6_240 = arith.constant 6 : index
    %c6_241 = arith.constant 6 : index
    %98 = vector.load %arg2[%c0_237, %c0_238, %c0_239, %c6_240, %c6_241] : memref<1x1x8x14x38xbf16, #tpu.memory_space<vmem>>, vector<1x1x8x1x32xbf16>
    %99 = vector.shape_cast %98 : vector<1x1x8x1x32xbf16> to vector<8x32xbf16>
    %100 = tpu.concatenate %3, %5, %7, %9, %11, %13, %15, %17, %19, %21, %23, %25, %27, %29, %31, %33 in 0 : vector<8x32xbf16>, vector<8x32xbf16>, vector<8x32xbf16>, vector<8x32xbf16>, vector<8x32xbf16>, vector<8x32xbf16>, vector<8x32xbf16>, vector<8x32xbf16>, vector<8x32xbf16>, vector<8x32xbf16>, vector<8x32xbf16>, vector<8x32xbf16>, vector<8x32xbf16>, vector<8x32xbf16>, vector<8x32xbf16>, vector<8x32xbf16> -> vector<128x32xbf16>
    %101 = tpu.concatenate %35, %37, %39, %41, %43, %45, %47, %49, %51, %53, %55, %57, %59, %61, %63, %65 in 0 : vector<8x32xbf16>, vector<8x32xbf16>, vector<8x32xbf16>, vector<8x32xbf16>, vector<8x32xbf16>, vector<8x32xbf16>, vector<8x32xbf16>, vector<8x32xbf16>, vector<8x32xbf16>, vector<8x32xbf16>, vector<8x32xbf16>, vector<8x32xbf16>, vector<8x32xbf16>, vector<8x32xbf16>, vector<8x32xbf16>, vector<8x32xbf16> -> vector<128x32xbf16>
    %102 = tpu.concatenate %67, %69, %71, %73, %75, %77, %79, %81, %83, %85, %87, %89, %91, %93, %95, %97 in 0 : vector<8x32xbf16>, vector<8x32xbf16>, vector<8x32xbf16>, vector<8x32xbf16>, vector<8x32xbf16>, vector<8x32xbf16>, vector<8x32xbf16>, vector<8x32xbf16>, vector<8x32xbf16>, vector<8x32xbf16>, vector<8x32xbf16>, vector<8x32xbf16>, vector<8x32xbf16>, vector<8x32xbf16>, vector<8x32xbf16>, vector<8x32xbf16> -> vector<128x32xbf16>
    %103 = tpu.concatenate %100, %101, %102, %99 in 0 : vector<128x32xbf16>, vector<128x32xbf16>, vector<128x32xbf16>, vector<8x32xbf16> -> vector<392x32xbf16>
    %cst = arith.constant dense<0.000000e+00> : vector<32x32xf32>
    %104 = tpu.matmul %0, %103, %cst {dimension_numbers = #tpu.dot_dimension_numbers<[1], [0], [0], [1], [0, 0, 1, 1], [], []>} : vector<32x392xbf16>, vector<392x32xbf16>, vector<32x32xf32> -> vector<32x32xf32>
    %105 = vector.broadcast %1 : vector<32x1xf32> to vector<32x32xf32>
    %106 = arith.addf %104, %105 : vector<32x32xf32>
    %cst_242 = arith.constant 0.000000e+00 : f32
    %107 = vector.broadcast %cst_242 : f32 to vector<32x32xf32>
    %108 = arith.maximumf %106, %107 : vector<32x32xf32>
    %c0_243 = arith.constant 0 : index
    %c0_244 = arith.constant 0 : index
    %c0_245 = arith.constant 0 : index
    %c0_246 = arith.constant 0 : index
    %c0_247 = arith.constant 0 : index
    %109 = vector.load %arg5[%c0_243, %c0_244, %c0_245, %c0_246, %c0_247] : memref<1x32x1x8x32xf32, #tpu.memory_space<vmem>>, vector<1x32x1x1x32xf32>
    %110 = vector.shape_cast %109 : vector<1x32x1x1x32xf32> to vector<32x32xf32>
    %111 = vector.shape_cast %108 : vector<32x32xf32> to vector<1x32x1x1x32xf32>
    tpu.vector_store %arg5[%c0_243, %c0_244, %c0_245, %c0_246, %c0_247], %111 {strides = array<i32>} : memref<1x32x1x8x32xf32, #tpu.memory_space<vmem>>, vector<1x32x1x1x32xf32>,
    %c0_248 = arith.constant 0 : index
    %c0_249 = arith.constant 0 : index
    %c0_250 = arith.constant 0 : index
    %c1_251 = arith.constant 1 : index
    %c0_252 = arith.constant 0 : index
    %112 = vector.load %arg2[%c0_248, %c0_249, %c0_250, %c1_251, %c0_252] : memref<1x1x8x14x38xbf16, #tpu.memory_space<vmem>>, vector<1x1x8x1x32xbf16>
    %113 = vector.shape_cast %112 : vector<1x1x8x1x32xbf16> to vector<8x32xbf16>
    %c0_253 = arith.constant 0 : index
    %c0_254 = arith.constant 0 : index
    %c0_255 = arith.constant 0 : index
    %c1_256 = arith.constant 1 : index
    %c1_257 = arith.constant 1 : index
    %114 = vector.load %arg2[%c0_253, %c0_254, %c0_255, %c1_256, %c1_257] : memref<1x1x8x14x38xbf16, #tpu.memory_space<vmem>>, vector<1x1x8x1x32xbf16>
    %115 = vector.shape_cast %114 : vector<1x1x8x1x32xbf16> to vector<8x32xbf16>
    %c0_258 = arith.constant 0 : index
    %c0_259 = arith.constant 0 : index
    %c0_260 = arith.constant 0 : index
    %c1_261 = arith.constant 1 : index
    %c2_262 = arith.constant 2 : index
    %116 = vector.load %arg2[%c0_258, %c0_259, %c0_260, %c1_261, %c2_262] : memref<1x1x8x14x38xbf16, #tpu.memory_space<vmem>>, vector<1x1x8x1x32xbf16>
    %117 = vector.shape_cast %116 : vector<1x1x8x1x32xbf16> to vector<8x32xbf16>
    %c0_263 = arith.constant 0 : index
    %c0_264 = arith.constant 0 : index
    %c0_265 = arith.constant 0 : index
    %c1_266 = arith.constant 1 : index
    %c3_267 = arith.constant 3 : index
    %118 = vector.load %arg2[%c0_263, %c0_264, %c0_265, %c1_266, %c3_267] : memref<1x1x8x14x38xbf16, #tpu.memory_space<vmem>>, vector<1x1x8x1x32xbf16>
    %119 = vector.shape_cast %118 : vector<1x1x8x1x32xbf16> to vector<8x32xbf16>
    %c0_268 = arith.constant 0 : index
    %c0_269 = arith.constant 0 : index
    %c0_270 = arith.constant 0 : index
    %c1_271 = arith.constant 1 : index
    %c4_272 = arith.constant 4 : index
    %120 = vector.load %arg2[%c0_268, %c0_269, %c0_270, %c1_271, %c4_272] : memref<1x1x8x14x38xbf16, #tpu.memory_space<vmem>>, vector<1x1x8x1x32xbf16>
    %121 = vector.shape_cast %120 : vector<1x1x8x1x32xbf16> to vector<8x32xbf16>
    %c0_273 = arith.constant 0 : index
    %c0_274 = arith.constant 0 : index
    %c0_275 = arith.constant 0 : index
    %c1_276 = arith.constant 1 : index
    %c5_277 = arith.constant 5 : index
    %122 = vector.load %arg2[%c0_273, %c0_274, %c0_275, %c1_276, %c5_277] : memref<1x1x8x14x38xbf16, #tpu.memory_space<vmem>>, vector<1x1x8x1x32xbf16>
    %123 = vector.shape_cast %122 : vector<1x1x8x1x32xbf16> to vector<8x32xbf16>
    %c0_278 = arith.constant 0 : index
    %c0_279 = arith.constant 0 : index
    %c0_280 = arith.constant 0 : index
    %c1_281 = arith.constant 1 : index
    %c6_282 = arith.constant 6 : index
    %124 = vector.load %arg2[%c0_278, %c0_279, %c0_280, %c1_281, %c6_282] : memref<1x1x8x14x38xbf16, #tpu.memory_space<vmem>>, vector<1x1x8x1x32xbf16>
    %125 = vector.shape_cast %124 : vector<1x1x8x1x32xbf16> to vector<8x32xbf16>
    %c0_283 = arith.constant 0 : index
    %c0_284 = arith.constant 0 : index
    %c0_285 = arith.constant 0 : index
    %c2_286 = arith.constant 2 : index
    %c0_287 = arith.constant 0 : index
    %126 = vector.load %arg2[%c0_283, %c0_284, %c0_285, %c2_286, %c0_287] : memref<1x1x8x14x38xbf16, #tpu.memory_space<vmem>>, vector<1x1x8x1x32xbf16>
    %127 = vector.shape_cast %126 : vector<1x1x8x1x32xbf16> to vector<8x32xbf16>
    %c0_288 = arith.constant 0 : index
    %c0_289 = arith.constant 0 : index
    %c0_290 = arith.constant 0 : index
    %c2_291 = arith.constant 2 : index
    %c1_292 = arith.constant 1 : index
    %128 = vector.load %arg2[%c0_288, %c0_289, %c0_290, %c2_291, %c1_292] : memref<1x1x8x14x38xbf16, #tpu.memory_space<vmem>>, vector<1x1x8x1x32xbf16>
    %129 = vector.shape_cast %128 : vector<1x1x8x1x32xbf16> to vector<8x32xbf16>
    %c0_293 = arith.constant 0 : index
    %c0_294 = arith.constant 0 : index
    %c0_295 = arith.constant 0 : index
    %c2_296 = arith.constant 2 : index
    %c2_297 = arith.constant 2 : index
    %130 = vector.load %arg2[%c0_293, %c0_294, %c0_295, %c2_296, %c2_297] : memref<1x1x8x14x38xbf16, #tpu.memory_space<vmem>>, vector<1x1x8x1x32xbf16>
    %131 = vector.shape_cast %130 : vector<1x1x8x1x32xbf16> to vector<8x32xbf16>
    %c0_298 = arith.constant 0 : index
    %c0_299 = arith.constant 0 : index
    %c0_300 = arith.constant 0 : index
    %c2_301 = arith.constant 2 : index
    %c3_302 = arith.constant 3 : index
    %132 = vector.load %arg2[%c0_298, %c0_299, %c0_300, %c2_301, %c3_302] : memref<1x1x8x14x38xbf16, #tpu.memory_space<vmem>>, vector<1x1x8x1x32xbf16>
    %133 = vector.shape_cast %132 : vector<1x1x8x1x32xbf16> to vector<8x32xbf16>
    %c0_303 = arith.constant 0 : index
    %c0_304 = arith.constant 0 : index
    %c0_305 = arith.constant 0 : index
    %c2_306 = arith.constant 2 : index
    %c4_307 = arith.constant 4 : index
    %134 = vector.load %arg2[%c0_303, %c0_304, %c0_305, %c2_306, %c4_307] : memref<1x1x8x14x38xbf16, #tpu.memory_space<vmem>>, vector<1x1x8x1x32xbf16>
    %135 = vector.shape_cast %134 : vector<1x1x8x1x32xbf16> to vector<8x32xbf16>
    %c0_308 = arith.constant 0 : index
    %c0_309 = arith.constant 0 : index
    %c0_310 = arith.constant 0 : index
    %c2_311 = arith.constant 2 : index
    %c5_312 = arith.constant 5 : index
    %136 = vector.load %arg2[%c0_308, %c0_309, %c0_310, %c2_311, %c5_312] : memref<1x1x8x14x38xbf16, #tpu.memory_space<vmem>>, vector<1x1x8x1x32xbf16>
    %137 = vector.shape_cast %136 : vector<1x1x8x1x32xbf16> to vector<8x32xbf16>
    %c0_313 = arith.constant 0 : index
    %c0_314 = arith.constant 0 : index
    %c0_315 = arith.constant 0 : index
    %c2_316 = arith.constant 2 : index
    %c6_317 = arith.constant 6 : index
    %138 = vector.load %arg2[%c0_313, %c0_314, %c0_315, %c2_316, %c6_317] : memref<1x1x8x14x38xbf16, #tpu.memory_space<vmem>>, vector<1x1x8x1x32xbf16>
    %139 = vector.shape_cast %138 : vector<1x1x8x1x32xbf16> to vector<8x32xbf16>
    %c0_318 = arith.constant 0 : index
    %c0_319 = arith.constant 0 : index
    %c0_320 = arith.constant 0 : index
    %c3_321 = arith.constant 3 : index
    %c0_322 = arith.constant 0 : index
    %140 = vector.load %arg2[%c0_318, %c0_319, %c0_320, %c3_321, %c0_322] : memref<1x1x8x14x38xbf16, #tpu.memory_space<vmem>>, vector<1x1x8x1x32xbf16>
    %141 = vector.shape_cast %140 : vector<1x1x8x1x32xbf16> to vector<8x32xbf16>
    %c0_323 = arith.constant 0 : index
    %c0_324 = arith.constant 0 : index
    %c0_325 = arith.constant 0 : index
    %c3_326 = arith.constant 3 : index
    %c1_327 = arith.constant 1 : index
    %142 = vector.load %arg2[%c0_323, %c0_324, %c0_325, %c3_326, %c1_327] : memref<1x1x8x14x38xbf16, #tpu.memory_space<vmem>>, vector<1x1x8x1x32xbf16>
    %143 = vector.shape_cast %142 : vector<1x1x8x1x32xbf16> to vector<8x32xbf16>
    %c0_328 = arith.constant 0 : index
    %c0_329 = arith.constant 0 : index
    %c0_330 = arith.constant 0 : index
    %c3_331 = arith.constant 3 : index
    %c2_332 = arith.constant 2 : index
    %144 = vector.load %arg2[%c0_328, %c0_329, %c0_330, %c3_331, %c2_332] : memref<1x1x8x14x38xbf16, #tpu.memory_space<vmem>>, vector<1x1x8x1x32xbf16>
    %145 = vector.shape_cast %144 : vector<1x1x8x1x32xbf16> to vector<8x32xbf16>
    %c0_333 = arith.constant 0 : index
    %c0_334 = arith.constant 0 : index
    %c0_335 = arith.constant 0 : index
    %c3_336 = arith.constant 3 : index
    %c3_337 = arith.constant 3 : index
    %146 = vector.load %arg2[%c0_333, %c0_334, %c0_335, %c3_336, %c3_337] : memref<1x1x8x14x38xbf16, #tpu.memory_space<vmem>>, vector<1x1x8x1x32xbf16>
    %147 = vector.shape_cast %146 : vector<1x1x8x1x32xbf16> to vector<8x32xbf16>
    %c0_338 = arith.constant 0 : index
    %c0_339 = arith.constant 0 : index
    %c0_340 = arith.constant 0 : index
    %c3_341 = arith.constant 3 : index
    %c4_342 = arith.constant 4 : index
    %148 = vector.load %arg2[%c0_338, %c0_339, %c0_340, %c3_341, %c4_342] : memref<1x1x8x14x38xbf16, #tpu.memory_space<vmem>>, vector<1x1x8x1x32xbf16>
    %149 = vector.shape_cast %148 : vector<1x1x8x1x32xbf16> to vector<8x32xbf16>
    %c0_343 = arith.constant 0 : index
    %c0_344 = arith.constant 0 : index
    %c0_345 = arith.constant 0 : index
    %c3_346 = arith.constant 3 : index
    %c5_347 = arith.constant 5 : index
    %150 = vector.load %arg2[%c0_343, %c0_344, %c0_345, %c3_346, %c5_347] : memref<1x1x8x14x38xbf16, #tpu.memory_space<vmem>>, vector<1x1x8x1x32xbf16>
    %151 = vector.shape_cast %150 : vector<1x1x8x1x32xbf16> to vector<8x32xbf16>
    %c0_348 = arith.constant 0 : index
    %c0_349 = arith.constant 0 : index
    %c0_350 = arith.constant 0 : index
    %c3_351 = arith.constant 3 : index
    %c6_352 = arith.constant 6 : index
    %152 = vector.load %arg2[%c0_348, %c0_349, %c0_350, %c3_351, %c6_352] : memref<1x1x8x14x38xbf16, #tpu.memory_space<vmem>>, vector<1x1x8x1x32xbf16>
    %153 = vector.shape_cast %152 : vector<1x1x8x1x32xbf16> to vector<8x32xbf16>
    %c0_353 = arith.constant 0 : index
    %c0_354 = arith.constant 0 : index
    %c0_355 = arith.constant 0 : index
    %c4_356 = arith.constant 4 : index
    %c0_357 = arith.constant 0 : index
    %154 = vector.load %arg2[%c0_353, %c0_354, %c0_355, %c4_356, %c0_357] : memref<1x1x8x14x38xbf16, #tpu.memory_space<vmem>>, vector<1x1x8x1x32xbf16>
    %155 = vector.shape_cast %154 : vector<1x1x8x1x32xbf16> to vector<8x32xbf16>
    %c0_358 = arith.constant 0 : index
    %c0_359 = arith.constant 0 : index
    %c0_360 = arith.constant 0 : index
    %c4_361 = arith.constant 4 : index
    %c1_362 = arith.constant 1 : index
    %156 = vector.load %arg2[%c0_358, %c0_359, %c0_360, %c4_361, %c1_362] : memref<1x1x8x14x38xbf16, #tpu.memory_space<vmem>>, vector<1x1x8x1x32xbf16>
    %157 = vector.shape_cast %156 : vector<1x1x8x1x32xbf16> to vector<8x32xbf16>
    %c0_363 = arith.constant 0 : index
    %c0_364 = arith.constant 0 : index
    %c0_365 = arith.constant 0 : index
    %c4_366 = arith.constant 4 : index
    %c2_367 = arith.constant 2 : index
    %158 = vector.load %arg2[%c0_363, %c0_364, %c0_365, %c4_366, %c2_367] : memref<1x1x8x14x38xbf16, #tpu.memory_space<vmem>>, vector<1x1x8x1x32xbf16>
    %159 = vector.shape_cast %158 : vector<1x1x8x1x32xbf16> to vector<8x32xbf16>
    %c0_368 = arith.constant 0 : index
    %c0_369 = arith.constant 0 : index
    %c0_370 = arith.constant 0 : index
    %c4_371 = arith.constant 4 : index
    %c3_372 = arith.constant 3 : index
    %160 = vector.load %arg2[%c0_368, %c0_369, %c0_370, %c4_371, %c3_372] : memref<1x1x8x14x38xbf16, #tpu.memory_space<vmem>>, vector<1x1x8x1x32xbf16>
    %161 = vector.shape_cast %160 : vector<1x1x8x1x32xbf16> to vector<8x32xbf16>
    %c0_373 = arith.constant 0 : index
    %c0_374 = arith.constant 0 : index
    %c0_375 = arith.constant 0 : index
    %c4_376 = arith.constant 4 : index
    %c4_377 = arith.constant 4 : index
    %162 = vector.load %arg2[%c0_373, %c0_374, %c0_375, %c4_376, %c4_377] : memref<1x1x8x14x38xbf16, #tpu.memory_space<vmem>>, vector<1x1x8x1x32xbf16>
    %163 = vector.shape_cast %162 : vector<1x1x8x1x32xbf16> to vector<8x32xbf16>
    %c0_378 = arith.constant 0 : index
    %c0_379 = arith.constant 0 : index
    %c0_380 = arith.constant 0 : index
    %c4_381 = arith.constant 4 : index
    %c5_382 = arith.constant 5 : index
    %164 = vector.load %arg2[%c0_378, %c0_379, %c0_380, %c4_381, %c5_382] : memref<1x1x8x14x38xbf16, #tpu.memory_space<vmem>>, vector<1x1x8x1x32xbf16>
    %165 = vector.shape_cast %164 : vector<1x1x8x1x32xbf16> to vector<8x32xbf16>
    %c0_383 = arith.constant 0 : index
    %c0_384 = arith.constant 0 : index
    %c0_385 = arith.constant 0 : index
    %c4_386 = arith.constant 4 : index
    %c6_387 = arith.constant 6 : index
    %166 = vector.load %arg2[%c0_383, %c0_384, %c0_385, %c4_386, %c6_387] : memref<1x1x8x14x38xbf16, #tpu.memory_space<vmem>>, vector<1x1x8x1x32xbf16>
    %167 = vector.shape_cast %166 : vector<1x1x8x1x32xbf16> to vector<8x32xbf16>
    %c0_388 = arith.constant 0 : index
    %c0_389 = arith.constant 0 : index
    %c0_390 = arith.constant 0 : index
    %c5_391 = arith.constant 5 : index
    %c0_392 = arith.constant 0 : index
    %168 = vector.load %arg2[%c0_388, %c0_389, %c0_390, %c5_391, %c0_392] : memref<1x1x8x14x38xbf16, #tpu.memory_space<vmem>>, vector<1x1x8x1x32xbf16>
    %169 = vector.shape_cast %168 : vector<1x1x8x1x32xbf16> to vector<8x32xbf16>
    %c0_393 = arith.constant 0 : index
    %c0_394 = arith.constant 0 : index
    %c0_395 = arith.constant 0 : index
    %c5_396 = arith.constant 5 : index
    %c1_397 = arith.constant 1 : index
    %170 = vector.load %arg2[%c0_393, %c0_394, %c0_395, %c5_396, %c1_397] : memref<1x1x8x14x38xbf16, #tpu.memory_space<vmem>>, vector<1x1x8x1x32xbf16>
    %171 = vector.shape_cast %170 : vector<1x1x8x1x32xbf16> to vector<8x32xbf16>
    %c0_398 = arith.constant 0 : index
    %c0_399 = arith.constant 0 : index
    %c0_400 = arith.constant 0 : index
    %c5_401 = arith.constant 5 : index
    %c2_402 = arith.constant 2 : index
    %172 = vector.load %arg2[%c0_398, %c0_399, %c0_400, %c5_401, %c2_402] : memref<1x1x8x14x38xbf16, #tpu.memory_space<vmem>>, vector<1x1x8x1x32xbf16>
    %173 = vector.shape_cast %172 : vector<1x1x8x1x32xbf16> to vector<8x32xbf16>
    %c0_403 = arith.constant 0 : index
    %c0_404 = arith.constant 0 : index
    %c0_405 = arith.constant 0 : index
    %c5_406 = arith.constant 5 : index
    %c3_407 = arith.constant 3 : index
    %174 = vector.load %arg2[%c0_403, %c0_404, %c0_405, %c5_406, %c3_407] : memref<1x1x8x14x38xbf16, #tpu.memory_space<vmem>>, vector<1x1x8x1x32xbf16>
    %175 = vector.shape_cast %174 : vector<1x1x8x1x32xbf16> to vector<8x32xbf16>
    %c0_408 = arith.constant 0 : index
    %c0_409 = arith.constant 0 : index
    %c0_410 = arith.constant 0 : index
    %c5_411 = arith.constant 5 : index
    %c4_412 = arith.constant 4 : index
    %176 = vector.load %arg2[%c0_408, %c0_409, %c0_410, %c5_411, %c4_412] : memref<1x1x8x14x38xbf16, #tpu.memory_space<vmem>>, vector<1x1x8x1x32xbf16>
    %177 = vector.shape_cast %176 : vector<1x1x8x1x32xbf16> to vector<8x32xbf16>
    %c0_413 = arith.constant 0 : index
    %c0_414 = arith.constant 0 : index
    %c0_415 = arith.constant 0 : index
    %c5_416 = arith.constant 5 : index
    %c5_417 = arith.constant 5 : index
    %178 = vector.load %arg2[%c0_413, %c0_414, %c0_415, %c5_416, %c5_417] : memref<1x1x8x14x38xbf16, #tpu.memory_space<vmem>>, vector<1x1x8x1x32xbf16>
    %179 = vector.shape_cast %178 : vector<1x1x8x1x32xbf16> to vector<8x32xbf16>
    %c0_418 = arith.constant 0 : index
    %c0_419 = arith.constant 0 : index
    %c0_420 = arith.constant 0 : index
    %c5_421 = arith.constant 5 : index
    %c6_422 = arith.constant 6 : index
    %180 = vector.load %arg2[%c0_418, %c0_419, %c0_420, %c5_421, %c6_422] : memref<1x1x8x14x38xbf16, #tpu.memory_space<vmem>>, vector<1x1x8x1x32xbf16>
    %181 = vector.shape_cast %180 : vector<1x1x8x1x32xbf16> to vector<8x32xbf16>
    %c0_423 = arith.constant 0 : index
    %c0_424 = arith.constant 0 : index
    %c0_425 = arith.constant 0 : index
    %c6_426 = arith.constant 6 : index
    %c0_427 = arith.constant 0 : index
    %182 = vector.load %arg2[%c0_423, %c0_424, %c0_425, %c6_426, %c0_427] : memref<1x1x8x14x38xbf16, #tpu.memory_space<vmem>>, vector<1x1x8x1x32xbf16>
    %183 = vector.shape_cast %182 : vector<1x1x8x1x32xbf16> to vector<8x32xbf16>
    %c0_428 = arith.constant 0 : index
    %c0_429 = arith.constant 0 : index
    %c0_430 = arith.constant 0 : index
    %c6_431 = arith.constant 6 : index
    %c1_432 = arith.constant 1 : index
    %184 = vector.load %arg2[%c0_428, %c0_429, %c0_430, %c6_431, %c1_432] : memref<1x1x8x14x38xbf16, #tpu.memory_space<vmem>>, vector<1x1x8x1x32xbf16>
    %185 = vector.shape_cast %184 : vector<1x1x8x1x32xbf16> to vector<8x32xbf16>
    %c0_433 = arith.constant 0 : index
    %c0_434 = arith.constant 0 : index
    %c0_435 = arith.constant 0 : index
    %c6_436 = arith.constant 6 : index
    %c2_437 = arith.constant 2 : index
    %186 = vector.load %arg2[%c0_433, %c0_434, %c0_435, %c6_436, %c2_437] : memref<1x1x8x14x38xbf16, #tpu.memory_space<vmem>>, vector<1x1x8x1x32xbf16>
    %187 = vector.shape_cast %186 : vector<1x1x8x1x32xbf16> to vector<8x32xbf16>
    %c0_438 = arith.constant 0 : index
    %c0_439 = arith.constant 0 : index
    %c0_440 = arith.constant 0 : index
    %c6_441 = arith.constant 6 : index
    %c3_442 = arith.constant 3 : index
    %188 = vector.load %arg2[%c0_438, %c0_439, %c0_440, %c6_441, %c3_442] : memref<1x1x8x14x38xbf16, #tpu.memory_space<vmem>>, vector<1x1x8x1x32xbf16>
    %189 = vector.shape_cast %188 : vector<1x1x8x1x32xbf16> to vector<8x32xbf16>
    %c0_443 = arith.constant 0 : index
    %c0_444 = arith.constant 0 : index
    %c0_445 = arith.constant 0 : index
    %c6_446 = arith.constant 6 : index
    %c4_447 = arith.constant 4 : index
    %190 = vector.load %arg2[%c0_443, %c0_444, %c0_445, %c6_446, %c4_447] : memref<1x1x8x14x38xbf16, #tpu.memory_space<vmem>>, vector<1x1x8x1x32xbf16>
    %191 = vector.shape_cast %190 : vector<1x1x8x1x32xbf16> to vector<8x32xbf16>
    %c0_448 = arith.constant 0 : index
    %c0_449 = arith.constant 0 : index
    %c0_450 = arith.constant 0 : index
    %c6_451 = arith.constant 6 : index
    %c5_452 = arith.constant 5 : index
    %192 = vector.load %arg2[%c0_448, %c0_449, %c0_450, %c6_451, %c5_452] : memref<1x1x8x14x38xbf16, #tpu.memory_space<vmem>>, vector<1x1x8x1x32xbf16>
    %193 = vector.shape_cast %192 : vector<1x1x8x1x32xbf16> to vector<8x32xbf16>
    %c0_453 = arith.constant 0 : index
    %c0_454 = arith.constant 0 : index
    %c0_455 = arith.constant 0 : index
    %c6_456 = arith.constant 6 : index
    %c6_457 = arith.constant 6 : index
    %194 = vector.load %arg2[%c0_453, %c0_454, %c0_455, %c6_456, %c6_457] : memref<1x1x8x14x38xbf16, #tpu.memory_space<vmem>>, vector<1x1x8x1x32xbf16>
    %195 = vector.shape_cast %194 : vector<1x1x8x1x32xbf16> to vector<8x32xbf16>
    %c0_458 = arith.constant 0 : index
    %c0_459 = arith.constant 0 : index
    %c0_460 = arith.constant 0 : index
    %c7 = arith.constant 7 : index
    %c0_461 = arith.constant 0 : index
    %196 = vector.load %arg2[%c0_458, %c0_459, %c0_460, %c7, %c0_461] : memref<1x1x8x14x38xbf16, #tpu.memory_space<vmem>>, vector<1x1x8x1x32xbf16>
    %197 = vector.shape_cast %196 : vector<1x1x8x1x32xbf16> to vector<8x32xbf16>
    %c0_462 = arith.constant 0 : index
    %c0_463 = arith.constant 0 : index
    %c0_464 = arith.constant 0 : index
    %c7_465 = arith.constant 7 : index
    %c1_466 = arith.constant 1 : index
    %198 = vector.load %arg2[%c0_462, %c0_463, %c0_464, %c7_465, %c1_466] : memref<1x1x8x14x38xbf16, #tpu.memory_space<vmem>>, vector<1x1x8x1x32xbf16>
    %199 = vector.shape_cast %198 : vector<1x1x8x1x32xbf16> to vector<8x32xbf16>
    %c0_467 = arith.constant 0 : index
    %c0_468 = arith.constant 0 : index
    %c0_469 = arith.constant 0 : index
    %c7_470 = arith.constant 7 : index
    %c2_471 = arith.constant 2 : index
    %200 = vector.load %arg2[%c0_467, %c0_468, %c0_469, %c7_470, %c2_471] : memref<1x1x8x14x38xbf16, #tpu.memory_space<vmem>>, vector<1x1x8x1x32xbf16>
    %201 = vector.shape_cast %200 : vector<1x1x8x1x32xbf16> to vector<8x32xbf16>
    %c0_472 = arith.constant 0 : index
    %c0_473 = arith.constant 0 : index
    %c0_474 = arith.constant 0 : index
    %c7_475 = arith.constant 7 : index
    %c3_476 = arith.constant 3 : index
    %202 = vector.load %arg2[%c0_472, %c0_473, %c0_474, %c7_475, %c3_476] : memref<1x1x8x14x38xbf16, #tpu.memory_space<vmem>>, vector<1x1x8x1x32xbf16>
    %203 = vector.shape_cast %202 : vector<1x1x8x1x32xbf16> to vector<8x32xbf16>
    %c0_477 = arith.constant 0 : index
    %c0_478 = arith.constant 0 : index
    %c0_479 = arith.constant 0 : index
    %c7_480 = arith.constant 7 : index
    %c4_481 = arith.constant 4 : index
    %204 = vector.load %arg2[%c0_477, %c0_478, %c0_479, %c7_480, %c4_481] : memref<1x1x8x14x38xbf16, #tpu.memory_space<vmem>>, vector<1x1x8x1x32xbf16>
    %205 = vector.shape_cast %204 : vector<1x1x8x1x32xbf16> to vector<8x32xbf16>
    %c0_482 = arith.constant 0 : index
    %c0_483 = arith.constant 0 : index
    %c0_484 = arith.constant 0 : index
    %c7_485 = arith.constant 7 : index
    %c5_486 = arith.constant 5 : index
    %206 = vector.load %arg2[%c0_482, %c0_483, %c0_484, %c7_485, %c5_486] : memref<1x1x8x14x38xbf16, #tpu.memory_space<vmem>>, vector<1x1x8x1x32xbf16>
    %207 = vector.shape_cast %206 : vector<1x1x8x1x32xbf16> to vector<8x32xbf16>
    %c0_487 = arith.constant 0 : index
    %c0_488 = arith.constant 0 : index
    %c0_489 = arith.constant 0 : index
    %c7_490 = arith.constant 7 : index
    %c6_491 = arith.constant 6 : index
    %208 = vector.load %arg2[%c0_487, %c0_488, %c0_489, %c7_490, %c6_491] : memref<1x1x8x14x38xbf16, #tpu.memory_space<vmem>>, vector<1x1x8x1x32xbf16>
    %209 = vector.shape_cast %208 : vector<1x1x8x1x32xbf16> to vector<8x32xbf16>
    %210 = tpu.concatenate %113, %115, %117, %119, %121, %123, %125, %127, %129, %131, %133, %135, %137, %139, %141, %143 in 0 : vector<8x32xbf16>, vector<8x32xbf16>, vector<8x32xbf16>, vector<8x32xbf16>, vector<8x32xbf16>, vector<8x32xbf16>, vector<8x32xbf16>, vector<8x32xbf16>, vector<8x32xbf16>, vector<8x32xbf16>, vector<8x32xbf16>, vector<8x32xbf16>, vector<8x32xbf16>, vector<8x32xbf16>, vector<8x32xbf16>, vector<8x32xbf16> -> vector<128x32xbf16>
    %211 = tpu.concatenate %145, %147, %149, %151, %153, %155, %157, %159, %161, %163, %165, %167, %169, %171, %173, %175 in 0 : vector<8x32xbf16>, vector<8x32xbf16>, vector<8x32xbf16>, vector<8x32xbf16>, vector<8x32xbf16>, vector<8x32xbf16>, vector<8x32xbf16>, vector<8x32xbf16>, vector<8x32xbf16>, vector<8x32xbf16>, vector<8x32xbf16>, vector<8x32xbf16>, vector<8x32xbf16>, vector<8x32xbf16>, vector<8x32xbf16>, vector<8x32xbf16> -> vector<128x32xbf16>
    %212 = tpu.concatenate %177, %179, %181, %183, %185, %187, %189, %191, %193, %195, %197, %199, %201, %203, %205, %207 in 0 : vector<8x32xbf16>, vector<8x32xbf16>, vector<8x32xbf16>, vector<8x32xbf16>, vector<8x32xbf16>, vector<8x32xbf16>, vector<8x32xbf16>, vector<8x32xbf16>, vector<8x32xbf16>, vector<8x32xbf16>, vector<8x32xbf16>, vector<8x32xbf16>, vector<8x32xbf16>, vector<8x32xbf16>, vector<8x32xbf16>, vector<8x32xbf16> -> vector<128x32xbf16>
    %213 = tpu.concatenate %210, %211, %212, %209 in 0 : vector<128x32xbf16>, vector<128x32xbf16>, vector<128x32xbf16>, vector<8x32xbf16> -> vector<392x32xbf16>
    %cst_492 = arith.constant dense<0.000000e+00> : vector<32x32xf32>
    %214 = tpu.matmul %0, %213, %cst_492 {dimension_numbers = #tpu.dot_dimension_numbers<[1], [0], [0], [1], [0, 0, 1, 1], [], []>} : vector<32x392xbf16>, vector<392x32xbf16>, vector<32x32xf32> -> vector<32x32xf32>
    %215 = vector.broadcast %1 : vector<32x1xf32> to vector<32x32xf32>
    %216 = arith.addf %214, %215 : vector<32x32xf32>
    %cst_493 = arith.constant 0.000000e+00 : f32
    %217 = vector.broadcast %cst_493 : f32 to vector<32x32xf32>
    %218 = arith.maximumf %216, %217 : vector<32x32xf32>
    %c0_494 = arith.constant 0 : index
    %c0_495 = arith.constant 0 : index
    %c0_496 = arith.constant 0 : index
    %c1_497 = arith.constant 1 : index
    %c0_498 = arith.constant 0 : index
    %219 = vector.load %arg5[%c0_494, %c0_495, %c0_496, %c1_497, %c0_498] : memref<1x32x1x8x32xf32, #tpu.memory_space<vmem>>, vector<1x32x1x1x32xf32>
    %220 = vector.shape_cast %219 : vector<1x32x1x1x32xf32> to vector<32x32xf32>
    %221 = vector.shape_cast %218 : vector<32x32xf32> to vector<1x32x1x1x32xf32>
    tpu.vector_store %arg5[%c0_494, %c0_495, %c0_496, %c1_497, %c0_498], %221 {strides = array<i32>} : memref<1x32x1x8x32xf32, #tpu.memory_space<vmem>>, vector<1x32x1x1x32xf32>,
    %c0_499 = arith.constant 0 : index
    %c0_500 = arith.constant 0 : index
    %c0_501 = arith.constant 0 : index
    %c2_502 = arith.constant 2 : index
    %c0_503 = arith.constant 0 : index
    %222 = vector.load %arg2[%c0_499, %c0_500, %c0_501, %c2_502, %c0_503] : memref<1x1x8x14x38xbf16, #tpu.memory_space<vmem>>, vector<1x1x8x1x32xbf16>
    %223 = vector.shape_cast %222 : vector<1x1x8x1x32xbf16> to vector<8x32xbf16>
    %c0_504 = arith.constant 0 : index
    %c0_505 = arith.constant 0 : index
    %c0_506 = arith.constant 0 : index
    %c2_507 = arith.constant 2 : index
    %c1_508 = arith.constant 1 : index
    %224 = vector.load %arg2[%c0_504, %c0_505, %c0_506, %c2_507, %c1_508] : memref<1x1x8x14x38xbf16, #tpu.memory_space<vmem>>, vector<1x1x8x1x32xbf16>
    %225 = vector.shape_cast %224 : vector<1x1x8x1x32xbf16> to vector<8x32xbf16>
    %c0_509 = arith.constant 0 : index
    %c0_510 = arith.constant 0 : index
    %c0_511 = arith.constant 0 : index
    %c2_512 = arith.constant 2 : index
    %c2_513 = arith.constant 2 : index
    %226 = vector.load %arg2[%c0_509, %c0_510, %c0_511, %c2_512, %c2_513] : memref<1x1x8x14x38xbf16, #tpu.memory_space<vmem>>, vector<1x1x8x1x32xbf16>
    %227 = vector.shape_cast %226 : vector<1x1x8x1x32xbf16> to vector<8x32xbf16>
    %c0_514 = arith.constant 0 : index
    %c0_515 = arith.constant 0 : index
    %c0_516 = arith.constant 0 : index
    %c2_517 = arith.constant 2 : index
    %c3_518 = arith.constant 3 : index
    %228 = vector.load %arg2[%c0_514, %c0_515, %c0_516, %c2_517, %c3_518] : memref<1x1x8x14x38xbf16, #tpu.memory_space<vmem>>, vector<1x1x8x1x32xbf16>
    %229 = vector.shape_cast %228 : vector<1x1x8x1x32xbf16> to vector<8x32xbf16>
    %c0_519 = arith.constant 0 : index
    %c0_520 = arith.constant 0 : index
    %c0_521 = arith.constant 0 : index
    %c2_522 = arith.constant 2 : index
    %c4_523 = arith.constant 4 : index
    %230 = vector.load %arg2[%c0_519, %c0_520, %c0_521, %c2_522, %c4_523] : memref<1x1x8x14x38xbf16, #tpu.memory_space<vmem>>, vector<1x1x8x1x32xbf16>
    %231 = vector.shape_cast %230 : vector<1x1x8x1x32xbf16> to vector<8x32xbf16>
    %c0_524 = arith.constant 0 : index
    %c0_525 = arith.constant 0 : index
    %c0_526 = arith.constant 0 : index
    %c2_527 = arith.constant 2 : index
    %c5_528 = arith.constant 5 : index
    %232 = vector.load %arg2[%c0_524, %c0_525, %c0_526, %c2_527, %c5_528] : memref<1x1x8x14x38xbf16, #tpu.memory_space<vmem>>, vector<1x1x8x1x32xbf16>
    %233 = vector.shape_cast %232 : vector<1x1x8x1x32xbf16> to vector<8x32xbf16>
    %c0_529 = arith.constant 0 : index
    %c0_530 = arith.constant 0 : index
    %c0_531 = arith.constant 0 : index
    %c2_532 = arith.constant 2 : index
    %c6_533 = arith.constant 6 : index
    %234 = vector.load %arg2[%c0_529, %c0_530, %c0_531, %c2_532, %c6_533] : memref<1x1x8x14x38xbf16, #tpu.memory_space<vmem>>, vector<1x1x8x1x32xbf16>
    %235 = vector.shape_cast %234 : vector<1x1x8x1x32xbf16> to vector<8x32xbf16>
    %c0_534 = arith.constant 0 : index
    %c0_535 = arith.constant 0 : index
    %c0_536 = arith.constant 0 : index
    %c3_537 = arith.constant 3 : index
    %c0_538 = arith.constant 0 : index
    %236 = vector.load %arg2[%c0_534, %c0_535, %c0_536, %c3_537, %c0_538] : memref<1x1x8x14x38xbf16, #tpu.memory_space<vmem>>, vector<1x1x8x1x32xbf16>
    %237 = vector.shape_cast %236 : vector<1x1x8x1x32xbf16> to vector<8x32xbf16>
    %c0_539 = arith.constant 0 : index
    %c0_540 = arith.constant 0 : index
    %c0_541 = arith.constant 0 : index
    %c3_542 = arith.constant 3 : index
    %c1_543 = arith.constant 1 : index
    %238 = vector.load %arg2[%c0_539, %c0_540, %c0_541, %c3_542, %c1_543] : memref<1x1x8x14x38xbf16, #tpu.memory_space<vmem>>, vector<1x1x8x1x32xbf16>
    %239 = vector.shape_cast %238 : vector<1x1x8x1x32xbf16> to vector<8x32xbf16>
    %c0_544 = arith.constant 0 : index
    %c0_545 = arith.constant 0 : index
    %c0_546 = arith.constant 0 : index
    %c3_547 = arith.constant 3 : index
    %c2_548 = arith.constant 2 : index
    %240 = vector.load %arg2[%c0_544, %c0_545, %c0_546, %c3_547, %c2_548] : memref<1x1x8x14x38xbf16, #tpu.memory_space<vmem>>, vector<1x1x8x1x32xbf16>
    %241 = vector.shape_cast %240 : vector<1x1x8x1x32xbf16> to vector<8x32xbf16>
    %c0_549 = arith.constant 0 : index
    %c0_550 = arith.constant 0 : index
    %c0_551 = arith.constant 0 : index
    %c3_552 = arith.constant 3 : index
    %c3_553 = arith.constant 3 : index
    %242 = vector.load %arg2[%c0_549, %c0_550, %c0_551, %c3_552, %c3_553] : memref<1x1x8x14x38xbf16, #tpu.memory_space<vmem>>, vector<1x1x8x1x32xbf16>
    %243 = vector.shape_cast %242 : vector<1x1x8x1x32xbf16> to vector<8x32xbf16>
    %c0_554 = arith.constant 0 : index
    %c0_555 = arith.constant 0 : index
    %c0_556 = arith.constant 0 : index
    %c3_557 = arith.constant 3 : index
    %c4_558 = arith.constant 4 : index
    %244 = vector.load %arg2[%c0_554, %c0_555, %c0_556, %c3_557, %c4_558] : memref<1x1x8x14x38xbf16, #tpu.memory_space<vmem>>, vector<1x1x8x1x32xbf16>
    %245 = vector.shape_cast %244 : vector<1x1x8x1x32xbf16> to vector<8x32xbf16>
    %c0_559 = arith.constant 0 : index
    %c0_560 = arith.constant 0 : index
    %c0_561 = arith.constant 0 : index
    %c3_562 = arith.constant 3 : index
    %c5_563 = arith.constant 5 : index
    %246 = vector.load %arg2[%c0_559, %c0_560, %c0_561, %c3_562, %c5_563] : memref<1x1x8x14x38xbf16, #tpu.memory_space<vmem>>, vector<1x1x8x1x32xbf16>
    %247 = vector.shape_cast %246 : vector<1x1x8x1x32xbf16> to vector<8x32xbf16>
    %c0_564 = arith.constant 0 : index
    %c0_565 = arith.constant 0 : index
    %c0_566 = arith.constant 0 : index
    %c3_567 = arith.constant 3 : index
    %c6_568 = arith.constant 6 : index
    %248 = vector.load %arg2[%c0_564, %c0_565, %c0_566, %c3_567, %c6_568] : memref<1x1x8x14x38xbf16, #tpu.memory_space<vmem>>, vector<1x1x8x1x32xbf16>
    %249 = vector.shape_cast %248 : vector<1x1x8x1x32xbf16> to vector<8x32xbf16>
    %c0_569 = arith.constant 0 : index
    %c0_570 = arith.constant 0 : index
    %c0_571 = arith.constant 0 : index
    %c4_572 = arith.constant 4 : index
    %c0_573 = arith.constant 0 : index
    %250 = vector.load %arg2[%c0_569, %c0_570, %c0_571, %c4_572, %c0_573] : memref<1x1x8x14x38xbf16, #tpu.memory_space<vmem>>, vector<1x1x8x1x32xbf16>
    %251 = vector.shape_cast %250 : vector<1x1x8x1x32xbf16> to vector<8x32xbf16>
    %c0_574 = arith.constant 0 : index
    %c0_575 = arith.constant 0 : index
    %c0_576 = arith.constant 0 : index
    %c4_577 = arith.constant 4 : index
    %c1_578 = arith.constant 1 : index
    %252 = vector.load %arg2[%c0_574, %c0_575, %c0_576, %c4_577, %c1_578] : memref<1x1x8x14x38xbf16, #tpu.memory_space<vmem>>, vector<1x1x8x1x32xbf16>
    %253 = vector.shape_cast %252 : vector<1x1x8x1x32xbf16> to vector<8x32xbf16>
    %c0_579 = arith.constant 0 : index
    %c0_580 = arith.constant 0 : index
    %c0_581 = arith.constant 0 : index
    %c4_582 = arith.constant 4 : index
    %c2_583 = arith.constant 2 : index
    %254 = vector.load %arg2[%c0_579, %c0_580, %c0_581, %c4_582, %c2_583] : memref<1x1x8x14x38xbf16, #tpu.memory_space<vmem>>, vector<1x1x8x1x32xbf16>
    %255 = vector.shape_cast %254 : vector<1x1x8x1x32xbf16> to vector<8x32xbf16>
    %c0_584 = arith.constant 0 : index
    %c0_585 = arith.constant 0 : index
    %c0_586 = arith.constant 0 : index
    %c4_587 = arith.constant 4 : index
    %c3_588 = arith.constant 3 : index
    %256 = vector.load %arg2[%c0_584, %c0_585, %c0_586, %c4_587, %c3_588] : memref<1x1x8x14x38xbf16, #tpu.memory_space<vmem>>, vector<1x1x8x1x32xbf16>
    %257 = vector.shape_cast %256 : vector<1x1x8x1x32xbf16> to vector<8x32xbf16>
    %c0_589 = arith.constant 0 : index
    %c0_590 = arith.constant 0 : index
    %c0_591 = arith.constant 0 : index
    %c4_592 = arith.constant 4 : index
    %c4_593 = arith.constant 4 : index
    %258 = vector.load %arg2[%c0_589, %c0_590, %c0_591, %c4_592, %c4_593] : memref<1x1x8x14x38xbf16, #tpu.memory_space<vmem>>, vector<1x1x8x1x32xbf16>
    %259 = vector.shape_cast %258 : vector<1x1x8x1x32xbf16> to vector<8x32xbf16>
    %c0_594 = arith.constant 0 : index
    %c0_595 = arith.constant 0 : index
    %c0_596 = arith.constant 0 : index
    %c4_597 = arith.constant 4 : index
    %c5_598 = arith.constant 5 : index
    %260 = vector.load %arg2[%c0_594, %c0_595, %c0_596, %c4_597, %c5_598] : memref<1x1x8x14x38xbf16, #tpu.memory_space<vmem>>, vector<1x1x8x1x32xbf16>
    %261 = vector.shape_cast %260 : vector<1x1x8x1x32xbf16> to vector<8x32xbf16>
    %c0_599 = arith.constant 0 : index
    %c0_600 = arith.constant 0 : index
    %c0_601 = arith.constant 0 : index
    %c4_602 = arith.constant 4 : index
    %c6_603 = arith.constant 6 : index
    %262 = vector.load %arg2[%c0_599, %c0_600, %c0_601, %c4_602, %c6_603] : memref<1x1x8x14x38xbf16, #tpu.memory_space<vmem>>, vector<1x1x8x1x32xbf16>
    %263 = vector.shape_cast %262 : vector<1x1x8x1x32xbf16> to vector<8x32xbf16>
    %c0_604 = arith.constant 0 : index
    %c0_605 = arith.constant 0 : index
    %c0_606 = arith.constant 0 : index
    %c5_607 = arith.constant 5 : index
    %c0_608 = arith.constant 0 : index
    %264 = vector.load %arg2[%c0_604, %c0_605, %c0_606, %c5_607, %c0_608] : memref<1x1x8x14x38xbf16, #tpu.memory_space<vmem>>, vector<1x1x8x1x32xbf16>
    %265 = vector.shape_cast %264 : vector<1x1x8x1x32xbf16> to vector<8x32xbf16>
    %c0_609 = arith.constant 0 : index
    %c0_610 = arith.constant 0 : index
    %c0_611 = arith.constant 0 : index
    %c5_612 = arith.constant 5 : index
    %c1_613 = arith.constant 1 : index
    %266 = vector.load %arg2[%c0_609, %c0_610, %c0_611, %c5_612, %c1_613] : memref<1x1x8x14x38xbf16, #tpu.memory_space<vmem>>, vector<1x1x8x1x32xbf16>
    %267 = vector.shape_cast %266 : vector<1x1x8x1x32xbf16> to vector<8x32xbf16>
    %c0_614 = arith.constant 0 : index
    %c0_615 = arith.constant 0 : index
    %c0_616 = arith.constant 0 : index
    %c5_617 = arith.constant 5 : index
    %c2_618 = arith.constant 2 : index
    %268 = vector.load %arg2[%c0_614, %c0_615, %c0_616, %c5_617, %c2_618] : memref<1x1x8x14x38xbf16, #tpu.memory_space<vmem>>, vector<1x1x8x1x32xbf16>
    %269 = vector.shape_cast %268 : vector<1x1x8x1x32xbf16> to vector<8x32xbf16>
    %c0_619 = arith.constant 0 : index
    %c0_620 = arith.constant 0 : index
    %c0_621 = arith.constant 0 : index
    %c5_622 = arith.constant 5 : index
    %c3_623 = arith.constant 3 : index
    %270 = vector.load %arg2[%c0_619, %c0_620, %c0_621, %c5_622, %c3_623] : memref<1x1x8x14x38xbf16, #tpu.memory_space<vmem>>, vector<1x1x8x1x32xbf16>
    %271 = vector.shape_cast %270 : vector<1x1x8x1x32xbf16> to vector<8x32xbf16>
    %c0_624 = arith.constant 0 : index
    %c0_625 = arith.constant 0 : index
    %c0_626 = arith.constant 0 : index
    %c5_627 = arith.constant 5 : index
    %c4_628 = arith.constant 4 : index
    %272 = vector.load %arg2[%c0_624, %c0_625, %c0_626, %c5_627, %c4_628] : memref<1x1x8x14x38xbf16, #tpu.memory_space<vmem>>, vector<1x1x8x1x32xbf16>
    %273 = vector.shape_cast %272 : vector<1x1x8x1x32xbf16> to vector<8x32xbf16>
    %c0_629 = arith.constant 0 : index
    %c0_630 = arith.constant 0 : index
    %c0_631 = arith.constant 0 : index
    %c5_632 = arith.constant 5 : index
    %c5_633 = arith.constant 5 : index
    %274 = vector.load %arg2[%c0_629, %c0_630, %c0_631, %c5_632, %c5_633] : memref<1x1x8x14x38xbf16, #tpu.memory_space<vmem>>, vector<1x1x8x1x32xbf16>
    %275 = vector.shape_cast %274 : vector<1x1x8x1x32xbf16> to vector<8x32xbf16>
    %c0_634 = arith.constant 0 : index
    %c0_635 = arith.constant 0 : index
    %c0_636 = arith.constant 0 : index
    %c5_637 = arith.constant 5 : index
    %c6_638 = arith.constant 6 : index
    %276 = vector.load %arg2[%c0_634, %c0_635, %c0_636, %c5_637, %c6_638] : memref<1x1x8x14x38xbf16, #tpu.memory_space<vmem>>, vector<1x1x8x1x32xbf16>
    %277 = vector.shape_cast %276 : vector<1x1x8x1x32xbf16> to vector<8x32xbf16>
    %c0_639 = arith.constant 0 : index
    %c0_640 = arith.constant 0 : index
    %c0_641 = arith.constant 0 : index
    %c6_642 = arith.constant 6 : index
    %c0_643 = arith.constant 0 : index
    %278 = vector.load %arg2[%c0_639, %c0_640, %c0_641, %c6_642, %c0_643] : memref<1x1x8x14x38xbf16, #tpu.memory_space<vmem>>, vector<1x1x8x1x32xbf16>
    %279 = vector.shape_cast %278 : vector<1x1x8x1x32xbf16> to vector<8x32xbf16>
    %c0_644 = arith.constant 0 : index
    %c0_645 = arith.constant 0 : index
    %c0_646 = arith.constant 0 : index
    %c6_647 = arith.constant 6 : index
    %c1_648 = arith.constant 1 : index
    %280 = vector.load %arg2[%c0_644, %c0_645, %c0_646, %c6_647, %c1_648] : memref<1x1x8x14x38xbf16, #tpu.memory_space<vmem>>, vector<1x1x8x1x32xbf16>
    %281 = vector.shape_cast %280 : vector<1x1x8x1x32xbf16> to vector<8x32xbf16>
    %c0_649 = arith.constant 0 : index
    %c0_650 = arith.constant 0 : index
    %c0_651 = arith.constant 0 : index
    %c6_652 = arith.constant 6 : index
    %c2_653 = arith.constant 2 : index
    %282 = vector.load %arg2[%c0_649, %c0_650, %c0_651, %c6_652, %c2_653] : memref<1x1x8x14x38xbf16, #tpu.memory_space<vmem>>, vector<1x1x8x1x32xbf16>
    %283 = vector.shape_cast %282 : vector<1x1x8x1x32xbf16> to vector<8x32xbf16>
    %c0_654 = arith.constant 0 : index
    %c0_655 = arith.constant 0 : index
    %c0_656 = arith.constant 0 : index
    %c6_657 = arith.constant 6 : index
    %c3_658 = arith.constant 3 : index
    %284 = vector.load %arg2[%c0_654, %c0_655, %c0_656, %c6_657, %c3_658] : memref<1x1x8x14x38xbf16, #tpu.memory_space<vmem>>, vector<1x1x8x1x32xbf16>
    %285 = vector.shape_cast %284 : vector<1x1x8x1x32xbf16> to vector<8x32xbf16>
    %c0_659 = arith.constant 0 : index
    %c0_660 = arith.constant 0 : index
    %c0_661 = arith.constant 0 : index
    %c6_662 = arith.constant 6 : index
    %c4_663 = arith.constant 4 : index
    %286 = vector.load %arg2[%c0_659, %c0_660, %c0_661, %c6_662, %c4_663] : memref<1x1x8x14x38xbf16, #tpu.memory_space<vmem>>, vector<1x1x8x1x32xbf16>
    %287 = vector.shape_cast %286 : vector<1x1x8x1x32xbf16> to vector<8x32xbf16>
    %c0_664 = arith.constant 0 : index
    %c0_665 = arith.constant 0 : index
    %c0_666 = arith.constant 0 : index
    %c6_667 = arith.constant 6 : index
    %c5_668 = arith.constant 5 : index
    %288 = vector.load %arg2[%c0_664, %c0_665, %c0_666, %c6_667, %c5_668] : memref<1x1x8x14x38xbf16, #tpu.memory_space<vmem>>, vector<1x1x8x1x32xbf16>
    %289 = vector.shape_cast %288 : vector<1x1x8x1x32xbf16> to vector<8x32xbf16>
    %c0_669 = arith.constant 0 : index
    %c0_670 = arith.constant 0 : index
    %c0_671 = arith.constant 0 : index
    %c6_672 = arith.constant 6 : index
    %c6_673 = arith.constant 6 : index
    %290 = vector.load %arg2[%c0_669, %c0_670, %c0_671, %c6_672, %c6_673] : memref<1x1x8x14x38xbf16, #tpu.memory_space<vmem>>, vector<1x1x8x1x32xbf16>
    %291 = vector.shape_cast %290 : vector<1x1x8x1x32xbf16> to vector<8x32xbf16>
    %c0_674 = arith.constant 0 : index
    %c0_675 = arith.constant 0 : index
    %c0_676 = arith.constant 0 : index
    %c7_677 = arith.constant 7 : index
    %c0_678 = arith.constant 0 : index
    %292 = vector.load %arg2[%c0_674, %c0_675, %c0_676, %c7_677, %c0_678] : memref<1x1x8x14x38xbf16, #tpu.memory_space<vmem>>, vector<1x1x8x1x32xbf16>
    %293 = vector.shape_cast %292 : vector<1x1x8x1x32xbf16> to vector<8x32xbf16>
    %c0_679 = arith.constant 0 : index
    %c0_680 = arith.constant 0 : index
    %c0_681 = arith.constant 0 : index
    %c7_682 = arith.constant 7 : index
    %c1_683 = arith.constant 1 : index
    %294 = vector.load %arg2[%c0_679, %c0_680, %c0_681, %c7_682, %c1_683] : memref<1x1x8x14x38xbf16, #tpu.memory_space<vmem>>, vector<1x1x8x1x32xbf16>
    %295 = vector.shape_cast %294 : vector<1x1x8x1x32xbf16> to vector<8x32xbf16>
    %c0_684 = arith.constant 0 : index
    %c0_685 = arith.constant 0 : index
    %c0_686 = arith.constant 0 : index
    %c7_687 = arith.constant 7 : index
    %c2_688 = arith.constant 2 : index
    %296 = vector.load %arg2[%c0_684, %c0_685, %c0_686, %c7_687, %c2_688] : memref<1x1x8x14x38xbf16, #tpu.memory_space<vmem>>, vector<1x1x8x1x32xbf16>
    %297 = vector.shape_cast %296 : vector<1x1x8x1x32xbf16> to vector<8x32xbf16>
    %c0_689 = arith.constant 0 : index
    %c0_690 = arith.constant 0 : index
    %c0_691 = arith.constant 0 : index
    %c7_692 = arith.constant 7 : index
    %c3_693 = arith.constant 3 : index
    %298 = vector.load %arg2[%c0_689, %c0_690, %c0_691, %c7_692, %c3_693] : memref<1x1x8x14x38xbf16, #tpu.memory_space<vmem>>, vector<1x1x8x1x32xbf16>
    %299 = vector.shape_cast %298 : vector<1x1x8x1x32xbf16> to vector<8x32xbf16>
    %c0_694 = arith.constant 0 : index
    %c0_695 = arith.constant 0 : index
    %c0_696 = arith.constant 0 : index
    %c7_697 = arith.constant 7 : index
    %c4_698 = arith.constant 4 : index
    %300 = vector.load %arg2[%c0_694, %c0_695, %c0_696, %c7_697, %c4_698] : memref<1x1x8x14x38xbf16, #tpu.memory_space<vmem>>, vector<1x1x8x1x32xbf16>
    %301 = vector.shape_cast %300 : vector<1x1x8x1x32xbf16> to vector<8x32xbf16>
    %c0_699 = arith.constant 0 : index
    %c0_700 = arith.constant 0 : index
    %c0_701 = arith.constant 0 : index
    %c7_702 = arith.constant 7 : index
    %c5_703 = arith.constant 5 : index
    %302 = vector.load %arg2[%c0_699, %c0_700, %c0_701, %c7_702, %c5_703] : memref<1x1x8x14x38xbf16, #tpu.memory_space<vmem>>, vector<1x1x8x1x32xbf16>
    %303 = vector.shape_cast %302 : vector<1x1x8x1x32xbf16> to vector<8x32xbf16>
    %c0_704 = arith.constant 0 : index
    %c0_705 = arith.constant 0 : index
    %c0_706 = arith.constant 0 : index
    %c7_707 = arith.constant 7 : index
    %c6_708 = arith.constant 6 : index
    %304 = vector.load %arg2[%c0_704, %c0_705, %c0_706, %c7_707, %c6_708] : memref<1x1x8x14x38xbf16, #tpu.memory_space<vmem>>, vector<1x1x8x1x32xbf16>
    %305 = vector.shape_cast %304 : vector<1x1x8x1x32xbf16> to vector<8x32xbf16>
    %c0_709 = arith.constant 0 : index
    %c0_710 = arith.constant 0 : index
    %c0_711 = arith.constant 0 : index
    %c8 = arith.constant 8 : index
    %c0_712 = arith.constant 0 : index
    %306 = vector.load %arg2[%c0_709, %c0_710, %c0_711, %c8, %c0_712] : memref<1x1x8x14x38xbf16, #tpu.memory_space<vmem>>, vector<1x1x8x1x32xbf16>
    %307 = vector.shape_cast %306 : vector<1x1x8x1x32xbf16> to vector<8x32xbf16>
    %c0_713 = arith.constant 0 : index
    %c0_714 = arith.constant 0 : index
    %c0_715 = arith.constant 0 : index
    %c8_716 = arith.constant 8 : index
    %c1_717 = arith.constant 1 : index
    %308 = vector.load %arg2[%c0_713, %c0_714, %c0_715, %c8_716, %c1_717] : memref<1x1x8x14x38xbf16, #tpu.memory_space<vmem>>, vector<1x1x8x1x32xbf16>
    %309 = vector.shape_cast %308 : vector<1x1x8x1x32xbf16> to vector<8x32xbf16>
    %c0_718 = arith.constant 0 : index
    %c0_719 = arith.constant 0 : index
    %c0_720 = arith.constant 0 : index
    %c8_721 = arith.constant 8 : index
    %c2_722 = arith.constant 2 : index
    %310 = vector.load %arg2[%c0_718, %c0_719, %c0_720, %c8_721, %c2_722] : memref<1x1x8x14x38xbf16, #tpu.memory_space<vmem>>, vector<1x1x8x1x32xbf16>
    %311 = vector.shape_cast %310 : vector<1x1x8x1x32xbf16> to vector<8x32xbf16>
    %c0_723 = arith.constant 0 : index
    %c0_724 = arith.constant 0 : index
    %c0_725 = arith.constant 0 : index
    %c8_726 = arith.constant 8 : index
    %c3_727 = arith.constant 3 : index
    %312 = vector.load %arg2[%c0_723, %c0_724, %c0_725, %c8_726, %c3_727] : memref<1x1x8x14x38xbf16, #tpu.memory_space<vmem>>, vector<1x1x8x1x32xbf16>
    %313 = vector.shape_cast %312 : vector<1x1x8x1x32xbf16> to vector<8x32xbf16>
    %c0_728 = arith.constant 0 : index
    %c0_729 = arith.constant 0 : index
    %c0_730 = arith.constant 0 : index
    %c8_731 = arith.constant 8 : index
    %c4_732 = arith.constant 4 : index
    %314 = vector.load %arg2[%c0_728, %c0_729, %c0_730, %c8_731, %c4_732] : memref<1x1x8x14x38xbf16, #tpu.memory_space<vmem>>, vector<1x1x8x1x32xbf16>
    %315 = vector.shape_cast %314 : vector<1x1x8x1x32xbf16> to vector<8x32xbf16>
    %c0_733 = arith.constant 0 : index
    %c0_734 = arith.constant 0 : index
    %c0_735 = arith.constant 0 : index
    %c8_736 = arith.constant 8 : index
    %c5_737 = arith.constant 5 : index
    %316 = vector.load %arg2[%c0_733, %c0_734, %c0_735, %c8_736, %c5_737] : memref<1x1x8x14x38xbf16, #tpu.memory_space<vmem>>, vector<1x1x8x1x32xbf16>
    %317 = vector.shape_cast %316 : vector<1x1x8x1x32xbf16> to vector<8x32xbf16>
    %c0_738 = arith.constant 0 : index
    %c0_739 = arith.constant 0 : index
    %c0_740 = arith.constant 0 : index
    %c8_741 = arith.constant 8 : index
    %c6_742 = arith.constant 6 : index
    %318 = vector.load %arg2[%c0_738, %c0_739, %c0_740, %c8_741, %c6_742] : memref<1x1x8x14x38xbf16, #tpu.memory_space<vmem>>, vector<1x1x8x1x32xbf16>
    %319 = vector.shape_cast %318 : vector<1x1x8x1x32xbf16> to vector<8x32xbf16>
    %320 = tpu.concatenate %223, %225, %227, %229, %231, %233, %235, %237, %239, %241, %243, %245, %247, %249, %251, %253 in 0 : vector<8x32xbf16>, vector<8x32xbf16>, vector<8x32xbf16>, vector<8x32xbf16>, vector<8x32xbf16>, vector<8x32xbf16>, vector<8x32xbf16>, vector<8x32xbf16>, vector<8x32xbf16>, vector<8x32xbf16>, vector<8x32xbf16>, vector<8x32xbf16>, vector<8x32xbf16>, vector<8x32xbf16>, vector<8x32xbf16>, vector<8x32xbf16> -> vector<128x32xbf16>
    %321 = tpu.concatenate %255, %257, %259, %261, %263, %265, %267, %269, %271, %273, %275, %277, %279, %281, %283, %285 in 0 : vector<8x32xbf16>, vector<8x32xbf16>, vector<8x32xbf16>, vector<8x32xbf16>, vector<8x32xbf16>, vector<8x32xbf16>, vector<8x32xbf16>, vector<8x32xbf16>, vector<8x32xbf16>, vector<8x32xbf16>, vector<8x32xbf16>, vector<8x32xbf16>, vector<8x32xbf16>, vector<8x32xbf16>, vector<8x32xbf16>, vector<8x32xbf16> -> vector<128x32xbf16>
    %322 = tpu.concatenate %287, %289, %291, %293, %295, %297, %299, %301, %303, %305, %307, %309, %311, %313, %315, %317 in 0 : vector<8x32xbf16>, vector<8x32xbf16>, vector<8x32xbf16>, vector<8x32xbf16>, vector<8x32xbf16>, vector<8x32xbf16>, vector<8x32xbf16>, vector<8x32xbf16>, vector<8x32xbf16>, vector<8x32xbf16>, vector<8x32xbf16>, vector<8x32xbf16>, vector<8x32xbf16>, vector<8x32xbf16>, vector<8x32xbf16>, vector<8x32xbf16> -> vector<128x32xbf16>
    %323 = tpu.concatenate %320, %321, %322, %319 in 0 : vector<128x32xbf16>, vector<128x32xbf16>, vector<128x32xbf16>, vector<8x32xbf16> -> vector<392x32xbf16>
    %cst_743 = arith.constant dense<0.000000e+00> : vector<32x32xf32>
    %324 = tpu.matmul %0, %323, %cst_743 {dimension_numbers = #tpu.dot_dimension_numbers<[1], [0], [0], [1], [0, 0, 1, 1], [], []>} : vector<32x392xbf16>, vector<392x32xbf16>, vector<32x32xf32> -> vector<32x32xf32>
    %325 = vector.broadcast %1 : vector<32x1xf32> to vector<32x32xf32>
    %326 = arith.addf %324, %325 : vector<32x32xf32>
    %cst_744 = arith.constant 0.000000e+00 : f32
    %327 = vector.broadcast %cst_744 : f32 to vector<32x32xf32>
    %328 = arith.maximumf %326, %327 : vector<32x32xf32>
    %c0_745 = arith.constant 0 : index
    %c0_746 = arith.constant 0 : index
    %c0_747 = arith.constant 0 : index
    %c2_748 = arith.constant 2 : index
    %c0_749 = arith.constant 0 : index
    %329 = vector.load %arg5[%c0_745, %c0_746, %c0_747, %c2_748, %c0_749] : memref<1x32x1x8x32xf32, #tpu.memory_space<vmem>>, vector<1x32x1x1x32xf32>
    %330 = vector.shape_cast %329 : vector<1x32x1x1x32xf32> to vector<32x32xf32>
    %331 = vector.shape_cast %328 : vector<32x32xf32> to vector<1x32x1x1x32xf32>
    tpu.vector_store %arg5[%c0_745, %c0_746, %c0_747, %c2_748, %c0_749], %331 {strides = array<i32>} : memref<1x32x1x8x32xf32, #tpu.memory_space<vmem>>, vector<1x32x1x1x32xf32>,
    %c0_750 = arith.constant 0 : index
    %c0_751 = arith.constant 0 : index
    %c0_752 = arith.constant 0 : index
    %c3_753 = arith.constant 3 : index
    %c0_754 = arith.constant 0 : index
    %332 = vector.load %arg2[%c0_750, %c0_751, %c0_752, %c3_753, %c0_754] : memref<1x1x8x14x38xbf16, #tpu.memory_space<vmem>>, vector<1x1x8x1x32xbf16>
    %333 = vector.shape_cast %332 : vector<1x1x8x1x32xbf16> to vector<8x32xbf16>
    %c0_755 = arith.constant 0 : index
    %c0_756 = arith.constant 0 : index
    %c0_757 = arith.constant 0 : index
    %c3_758 = arith.constant 3 : index
    %c1_759 = arith.constant 1 : index
    %334 = vector.load %arg2[%c0_755, %c0_756, %c0_757, %c3_758, %c1_759] : memref<1x1x8x14x38xbf16, #tpu.memory_space<vmem>>, vector<1x1x8x1x32xbf16>
    %335 = vector.shape_cast %334 : vector<1x1x8x1x32xbf16> to vector<8x32xbf16>
    %c0_760 = arith.constant 0 : index
    %c0_761 = arith.constant 0 : index
    %c0_762 = arith.constant 0 : index
    %c3_763 = arith.constant 3 : index
    %c2_764 = arith.constant 2 : index
    %336 = vector.load %arg2[%c0_760, %c0_761, %c0_762, %c3_763, %c2_764] : memref<1x1x8x14x38xbf16, #tpu.memory_space<vmem>>, vector<1x1x8x1x32xbf16>
    %337 = vector.shape_cast %336 : vector<1x1x8x1x32xbf16> to vector<8x32xbf16>
    %c0_765 = arith.constant 0 : index
    %c0_766 = arith.constant 0 : index
    %c0_767 = arith.constant 0 : index
    %c3_768 = arith.constant 3 : index
    %c3_769 = arith.constant 3 : index
    %338 = vector.load %arg2[%c0_765, %c0_766, %c0_767, %c3_768, %c3_769] : memref<1x1x8x14x38xbf16, #tpu.memory_space<vmem>>, vector<1x1x8x1x32xbf16>
    %339 = vector.shape_cast %338 : vector<1x1x8x1x32xbf16> to vector<8x32xbf16>
    %c0_770 = arith.constant 0 : index
    %c0_771 = arith.constant 0 : index
    %c0_772 = arith.constant 0 : index
    %c3_773 = arith.constant 3 : index
    %c4_774 = arith.constant 4 : index
    %340 = vector.load %arg2[%c0_770, %c0_771, %c0_772, %c3_773, %c4_774] : memref<1x1x8x14x38xbf16, #tpu.memory_space<vmem>>, vector<1x1x8x1x32xbf16>
    %341 = vector.shape_cast %340 : vector<1x1x8x1x32xbf16> to vector<8x32xbf16>
    %c0_775 = arith.constant 0 : index
    %c0_776 = arith.constant 0 : index
    %c0_777 = arith.constant 0 : index
    %c3_778 = arith.constant 3 : index
    %c5_779 = arith.constant 5 : index
    %342 = vector.load %arg2[%c0_775, %c0_776, %c0_777, %c3_778, %c5_779] : memref<1x1x8x14x38xbf16, #tpu.memory_space<vmem>>, vector<1x1x8x1x32xbf16>
    %343 = vector.shape_cast %342 : vector<1x1x8x1x32xbf16> to vector<8x32xbf16>
    %c0_780 = arith.constant 0 : index
    %c0_781 = arith.constant 0 : index
    %c0_782 = arith.constant 0 : index
    %c3_783 = arith.constant 3 : index
    %c6_784 = arith.constant 6 : index
    %344 = vector.load %arg2[%c0_780, %c0_781, %c0_782, %c3_783, %c6_784] : memref<1x1x8x14x38xbf16, #tpu.memory_space<vmem>>, vector<1x1x8x1x32xbf16>
    %345 = vector.shape_cast %344 : vector<1x1x8x1x32xbf16> to vector<8x32xbf16>
    %c0_785 = arith.constant 0 : index
    %c0_786 = arith.constant 0 : index
    %c0_787 = arith.constant 0 : index
    %c4_788 = arith.constant 4 : index
    %c0_789 = arith.constant 0 : index
    %346 = vector.load %arg2[%c0_785, %c0_786, %c0_787, %c4_788, %c0_789] : memref<1x1x8x14x38xbf16, #tpu.memory_space<vmem>>, vector<1x1x8x1x32xbf16>
    %347 = vector.shape_cast %346 : vector<1x1x8x1x32xbf16> to vector<8x32xbf16>
    %c0_790 = arith.constant 0 : index
    %c0_791 = arith.constant 0 : index
    %c0_792 = arith.constant 0 : index
    %c4_793 = arith.constant 4 : index
    %c1_794 = arith.constant 1 : index
    %348 = vector.load %arg2[%c0_790, %c0_791, %c0_792, %c4_793, %c1_794] : memref<1x1x8x14x38xbf16, #tpu.memory_space<vmem>>, vector<1x1x8x1x32xbf16>
    %349 = vector.shape_cast %348 : vector<1x1x8x1x32xbf16> to vector<8x32xbf16>
    %c0_795 = arith.constant 0 : index
    %c0_796 = arith.constant 0 : index
    %c0_797 = arith.constant 0 : index
    %c4_798 = arith.constant 4 : index
    %c2_799 = arith.constant 2 : index
    %350 = vector.load %arg2[%c0_795, %c0_796, %c0_797, %c4_798, %c2_799] : memref<1x1x8x14x38xbf16, #tpu.memory_space<vmem>>, vector<1x1x8x1x32xbf16>
    %351 = vector.shape_cast %350 : vector<1x1x8x1x32xbf16> to vector<8x32xbf16>
    %c0_800 = arith.constant 0 : index
    %c0_801 = arith.constant 0 : index
    %c0_802 = arith.constant 0 : index
    %c4_803 = arith.constant 4 : index
    %c3_804 = arith.constant 3 : index
    %352 = vector.load %arg2[%c0_800, %c0_801, %c0_802, %c4_803, %c3_804] : memref<1x1x8x14x38xbf16, #tpu.memory_space<vmem>>, vector<1x1x8x1x32xbf16>
    %353 = vector.shape_cast %352 : vector<1x1x8x1x32xbf16> to vector<8x32xbf16>
    %c0_805 = arith.constant 0 : index
    %c0_806 = arith.constant 0 : index
    %c0_807 = arith.constant 0 : index
    %c4_808 = arith.constant 4 : index
    %c4_809 = arith.constant 4 : index
    %354 = vector.load %arg2[%c0_805, %c0_806, %c0_807, %c4_808, %c4_809] : memref<1x1x8x14x38xbf16, #tpu.memory_space<vmem>>, vector<1x1x8x1x32xbf16>
    %355 = vector.shape_cast %354 : vector<1x1x8x1x32xbf16> to vector<8x32xbf16>
    %c0_810 = arith.constant 0 : index
    %c0_811 = arith.constant 0 : index
    %c0_812 = arith.constant 0 : index
    %c4_813 = arith.constant 4 : index
    %c5_814 = arith.constant 5 : index
    %356 = vector.load %arg2[%c0_810, %c0_811, %c0_812, %c4_813, %c5_814] : memref<1x1x8x14x38xbf16, #tpu.memory_space<vmem>>, vector<1x1x8x1x32xbf16>
    %357 = vector.shape_cast %356 : vector<1x1x8x1x32xbf16> to vector<8x32xbf16>
    %c0_815 = arith.constant 0 : index
    %c0_816 = arith.constant 0 : index
    %c0_817 = arith.constant 0 : index
    %c4_818 = arith.constant 4 : index
    %c6_819 = arith.constant 6 : index
    %358 = vector.load %arg2[%c0_815, %c0_816, %c0_817, %c4_818, %c6_819] : memref<1x1x8x14x38xbf16, #tpu.memory_space<vmem>>, vector<1x1x8x1x32xbf16>
    %359 = vector.shape_cast %358 : vector<1x1x8x1x32xbf16> to vector<8x32xbf16>
    %c0_820 = arith.constant 0 : index
    %c0_821 = arith.constant 0 : index
    %c0_822 = arith.constant 0 : index
    %c5_823 = arith.constant 5 : index
    %c0_824 = arith.constant 0 : index
    %360 = vector.load %arg2[%c0_820, %c0_821, %c0_822, %c5_823, %c0_824] : memref<1x1x8x14x38xbf16, #tpu.memory_space<vmem>>, vector<1x1x8x1x32xbf16>
    %361 = vector.shape_cast %360 : vector<1x1x8x1x32xbf16> to vector<8x32xbf16>
    %c0_825 = arith.constant 0 : index
    %c0_826 = arith.constant 0 : index
    %c0_827 = arith.constant 0 : index
    %c5_828 = arith.constant 5 : index
    %c1_829 = arith.constant 1 : index
    %362 = vector.load %arg2[%c0_825, %c0_826, %c0_827, %c5_828, %c1_829] : memref<1x1x8x14x38xbf16, #tpu.memory_space<vmem>>, vector<1x1x8x1x32xbf16>
    %363 = vector.shape_cast %362 : vector<1x1x8x1x32xbf16> to vector<8x32xbf16>
    %c0_830 = arith.constant 0 : index
    %c0_831 = arith.constant 0 : index
    %c0_832 = arith.constant 0 : index
    %c5_833 = arith.constant 5 : index
    %c2_834 = arith.constant 2 : index
    %364 = vector.load %arg2[%c0_830, %c0_831, %c0_832, %c5_833, %c2_834] : memref<1x1x8x14x38xbf16, #tpu.memory_space<vmem>>, vector<1x1x8x1x32xbf16>
    %365 = vector.shape_cast %364 : vector<1x1x8x1x32xbf16> to vector<8x32xbf16>
    %c0_835 = arith.constant 0 : index
    %c0_836 = arith.constant 0 : index
    %c0_837 = arith.constant 0 : index
    %c5_838 = arith.constant 5 : index
    %c3_839 = arith.constant 3 : index
    %366 = vector.load %arg2[%c0_835, %c0_836, %c0_837, %c5_838, %c3_839] : memref<1x1x8x14x38xbf16, #tpu.memory_space<vmem>>, vector<1x1x8x1x32xbf16>
    %367 = vector.shape_cast %366 : vector<1x1x8x1x32xbf16> to vector<8x32xbf16>
    %c0_840 = arith.constant 0 : index
    %c0_841 = arith.constant 0 : index
    %c0_842 = arith.constant 0 : index
    %c5_843 = arith.constant 5 : index
    %c4_844 = arith.constant 4 : index
    %368 = vector.load %arg2[%c0_840, %c0_841, %c0_842, %c5_843, %c4_844] : memref<1x1x8x14x38xbf16, #tpu.memory_space<vmem>>, vector<1x1x8x1x32xbf16>
    %369 = vector.shape_cast %368 : vector<1x1x8x1x32xbf16> to vector<8x32xbf16>
    %c0_845 = arith.constant 0 : index
    %c0_846 = arith.constant 0 : index
    %c0_847 = arith.constant 0 : index
    %c5_848 = arith.constant 5 : index
    %c5_849 = arith.constant 5 : index
    %370 = vector.load %arg2[%c0_845, %c0_846, %c0_847, %c5_848, %c5_849] : memref<1x1x8x14x38xbf16, #tpu.memory_space<vmem>>, vector<1x1x8x1x32xbf16>
    %371 = vector.shape_cast %370 : vector<1x1x8x1x32xbf16> to vector<8x32xbf16>
    %c0_850 = arith.constant 0 : index
    %c0_851 = arith.constant 0 : index
    %c0_852 = arith.constant 0 : index
    %c5_853 = arith.constant 5 : index
    %c6_854 = arith.constant 6 : index
    %372 = vector.load %arg2[%c0_850, %c0_851, %c0_852, %c5_853, %c6_854] : memref<1x1x8x14x38xbf16, #tpu.memory_space<vmem>>, vector<1x1x8x1x32xbf16>
    %373 = vector.shape_cast %372 : vector<1x1x8x1x32xbf16> to vector<8x32xbf16>
    %c0_855 = arith.constant 0 : index
    %c0_856 = arith.constant 0 : index
    %c0_857 = arith.constant 0 : index
    %c6_858 = arith.constant 6 : index
    %c0_859 = arith.constant 0 : index
    %374 = vector.load %arg2[%c0_855, %c0_856, %c0_857, %c6_858, %c0_859] : memref<1x1x8x14x38xbf16, #tpu.memory_space<vmem>>, vector<1x1x8x1x32xbf16>
    %375 = vector.shape_cast %374 : vector<1x1x8x1x32xbf16> to vector<8x32xbf16>
    %c0_860 = arith.constant 0 : index
    %c0_861 = arith.constant 0 : index
    %c0_862 = arith.constant 0 : index
    %c6_863 = arith.constant 6 : index
    %c1_864 = arith.constant 1 : index
    %376 = vector.load %arg2[%c0_860, %c0_861, %c0_862, %c6_863, %c1_864] : memref<1x1x8x14x38xbf16, #tpu.memory_space<vmem>>, vector<1x1x8x1x32xbf16>
    %377 = vector.shape_cast %376 : vector<1x1x8x1x32xbf16> to vector<8x32xbf16>
    %c0_865 = arith.constant 0 : index
    %c0_866 = arith.constant 0 : index
    %c0_867 = arith.constant 0 : index
    %c6_868 = arith.constant 6 : index
    %c2_869 = arith.constant 2 : index
    %378 = vector.load %arg2[%c0_865, %c0_866, %c0_867, %c6_868, %c2_869] : memref<1x1x8x14x38xbf16, #tpu.memory_space<vmem>>, vector<1x1x8x1x32xbf16>
    %379 = vector.shape_cast %378 : vector<1x1x8x1x32xbf16> to vector<8x32xbf16>
    %c0_870 = arith.constant 0 : index
    %c0_871 = arith.constant 0 : index
    %c0_872 = arith.constant 0 : index
    %c6_873 = arith.constant 6 : index
    %c3_874 = arith.constant 3 : index
    %380 = vector.load %arg2[%c0_870, %c0_871, %c0_872, %c6_873, %c3_874] : memref<1x1x8x14x38xbf16, #tpu.memory_space<vmem>>, vector<1x1x8x1x32xbf16>
    %381 = vector.shape_cast %380 : vector<1x1x8x1x32xbf16> to vector<8x32xbf16>
    %c0_875 = arith.constant 0 : index
    %c0_876 = arith.constant 0 : index
    %c0_877 = arith.constant 0 : index
    %c6_878 = arith.constant 6 : index
    %c4_879 = arith.constant 4 : index
    %382 = vector.load %arg2[%c0_875, %c0_876, %c0_877, %c6_878, %c4_879] : memref<1x1x8x14x38xbf16, #tpu.memory_space<vmem>>, vector<1x1x8x1x32xbf16>
    %383 = vector.shape_cast %382 : vector<1x1x8x1x32xbf16> to vector<8x32xbf16>
    %c0_880 = arith.constant 0 : index
    %c0_881 = arith.constant 0 : index
    %c0_882 = arith.constant 0 : index
    %c6_883 = arith.constant 6 : index
    %c5_884 = arith.constant 5 : index
    %384 = vector.load %arg2[%c0_880, %c0_881, %c0_882, %c6_883, %c5_884] : memref<1x1x8x14x38xbf16, #tpu.memory_space<vmem>>, vector<1x1x8x1x32xbf16>
    %385 = vector.shape_cast %384 : vector<1x1x8x1x32xbf16> to vector<8x32xbf16>
    %c0_885 = arith.constant 0 : index
    %c0_886 = arith.constant 0 : index
    %c0_887 = arith.constant 0 : index
    %c6_888 = arith.constant 6 : index
    %c6_889 = arith.constant 6 : index
    %386 = vector.load %arg2[%c0_885, %c0_886, %c0_887, %c6_888, %c6_889] : memref<1x1x8x14x38xbf16, #tpu.memory_space<vmem>>, vector<1x1x8x1x32xbf16>
    %387 = vector.shape_cast %386 : vector<1x1x8x1x32xbf16> to vector<8x32xbf16>
    %c0_890 = arith.constant 0 : index
    %c0_891 = arith.constant 0 : index
    %c0_892 = arith.constant 0 : index
    %c7_893 = arith.constant 7 : index
    %c0_894 = arith.constant 0 : index
    %388 = vector.load %arg2[%c0_890, %c0_891, %c0_892, %c7_893, %c0_894] : memref<1x1x8x14x38xbf16, #tpu.memory_space<vmem>>, vector<1x1x8x1x32xbf16>
    %389 = vector.shape_cast %388 : vector<1x1x8x1x32xbf16> to vector<8x32xbf16>
    %c0_895 = arith.constant 0 : index
    %c0_896 = arith.constant 0 : index
    %c0_897 = arith.constant 0 : index
    %c7_898 = arith.constant 7 : index
    %c1_899 = arith.constant 1 : index
    %390 = vector.load %arg2[%c0_895, %c0_896, %c0_897, %c7_898, %c1_899] : memref<1x1x8x14x38xbf16, #tpu.memory_space<vmem>>, vector<1x1x8x1x32xbf16>
    %391 = vector.shape_cast %390 : vector<1x1x8x1x32xbf16> to vector<8x32xbf16>
    %c0_900 = arith.constant 0 : index
    %c0_901 = arith.constant 0 : index
    %c0_902 = arith.constant 0 : index
    %c7_903 = arith.constant 7 : index
    %c2_904 = arith.constant 2 : index
    %392 = vector.load %arg2[%c0_900, %c0_901, %c0_902, %c7_903, %c2_904] : memref<1x1x8x14x38xbf16, #tpu.memory_space<vmem>>, vector<1x1x8x1x32xbf16>
    %393 = vector.shape_cast %392 : vector<1x1x8x1x32xbf16> to vector<8x32xbf16>
    %c0_905 = arith.constant 0 : index
    %c0_906 = arith.constant 0 : index
    %c0_907 = arith.constant 0 : index
    %c7_908 = arith.constant 7 : index
    %c3_909 = arith.constant 3 : index
    %394 = vector.load %arg2[%c0_905, %c0_906, %c0_907, %c7_908, %c3_909] : memref<1x1x8x14x38xbf16, #tpu.memory_space<vmem>>, vector<1x1x8x1x32xbf16>
    %395 = vector.shape_cast %394 : vector<1x1x8x1x32xbf16> to vector<8x32xbf16>
    %c0_910 = arith.constant 0 : index
    %c0_911 = arith.constant 0 : index
    %c0_912 = arith.constant 0 : index
    %c7_913 = arith.constant 7 : index
    %c4_914 = arith.constant 4 : index
    %396 = vector.load %arg2[%c0_910, %c0_911, %c0_912, %c7_913, %c4_914] : memref<1x1x8x14x38xbf16, #tpu.memory_space<vmem>>, vector<1x1x8x1x32xbf16>
    %397 = vector.shape_cast %396 : vector<1x1x8x1x32xbf16> to vector<8x32xbf16>
    %c0_915 = arith.constant 0 : index
    %c0_916 = arith.constant 0 : index
    %c0_917 = arith.constant 0 : index
    %c7_918 = arith.constant 7 : index
    %c5_919 = arith.constant 5 : index
    %398 = vector.load %arg2[%c0_915, %c0_916, %c0_917, %c7_918, %c5_919] : memref<1x1x8x14x38xbf16, #tpu.memory_space<vmem>>, vector<1x1x8x1x32xbf16>
    %399 = vector.shape_cast %398 : vector<1x1x8x1x32xbf16> to vector<8x32xbf16>
    %c0_920 = arith.constant 0 : index
    %c0_921 = arith.constant 0 : index
    %c0_922 = arith.constant 0 : index
    %c7_923 = arith.constant 7 : index
    %c6_924 = arith.constant 6 : index
    %400 = vector.load %arg2[%c0_920, %c0_921, %c0_922, %c7_923, %c6_924] : memref<1x1x8x14x38xbf16, #tpu.memory_space<vmem>>, vector<1x1x8x1x32xbf16>
    %401 = vector.shape_cast %400 : vector<1x1x8x1x32xbf16> to vector<8x32xbf16>
    %c0_925 = arith.constant 0 : index
    %c0_926 = arith.constant 0 : index
    %c0_927 = arith.constant 0 : index
    %c8_928 = arith.constant 8 : index
    %c0_929 = arith.constant 0 : index
    %402 = vector.load %arg2[%c0_925, %c0_926, %c0_927, %c8_928, %c0_929] : memref<1x1x8x14x38xbf16, #tpu.memory_space<vmem>>, vector<1x1x8x1x32xbf16>
    %403 = vector.shape_cast %402 : vector<1x1x8x1x32xbf16> to vector<8x32xbf16>
    %c0_930 = arith.constant 0 : index
    %c0_931 = arith.constant 0 : index
    %c0_932 = arith.constant 0 : index
    %c8_933 = arith.constant 8 : index
    %c1_934 = arith.constant 1 : index
    %404 = vector.load %arg2[%c0_930, %c0_931, %c0_932, %c8_933, %c1_934] : memref<1x1x8x14x38xbf16, #tpu.memory_space<vmem>>, vector<1x1x8x1x32xbf16>
    %405 = vector.shape_cast %404 : vector<1x1x8x1x32xbf16> to vector<8x32xbf16>
    %c0_935 = arith.constant 0 : index
    %c0_936 = arith.constant 0 : index
    %c0_937 = arith.constant 0 : index
    %c8_938 = arith.constant 8 : index
    %c2_939 = arith.constant 2 : index
    %406 = vector.load %arg2[%c0_935, %c0_936, %c0_937, %c8_938, %c2_939] : memref<1x1x8x14x38xbf16, #tpu.memory_space<vmem>>, vector<1x1x8x1x32xbf16>
    %407 = vector.shape_cast %406 : vector<1x1x8x1x32xbf16> to vector<8x32xbf16>
    %c0_940 = arith.constant 0 : index
    %c0_941 = arith.constant 0 : index
    %c0_942 = arith.constant 0 : index
    %c8_943 = arith.constant 8 : index
    %c3_944 = arith.constant 3 : index
    %408 = vector.load %arg2[%c0_940, %c0_941, %c0_942, %c8_943, %c3_944] : memref<1x1x8x14x38xbf16, #tpu.memory_space<vmem>>, vector<1x1x8x1x32xbf16>
    %409 = vector.shape_cast %408 : vector<1x1x8x1x32xbf16> to vector<8x32xbf16>
    %c0_945 = arith.constant 0 : index
    %c0_946 = arith.constant 0 : index
    %c0_947 = arith.constant 0 : index
    %c8_948 = arith.constant 8 : index
    %c4_949 = arith.constant 4 : index
    %410 = vector.load %arg2[%c0_945, %c0_946, %c0_947, %c8_948, %c4_949] : memref<1x1x8x14x38xbf16, #tpu.memory_space<vmem>>, vector<1x1x8x1x32xbf16>
    %411 = vector.shape_cast %410 : vector<1x1x8x1x32xbf16> to vector<8x32xbf16>
    %c0_950 = arith.constant 0 : index
    %c0_951 = arith.constant 0 : index
    %c0_952 = arith.constant 0 : index
    %c8_953 = arith.constant 8 : index
    %c5_954 = arith.constant 5 : index
    %412 = vector.load %arg2[%c0_950, %c0_951, %c0_952, %c8_953, %c5_954] : memref<1x1x8x14x38xbf16, #tpu.memory_space<vmem>>, vector<1x1x8x1x32xbf16>
    %413 = vector.shape_cast %412 : vector<1x1x8x1x32xbf16> to vector<8x32xbf16>
    %c0_955 = arith.constant 0 : index
    %c0_956 = arith.constant 0 : index
    %c0_957 = arith.constant 0 : index
    %c8_958 = arith.constant 8 : index
    %c6_959 = arith.constant 6 : index
    %414 = vector.load %arg2[%c0_955, %c0_956, %c0_957, %c8_958, %c6_959] : memref<1x1x8x14x38xbf16, #tpu.memory_space<vmem>>, vector<1x1x8x1x32xbf16>
    %415 = vector.shape_cast %414 : vector<1x1x8x1x32xbf16> to vector<8x32xbf16>
    %c0_960 = arith.constant 0 : index
    %c0_961 = arith.constant 0 : index
    %c0_962 = arith.constant 0 : index
    %c9 = arith.constant 9 : index
    %c0_963 = arith.constant 0 : index
    %416 = vector.load %arg2[%c0_960, %c0_961, %c0_962, %c9, %c0_963] : memref<1x1x8x14x38xbf16, #tpu.memory_space<vmem>>, vector<1x1x8x1x32xbf16>
    %417 = vector.shape_cast %416 : vector<1x1x8x1x32xbf16> to vector<8x32xbf16>
    %c0_964 = arith.constant 0 : index
    %c0_965 = arith.constant 0 : index
    %c0_966 = arith.constant 0 : index
    %c9_967 = arith.constant 9 : index
    %c1_968 = arith.constant 1 : index
    %418 = vector.load %arg2[%c0_964, %c0_965, %c0_966, %c9_967, %c1_968] : memref<1x1x8x14x38xbf16, #tpu.memory_space<vmem>>, vector<1x1x8x1x32xbf16>
    %419 = vector.shape_cast %418 : vector<1x1x8x1x32xbf16> to vector<8x32xbf16>
    %c0_969 = arith.constant 0 : index
    %c0_970 = arith.constant 0 : index
    %c0_971 = arith.constant 0 : index
    %c9_972 = arith.constant 9 : index
    %c2_973 = arith.constant 2 : index
    %420 = vector.load %arg2[%c0_969, %c0_970, %c0_971, %c9_972, %c2_973] : memref<1x1x8x14x38xbf16, #tpu.memory_space<vmem>>, vector<1x1x8x1x32xbf16>
    %421 = vector.shape_cast %420 : vector<1x1x8x1x32xbf16> to vector<8x32xbf16>
    %c0_974 = arith.constant 0 : index
    %c0_975 = arith.constant 0 : index
    %c0_976 = arith.constant 0 : index
    %c9_977 = arith.constant 9 : index
    %c3_978 = arith.constant 3 : index
    %422 = vector.load %arg2[%c0_974, %c0_975, %c0_976, %c9_977, %c3_978] : memref<1x1x8x14x38xbf16, #tpu.memory_space<vmem>>, vector<1x1x8x1x32xbf16>
    %423 = vector.shape_cast %422 : vector<1x1x8x1x32xbf16> to vector<8x32xbf16>
    %c0_979 = arith.constant 0 : index
    %c0_980 = arith.constant 0 : index
    %c0_981 = arith.constant 0 : index
    %c9_982 = arith.constant 9 : index
    %c4_983 = arith.constant 4 : index
    %424 = vector.load %arg2[%c0_979, %c0_980, %c0_981, %c9_982, %c4_983] : memref<1x1x8x14x38xbf16, #tpu.memory_space<vmem>>, vector<1x1x8x1x32xbf16>
    %425 = vector.shape_cast %424 : vector<1x1x8x1x32xbf16> to vector<8x32xbf16>
    %c0_984 = arith.constant 0 : index
    %c0_985 = arith.constant 0 : index
    %c0_986 = arith.constant 0 : index
    %c9_987 = arith.constant 9 : index
    %c5_988 = arith.constant 5 : index
    %426 = vector.load %arg2[%c0_984, %c0_985, %c0_986, %c9_987, %c5_988] : memref<1x1x8x14x38xbf16, #tpu.memory_space<vmem>>, vector<1x1x8x1x32xbf16>
    %427 = vector.shape_cast %426 : vector<1x1x8x1x32xbf16> to vector<8x32xbf16>
    %c0_989 = arith.constant 0 : index
    %c0_990 = arith.constant 0 : index
    %c0_991 = arith.constant 0 : index
    %c9_992 = arith.constant 9 : index
    %c6_993 = arith.constant 6 : index
    %428 = vector.load %arg2[%c0_989, %c0_990, %c0_991, %c9_992, %c6_993] : memref<1x1x8x14x38xbf16, #tpu.memory_space<vmem>>, vector<1x1x8x1x32xbf16>
    %429 = vector.shape_cast %428 : vector<1x1x8x1x32xbf16> to vector<8x32xbf16>
    %430 = tpu.concatenate %333, %335, %337, %339, %341, %343, %345, %347, %349, %351, %353, %355, %357, %359, %361, %363 in 0 : vector<8x32xbf16>, vector<8x32xbf16>, vector<8x32xbf16>, vector<8x32xbf16>, vector<8x32xbf16>, vector<8x32xbf16>, vector<8x32xbf16>, vector<8x32xbf16>, vector<8x32xbf16>, vector<8x32xbf16>, vector<8x32xbf16>, vector<8x32xbf16>, vector<8x32xbf16>, vector<8x32xbf16>, vector<8x32xbf16>, vector<8x32xbf16> -> vector<128x32xbf16>
    %431 = tpu.concatenate %365, %367, %369, %371, %373, %375, %377, %379, %381, %383, %385, %387, %389, %391, %393, %395 in 0 : vector<8x32xbf16>, vector<8x32xbf16>, vector<8x32xbf16>, vector<8x32xbf16>, vector<8x32xbf16>, vector<8x32xbf16>, vector<8x32xbf16>, vector<8x32xbf16>, vector<8x32xbf16>, vector<8x32xbf16>, vector<8x32xbf16>, vector<8x32xbf16>, vector<8x32xbf16>, vector<8x32xbf16>, vector<8x32xbf16>, vector<8x32xbf16> -> vector<128x32xbf16>
    %432 = tpu.concatenate %397, %399, %401, %403, %405, %407, %409, %411, %413, %415, %417, %419, %421, %423, %425, %427 in 0 : vector<8x32xbf16>, vector<8x32xbf16>, vector<8x32xbf16>, vector<8x32xbf16>, vector<8x32xbf16>, vector<8x32xbf16>, vector<8x32xbf16>, vector<8x32xbf16>, vector<8x32xbf16>, vector<8x32xbf16>, vector<8x32xbf16>, vector<8x32xbf16>, vector<8x32xbf16>, vector<8x32xbf16>, vector<8x32xbf16>, vector<8x32xbf16> -> vector<128x32xbf16>
    %433 = tpu.concatenate %430, %431, %432, %429 in 0 : vector<128x32xbf16>, vector<128x32xbf16>, vector<128x32xbf16>, vector<8x32xbf16> -> vector<392x32xbf16>
    %cst_994 = arith.constant dense<0.000000e+00> : vector<32x32xf32>
    %434 = tpu.matmul %0, %433, %cst_994 {dimension_numbers = #tpu.dot_dimension_numbers<[1], [0], [0], [1], [0, 0, 1, 1], [], []>} : vector<32x392xbf16>, vector<392x32xbf16>, vector<32x32xf32> -> vector<32x32xf32>
    %435 = vector.broadcast %1 : vector<32x1xf32> to vector<32x32xf32>
    %436 = arith.addf %434, %435 : vector<32x32xf32>
    %cst_995 = arith.constant 0.000000e+00 : f32
    %437 = vector.broadcast %cst_995 : f32 to vector<32x32xf32>
    %438 = arith.maximumf %436, %437 : vector<32x32xf32>
    %c0_996 = arith.constant 0 : index
    %c0_997 = arith.constant 0 : index
    %c0_998 = arith.constant 0 : index
    %c3_999 = arith.constant 3 : index
    %c0_1000 = arith.constant 0 : index
    %439 = vector.load %arg5[%c0_996, %c0_997, %c0_998, %c3_999, %c0_1000] : memref<1x32x1x8x32xf32, #tpu.memory_space<vmem>>, vector<1x32x1x1x32xf32>
    %440 = vector.shape_cast %439 : vector<1x32x1x1x32xf32> to vector<32x32xf32>
    %441 = vector.shape_cast %438 : vector<32x32xf32> to vector<1x32x1x1x32xf32>
    tpu.vector_store %arg5[%c0_996, %c0_997, %c0_998, %c3_999, %c0_1000], %441 {strides = array<i32>} : memref<1x32x1x8x32xf32, #tpu.memory_space<vmem>>, vector<1x32x1x1x32xf32>,
    %c0_1001 = arith.constant 0 : index
    %c0_1002 = arith.constant 0 : index
    %c0_1003 = arith.constant 0 : index
    %c4_1004 = arith.constant 4 : index
    %c0_1005 = arith.constant 0 : index
    %442 = vector.load %arg2[%c0_1001, %c0_1002, %c0_1003, %c4_1004, %c0_1005] : memref<1x1x8x14x38xbf16, #tpu.memory_space<vmem>>, vector<1x1x8x1x32xbf16>
    %443 = vector.shape_cast %442 : vector<1x1x8x1x32xbf16> to vector<8x32xbf16>
    %c0_1006 = arith.constant 0 : index
    %c0_1007 = arith.constant 0 : index
    %c0_1008 = arith.constant 0 : index
    %c4_1009 = arith.constant 4 : index
    %c1_1010 = arith.constant 1 : index
    %444 = vector.load %arg2[%c0_1006, %c0_1007, %c0_1008, %c4_1009, %c1_1010] : memref<1x1x8x14x38xbf16, #tpu.memory_space<vmem>>, vector<1x1x8x1x32xbf16>
    %445 = vector.shape_cast %444 : vector<1x1x8x1x32xbf16> to vector<8x32xbf16>
    %c0_1011 = arith.constant 0 : index
    %c0_1012 = arith.constant 0 : index
    %c0_1013 = arith.constant 0 : index
    %c4_1014 = arith.constant 4 : index
    %c2_1015 = arith.constant 2 : index
    %446 = vector.load %arg2[%c0_1011, %c0_1012, %c0_1013, %c4_1014, %c2_1015] : memref<1x1x8x14x38xbf16, #tpu.memory_space<vmem>>, vector<1x1x8x1x32xbf16>
    %447 = vector.shape_cast %446 : vector<1x1x8x1x32xbf16> to vector<8x32xbf16>
    %c0_1016 = arith.constant 0 : index
    %c0_1017 = arith.constant 0 : index
    %c0_1018 = arith.constant 0 : index
    %c4_1019 = arith.constant 4 : index
    %c3_1020 = arith.constant 3 : index
    %448 = vector.load %arg2[%c0_1016, %c0_1017, %c0_1018, %c4_1019, %c3_1020] : memref<1x1x8x14x38xbf16, #tpu.memory_space<vmem>>, vector<1x1x8x1x32xbf16>
    %449 = vector.shape_cast %448 : vector<1x1x8x1x32xbf16> to vector<8x32xbf16>
    %c0_1021 = arith.constant 0 : index
    %c0_1022 = arith.constant 0 : index
    %c0_1023 = arith.constant 0 : index
    %c4_1024 = arith.constant 4 : index
    %c4_1025 = arith.constant 4 : index
    %450 = vector.load %arg2[%c0_1021, %c0_1022, %c0_1023, %c4_1024, %c4_1025] : memref<1x1x8x14x38xbf16, #tpu.memory_space<vmem>>, vector<1x1x8x1x32xbf16>
    %451 = vector.shape_cast %450 : vector<1x1x8x1x32xbf16> to vector<8x32xbf16>
    %c0_1026 = arith.constant 0 : index
    %c0_1027 = arith.constant 0 : index
    %c0_1028 = arith.constant 0 : index
    %c4_1029 = arith.constant 4 : index
    %c5_1030 = arith.constant 5 : index
    %452 = vector.load %arg2[%c0_1026, %c0_1027, %c0_1028, %c4_1029, %c5_1030] : memref<1x1x8x14x38xbf16, #tpu.memory_space<vmem>>, vector<1x1x8x1x32xbf16>
    %453 = vector.shape_cast %452 : vector<1x1x8x1x32xbf16> to vector<8x32xbf16>
    %c0_1031 = arith.constant 0 : index
    %c0_1032 = arith.constant 0 : index
    %c0_1033 = arith.constant 0 : index
    %c4_1034 = arith.constant 4 : index
    %c6_1035 = arith.constant 6 : index
    %454 = vector.load %arg2[%c0_1031, %c0_1032, %c0_1033, %c4_1034, %c6_1035] : memref<1x1x8x14x38xbf16, #tpu.memory_space<vmem>>, vector<1x1x8x1x32xbf16>
    %455 = vector.shape_cast %454 : vector<1x1x8x1x32xbf16> to vector<8x32xbf16>
    %c0_1036 = arith.constant 0 : index
    %c0_1037 = arith.constant 0 : index
    %c0_1038 = arith.constant 0 : index
    %c5_1039 = arith.constant 5 : index
    %c0_1040 = arith.constant 0 : index
    %456 = vector.load %arg2[%c0_1036, %c0_1037, %c0_1038, %c5_1039, %c0_1040] : memref<1x1x8x14x38xbf16, #tpu.memory_space<vmem>>, vector<1x1x8x1x32xbf16>
    %457 = vector.shape_cast %456 : vector<1x1x8x1x32xbf16> to vector<8x32xbf16>
    %c0_1041 = arith.constant 0 : index
    %c0_1042 = arith.constant 0 : index
    %c0_1043 = arith.constant 0 : index
    %c5_1044 = arith.constant 5 : index
    %c1_1045 = arith.constant 1 : index
    %458 = vector.load %arg2[%c0_1041, %c0_1042, %c0_1043, %c5_1044, %c1_1045] : memref<1x1x8x14x38xbf16, #tpu.memory_space<vmem>>, vector<1x1x8x1x32xbf16>
    %459 = vector.shape_cast %458 : vector<1x1x8x1x32xbf16> to vector<8x32xbf16>
    %c0_1046 = arith.constant 0 : index
    %c0_1047 = arith.constant 0 : index
    %c0_1048 = arith.constant 0 : index
    %c5_1049 = arith.constant 5 : index
    %c2_1050 = arith.constant 2 : index
    %460 = vector.load %arg2[%c0_1046, %c0_1047, %c0_1048, %c5_1049, %c2_1050] : memref<1x1x8x14x38xbf16, #tpu.memory_space<vmem>>, vector<1x1x8x1x32xbf16>
    %461 = vector.shape_cast %460 : vector<1x1x8x1x32xbf16> to vector<8x32xbf16>
    %c0_1051 = arith.constant 0 : index
    %c0_1052 = arith.constant 0 : index
    %c0_1053 = arith.constant 0 : index
    %c5_1054 = arith.constant 5 : index
    %c3_1055 = arith.constant 3 : index
    %462 = vector.load %arg2[%c0_1051, %c0_1052, %c0_1053, %c5_1054, %c3_1055] : memref<1x1x8x14x38xbf16, #tpu.memory_space<vmem>>, vector<1x1x8x1x32xbf16>
    %463 = vector.shape_cast %462 : vector<1x1x8x1x32xbf16> to vector<8x32xbf16>
    %c0_1056 = arith.constant 0 : index
    %c0_1057 = arith.constant 0 : index
    %c0_1058 = arith.constant 0 : index
    %c5_1059 = arith.constant 5 : index
    %c4_1060 = arith.constant 4 : index
    %464 = vector.load %arg2[%c0_1056, %c0_1057, %c0_1058, %c5_1059, %c4_1060] : memref<1x1x8x14x38xbf16, #tpu.memory_space<vmem>>, vector<1x1x8x1x32xbf16>
    %465 = vector.shape_cast %464 : vector<1x1x8x1x32xbf16> to vector<8x32xbf16>
    %c0_1061 = arith.constant 0 : index
    %c0_1062 = arith.constant 0 : index
    %c0_1063 = arith.constant 0 : index
    %c5_1064 = arith.constant 5 : index
    %c5_1065 = arith.constant 5 : index
    %466 = vector.load %arg2[%c0_1061, %c0_1062, %c0_1063, %c5_1064, %c5_1065] : memref<1x1x8x14x38xbf16, #tpu.memory_space<vmem>>, vector<1x1x8x1x32xbf16>
    %467 = vector.shape_cast %466 : vector<1x1x8x1x32xbf16> to vector<8x32xbf16>
    %c0_1066 = arith.constant 0 : index
    %c0_1067 = arith.constant 0 : index
    %c0_1068 = arith.constant 0 : index
    %c5_1069 = arith.constant 5 : index
    %c6_1070 = arith.constant 6 : index
    %468 = vector.load %arg2[%c0_1066, %c0_1067, %c0_1068, %c5_1069, %c6_1070] : memref<1x1x8x14x38xbf16, #tpu.memory_space<vmem>>, vector<1x1x8x1x32xbf16>
    %469 = vector.shape_cast %468 : vector<1x1x8x1x32xbf16> to vector<8x32xbf16>
    %c0_1071 = arith.constant 0 : index
    %c0_1072 = arith.constant 0 : index
    %c0_1073 = arith.constant 0 : index
    %c6_1074 = arith.constant 6 : index
    %c0_1075 = arith.constant 0 : index
    %470 = vector.load %arg2[%c0_1071, %c0_1072, %c0_1073, %c6_1074, %c0_1075] : memref<1x1x8x14x38xbf16, #tpu.memory_space<vmem>>, vector<1x1x8x1x32xbf16>
    %471 = vector.shape_cast %470 : vector<1x1x8x1x32xbf16> to vector<8x32xbf16>
    %c0_1076 = arith.constant 0 : index
    %c0_1077 = arith.constant 0 : index
    %c0_1078 = arith.constant 0 : index
    %c6_1079 = arith.constant 6 : index
    %c1_1080 = arith.constant 1 : index
    %472 = vector.load %arg2[%c0_1076, %c0_1077, %c0_1078, %c6_1079, %c1_1080] : memref<1x1x8x14x38xbf16, #tpu.memory_space<vmem>>, vector<1x1x8x1x32xbf16>
    %473 = vector.shape_cast %472 : vector<1x1x8x1x32xbf16> to vector<8x32xbf16>
    %c0_1081 = arith.constant 0 : index
    %c0_1082 = arith.constant 0 : index
    %c0_1083 = arith.constant 0 : index
    %c6_1084 = arith.constant 6 : index
    %c2_1085 = arith.constant 2 : index
    %474 = vector.load %arg2[%c0_1081, %c0_1082, %c0_1083, %c6_1084, %c2_1085] : memref<1x1x8x14x38xbf16, #tpu.memory_space<vmem>>, vector<1x1x8x1x32xbf16>
    %475 = vector.shape_cast %474 : vector<1x1x8x1x32xbf16> to vector<8x32xbf16>
    %c0_1086 = arith.constant 0 : index
    %c0_1087 = arith.constant 0 : index
    %c0_1088 = arith.constant 0 : index
    %c6_1089 = arith.constant 6 : index
    %c3_1090 = arith.constant 3 : index
    %476 = vector.load %arg2[%c0_1086, %c0_1087, %c0_1088, %c6_1089, %c3_1090] : memref<1x1x8x14x38xbf16, #tpu.memory_space<vmem>>, vector<1x1x8x1x32xbf16>
    %477 = vector.shape_cast %476 : vector<1x1x8x1x32xbf16> to vector<8x32xbf16>
    %c0_1091 = arith.constant 0 : index
    %c0_1092 = arith.constant 0 : index
    %c0_1093 = arith.constant 0 : index
    %c6_1094 = arith.constant 6 : index
    %c4_1095 = arith.constant 4 : index
    %478 = vector.load %arg2[%c0_1091, %c0_1092, %c0_1093, %c6_1094, %c4_1095] : memref<1x1x8x14x38xbf16, #tpu.memory_space<vmem>>, vector<1x1x8x1x32xbf16>
    %479 = vector.shape_cast %478 : vector<1x1x8x1x32xbf16> to vector<8x32xbf16>
    %c0_1096 = arith.constant 0 : index
    %c0_1097 = arith.constant 0 : index
    %c0_1098 = arith.constant 0 : index
    %c6_1099 = arith.constant 6 : index
    %c5_1100 = arith.constant 5 : index
    %480 = vector.load %arg2[%c0_1096, %c0_1097, %c0_1098, %c6_1099, %c5_1100] : memref<1x1x8x14x38xbf16, #tpu.memory_space<vmem>>, vector<1x1x8x1x32xbf16>
    %481 = vector.shape_cast %480 : vector<1x1x8x1x32xbf16> to vector<8x32xbf16>
    %c0_1101 = arith.constant 0 : index
    %c0_1102 = arith.constant 0 : index
    %c0_1103 = arith.constant 0 : index
    %c6_1104 = arith.constant 6 : index
    %c6_1105 = arith.constant 6 : index
    %482 = vector.load %arg2[%c0_1101, %c0_1102, %c0_1103, %c6_1104, %c6_1105] : memref<1x1x8x14x38xbf16, #tpu.memory_space<vmem>>, vector<1x1x8x1x32xbf16>
    %483 = vector.shape_cast %482 : vector<1x1x8x1x32xbf16> to vector<8x32xbf16>
    %c0_1106 = arith.constant 0 : index
    %c0_1107 = arith.constant 0 : index
    %c0_1108 = arith.constant 0 : index
    %c7_1109 = arith.constant 7 : index
    %c0_1110 = arith.constant 0 : index
    %484 = vector.load %arg2[%c0_1106, %c0_1107, %c0_1108, %c7_1109, %c0_1110] : memref<1x1x8x14x38xbf16, #tpu.memory_space<vmem>>, vector<1x1x8x1x32xbf16>
    %485 = vector.shape_cast %484 : vector<1x1x8x1x32xbf16> to vector<8x32xbf16>
    %c0_1111 = arith.constant 0 : index
    %c0_1112 = arith.constant 0 : index
    %c0_1113 = arith.constant 0 : index
    %c7_1114 = arith.constant 7 : index
    %c1_1115 = arith.constant 1 : index
    %486 = vector.load %arg2[%c0_1111, %c0_1112, %c0_1113, %c7_1114, %c1_1115] : memref<1x1x8x14x38xbf16, #tpu.memory_space<vmem>>, vector<1x1x8x1x32xbf16>
    %487 = vector.shape_cast %486 : vector<1x1x8x1x32xbf16> to vector<8x32xbf16>
    %c0_1116 = arith.constant 0 : index
    %c0_1117 = arith.constant 0 : index
    %c0_1118 = arith.constant 0 : index
    %c7_1119 = arith.constant 7 : index
    %c2_1120 = arith.constant 2 : index
    %488 = vector.load %arg2[%c0_1116, %c0_1117, %c0_1118, %c7_1119, %c2_1120] : memref<1x1x8x14x38xbf16, #tpu.memory_space<vmem>>, vector<1x1x8x1x32xbf16>
    %489 = vector.shape_cast %488 : vector<1x1x8x1x32xbf16> to vector<8x32xbf16>
    %c0_1121 = arith.constant 0 : index
    %c0_1122 = arith.constant 0 : index
    %c0_1123 = arith.constant 0 : index
    %c7_1124 = arith.constant 7 : index
    %c3_1125 = arith.constant 3 : index
    %490 = vector.load %arg2[%c0_1121, %c0_1122, %c0_1123, %c7_1124, %c3_1125] : memref<1x1x8x14x38xbf16, #tpu.memory_space<vmem>>, vector<1x1x8x1x32xbf16>
    %491 = vector.shape_cast %490 : vector<1x1x8x1x32xbf16> to vector<8x32xbf16>
    %c0_1126 = arith.constant 0 : index
    %c0_1127 = arith.constant 0 : index
    %c0_1128 = arith.constant 0 : index
    %c7_1129 = arith.constant 7 : index
    %c4_1130 = arith.constant 4 : index
    %492 = vector.load %arg2[%c0_1126, %c0_1127, %c0_1128, %c7_1129, %c4_1130] : memref<1x1x8x14x38xbf16, #tpu.memory_space<vmem>>, vector<1x1x8x1x32xbf16>
    %493 = vector.shape_cast %492 : vector<1x1x8x1x32xbf16> to vector<8x32xbf16>
    %c0_1131 = arith.constant 0 : index
    %c0_1132 = arith.constant 0 : index
    %c0_1133 = arith.constant 0 : index
    %c7_1134 = arith.constant 7 : index
    %c5_1135 = arith.constant 5 : index
    %494 = vector.load %arg2[%c0_1131, %c0_1132, %c0_1133, %c7_1134, %c5_1135] : memref<1x1x8x14x38xbf16, #tpu.memory_space<vmem>>, vector<1x1x8x1x32xbf16>
    %495 = vector.shape_cast %494 : vector<1x1x8x1x32xbf16> to vector<8x32xbf16>
    %c0_1136 = arith.constant 0 : index
    %c0_1137 = arith.constant 0 : index
    %c0_1138 = arith.constant 0 : index
    %c7_1139 = arith.constant 7 : index
    %c6_1140 = arith.constant 6 : index
    %496 = vector.load %arg2[%c0_1136, %c0_1137, %c0_1138, %c7_1139, %c6_1140] : memref<1x1x8x14x38xbf16, #tpu.memory_space<vmem>>, vector<1x1x8x1x32xbf16>
    %497 = vector.shape_cast %496 : vector<1x1x8x1x32xbf16> to vector<8x32xbf16>
    %c0_1141 = arith.constant 0 : index
    %c0_1142 = arith.constant 0 : index
    %c0_1143 = arith.constant 0 : index
    %c8_1144 = arith.constant 8 : index
    %c0_1145 = arith.constant 0 : index
    %498 = vector.load %arg2[%c0_1141, %c0_1142, %c0_1143, %c8_1144, %c0_1145] : memref<1x1x8x14x38xbf16, #tpu.memory_space<vmem>>, vector<1x1x8x1x32xbf16>
    %499 = vector.shape_cast %498 : vector<1x1x8x1x32xbf16> to vector<8x32xbf16>
    %c0_1146 = arith.constant 0 : index
    %c0_1147 = arith.constant 0 : index
    %c0_1148 = arith.constant 0 : index
    %c8_1149 = arith.constant 8 : index
    %c1_1150 = arith.constant 1 : index
    %500 = vector.load %arg2[%c0_1146, %c0_1147, %c0_1148, %c8_1149, %c1_1150] : memref<1x1x8x14x38xbf16, #tpu.memory_space<vmem>>, vector<1x1x8x1x32xbf16>
    %501 = vector.shape_cast %500 : vector<1x1x8x1x32xbf16> to vector<8x32xbf16>
    %c0_1151 = arith.constant 0 : index
    %c0_1152 = arith.constant 0 : index
    %c0_1153 = arith.constant 0 : index
    %c8_1154 = arith.constant 8 : index
    %c2_1155 = arith.constant 2 : index
    %502 = vector.load %arg2[%c0_1151, %c0_1152, %c0_1153, %c8_1154, %c2_1155] : memref<1x1x8x14x38xbf16, #tpu.memory_space<vmem>>, vector<1x1x8x1x32xbf16>
    %503 = vector.shape_cast %502 : vector<1x1x8x1x32xbf16> to vector<8x32xbf16>
    %c0_1156 = arith.constant 0 : index
    %c0_1157 = arith.constant 0 : index
    %c0_1158 = arith.constant 0 : index
    %c8_1159 = arith.constant 8 : index
    %c3_1160 = arith.constant 3 : index
    %504 = vector.load %arg2[%c0_1156, %c0_1157, %c0_1158, %c8_1159, %c3_1160] : memref<1x1x8x14x38xbf16, #tpu.memory_space<vmem>>, vector<1x1x8x1x32xbf16>
    %505 = vector.shape_cast %504 : vector<1x1x8x1x32xbf16> to vector<8x32xbf16>
    %c0_1161 = arith.constant 0 : index
    %c0_1162 = arith.constant 0 : index
    %c0_1163 = arith.constant 0 : index
    %c8_1164 = arith.constant 8 : index
    %c4_1165 = arith.constant 4 : index
    %506 = vector.load %arg2[%c0_1161, %c0_1162, %c0_1163, %c8_1164, %c4_1165] : memref<1x1x8x14x38xbf16, #tpu.memory_space<vmem>>, vector<1x1x8x1x32xbf16>
    %507 = vector.shape_cast %506 : vector<1x1x8x1x32xbf16> to vector<8x32xbf16>
    %c0_1166 = arith.constant 0 : index
    %c0_1167 = arith.constant 0 : index
    %c0_1168 = arith.constant 0 : index
    %c8_1169 = arith.constant 8 : index
    %c5_1170 = arith.constant 5 : index
    %508 = vector.load %arg2[%c0_1166, %c0_1167, %c0_1168, %c8_1169, %c5_1170] : memref<1x1x8x14x38xbf16, #tpu.memory_space<vmem>>, vector<1x1x8x1x32xbf16>
    %509 = vector.shape_cast %508 : vector<1x1x8x1x32xbf16> to vector<8x32xbf16>
    %c0_1171 = arith.constant 0 : index
    %c0_1172 = arith.constant 0 : index
    %c0_1173 = arith.constant 0 : index
    %c8_1174 = arith.constant 8 : index
    %c6_1175 = arith.constant 6 : index
    %510 = vector.load %arg2[%c0_1171, %c0_1172, %c0_1173, %c8_1174, %c6_1175] : memref<1x1x8x14x38xbf16, #tpu.memory_space<vmem>>, vector<1x1x8x1x32xbf16>
    %511 = vector.shape_cast %510 : vector<1x1x8x1x32xbf16> to vector<8x32xbf16>
    %c0_1176 = arith.constant 0 : index
    %c0_1177 = arith.constant 0 : index
    %c0_1178 = arith.constant 0 : index
    %c9_1179 = arith.constant 9 : index
    %c0_1180 = arith.constant 0 : index
    %512 = vector.load %arg2[%c0_1176, %c0_1177, %c0_1178, %c9_1179, %c0_1180] : memref<1x1x8x14x38xbf16, #tpu.memory_space<vmem>>, vector<1x1x8x1x32xbf16>
    %513 = vector.shape_cast %512 : vector<1x1x8x1x32xbf16> to vector<8x32xbf16>
    %c0_1181 = arith.constant 0 : index
    %c0_1182 = arith.constant 0 : index
    %c0_1183 = arith.constant 0 : index
    %c9_1184 = arith.constant 9 : index
    %c1_1185 = arith.constant 1 : index
    %514 = vector.load %arg2[%c0_1181, %c0_1182, %c0_1183, %c9_1184, %c1_1185] : memref<1x1x8x14x38xbf16, #tpu.memory_space<vmem>>, vector<1x1x8x1x32xbf16>
    %515 = vector.shape_cast %514 : vector<1x1x8x1x32xbf16> to vector<8x32xbf16>
    %c0_1186 = arith.constant 0 : index
    %c0_1187 = arith.constant 0 : index
    %c0_1188 = arith.constant 0 : index
    %c9_1189 = arith.constant 9 : index
    %c2_1190 = arith.constant 2 : index
    %516 = vector.load %arg2[%c0_1186, %c0_1187, %c0_1188, %c9_1189, %c2_1190] : memref<1x1x8x14x38xbf16, #tpu.memory_space<vmem>>, vector<1x1x8x1x32xbf16>
    %517 = vector.shape_cast %516 : vector<1x1x8x1x32xbf16> to vector<8x32xbf16>
    %c0_1191 = arith.constant 0 : index
    %c0_1192 = arith.constant 0 : index
    %c0_1193 = arith.constant 0 : index
    %c9_1194 = arith.constant 9 : index
    %c3_1195 = arith.constant 3 : index
    %518 = vector.load %arg2[%c0_1191, %c0_1192, %c0_1193, %c9_1194, %c3_1195] : memref<1x1x8x14x38xbf16, #tpu.memory_space<vmem>>, vector<1x1x8x1x32xbf16>
    %519 = vector.shape_cast %518 : vector<1x1x8x1x32xbf16> to vector<8x32xbf16>
    %c0_1196 = arith.constant 0 : index
    %c0_1197 = arith.constant 0 : index
    %c0_1198 = arith.constant 0 : index
    %c9_1199 = arith.constant 9 : index
    %c4_1200 = arith.constant 4 : index
    %520 = vector.load %arg2[%c0_1196, %c0_1197, %c0_1198, %c9_1199, %c4_1200] : memref<1x1x8x14x38xbf16, #tpu.memory_space<vmem>>, vector<1x1x8x1x32xbf16>
    %521 = vector.shape_cast %520 : vector<1x1x8x1x32xbf16> to vector<8x32xbf16>
    %c0_1201 = arith.constant 0 : index
    %c0_1202 = arith.constant 0 : index
    %c0_1203 = arith.constant 0 : index
    %c9_1204 = arith.constant 9 : index
    %c5_1205 = arith.constant 5 : index
    %522 = vector.load %arg2[%c0_1201, %c0_1202, %c0_1203, %c9_1204, %c5_1205] : memref<1x1x8x14x38xbf16, #tpu.memory_space<vmem>>, vector<1x1x8x1x32xbf16>
    %523 = vector.shape_cast %522 : vector<1x1x8x1x32xbf16> to vector<8x32xbf16>
    %c0_1206 = arith.constant 0 : index
    %c0_1207 = arith.constant 0 : index
    %c0_1208 = arith.constant 0 : index
    %c9_1209 = arith.constant 9 : index
    %c6_1210 = arith.constant 6 : index
    %524 = vector.load %arg2[%c0_1206, %c0_1207, %c0_1208, %c9_1209, %c6_1210] : memref<1x1x8x14x38xbf16, #tpu.memory_space<vmem>>, vector<1x1x8x1x32xbf16>
    %525 = vector.shape_cast %524 : vector<1x1x8x1x32xbf16> to vector<8x32xbf16>
    %c0_1211 = arith.constant 0 : index
    %c0_1212 = arith.constant 0 : index
    %c0_1213 = arith.constant 0 : index
    %c10 = arith.constant 10 : index
    %c0_1214 = arith.constant 0 : index
    %526 = vector.load %arg2[%c0_1211, %c0_1212, %c0_1213, %c10, %c0_1214] : memref<1x1x8x14x38xbf16, #tpu.memory_space<vmem>>, vector<1x1x8x1x32xbf16>
    %527 = vector.shape_cast %526 : vector<1x1x8x1x32xbf16> to vector<8x32xbf16>
    %c0_1215 = arith.constant 0 : index
    %c0_1216 = arith.constant 0 : index
    %c0_1217 = arith.constant 0 : index
    %c10_1218 = arith.constant 10 : index
    %c1_1219 = arith.constant 1 : index
    %528 = vector.load %arg2[%c0_1215, %c0_1216, %c0_1217, %c10_1218, %c1_1219] : memref<1x1x8x14x38xbf16, #tpu.memory_space<vmem>>, vector<1x1x8x1x32xbf16>
    %529 = vector.shape_cast %528 : vector<1x1x8x1x32xbf16> to vector<8x32xbf16>
    %c0_1220 = arith.constant 0 : index
    %c0_1221 = arith.constant 0 : index
    %c0_1222 = arith.constant 0 : index
    %c10_1223 = arith.constant 10 : index
    %c2_1224 = arith.constant 2 : index
    %530 = vector.load %arg2[%c0_1220, %c0_1221, %c0_1222, %c10_1223, %c2_1224] : memref<1x1x8x14x38xbf16, #tpu.memory_space<vmem>>, vector<1x1x8x1x32xbf16>
    %531 = vector.shape_cast %530 : vector<1x1x8x1x32xbf16> to vector<8x32xbf16>
    %c0_1225 = arith.constant 0 : index
    %c0_1226 = arith.constant 0 : index
    %c0_1227 = arith.constant 0 : index
    %c10_1228 = arith.constant 10 : index
    %c3_1229 = arith.constant 3 : index
    %532 = vector.load %arg2[%c0_1225, %c0_1226, %c0_1227, %c10_1228, %c3_1229] : memref<1x1x8x14x38xbf16, #tpu.memory_space<vmem>>, vector<1x1x8x1x32xbf16>
    %533 = vector.shape_cast %532 : vector<1x1x8x1x32xbf16> to vector<8x32xbf16>
    %c0_1230 = arith.constant 0 : index
    %c0_1231 = arith.constant 0 : index
    %c0_1232 = arith.constant 0 : index
    %c10_1233 = arith.constant 10 : index
    %c4_1234 = arith.constant 4 : index
    %534 = vector.load %arg2[%c0_1230, %c0_1231, %c0_1232, %c10_1233, %c4_1234] : memref<1x1x8x14x38xbf16, #tpu.memory_space<vmem>>, vector<1x1x8x1x32xbf16>
    %535 = vector.shape_cast %534 : vector<1x1x8x1x32xbf16> to vector<8x32xbf16>
    %c0_1235 = arith.constant 0 : index
    %c0_1236 = arith.constant 0 : index
    %c0_1237 = arith.constant 0 : index
    %c10_1238 = arith.constant 10 : index
    %c5_1239 = arith.constant 5 : index
    %536 = vector.load %arg2[%c0_1235, %c0_1236, %c0_1237, %c10_1238, %c5_1239] : memref<1x1x8x14x38xbf16, #tpu.memory_space<vmem>>, vector<1x1x8x1x32xbf16>
    %537 = vector.shape_cast %536 : vector<1x1x8x1x32xbf16> to vector<8x32xbf16>
    %c0_1240 = arith.constant 0 : index
    %c0_1241 = arith.constant 0 : index
    %c0_1242 = arith.constant 0 : index
    %c10_1243 = arith.constant 10 : index
    %c6_1244 = arith.constant 6 : index
    %538 = vector.load %arg2[%c0_1240, %c0_1241, %c0_1242, %c10_1243, %c6_1244] : memref<1x1x8x14x38xbf16, #tpu.memory_space<vmem>>, vector<1x1x8x1x32xbf16>
    %539 = vector.shape_cast %538 : vector<1x1x8x1x32xbf16> to vector<8x32xbf16>
    %540 = tpu.concatenate %443, %445, %447, %449, %451, %453, %455, %457, %459, %461, %463, %465, %467, %469, %471, %473 in 0 : vector<8x32xbf16>, vector<8x32xbf16>, vector<8x32xbf16>, vector<8x32xbf16>, vector<8x32xbf16>, vector<8x32xbf16>, vector<8x32xbf16>, vector<8x32xbf16>, vector<8x32xbf16>, vector<8x32xbf16>, vector<8x32xbf16>, vector<8x32xbf16>, vector<8x32xbf16>, vector<8x32xbf16>, vector<8x32xbf16>, vector<8x32xbf16> -> vector<128x32xbf16>
    %541 = tpu.concatenate %475, %477, %479, %481, %483, %485, %487, %489, %491, %493, %495, %497, %499, %501, %503, %505 in 0 : vector<8x32xbf16>, vector<8x32xbf16>, vector<8x32xbf16>, vector<8x32xbf16>, vector<8x32xbf16>, vector<8x32xbf16>, vector<8x32xbf16>, vector<8x32xbf16>, vector<8x32xbf16>, vector<8x32xbf16>, vector<8x32xbf16>, vector<8x32xbf16>, vector<8x32xbf16>, vector<8x32xbf16>, vector<8x32xbf16>, vector<8x32xbf16> -> vector<128x32xbf16>
    %542 = tpu.concatenate %507, %509, %511, %513, %515, %517, %519, %521, %523, %525, %527, %529, %531, %533, %535, %537 in 0 : vector<8x32xbf16>, vector<8x32xbf16>, vector<8x32xbf16>, vector<8x32xbf16>, vector<8x32xbf16>, vector<8x32xbf16>, vector<8x32xbf16>, vector<8x32xbf16>, vector<8x32xbf16>, vector<8x32xbf16>, vector<8x32xbf16>, vector<8x32xbf16>, vector<8x32xbf16>, vector<8x32xbf16>, vector<8x32xbf16>, vector<8x32xbf16> -> vector<128x32xbf16>
    %543 = tpu.concatenate %540, %541, %542, %539 in 0 : vector<128x32xbf16>, vector<128x32xbf16>, vector<128x32xbf16>, vector<8x32xbf16> -> vector<392x32xbf16>
    %cst_1245 = arith.constant dense<0.000000e+00> : vector<32x32xf32>
    %544 = tpu.matmul %0, %543, %cst_1245 {dimension_numbers = #tpu.dot_dimension_numbers<[1], [0], [0], [1], [0, 0, 1, 1], [], []>} : vector<32x392xbf16>, vector<392x32xbf16>, vector<32x32xf32> -> vector<32x32xf32>
    %545 = vector.broadcast %1 : vector<32x1xf32> to vector<32x32xf32>
    %546 = arith.addf %544, %545 : vector<32x32xf32>
    %cst_1246 = arith.constant 0.000000e+00 : f32
    %547 = vector.broadcast %cst_1246 : f32 to vector<32x32xf32>
    %548 = arith.maximumf %546, %547 : vector<32x32xf32>
    %c0_1247 = arith.constant 0 : index
    %c0_1248 = arith.constant 0 : index
    %c0_1249 = arith.constant 0 : index
    %c4_1250 = arith.constant 4 : index
    %c0_1251 = arith.constant 0 : index
    %549 = vector.load %arg5[%c0_1247, %c0_1248, %c0_1249, %c4_1250, %c0_1251] : memref<1x32x1x8x32xf32, #tpu.memory_space<vmem>>, vector<1x32x1x1x32xf32>
    %550 = vector.shape_cast %549 : vector<1x32x1x1x32xf32> to vector<32x32xf32>
    %551 = vector.shape_cast %548 : vector<32x32xf32> to vector<1x32x1x1x32xf32>
    tpu.vector_store %arg5[%c0_1247, %c0_1248, %c0_1249, %c4_1250, %c0_1251], %551 {strides = array<i32>} : memref<1x32x1x8x32xf32, #tpu.memory_space<vmem>>, vector<1x32x1x1x32xf32>,
    %c0_1252 = arith.constant 0 : index
    %c0_1253 = arith.constant 0 : index
    %c0_1254 = arith.constant 0 : index
    %c5_1255 = arith.constant 5 : index
    %c0_1256 = arith.constant 0 : index
    %552 = vector.load %arg2[%c0_1252, %c0_1253, %c0_1254, %c5_1255, %c0_1256] : memref<1x1x8x14x38xbf16, #tpu.memory_space<vmem>>, vector<1x1x8x1x32xbf16>
    %553 = vector.shape_cast %552 : vector<1x1x8x1x32xbf16> to vector<8x32xbf16>
    %c0_1257 = arith.constant 0 : index
    %c0_1258 = arith.constant 0 : index
    %c0_1259 = arith.constant 0 : index
    %c5_1260 = arith.constant 5 : index
    %c1_1261 = arith.constant 1 : index
    %554 = vector.load %arg2[%c0_1257, %c0_1258, %c0_1259, %c5_1260, %c1_1261] : memref<1x1x8x14x38xbf16, #tpu.memory_space<vmem>>, vector<1x1x8x1x32xbf16>
    %555 = vector.shape_cast %554 : vector<1x1x8x1x32xbf16> to vector<8x32xbf16>
    %c0_1262 = arith.constant 0 : index
    %c0_1263 = arith.constant 0 : index
    %c0_1264 = arith.constant 0 : index
    %c5_1265 = arith.constant 5 : index
    %c2_1266 = arith.constant 2 : index
    %556 = vector.load %arg2[%c0_1262, %c0_1263, %c0_1264, %c5_1265, %c2_1266] : memref<1x1x8x14x38xbf16, #tpu.memory_space<vmem>>, vector<1x1x8x1x32xbf16>
    %557 = vector.shape_cast %556 : vector<1x1x8x1x32xbf16> to vector<8x32xbf16>
    %c0_1267 = arith.constant 0 : index
    %c0_1268 = arith.constant 0 : index
    %c0_1269 = arith.constant 0 : index
    %c5_1270 = arith.constant 5 : index
    %c3_1271 = arith.constant 3 : index
    %558 = vector.load %arg2[%c0_1267, %c0_1268, %c0_1269, %c5_1270, %c3_1271] : memref<1x1x8x14x38xbf16, #tpu.memory_space<vmem>>, vector<1x1x8x1x32xbf16>
    %559 = vector.shape_cast %558 : vector<1x1x8x1x32xbf16> to vector<8x32xbf16>
    %c0_1272 = arith.constant 0 : index
    %c0_1273 = arith.constant 0 : index
    %c0_1274 = arith.constant 0 : index
    %c5_1275 = arith.constant 5 : index
    %c4_1276 = arith.constant 4 : index
    %560 = vector.load %arg2[%c0_1272, %c0_1273, %c0_1274, %c5_1275, %c4_1276] : memref<1x1x8x14x38xbf16, #tpu.memory_space<vmem>>, vector<1x1x8x1x32xbf16>
    %561 = vector.shape_cast %560 : vector<1x1x8x1x32xbf16> to vector<8x32xbf16>
    %c0_1277 = arith.constant 0 : index
    %c0_1278 = arith.constant 0 : index
    %c0_1279 = arith.constant 0 : index
    %c5_1280 = arith.constant 5 : index
    %c5_1281 = arith.constant 5 : index
    %562 = vector.load %arg2[%c0_1277, %c0_1278, %c0_1279, %c5_1280, %c5_1281] : memref<1x1x8x14x38xbf16, #tpu.memory_space<vmem>>, vector<1x1x8x1x32xbf16>
    %563 = vector.shape_cast %562 : vector<1x1x8x1x32xbf16> to vector<8x32xbf16>
    %c0_1282 = arith.constant 0 : index
    %c0_1283 = arith.constant 0 : index
    %c0_1284 = arith.constant 0 : index
    %c5_1285 = arith.constant 5 : index
    %c6_1286 = arith.constant 6 : index
    %564 = vector.load %arg2[%c0_1282, %c0_1283, %c0_1284, %c5_1285, %c6_1286] : memref<1x1x8x14x38xbf16, #tpu.memory_space<vmem>>, vector<1x1x8x1x32xbf16>
    %565 = vector.shape_cast %564 : vector<1x1x8x1x32xbf16> to vector<8x32xbf16>
    %c0_1287 = arith.constant 0 : index
    %c0_1288 = arith.constant 0 : index
    %c0_1289 = arith.constant 0 : index
    %c6_1290 = arith.constant 6 : index
    %c0_1291 = arith.constant 0 : index
    %566 = vector.load %arg2[%c0_1287, %c0_1288, %c0_1289, %c6_1290, %c0_1291] : memref<1x1x8x14x38xbf16, #tpu.memory_space<vmem>>, vector<1x1x8x1x32xbf16>
    %567 = vector.shape_cast %566 : vector<1x1x8x1x32xbf16> to vector<8x32xbf16>
    %c0_1292 = arith.constant 0 : index
    %c0_1293 = arith.constant 0 : index
    %c0_1294 = arith.constant 0 : index
    %c6_1295 = arith.constant 6 : index
    %c1_1296 = arith.constant 1 : index
    %568 = vector.load %arg2[%c0_1292, %c0_1293, %c0_1294, %c6_1295, %c1_1296] : memref<1x1x8x14x38xbf16, #tpu.memory_space<vmem>>, vector<1x1x8x1x32xbf16>
    %569 = vector.shape_cast %568 : vector<1x1x8x1x32xbf16> to vector<8x32xbf16>
    %c0_1297 = arith.constant 0 : index
    %c0_1298 = arith.constant 0 : index
    %c0_1299 = arith.constant 0 : index
    %c6_1300 = arith.constant 6 : index
    %c2_1301 = arith.constant 2 : index
    %570 = vector.load %arg2[%c0_1297, %c0_1298, %c0_1299, %c6_1300, %c2_1301] : memref<1x1x8x14x38xbf16, #tpu.memory_space<vmem>>, vector<1x1x8x1x32xbf16>
    %571 = vector.shape_cast %570 : vector<1x1x8x1x32xbf16> to vector<8x32xbf16>
    %c0_1302 = arith.constant 0 : index
    %c0_1303 = arith.constant 0 : index
    %c0_1304 = arith.constant 0 : index
    %c6_1305 = arith.constant 6 : index
    %c3_1306 = arith.constant 3 : index
    %572 = vector.load %arg2[%c0_1302, %c0_1303, %c0_1304, %c6_1305, %c3_1306] : memref<1x1x8x14x38xbf16, #tpu.memory_space<vmem>>, vector<1x1x8x1x32xbf16>
    %573 = vector.shape_cast %572 : vector<1x1x8x1x32xbf16> to vector<8x32xbf16>
    %c0_1307 = arith.constant 0 : index
    %c0_1308 = arith.constant 0 : index
    %c0_1309 = arith.constant 0 : index
    %c6_1310 = arith.constant 6 : index
    %c4_1311 = arith.constant 4 : index
    %574 = vector.load %arg2[%c0_1307, %c0_1308, %c0_1309, %c6_1310, %c4_1311] : memref<1x1x8x14x38xbf16, #tpu.memory_space<vmem>>, vector<1x1x8x1x32xbf16>
    %575 = vector.shape_cast %574 : vector<1x1x8x1x32xbf16> to vector<8x32xbf16>
    %c0_1312 = arith.constant 0 : index
    %c0_1313 = arith.constant 0 : index
    %c0_1314 = arith.constant 0 : index
    %c6_1315 = arith.constant 6 : index
    %c5_1316 = arith.constant 5 : index
    %576 = vector.load %arg2[%c0_1312, %c0_1313, %c0_1314, %c6_1315, %c5_1316] : memref<1x1x8x14x38xbf16, #tpu.memory_space<vmem>>, vector<1x1x8x1x32xbf16>
    %577 = vector.shape_cast %576 : vector<1x1x8x1x32xbf16> to vector<8x32xbf16>
    %c0_1317 = arith.constant 0 : index
    %c0_1318 = arith.constant 0 : index
    %c0_1319 = arith.constant 0 : index
    %c6_1320 = arith.constant 6 : index
    %c6_1321 = arith.constant 6 : index
    %578 = vector.load %arg2[%c0_1317, %c0_1318, %c0_1319, %c6_1320, %c6_1321] : memref<1x1x8x14x38xbf16, #tpu.memory_space<vmem>>, vector<1x1x8x1x32xbf16>
    %579 = vector.shape_cast %578 : vector<1x1x8x1x32xbf16> to vector<8x32xbf16>
    %c0_1322 = arith.constant 0 : index
    %c0_1323 = arith.constant 0 : index
    %c0_1324 = arith.constant 0 : index
    %c7_1325 = arith.constant 7 : index
    %c0_1326 = arith.constant 0 : index
    %580 = vector.load %arg2[%c0_1322, %c0_1323, %c0_1324, %c7_1325, %c0_1326] : memref<1x1x8x14x38xbf16, #tpu.memory_space<vmem>>, vector<1x1x8x1x32xbf16>
    %581 = vector.shape_cast %580 : vector<1x1x8x1x32xbf16> to vector<8x32xbf16>
    %c0_1327 = arith.constant 0 : index
    %c0_1328 = arith.constant 0 : index
    %c0_1329 = arith.constant 0 : index
    %c7_1330 = arith.constant 7 : index
    %c1_1331 = arith.constant 1 : index
    %582 = vector.load %arg2[%c0_1327, %c0_1328, %c0_1329, %c7_1330, %c1_1331] : memref<1x1x8x14x38xbf16, #tpu.memory_space<vmem>>, vector<1x1x8x1x32xbf16>
    %583 = vector.shape_cast %582 : vector<1x1x8x1x32xbf16> to vector<8x32xbf16>
    %c0_1332 = arith.constant 0 : index
    %c0_1333 = arith.constant 0 : index
    %c0_1334 = arith.constant 0 : index
    %c7_1335 = arith.constant 7 : index
    %c2_1336 = arith.constant 2 : index
    %584 = vector.load %arg2[%c0_1332, %c0_1333, %c0_1334, %c7_1335, %c2_1336] : memref<1x1x8x14x38xbf16, #tpu.memory_space<vmem>>, vector<1x1x8x1x32xbf16>
    %585 = vector.shape_cast %584 : vector<1x1x8x1x32xbf16> to vector<8x32xbf16>
    %c0_1337 = arith.constant 0 : index
    %c0_1338 = arith.constant 0 : index
    %c0_1339 = arith.constant 0 : index
    %c7_1340 = arith.constant 7 : index
    %c3_1341 = arith.constant 3 : index
    %586 = vector.load %arg2[%c0_1337, %c0_1338, %c0_1339, %c7_1340, %c3_1341] : memref<1x1x8x14x38xbf16, #tpu.memory_space<vmem>>, vector<1x1x8x1x32xbf16>
    %587 = vector.shape_cast %586 : vector<1x1x8x1x32xbf16> to vector<8x32xbf16>
    %c0_1342 = arith.constant 0 : index
    %c0_1343 = arith.constant 0 : index
    %c0_1344 = arith.constant 0 : index
    %c7_1345 = arith.constant 7 : index
    %c4_1346 = arith.constant 4 : index
    %588 = vector.load %arg2[%c0_1342, %c0_1343, %c0_1344, %c7_1345, %c4_1346] : memref<1x1x8x14x38xbf16, #tpu.memory_space<vmem>>, vector<1x1x8x1x32xbf16>
    %589 = vector.shape_cast %588 : vector<1x1x8x1x32xbf16> to vector<8x32xbf16>
    %c0_1347 = arith.constant 0 : index
    %c0_1348 = arith.constant 0 : index
    %c0_1349 = arith.constant 0 : index
    %c7_1350 = arith.constant 7 : index
    %c5_1351 = arith.constant 5 : index
    %590 = vector.load %arg2[%c0_1347, %c0_1348, %c0_1349, %c7_1350, %c5_1351] : memref<1x1x8x14x38xbf16, #tpu.memory_space<vmem>>, vector<1x1x8x1x32xbf16>
    %591 = vector.shape_cast %590 : vector<1x1x8x1x32xbf16> to vector<8x32xbf16>
    %c0_1352 = arith.constant 0 : index
    %c0_1353 = arith.constant 0 : index
    %c0_1354 = arith.constant 0 : index
    %c7_1355 = arith.constant 7 : index
    %c6_1356 = arith.constant 6 : index
    %592 = vector.load %arg2[%c0_1352, %c0_1353, %c0_1354, %c7_1355, %c6_1356] : memref<1x1x8x14x38xbf16, #tpu.memory_space<vmem>>, vector<1x1x8x1x32xbf16>
    %593 = vector.shape_cast %592 : vector<1x1x8x1x32xbf16> to vector<8x32xbf16>
    %c0_1357 = arith.constant 0 : index
    %c0_1358 = arith.constant 0 : index
    %c0_1359 = arith.constant 0 : index
    %c8_1360 = arith.constant 8 : index
    %c0_1361 = arith.constant 0 : index
    %594 = vector.load %arg2[%c0_1357, %c0_1358, %c0_1359, %c8_1360, %c0_1361] : memref<1x1x8x14x38xbf16, #tpu.memory_space<vmem>>, vector<1x1x8x1x32xbf16>
    %595 = vector.shape_cast %594 : vector<1x1x8x1x32xbf16> to vector<8x32xbf16>
    %c0_1362 = arith.constant 0 : index
    %c0_1363 = arith.constant 0 : index
    %c0_1364 = arith.constant 0 : index
    %c8_1365 = arith.constant 8 : index
    %c1_1366 = arith.constant 1 : index
    %596 = vector.load %arg2[%c0_1362, %c0_1363, %c0_1364, %c8_1365, %c1_1366] : memref<1x1x8x14x38xbf16, #tpu.memory_space<vmem>>, vector<1x1x8x1x32xbf16>
    %597 = vector.shape_cast %596 : vector<1x1x8x1x32xbf16> to vector<8x32xbf16>
    %c0_1367 = arith.constant 0 : index
    %c0_1368 = arith.constant 0 : index
    %c0_1369 = arith.constant 0 : index
    %c8_1370 = arith.constant 8 : index
    %c2_1371 = arith.constant 2 : index
    %598 = vector.load %arg2[%c0_1367, %c0_1368, %c0_1369, %c8_1370, %c2_1371] : memref<1x1x8x14x38xbf16, #tpu.memory_space<vmem>>, vector<1x1x8x1x32xbf16>
    %599 = vector.shape_cast %598 : vector<1x1x8x1x32xbf16> to vector<8x32xbf16>
    %c0_1372 = arith.constant 0 : index
    %c0_1373 = arith.constant 0 : index
    %c0_1374 = arith.constant 0 : index
    %c8_1375 = arith.constant 8 : index
    %c3_1376 = arith.constant 3 : index
    %600 = vector.load %arg2[%c0_1372, %c0_1373, %c0_1374, %c8_1375, %c3_1376] : memref<1x1x8x14x38xbf16, #tpu.memory_space<vmem>>, vector<1x1x8x1x32xbf16>
    %601 = vector.shape_cast %600 : vector<1x1x8x1x32xbf16> to vector<8x32xbf16>
    %c0_1377 = arith.constant 0 : index
    %c0_1378 = arith.constant 0 : index
    %c0_1379 = arith.constant 0 : index
    %c8_1380 = arith.constant 8 : index
    %c4_1381 = arith.constant 4 : index
    %602 = vector.load %arg2[%c0_1377, %c0_1378, %c0_1379, %c8_1380, %c4_1381] : memref<1x1x8x14x38xbf16, #tpu.memory_space<vmem>>, vector<1x1x8x1x32xbf16>
    %603 = vector.shape_cast %602 : vector<1x1x8x1x32xbf16> to vector<8x32xbf16>
    %c0_1382 = arith.constant 0 : index
    %c0_1383 = arith.constant 0 : index
    %c0_1384 = arith.constant 0 : index
    %c8_1385 = arith.constant 8 : index
    %c5_1386 = arith.constant 5 : index
    %604 = vector.load %arg2[%c0_1382, %c0_1383, %c0_1384, %c8_1385, %c5_1386] : memref<1x1x8x14x38xbf16, #tpu.memory_space<vmem>>, vector<1x1x8x1x32xbf16>
    %605 = vector.shape_cast %604 : vector<1x1x8x1x32xbf16> to vector<8x32xbf16>
    %c0_1387 = arith.constant 0 : index
    %c0_1388 = arith.constant 0 : index
    %c0_1389 = arith.constant 0 : index
    %c8_1390 = arith.constant 8 : index
    %c6_1391 = arith.constant 6 : index
    %606 = vector.load %arg2[%c0_1387, %c0_1388, %c0_1389, %c8_1390, %c6_1391] : memref<1x1x8x14x38xbf16, #tpu.memory_space<vmem>>, vector<1x1x8x1x32xbf16>
    %607 = vector.shape_cast %606 : vector<1x1x8x1x32xbf16> to vector<8x32xbf16>
    %c0_1392 = arith.constant 0 : index
    %c0_1393 = arith.constant 0 : index
    %c0_1394 = arith.constant 0 : index
    %c9_1395 = arith.constant 9 : index
    %c0_1396 = arith.constant 0 : index
    %608 = vector.load %arg2[%c0_1392, %c0_1393, %c0_1394, %c9_1395, %c0_1396] : memref<1x1x8x14x38xbf16, #tpu.memory_space<vmem>>, vector<1x1x8x1x32xbf16>
    %609 = vector.shape_cast %608 : vector<1x1x8x1x32xbf16> to vector<8x32xbf16>
    %c0_1397 = arith.constant 0 : index
    %c0_1398 = arith.constant 0 : index
    %c0_1399 = arith.constant 0 : index
    %c9_1400 = arith.constant 9 : index
    %c1_1401 = arith.constant 1 : index
    %610 = vector.load %arg2[%c0_1397, %c0_1398, %c0_1399, %c9_1400, %c1_1401] : memref<1x1x8x14x38xbf16, #tpu.memory_space<vmem>>, vector<1x1x8x1x32xbf16>
    %611 = vector.shape_cast %610 : vector<1x1x8x1x32xbf16> to vector<8x32xbf16>
    %c0_1402 = arith.constant 0 : index
    %c0_1403 = arith.constant 0 : index
    %c0_1404 = arith.constant 0 : index
    %c9_1405 = arith.constant 9 : index
    %c2_1406 = arith.constant 2 : index
    %612 = vector.load %arg2[%c0_1402, %c0_1403, %c0_1404, %c9_1405, %c2_1406] : memref<1x1x8x14x38xbf16, #tpu.memory_space<vmem>>, vector<1x1x8x1x32xbf16>
    %613 = vector.shape_cast %612 : vector<1x1x8x1x32xbf16> to vector<8x32xbf16>
    %c0_1407 = arith.constant 0 : index
    %c0_1408 = arith.constant 0 : index
    %c0_1409 = arith.constant 0 : index
    %c9_1410 = arith.constant 9 : index
    %c3_1411 = arith.constant 3 : index
    %614 = vector.load %arg2[%c0_1407, %c0_1408, %c0_1409, %c9_1410, %c3_1411] : memref<1x1x8x14x38xbf16, #tpu.memory_space<vmem>>, vector<1x1x8x1x32xbf16>
    %615 = vector.shape_cast %614 : vector<1x1x8x1x32xbf16> to vector<8x32xbf16>
    %c0_1412 = arith.constant 0 : index
    %c0_1413 = arith.constant 0 : index
    %c0_1414 = arith.constant 0 : index
    %c9_1415 = arith.constant 9 : index
    %c4_1416 = arith.constant 4 : index
    %616 = vector.load %arg2[%c0_1412, %c0_1413, %c0_1414, %c9_1415, %c4_1416] : memref<1x1x8x14x38xbf16, #tpu.memory_space<vmem>>, vector<1x1x8x1x32xbf16>
    %617 = vector.shape_cast %616 : vector<1x1x8x1x32xbf16> to vector<8x32xbf16>
    %c0_1417 = arith.constant 0 : index
    %c0_1418 = arith.constant 0 : index
    %c0_1419 = arith.constant 0 : index
    %c9_1420 = arith.constant 9 : index
    %c5_1421 = arith.constant 5 : index
    %618 = vector.load %arg2[%c0_1417, %c0_1418, %c0_1419, %c9_1420, %c5_1421] : memref<1x1x8x14x38xbf16, #tpu.memory_space<vmem>>, vector<1x1x8x1x32xbf16>
    %619 = vector.shape_cast %618 : vector<1x1x8x1x32xbf16> to vector<8x32xbf16>
    %c0_1422 = arith.constant 0 : index
    %c0_1423 = arith.constant 0 : index
    %c0_1424 = arith.constant 0 : index
    %c9_1425 = arith.constant 9 : index
    %c6_1426 = arith.constant 6 : index
    %620 = vector.load %arg2[%c0_1422, %c0_1423, %c0_1424, %c9_1425, %c6_1426] : memref<1x1x8x14x38xbf16, #tpu.memory_space<vmem>>, vector<1x1x8x1x32xbf16>
    %621 = vector.shape_cast %620 : vector<1x1x8x1x32xbf16> to vector<8x32xbf16>
    %c0_1427 = arith.constant 0 : index
    %c0_1428 = arith.constant 0 : index
    %c0_1429 = arith.constant 0 : index
    %c10_1430 = arith.constant 10 : index
    %c0_1431 = arith.constant 0 : index
    %622 = vector.load %arg2[%c0_1427, %c0_1428, %c0_1429, %c10_1430, %c0_1431] : memref<1x1x8x14x38xbf16, #tpu.memory_space<vmem>>, vector<1x1x8x1x32xbf16>
    %623 = vector.shape_cast %622 : vector<1x1x8x1x32xbf16> to vector<8x32xbf16>
    %c0_1432 = arith.constant 0 : index
    %c0_1433 = arith.constant 0 : index
    %c0_1434 = arith.constant 0 : index
    %c10_1435 = arith.constant 10 : index
    %c1_1436 = arith.constant 1 : index
    %624 = vector.load %arg2[%c0_1432, %c0_1433, %c0_1434, %c10_1435, %c1_1436] : memref<1x1x8x14x38xbf16, #tpu.memory_space<vmem>>, vector<1x1x8x1x32xbf16>
    %625 = vector.shape_cast %624 : vector<1x1x8x1x32xbf16> to vector<8x32xbf16>
    %c0_1437 = arith.constant 0 : index
    %c0_1438 = arith.constant 0 : index
    %c0_1439 = arith.constant 0 : index
    %c10_1440 = arith.constant 10 : index
    %c2_1441 = arith.constant 2 : index
    %626 = vector.load %arg2[%c0_1437, %c0_1438, %c0_1439, %c10_1440, %c2_1441] : memref<1x1x8x14x38xbf16, #tpu.memory_space<vmem>>, vector<1x1x8x1x32xbf16>
    %627 = vector.shape_cast %626 : vector<1x1x8x1x32xbf16> to vector<8x32xbf16>
    %c0_1442 = arith.constant 0 : index
    %c0_1443 = arith.constant 0 : index
    %c0_1444 = arith.constant 0 : index
    %c10_1445 = arith.constant 10 : index
    %c3_1446 = arith.constant 3 : index
    %628 = vector.load %arg2[%c0_1442, %c0_1443, %c0_1444, %c10_1445, %c3_1446] : memref<1x1x8x14x38xbf16, #tpu.memory_space<vmem>>, vector<1x1x8x1x32xbf16>
    %629 = vector.shape_cast %628 : vector<1x1x8x1x32xbf16> to vector<8x32xbf16>
    %c0_1447 = arith.constant 0 : index
    %c0_1448 = arith.constant 0 : index
    %c0_1449 = arith.constant 0 : index
    %c10_1450 = arith.constant 10 : index
    %c4_1451 = arith.constant 4 : index
    %630 = vector.load %arg2[%c0_1447, %c0_1448, %c0_1449, %c10_1450, %c4_1451] : memref<1x1x8x14x38xbf16, #tpu.memory_space<vmem>>, vector<1x1x8x1x32xbf16>
    %631 = vector.shape_cast %630 : vector<1x1x8x1x32xbf16> to vector<8x32xbf16>
    %c0_1452 = arith.constant 0 : index
    %c0_1453 = arith.constant 0 : index
    %c0_1454 = arith.constant 0 : index
    %c10_1455 = arith.constant 10 : index
    %c5_1456 = arith.constant 5 : index
    %632 = vector.load %arg2[%c0_1452, %c0_1453, %c0_1454, %c10_1455, %c5_1456] : memref<1x1x8x14x38xbf16, #tpu.memory_space<vmem>>, vector<1x1x8x1x32xbf16>
    %633 = vector.shape_cast %632 : vector<1x1x8x1x32xbf16> to vector<8x32xbf16>
    %c0_1457 = arith.constant 0 : index
    %c0_1458 = arith.constant 0 : index
    %c0_1459 = arith.constant 0 : index
    %c10_1460 = arith.constant 10 : index
    %c6_1461 = arith.constant 6 : index
    %634 = vector.load %arg2[%c0_1457, %c0_1458, %c0_1459, %c10_1460, %c6_1461] : memref<1x1x8x14x38xbf16, #tpu.memory_space<vmem>>, vector<1x1x8x1x32xbf16>
    %635 = vector.shape_cast %634 : vector<1x1x8x1x32xbf16> to vector<8x32xbf16>
    %c0_1462 = arith.constant 0 : index
    %c0_1463 = arith.constant 0 : index
    %c0_1464 = arith.constant 0 : index
    %c11 = arith.constant 11 : index
    %c0_1465 = arith.constant 0 : index
    %636 = vector.load %arg2[%c0_1462, %c0_1463, %c0_1464, %c11, %c0_1465] : memref<1x1x8x14x38xbf16, #tpu.memory_space<vmem>>, vector<1x1x8x1x32xbf16>
    %637 = vector.shape_cast %636 : vector<1x1x8x1x32xbf16> to vector<8x32xbf16>
    %c0_1466 = arith.constant 0 : index
    %c0_1467 = arith.constant 0 : index
    %c0_1468 = arith.constant 0 : index
    %c11_1469 = arith.constant 11 : index
    %c1_1470 = arith.constant 1 : index
    %638 = vector.load %arg2[%c0_1466, %c0_1467, %c0_1468, %c11_1469, %c1_1470] : memref<1x1x8x14x38xbf16, #tpu.memory_space<vmem>>, vector<1x1x8x1x32xbf16>
    %639 = vector.shape_cast %638 : vector<1x1x8x1x32xbf16> to vector<8x32xbf16>
    %c0_1471 = arith.constant 0 : index
    %c0_1472 = arith.constant 0 : index
    %c0_1473 = arith.constant 0 : index
    %c11_1474 = arith.constant 11 : index
    %c2_1475 = arith.constant 2 : index
    %640 = vector.load %arg2[%c0_1471, %c0_1472, %c0_1473, %c11_1474, %c2_1475] : memref<1x1x8x14x38xbf16, #tpu.memory_space<vmem>>, vector<1x1x8x1x32xbf16>
    %641 = vector.shape_cast %640 : vector<1x1x8x1x32xbf16> to vector<8x32xbf16>
    %c0_1476 = arith.constant 0 : index
    %c0_1477 = arith.constant 0 : index
    %c0_1478 = arith.constant 0 : index
    %c11_1479 = arith.constant 11 : index
    %c3_1480 = arith.constant 3 : index
    %642 = vector.load %arg2[%c0_1476, %c0_1477, %c0_1478, %c11_1479, %c3_1480] : memref<1x1x8x14x38xbf16, #tpu.memory_space<vmem>>, vector<1x1x8x1x32xbf16>
    %643 = vector.shape_cast %642 : vector<1x1x8x1x32xbf16> to vector<8x32xbf16>
    %c0_1481 = arith.constant 0 : index
    %c0_1482 = arith.constant 0 : index
    %c0_1483 = arith.constant 0 : index
    %c11_1484 = arith.constant 11 : index
    %c4_1485 = arith.constant 4 : index
    %644 = vector.load %arg2[%c0_1481, %c0_1482, %c0_1483, %c11_1484, %c4_1485] : memref<1x1x8x14x38xbf16, #tpu.memory_space<vmem>>, vector<1x1x8x1x32xbf16>
    %645 = vector.shape_cast %644 : vector<1x1x8x1x32xbf16> to vector<8x32xbf16>
    %c0_1486 = arith.constant 0 : index
    %c0_1487 = arith.constant 0 : index
    %c0_1488 = arith.constant 0 : index
    %c11_1489 = arith.constant 11 : index
    %c5_1490 = arith.constant 5 : index
    %646 = vector.load %arg2[%c0_1486, %c0_1487, %c0_1488, %c11_1489, %c5_1490] : memref<1x1x8x14x38xbf16, #tpu.memory_space<vmem>>, vector<1x1x8x1x32xbf16>
    %647 = vector.shape_cast %646 : vector<1x1x8x1x32xbf16> to vector<8x32xbf16>
    %c0_1491 = arith.constant 0 : index
    %c0_1492 = arith.constant 0 : index
    %c0_1493 = arith.constant 0 : index
    %c11_1494 = arith.constant 11 : index
    %c6_1495 = arith.constant 6 : index
    %648 = vector.load %arg2[%c0_1491, %c0_1492, %c0_1493, %c11_1494, %c6_1495] : memref<1x1x8x14x38xbf16, #tpu.memory_space<vmem>>, vector<1x1x8x1x32xbf16>
    %649 = vector.shape_cast %648 : vector<1x1x8x1x32xbf16> to vector<8x32xbf16>
    %650 = tpu.concatenate %553, %555, %557, %559, %561, %563, %565, %567, %569, %571, %573, %575, %577, %579, %581, %583 in 0 : vector<8x32xbf16>, vector<8x32xbf16>, vector<8x32xbf16>, vector<8x32xbf16>, vector<8x32xbf16>, vector<8x32xbf16>, vector<8x32xbf16>, vector<8x32xbf16>, vector<8x32xbf16>, vector<8x32xbf16>, vector<8x32xbf16>, vector<8x32xbf16>, vector<8x32xbf16>, vector<8x32xbf16>, vector<8x32xbf16>, vector<8x32xbf16> -> vector<128x32xbf16>
    %651 = tpu.concatenate %585, %587, %589, %591, %593, %595, %597, %599, %601, %603, %605, %607, %609, %611, %613, %615 in 0 : vector<8x32xbf16>, vector<8x32xbf16>, vector<8x32xbf16>, vector<8x32xbf16>, vector<8x32xbf16>, vector<8x32xbf16>, vector<8x32xbf16>, vector<8x32xbf16>, vector<8x32xbf16>, vector<8x32xbf16>, vector<8x32xbf16>, vector<8x32xbf16>, vector<8x32xbf16>, vector<8x32xbf16>, vector<8x32xbf16>, vector<8x32xbf16> -> vector<128x32xbf16>
    %652 = tpu.concatenate %617, %619, %621, %623, %625, %627, %629, %631, %633, %635, %637, %639, %641, %643, %645, %647 in 0 : vector<8x32xbf16>, vector<8x32xbf16>, vector<8x32xbf16>, vector<8x32xbf16>, vector<8x32xbf16>, vector<8x32xbf16>, vector<8x32xbf16>, vector<8x32xbf16>, vector<8x32xbf16>, vector<8x32xbf16>, vector<8x32xbf16>, vector<8x32xbf16>, vector<8x32xbf16>, vector<8x32xbf16>, vector<8x32xbf16>, vector<8x32xbf16> -> vector<128x32xbf16>
    %653 = tpu.concatenate %650, %651, %652, %649 in 0 : vector<128x32xbf16>, vector<128x32xbf16>, vector<128x32xbf16>, vector<8x32xbf16> -> vector<392x32xbf16>
    %cst_1496 = arith.constant dense<0.000000e+00> : vector<32x32xf32>
    %654 = tpu.matmul %0, %653, %cst_1496 {dimension_numbers = #tpu.dot_dimension_numbers<[1], [0], [0], [1], [0, 0, 1, 1], [], []>} : vector<32x392xbf16>, vector<392x32xbf16>, vector<32x32xf32> -> vector<32x32xf32>
    %655 = vector.broadcast %1 : vector<32x1xf32> to vector<32x32xf32>
    %656 = arith.addf %654, %655 : vector<32x32xf32>
    %cst_1497 = arith.constant 0.000000e+00 : f32
    %657 = vector.broadcast %cst_1497 : f32 to vector<32x32xf32>
    %658 = arith.maximumf %656, %657 : vector<32x32xf32>
    %c0_1498 = arith.constant 0 : index
    %c0_1499 = arith.constant 0 : index
    %c0_1500 = arith.constant 0 : index
    %c5_1501 = arith.constant 5 : index
    %c0_1502 = arith.constant 0 : index
    %659 = vector.load %arg5[%c0_1498, %c0_1499, %c0_1500, %c5_1501, %c0_1502] : memref<1x32x1x8x32xf32, #tpu.memory_space<vmem>>, vector<1x32x1x1x32xf32>
    %660 = vector.shape_cast %659 : vector<1x32x1x1x32xf32> to vector<32x32xf32>
    %661 = vector.shape_cast %658 : vector<32x32xf32> to vector<1x32x1x1x32xf32>
    tpu.vector_store %arg5[%c0_1498, %c0_1499, %c0_1500, %c5_1501, %c0_1502], %661 {strides = array<i32>} : memref<1x32x1x8x32xf32, #tpu.memory_space<vmem>>, vector<1x32x1x1x32xf32>,
    %c0_1503 = arith.constant 0 : index
    %c0_1504 = arith.constant 0 : index
    %c0_1505 = arith.constant 0 : index
    %c6_1506 = arith.constant 6 : index
    %c0_1507 = arith.constant 0 : index
    %662 = vector.load %arg2[%c0_1503, %c0_1504, %c0_1505, %c6_1506, %c0_1507] : memref<1x1x8x14x38xbf16, #tpu.memory_space<vmem>>, vector<1x1x8x1x32xbf16>
    %663 = vector.shape_cast %662 : vector<1x1x8x1x32xbf16> to vector<8x32xbf16>
    %c0_1508 = arith.constant 0 : index
    %c0_1509 = arith.constant 0 : index
    %c0_1510 = arith.constant 0 : index
    %c6_1511 = arith.constant 6 : index
    %c1_1512 = arith.constant 1 : index
    %664 = vector.load %arg2[%c0_1508, %c0_1509, %c0_1510, %c6_1511, %c1_1512] : memref<1x1x8x14x38xbf16, #tpu.memory_space<vmem>>, vector<1x1x8x1x32xbf16>
    %665 = vector.shape_cast %664 : vector<1x1x8x1x32xbf16> to vector<8x32xbf16>
    %c0_1513 = arith.constant 0 : index
    %c0_1514 = arith.constant 0 : index
    %c0_1515 = arith.constant 0 : index
    %c6_1516 = arith.constant 6 : index
    %c2_1517 = arith.constant 2 : index
    %666 = vector.load %arg2[%c0_1513, %c0_1514, %c0_1515, %c6_1516, %c2_1517] : memref<1x1x8x14x38xbf16, #tpu.memory_space<vmem>>, vector<1x1x8x1x32xbf16>
    %667 = vector.shape_cast %666 : vector<1x1x8x1x32xbf16> to vector<8x32xbf16>
    %c0_1518 = arith.constant 0 : index
    %c0_1519 = arith.constant 0 : index
    %c0_1520 = arith.constant 0 : index
    %c6_1521 = arith.constant 6 : index
    %c3_1522 = arith.constant 3 : index
    %668 = vector.load %arg2[%c0_1518, %c0_1519, %c0_1520, %c6_1521, %c3_1522] : memref<1x1x8x14x38xbf16, #tpu.memory_space<vmem>>, vector<1x1x8x1x32xbf16>
    %669 = vector.shape_cast %668 : vector<1x1x8x1x32xbf16> to vector<8x32xbf16>
    %c0_1523 = arith.constant 0 : index
    %c0_1524 = arith.constant 0 : index
    %c0_1525 = arith.constant 0 : index
    %c6_1526 = arith.constant 6 : index
    %c4_1527 = arith.constant 4 : index
    %670 = vector.load %arg2[%c0_1523, %c0_1524, %c0_1525, %c6_1526, %c4_1527] : memref<1x1x8x14x38xbf16, #tpu.memory_space<vmem>>, vector<1x1x8x1x32xbf16>
    %671 = vector.shape_cast %670 : vector<1x1x8x1x32xbf16> to vector<8x32xbf16>
    %c0_1528 = arith.constant 0 : index
    %c0_1529 = arith.constant 0 : index
    %c0_1530 = arith.constant 0 : index
    %c6_1531 = arith.constant 6 : index
    %c5_1532 = arith.constant 5 : index
    %672 = vector.load %arg2[%c0_1528, %c0_1529, %c0_1530, %c6_1531, %c5_1532] : memref<1x1x8x14x38xbf16, #tpu.memory_space<vmem>>, vector<1x1x8x1x32xbf16>
    %673 = vector.shape_cast %672 : vector<1x1x8x1x32xbf16> to vector<8x32xbf16>
    %c0_1533 = arith.constant 0 : index
    %c0_1534 = arith.constant 0 : index
    %c0_1535 = arith.constant 0 : index
    %c6_1536 = arith.constant 6 : index
    %c6_1537 = arith.constant 6 : index
    %674 = vector.load %arg2[%c0_1533, %c0_1534, %c0_1535, %c6_1536, %c6_1537] : memref<1x1x8x14x38xbf16, #tpu.memory_space<vmem>>, vector<1x1x8x1x32xbf16>
    %675 = vector.shape_cast %674 : vector<1x1x8x1x32xbf16> to vector<8x32xbf16>
    %c0_1538 = arith.constant 0 : index
    %c0_1539 = arith.constant 0 : index
    %c0_1540 = arith.constant 0 : index
    %c7_1541 = arith.constant 7 : index
    %c0_1542 = arith.constant 0 : index
    %676 = vector.load %arg2[%c0_1538, %c0_1539, %c0_1540, %c7_1541, %c0_1542] : memref<1x1x8x14x38xbf16, #tpu.memory_space<vmem>>, vector<1x1x8x1x32xbf16>
    %677 = vector.shape_cast %676 : vector<1x1x8x1x32xbf16> to vector<8x32xbf16>
    %c0_1543 = arith.constant 0 : index
    %c0_1544 = arith.constant 0 : index
    %c0_1545 = arith.constant 0 : index
    %c7_1546 = arith.constant 7 : index
    %c1_1547 = arith.constant 1 : index
    %678 = vector.load %arg2[%c0_1543, %c0_1544, %c0_1545, %c7_1546, %c1_1547] : memref<1x1x8x14x38xbf16, #tpu.memory_space<vmem>>, vector<1x1x8x1x32xbf16>
    %679 = vector.shape_cast %678 : vector<1x1x8x1x32xbf16> to vector<8x32xbf16>
    %c0_1548 = arith.constant 0 : index
    %c0_1549 = arith.constant 0 : index
    %c0_1550 = arith.constant 0 : index
    %c7_1551 = arith.constant 7 : index
    %c2_1552 = arith.constant 2 : index
    %680 = vector.load %arg2[%c0_1548, %c0_1549, %c0_1550, %c7_1551, %c2_1552] : memref<1x1x8x14x38xbf16, #tpu.memory_space<vmem>>, vector<1x1x8x1x32xbf16>
    %681 = vector.shape_cast %680 : vector<1x1x8x1x32xbf16> to vector<8x32xbf16>
    %c0_1553 = arith.constant 0 : index
    %c0_1554 = arith.constant 0 : index
    %c0_1555 = arith.constant 0 : index
    %c7_1556 = arith.constant 7 : index
    %c3_1557 = arith.constant 3 : index
    %682 = vector.load %arg2[%c0_1553, %c0_1554, %c0_1555, %c7_1556, %c3_1557] : memref<1x1x8x14x38xbf16, #tpu.memory_space<vmem>>, vector<1x1x8x1x32xbf16>
    %683 = vector.shape_cast %682 : vector<1x1x8x1x32xbf16> to vector<8x32xbf16>
    %c0_1558 = arith.constant 0 : index
    %c0_1559 = arith.constant 0 : index
    %c0_1560 = arith.constant 0 : index
    %c7_1561 = arith.constant 7 : index
    %c4_1562 = arith.constant 4 : index
    %684 = vector.load %arg2[%c0_1558, %c0_1559, %c0_1560, %c7_1561, %c4_1562] : memref<1x1x8x14x38xbf16, #tpu.memory_space<vmem>>, vector<1x1x8x1x32xbf16>
    %685 = vector.shape_cast %684 : vector<1x1x8x1x32xbf16> to vector<8x32xbf16>
    %c0_1563 = arith.constant 0 : index
    %c0_1564 = arith.constant 0 : index
    %c0_1565 = arith.constant 0 : index
    %c7_1566 = arith.constant 7 : index
    %c5_1567 = arith.constant 5 : index
    %686 = vector.load %arg2[%c0_1563, %c0_1564, %c0_1565, %c7_1566, %c5_1567] : memref<1x1x8x14x38xbf16, #tpu.memory_space<vmem>>, vector<1x1x8x1x32xbf16>
    %687 = vector.shape_cast %686 : vector<1x1x8x1x32xbf16> to vector<8x32xbf16>
    %c0_1568 = arith.constant 0 : index
    %c0_1569 = arith.constant 0 : index
    %c0_1570 = arith.constant 0 : index
    %c7_1571 = arith.constant 7 : index
    %c6_1572 = arith.constant 6 : index
    %688 = vector.load %arg2[%c0_1568, %c0_1569, %c0_1570, %c7_1571, %c6_1572] : memref<1x1x8x14x38xbf16, #tpu.memory_space<vmem>>, vector<1x1x8x1x32xbf16>
    %689 = vector.shape_cast %688 : vector<1x1x8x1x32xbf16> to vector<8x32xbf16>
    %c0_1573 = arith.constant 0 : index
    %c0_1574 = arith.constant 0 : index
    %c0_1575 = arith.constant 0 : index
    %c8_1576 = arith.constant 8 : index
    %c0_1577 = arith.constant 0 : index
    %690 = vector.load %arg2[%c0_1573, %c0_1574, %c0_1575, %c8_1576, %c0_1577] : memref<1x1x8x14x38xbf16, #tpu.memory_space<vmem>>, vector<1x1x8x1x32xbf16>
    %691 = vector.shape_cast %690 : vector<1x1x8x1x32xbf16> to vector<8x32xbf16>
    %c0_1578 = arith.constant 0 : index
    %c0_1579 = arith.constant 0 : index
    %c0_1580 = arith.constant 0 : index
    %c8_1581 = arith.constant 8 : index
    %c1_1582 = arith.constant 1 : index
    %692 = vector.load %arg2[%c0_1578, %c0_1579, %c0_1580, %c8_1581, %c1_1582] : memref<1x1x8x14x38xbf16, #tpu.memory_space<vmem>>, vector<1x1x8x1x32xbf16>
    %693 = vector.shape_cast %692 : vector<1x1x8x1x32xbf16> to vector<8x32xbf16>
    %c0_1583 = arith.constant 0 : index
    %c0_1584 = arith.constant 0 : index
    %c0_1585 = arith.constant 0 : index
    %c8_1586 = arith.constant 8 : index
    %c2_1587 = arith.constant 2 : index
    %694 = vector.load %arg2[%c0_1583, %c0_1584, %c0_1585, %c8_1586, %c2_1587] : memref<1x1x8x14x38xbf16, #tpu.memory_space<vmem>>, vector<1x1x8x1x32xbf16>
    %695 = vector.shape_cast %694 : vector<1x1x8x1x32xbf16> to vector<8x32xbf16>
    %c0_1588 = arith.constant 0 : index
    %c0_1589 = arith.constant 0 : index
    %c0_1590 = arith.constant 0 : index
    %c8_1591 = arith.constant 8 : index
    %c3_1592 = arith.constant 3 : index
    %696 = vector.load %arg2[%c0_1588, %c0_1589, %c0_1590, %c8_1591, %c3_1592] : memref<1x1x8x14x38xbf16, #tpu.memory_space<vmem>>, vector<1x1x8x1x32xbf16>
    %697 = vector.shape_cast %696 : vector<1x1x8x1x32xbf16> to vector<8x32xbf16>
    %c0_1593 = arith.constant 0 : index
    %c0_1594 = arith.constant 0 : index
    %c0_1595 = arith.constant 0 : index
    %c8_1596 = arith.constant 8 : index
    %c4_1597 = arith.constant 4 : index
    %698 = vector.load %arg2[%c0_1593, %c0_1594, %c0_1595, %c8_1596, %c4_1597] : memref<1x1x8x14x38xbf16, #tpu.memory_space<vmem>>, vector<1x1x8x1x32xbf16>
    %699 = vector.shape_cast %698 : vector<1x1x8x1x32xbf16> to vector<8x32xbf16>
    %c0_1598 = arith.constant 0 : index
    %c0_1599 = arith.constant 0 : index
    %c0_1600 = arith.constant 0 : index
    %c8_1601 = arith.constant 8 : index
    %c5_1602 = arith.constant 5 : index
    %700 = vector.load %arg2[%c0_1598, %c0_1599, %c0_1600, %c8_1601, %c5_1602] : memref<1x1x8x14x38xbf16, #tpu.memory_space<vmem>>, vector<1x1x8x1x32xbf16>
    %701 = vector.shape_cast %700 : vector<1x1x8x1x32xbf16> to vector<8x32xbf16>
    %c0_1603 = arith.constant 0 : index
    %c0_1604 = arith.constant 0 : index
    %c0_1605 = arith.constant 0 : index
    %c8_1606 = arith.constant 8 : index
    %c6_1607 = arith.constant 6 : index
    %702 = vector.load %arg2[%c0_1603, %c0_1604, %c0_1605, %c8_1606, %c6_1607] : memref<1x1x8x14x38xbf16, #tpu.memory_space<vmem>>, vector<1x1x8x1x32xbf16>
    %703 = vector.shape_cast %702 : vector<1x1x8x1x32xbf16> to vector<8x32xbf16>
    %c0_1608 = arith.constant 0 : index
    %c0_1609 = arith.constant 0 : index
    %c0_1610 = arith.constant 0 : index
    %c9_1611 = arith.constant 9 : index
    %c0_1612 = arith.constant 0 : index
    %704 = vector.load %arg2[%c0_1608, %c0_1609, %c0_1610, %c9_1611, %c0_1612] : memref<1x1x8x14x38xbf16, #tpu.memory_space<vmem>>, vector<1x1x8x1x32xbf16>
    %705 = vector.shape_cast %704 : vector<1x1x8x1x32xbf16> to vector<8x32xbf16>
    %c0_1613 = arith.constant 0 : index
    %c0_1614 = arith.constant 0 : index
    %c0_1615 = arith.constant 0 : index
    %c9_1616 = arith.constant 9 : index
    %c1_1617 = arith.constant 1 : index
    %706 = vector.load %arg2[%c0_1613, %c0_1614, %c0_1615, %c9_1616, %c1_1617] : memref<1x1x8x14x38xbf16, #tpu.memory_space<vmem>>, vector<1x1x8x1x32xbf16>
    %707 = vector.shape_cast %706 : vector<1x1x8x1x32xbf16> to vector<8x32xbf16>
    %c0_1618 = arith.constant 0 : index
    %c0_1619 = arith.constant 0 : index
    %c0_1620 = arith.constant 0 : index
    %c9_1621 = arith.constant 9 : index
    %c2_1622 = arith.constant 2 : index
    %708 = vector.load %arg2[%c0_1618, %c0_1619, %c0_1620, %c9_1621, %c2_1622] : memref<1x1x8x14x38xbf16, #tpu.memory_space<vmem>>, vector<1x1x8x1x32xbf16>
    %709 = vector.shape_cast %708 : vector<1x1x8x1x32xbf16> to vector<8x32xbf16>
    %c0_1623 = arith.constant 0 : index
    %c0_1624 = arith.constant 0 : index
    %c0_1625 = arith.constant 0 : index
    %c9_1626 = arith.constant 9 : index
    %c3_1627 = arith.constant 3 : index
    %710 = vector.load %arg2[%c0_1623, %c0_1624, %c0_1625, %c9_1626, %c3_1627] : memref<1x1x8x14x38xbf16, #tpu.memory_space<vmem>>, vector<1x1x8x1x32xbf16>
    %711 = vector.shape_cast %710 : vector<1x1x8x1x32xbf16> to vector<8x32xbf16>
    %c0_1628 = arith.constant 0 : index
    %c0_1629 = arith.constant 0 : index
    %c0_1630 = arith.constant 0 : index
    %c9_1631 = arith.constant 9 : index
    %c4_1632 = arith.constant 4 : index
    %712 = vector.load %arg2[%c0_1628, %c0_1629, %c0_1630, %c9_1631, %c4_1632] : memref<1x1x8x14x38xbf16, #tpu.memory_space<vmem>>, vector<1x1x8x1x32xbf16>
    %713 = vector.shape_cast %712 : vector<1x1x8x1x32xbf16> to vector<8x32xbf16>
    %c0_1633 = arith.constant 0 : index
    %c0_1634 = arith.constant 0 : index
    %c0_1635 = arith.constant 0 : index
    %c9_1636 = arith.constant 9 : index
    %c5_1637 = arith.constant 5 : index
    %714 = vector.load %arg2[%c0_1633, %c0_1634, %c0_1635, %c9_1636, %c5_1637] : memref<1x1x8x14x38xbf16, #tpu.memory_space<vmem>>, vector<1x1x8x1x32xbf16>
    %715 = vector.shape_cast %714 : vector<1x1x8x1x32xbf16> to vector<8x32xbf16>
    %c0_1638 = arith.constant 0 : index
    %c0_1639 = arith.constant 0 : index
    %c0_1640 = arith.constant 0 : index
    %c9_1641 = arith.constant 9 : index
    %c6_1642 = arith.constant 6 : index
    %716 = vector.load %arg2[%c0_1638, %c0_1639, %c0_1640, %c9_1641, %c6_1642] : memref<1x1x8x14x38xbf16, #tpu.memory_space<vmem>>, vector<1x1x8x1x32xbf16>
    %717 = vector.shape_cast %716 : vector<1x1x8x1x32xbf16> to vector<8x32xbf16>
    %c0_1643 = arith.constant 0 : index
    %c0_1644 = arith.constant 0 : index
    %c0_1645 = arith.constant 0 : index
    %c10_1646 = arith.constant 10 : index
    %c0_1647 = arith.constant 0 : index
    %718 = vector.load %arg2[%c0_1643, %c0_1644, %c0_1645, %c10_1646, %c0_1647] : memref<1x1x8x14x38xbf16, #tpu.memory_space<vmem>>, vector<1x1x8x1x32xbf16>
    %719 = vector.shape_cast %718 : vector<1x1x8x1x32xbf16> to vector<8x32xbf16>
    %c0_1648 = arith.constant 0 : index
    %c0_1649 = arith.constant 0 : index
    %c0_1650 = arith.constant 0 : index
    %c10_1651 = arith.constant 10 : index
    %c1_1652 = arith.constant 1 : index
    %720 = vector.load %arg2[%c0_1648, %c0_1649, %c0_1650, %c10_1651, %c1_1652] : memref<1x1x8x14x38xbf16, #tpu.memory_space<vmem>>, vector<1x1x8x1x32xbf16>
    %721 = vector.shape_cast %720 : vector<1x1x8x1x32xbf16> to vector<8x32xbf16>
    %c0_1653 = arith.constant 0 : index
    %c0_1654 = arith.constant 0 : index
    %c0_1655 = arith.constant 0 : index
    %c10_1656 = arith.constant 10 : index
    %c2_1657 = arith.constant 2 : index
    %722 = vector.load %arg2[%c0_1653, %c0_1654, %c0_1655, %c10_1656, %c2_1657] : memref<1x1x8x14x38xbf16, #tpu.memory_space<vmem>>, vector<1x1x8x1x32xbf16>
    %723 = vector.shape_cast %722 : vector<1x1x8x1x32xbf16> to vector<8x32xbf16>
    %c0_1658 = arith.constant 0 : index
    %c0_1659 = arith.constant 0 : index
    %c0_1660 = arith.constant 0 : index
    %c10_1661 = arith.constant 10 : index
    %c3_1662 = arith.constant 3 : index
    %724 = vector.load %arg2[%c0_1658, %c0_1659, %c0_1660, %c10_1661, %c3_1662] : memref<1x1x8x14x38xbf16, #tpu.memory_space<vmem>>, vector<1x1x8x1x32xbf16>
    %725 = vector.shape_cast %724 : vector<1x1x8x1x32xbf16> to vector<8x32xbf16>
    %c0_1663 = arith.constant 0 : index
    %c0_1664 = arith.constant 0 : index
    %c0_1665 = arith.constant 0 : index
    %c10_1666 = arith.constant 10 : index
    %c4_1667 = arith.constant 4 : index
    %726 = vector.load %arg2[%c0_1663, %c0_1664, %c0_1665, %c10_1666, %c4_1667] : memref<1x1x8x14x38xbf16, #tpu.memory_space<vmem>>, vector<1x1x8x1x32xbf16>
    %727 = vector.shape_cast %726 : vector<1x1x8x1x32xbf16> to vector<8x32xbf16>
    %c0_1668 = arith.constant 0 : index
    %c0_1669 = arith.constant 0 : index
    %c0_1670 = arith.constant 0 : index
    %c10_1671 = arith.constant 10 : index
    %c5_1672 = arith.constant 5 : index
    %728 = vector.load %arg2[%c0_1668, %c0_1669, %c0_1670, %c10_1671, %c5_1672] : memref<1x1x8x14x38xbf16, #tpu.memory_space<vmem>>, vector<1x1x8x1x32xbf16>
    %729 = vector.shape_cast %728 : vector<1x1x8x1x32xbf16> to vector<8x32xbf16>
    %c0_1673 = arith.constant 0 : index
    %c0_1674 = arith.constant 0 : index
    %c0_1675 = arith.constant 0 : index
    %c10_1676 = arith.constant 10 : index
    %c6_1677 = arith.constant 6 : index
    %730 = vector.load %arg2[%c0_1673, %c0_1674, %c0_1675, %c10_1676, %c6_1677] : memref<1x1x8x14x38xbf16, #tpu.memory_space<vmem>>, vector<1x1x8x1x32xbf16>
    %731 = vector.shape_cast %730 : vector<1x1x8x1x32xbf16> to vector<8x32xbf16>
    %c0_1678 = arith.constant 0 : index
    %c0_1679 = arith.constant 0 : index
    %c0_1680 = arith.constant 0 : index
    %c11_1681 = arith.constant 11 : index
    %c0_1682 = arith.constant 0 : index
    %732 = vector.load %arg2[%c0_1678, %c0_1679, %c0_1680, %c11_1681, %c0_1682] : memref<1x1x8x14x38xbf16, #tpu.memory_space<vmem>>, vector<1x1x8x1x32xbf16>
    %733 = vector.shape_cast %732 : vector<1x1x8x1x32xbf16> to vector<8x32xbf16>
    %c0_1683 = arith.constant 0 : index
    %c0_1684 = arith.constant 0 : index
    %c0_1685 = arith.constant 0 : index
    %c11_1686 = arith.constant 11 : index
    %c1_1687 = arith.constant 1 : index
    %734 = vector.load %arg2[%c0_1683, %c0_1684, %c0_1685, %c11_1686, %c1_1687] : memref<1x1x8x14x38xbf16, #tpu.memory_space<vmem>>, vector<1x1x8x1x32xbf16>
    %735 = vector.shape_cast %734 : vector<1x1x8x1x32xbf16> to vector<8x32xbf16>
    %c0_1688 = arith.constant 0 : index
    %c0_1689 = arith.constant 0 : index
    %c0_1690 = arith.constant 0 : index
    %c11_1691 = arith.constant 11 : index
    %c2_1692 = arith.constant 2 : index
    %736 = vector.load %arg2[%c0_1688, %c0_1689, %c0_1690, %c11_1691, %c2_1692] : memref<1x1x8x14x38xbf16, #tpu.memory_space<vmem>>, vector<1x1x8x1x32xbf16>
    %737 = vector.shape_cast %736 : vector<1x1x8x1x32xbf16> to vector<8x32xbf16>
    %c0_1693 = arith.constant 0 : index
    %c0_1694 = arith.constant 0 : index
    %c0_1695 = arith.constant 0 : index
    %c11_1696 = arith.constant 11 : index
    %c3_1697 = arith.constant 3 : index
    %738 = vector.load %arg2[%c0_1693, %c0_1694, %c0_1695, %c11_1696, %c3_1697] : memref<1x1x8x14x38xbf16, #tpu.memory_space<vmem>>, vector<1x1x8x1x32xbf16>
    %739 = vector.shape_cast %738 : vector<1x1x8x1x32xbf16> to vector<8x32xbf16>
    %c0_1698 = arith.constant 0 : index
    %c0_1699 = arith.constant 0 : index
    %c0_1700 = arith.constant 0 : index
    %c11_1701 = arith.constant 11 : index
    %c4_1702 = arith.constant 4 : index
    %740 = vector.load %arg2[%c0_1698, %c0_1699, %c0_1700, %c11_1701, %c4_1702] : memref<1x1x8x14x38xbf16, #tpu.memory_space<vmem>>, vector<1x1x8x1x32xbf16>
    %741 = vector.shape_cast %740 : vector<1x1x8x1x32xbf16> to vector<8x32xbf16>
    %c0_1703 = arith.constant 0 : index
    %c0_1704 = arith.constant 0 : index
    %c0_1705 = arith.constant 0 : index
    %c11_1706 = arith.constant 11 : index
    %c5_1707 = arith.constant 5 : index
    %742 = vector.load %arg2[%c0_1703, %c0_1704, %c0_1705, %c11_1706, %c5_1707] : memref<1x1x8x14x38xbf16, #tpu.memory_space<vmem>>, vector<1x1x8x1x32xbf16>
    %743 = vector.shape_cast %742 : vector<1x1x8x1x32xbf16> to vector<8x32xbf16>
    %c0_1708 = arith.constant 0 : index
    %c0_1709 = arith.constant 0 : index
    %c0_1710 = arith.constant 0 : index
    %c11_1711 = arith.constant 11 : index
    %c6_1712 = arith.constant 6 : index
    %744 = vector.load %arg2[%c0_1708, %c0_1709, %c0_1710, %c11_1711, %c6_1712] : memref<1x1x8x14x38xbf16, #tpu.memory_space<vmem>>, vector<1x1x8x1x32xbf16>
    %745 = vector.shape_cast %744 : vector<1x1x8x1x32xbf16> to vector<8x32xbf16>
    %c0_1713 = arith.constant 0 : index
    %c0_1714 = arith.constant 0 : index
    %c0_1715 = arith.constant 0 : index
    %c12 = arith.constant 12 : index
    %c0_1716 = arith.constant 0 : index
    %746 = vector.load %arg2[%c0_1713, %c0_1714, %c0_1715, %c12, %c0_1716] : memref<1x1x8x14x38xbf16, #tpu.memory_space<vmem>>, vector<1x1x8x1x32xbf16>
    %747 = vector.shape_cast %746 : vector<1x1x8x1x32xbf16> to vector<8x32xbf16>
    %c0_1717 = arith.constant 0 : index
    %c0_1718 = arith.constant 0 : index
    %c0_1719 = arith.constant 0 : index
    %c12_1720 = arith.constant 12 : index
    %c1_1721 = arith.constant 1 : index
    %748 = vector.load %arg2[%c0_1717, %c0_1718, %c0_1719, %c12_1720, %c1_1721] : memref<1x1x8x14x38xbf16, #tpu.memory_space<vmem>>, vector<1x1x8x1x32xbf16>
    %749 = vector.shape_cast %748 : vector<1x1x8x1x32xbf16> to vector<8x32xbf16>
    %c0_1722 = arith.constant 0 : index
    %c0_1723 = arith.constant 0 : index
    %c0_1724 = arith.constant 0 : index
    %c12_1725 = arith.constant 12 : index
    %c2_1726 = arith.constant 2 : index
    %750 = vector.load %arg2[%c0_1722, %c0_1723, %c0_1724, %c12_1725, %c2_1726] : memref<1x1x8x14x38xbf16, #tpu.memory_space<vmem>>, vector<1x1x8x1x32xbf16>
    %751 = vector.shape_cast %750 : vector<1x1x8x1x32xbf16> to vector<8x32xbf16>
    %c0_1727 = arith.constant 0 : index
    %c0_1728 = arith.constant 0 : index
    %c0_1729 = arith.constant 0 : index
    %c12_1730 = arith.constant 12 : index
    %c3_1731 = arith.constant 3 : index
    %752 = vector.load %arg2[%c0_1727, %c0_1728, %c0_1729, %c12_1730, %c3_1731] : memref<1x1x8x14x38xbf16, #tpu.memory_space<vmem>>, vector<1x1x8x1x32xbf16>
    %753 = vector.shape_cast %752 : vector<1x1x8x1x32xbf16> to vector<8x32xbf16>
    %c0_1732 = arith.constant 0 : index
    %c0_1733 = arith.constant 0 : index
    %c0_1734 = arith.constant 0 : index
    %c12_1735 = arith.constant 12 : index
    %c4_1736 = arith.constant 4 : index
    %754 = vector.load %arg2[%c0_1732, %c0_1733, %c0_1734, %c12_1735, %c4_1736] : memref<1x1x8x14x38xbf16, #tpu.memory_space<vmem>>, vector<1x1x8x1x32xbf16>
    %755 = vector.shape_cast %754 : vector<1x1x8x1x32xbf16> to vector<8x32xbf16>
    %c0_1737 = arith.constant 0 : index
    %c0_1738 = arith.constant 0 : index
    %c0_1739 = arith.constant 0 : index
    %c12_1740 = arith.constant 12 : index
    %c5_1741 = arith.constant 5 : index
    %756 = vector.load %arg2[%c0_1737, %c0_1738, %c0_1739, %c12_1740, %c5_1741] : memref<1x1x8x14x38xbf16, #tpu.memory_space<vmem>>, vector<1x1x8x1x32xbf16>
    %757 = vector.shape_cast %756 : vector<1x1x8x1x32xbf16> to vector<8x32xbf16>
    %c0_1742 = arith.constant 0 : index
    %c0_1743 = arith.constant 0 : index
    %c0_1744 = arith.constant 0 : index
    %c12_1745 = arith.constant 12 : index
    %c6_1746 = arith.constant 6 : index
    %758 = vector.load %arg2[%c0_1742, %c0_1743, %c0_1744, %c12_1745, %c6_1746] : memref<1x1x8x14x38xbf16, #tpu.memory_space<vmem>>, vector<1x1x8x1x32xbf16>
    %759 = vector.shape_cast %758 : vector<1x1x8x1x32xbf16> to vector<8x32xbf16>
    %760 = tpu.concatenate %663, %665, %667, %669, %671, %673, %675, %677, %679, %681, %683, %685, %687, %689, %691, %693 in 0 : vector<8x32xbf16>, vector<8x32xbf16>, vector<8x32xbf16>, vector<8x32xbf16>, vector<8x32xbf16>, vector<8x32xbf16>, vector<8x32xbf16>, vector<8x32xbf16>, vector<8x32xbf16>, vector<8x32xbf16>, vector<8x32xbf16>, vector<8x32xbf16>, vector<8x32xbf16>, vector<8x32xbf16>, vector<8x32xbf16>, vector<8x32xbf16> -> vector<128x32xbf16>
    %761 = tpu.concatenate %695, %697, %699, %701, %703, %705, %707, %709, %711, %713, %715, %717, %719, %721, %723, %725 in 0 : vector<8x32xbf16>, vector<8x32xbf16>, vector<8x32xbf16>, vector<8x32xbf16>, vector<8x32xbf16>, vector<8x32xbf16>, vector<8x32xbf16>, vector<8x32xbf16>, vector<8x32xbf16>, vector<8x32xbf16>, vector<8x32xbf16>, vector<8x32xbf16>, vector<8x32xbf16>, vector<8x32xbf16>, vector<8x32xbf16>, vector<8x32xbf16> -> vector<128x32xbf16>
    %762 = tpu.concatenate %727, %729, %731, %733, %735, %737, %739, %741, %743, %745, %747, %749, %751, %753, %755, %757 in 0 : vector<8x32xbf16>, vector<8x32xbf16>, vector<8x32xbf16>, vector<8x32xbf16>, vector<8x32xbf16>, vector<8x32xbf16>, vector<8x32xbf16>, vector<8x32xbf16>, vector<8x32xbf16>, vector<8x32xbf16>, vector<8x32xbf16>, vector<8x32xbf16>, vector<8x32xbf16>, vector<8x32xbf16>, vector<8x32xbf16>, vector<8x32xbf16> -> vector<128x32xbf16>
    %763 = tpu.concatenate %760, %761, %762, %759 in 0 : vector<128x32xbf16>, vector<128x32xbf16>, vector<128x32xbf16>, vector<8x32xbf16> -> vector<392x32xbf16>
    %cst_1747 = arith.constant dense<0.000000e+00> : vector<32x32xf32>
    %764 = tpu.matmul %0, %763, %cst_1747 {dimension_numbers = #tpu.dot_dimension_numbers<[1], [0], [0], [1], [0, 0, 1, 1], [], []>} : vector<32x392xbf16>, vector<392x32xbf16>, vector<32x32xf32> -> vector<32x32xf32>
    %765 = vector.broadcast %1 : vector<32x1xf32> to vector<32x32xf32>
    %766 = arith.addf %764, %765 : vector<32x32xf32>
    %cst_1748 = arith.constant 0.000000e+00 : f32
    %767 = vector.broadcast %cst_1748 : f32 to vector<32x32xf32>
    %768 = arith.maximumf %766, %767 : vector<32x32xf32>
    %c0_1749 = arith.constant 0 : index
    %c0_1750 = arith.constant 0 : index
    %c0_1751 = arith.constant 0 : index
    %c6_1752 = arith.constant 6 : index
    %c0_1753 = arith.constant 0 : index
    %769 = vector.load %arg5[%c0_1749, %c0_1750, %c0_1751, %c6_1752, %c0_1753] : memref<1x32x1x8x32xf32, #tpu.memory_space<vmem>>, vector<1x32x1x1x32xf32>
    %770 = vector.shape_cast %769 : vector<1x32x1x1x32xf32> to vector<32x32xf32>
    %771 = vector.shape_cast %768 : vector<32x32xf32> to vector<1x32x1x1x32xf32>
    tpu.vector_store %arg5[%c0_1749, %c0_1750, %c0_1751, %c6_1752, %c0_1753], %771 {strides = array<i32>} : memref<1x32x1x8x32xf32, #tpu.memory_space<vmem>>, vector<1x32x1x1x32xf32>,
    %c0_1754 = arith.constant 0 : index
    %c0_1755 = arith.constant 0 : index
    %c0_1756 = arith.constant 0 : index
    %c7_1757 = arith.constant 7 : index
    %c0_1758 = arith.constant 0 : index
    %772 = vector.load %arg2[%c0_1754, %c0_1755, %c0_1756, %c7_1757, %c0_1758] : memref<1x1x8x14x38xbf16, #tpu.memory_space<vmem>>, vector<1x1x8x1x32xbf16>
    %773 = vector.shape_cast %772 : vector<1x1x8x1x32xbf16> to vector<8x32xbf16>
    %c0_1759 = arith.constant 0 : index
    %c0_1760 = arith.constant 0 : index
    %c0_1761 = arith.constant 0 : index
    %c7_1762 = arith.constant 7 : index
    %c1_1763 = arith.constant 1 : index
    %774 = vector.load %arg2[%c0_1759, %c0_1760, %c0_1761, %c7_1762, %c1_1763] : memref<1x1x8x14x38xbf16, #tpu.memory_space<vmem>>, vector<1x1x8x1x32xbf16>
    %775 = vector.shape_cast %774 : vector<1x1x8x1x32xbf16> to vector<8x32xbf16>
    %c0_1764 = arith.constant 0 : index
    %c0_1765 = arith.constant 0 : index
    %c0_1766 = arith.constant 0 : index
    %c7_1767 = arith.constant 7 : index
    %c2_1768 = arith.constant 2 : index
    %776 = vector.load %arg2[%c0_1764, %c0_1765, %c0_1766, %c7_1767, %c2_1768] : memref<1x1x8x14x38xbf16, #tpu.memory_space<vmem>>, vector<1x1x8x1x32xbf16>
    %777 = vector.shape_cast %776 : vector<1x1x8x1x32xbf16> to vector<8x32xbf16>
    %c0_1769 = arith.constant 0 : index
    %c0_1770 = arith.constant 0 : index
    %c0_1771 = arith.constant 0 : index
    %c7_1772 = arith.constant 7 : index
    %c3_1773 = arith.constant 3 : index
    %778 = vector.load %arg2[%c0_1769, %c0_1770, %c0_1771, %c7_1772, %c3_1773] : memref<1x1x8x14x38xbf16, #tpu.memory_space<vmem>>, vector<1x1x8x1x32xbf16>
    %779 = vector.shape_cast %778 : vector<1x1x8x1x32xbf16> to vector<8x32xbf16>
    %c0_1774 = arith.constant 0 : index
    %c0_1775 = arith.constant 0 : index
    %c0_1776 = arith.constant 0 : index
    %c7_1777 = arith.constant 7 : index
    %c4_1778 = arith.constant 4 : index
    %780 = vector.load %arg2[%c0_1774, %c0_1775, %c0_1776, %c7_1777, %c4_1778] : memref<1x1x8x14x38xbf16, #tpu.memory_space<vmem>>, vector<1x1x8x1x32xbf16>
    %781 = vector.shape_cast %780 : vector<1x1x8x1x32xbf16> to vector<8x32xbf16>
    %c0_1779 = arith.constant 0 : index
    %c0_1780 = arith.constant 0 : index
    %c0_1781 = arith.constant 0 : index
    %c7_1782 = arith.constant 7 : index
    %c5_1783 = arith.constant 5 : index
    %782 = vector.load %arg2[%c0_1779, %c0_1780, %c0_1781, %c7_1782, %c5_1783] : memref<1x1x8x14x38xbf16, #tpu.memory_space<vmem>>, vector<1x1x8x1x32xbf16>
    %783 = vector.shape_cast %782 : vector<1x1x8x1x32xbf16> to vector<8x32xbf16>
    %c0_1784 = arith.constant 0 : index
    %c0_1785 = arith.constant 0 : index
    %c0_1786 = arith.constant 0 : index
    %c7_1787 = arith.constant 7 : index
    %c6_1788 = arith.constant 6 : index
    %784 = vector.load %arg2[%c0_1784, %c0_1785, %c0_1786, %c7_1787, %c6_1788] : memref<1x1x8x14x38xbf16, #tpu.memory_space<vmem>>, vector<1x1x8x1x32xbf16>
    %785 = vector.shape_cast %784 : vector<1x1x8x1x32xbf16> to vector<8x32xbf16>
    %c0_1789 = arith.constant 0 : index
    %c0_1790 = arith.constant 0 : index
    %c0_1791 = arith.constant 0 : index
    %c8_1792 = arith.constant 8 : index
    %c0_1793 = arith.constant 0 : index
    %786 = vector.load %arg2[%c0_1789, %c0_1790, %c0_1791, %c8_1792, %c0_1793] : memref<1x1x8x14x38xbf16, #tpu.memory_space<vmem>>, vector<1x1x8x1x32xbf16>
    %787 = vector.shape_cast %786 : vector<1x1x8x1x32xbf16> to vector<8x32xbf16>
    %c0_1794 = arith.constant 0 : index
    %c0_1795 = arith.constant 0 : index
    %c0_1796 = arith.constant 0 : index
    %c8_1797 = arith.constant 8 : index
    %c1_1798 = arith.constant 1 : index
    %788 = vector.load %arg2[%c0_1794, %c0_1795, %c0_1796, %c8_1797, %c1_1798] : memref<1x1x8x14x38xbf16, #tpu.memory_space<vmem>>, vector<1x1x8x1x32xbf16>
    %789 = vector.shape_cast %788 : vector<1x1x8x1x32xbf16> to vector<8x32xbf16>
    %c0_1799 = arith.constant 0 : index
    %c0_1800 = arith.constant 0 : index
    %c0_1801 = arith.constant 0 : index
    %c8_1802 = arith.constant 8 : index
    %c2_1803 = arith.constant 2 : index
    %790 = vector.load %arg2[%c0_1799, %c0_1800, %c0_1801, %c8_1802, %c2_1803] : memref<1x1x8x14x38xbf16, #tpu.memory_space<vmem>>, vector<1x1x8x1x32xbf16>
    %791 = vector.shape_cast %790 : vector<1x1x8x1x32xbf16> to vector<8x32xbf16>
    %c0_1804 = arith.constant 0 : index
    %c0_1805 = arith.constant 0 : index
    %c0_1806 = arith.constant 0 : index
    %c8_1807 = arith.constant 8 : index
    %c3_1808 = arith.constant 3 : index
    %792 = vector.load %arg2[%c0_1804, %c0_1805, %c0_1806, %c8_1807, %c3_1808] : memref<1x1x8x14x38xbf16, #tpu.memory_space<vmem>>, vector<1x1x8x1x32xbf16>
    %793 = vector.shape_cast %792 : vector<1x1x8x1x32xbf16> to vector<8x32xbf16>
    %c0_1809 = arith.constant 0 : index
    %c0_1810 = arith.constant 0 : index
    %c0_1811 = arith.constant 0 : index
    %c8_1812 = arith.constant 8 : index
    %c4_1813 = arith.constant 4 : index
    %794 = vector.load %arg2[%c0_1809, %c0_1810, %c0_1811, %c8_1812, %c4_1813] : memref<1x1x8x14x38xbf16, #tpu.memory_space<vmem>>, vector<1x1x8x1x32xbf16>
    %795 = vector.shape_cast %794 : vector<1x1x8x1x32xbf16> to vector<8x32xbf16>
    %c0_1814 = arith.constant 0 : index
    %c0_1815 = arith.constant 0 : index
    %c0_1816 = arith.constant 0 : index
    %c8_1817 = arith.constant 8 : index
    %c5_1818 = arith.constant 5 : index
    %796 = vector.load %arg2[%c0_1814, %c0_1815, %c0_1816, %c8_1817, %c5_1818] : memref<1x1x8x14x38xbf16, #tpu.memory_space<vmem>>, vector<1x1x8x1x32xbf16>
    %797 = vector.shape_cast %796 : vector<1x1x8x1x32xbf16> to vector<8x32xbf16>
    %c0_1819 = arith.constant 0 : index
    %c0_1820 = arith.constant 0 : index
    %c0_1821 = arith.constant 0 : index
    %c8_1822 = arith.constant 8 : index
    %c6_1823 = arith.constant 6 : index
    %798 = vector.load %arg2[%c0_1819, %c0_1820, %c0_1821, %c8_1822, %c6_1823] : memref<1x1x8x14x38xbf16, #tpu.memory_space<vmem>>, vector<1x1x8x1x32xbf16>
    %799 = vector.shape_cast %798 : vector<1x1x8x1x32xbf16> to vector<8x32xbf16>
    %c0_1824 = arith.constant 0 : index
    %c0_1825 = arith.constant 0 : index
    %c0_1826 = arith.constant 0 : index
    %c9_1827 = arith.constant 9 : index
    %c0_1828 = arith.constant 0 : index
    %800 = vector.load %arg2[%c0_1824, %c0_1825, %c0_1826, %c9_1827, %c0_1828] : memref<1x1x8x14x38xbf16, #tpu.memory_space<vmem>>, vector<1x1x8x1x32xbf16>
    %801 = vector.shape_cast %800 : vector<1x1x8x1x32xbf16> to vector<8x32xbf16>
    %c0_1829 = arith.constant 0 : index
    %c0_1830 = arith.constant 0 : index
    %c0_1831 = arith.constant 0 : index
    %c9_1832 = arith.constant 9 : index
    %c1_1833 = arith.constant 1 : index
    %802 = vector.load %arg2[%c0_1829, %c0_1830, %c0_1831, %c9_1832, %c1_1833] : memref<1x1x8x14x38xbf16, #tpu.memory_space<vmem>>, vector<1x1x8x1x32xbf16>
    %803 = vector.shape_cast %802 : vector<1x1x8x1x32xbf16> to vector<8x32xbf16>
    %c0_1834 = arith.constant 0 : index
    %c0_1835 = arith.constant 0 : index
    %c0_1836 = arith.constant 0 : index
    %c9_1837 = arith.constant 9 : index
    %c2_1838 = arith.constant 2 : index
    %804 = vector.load %arg2[%c0_1834, %c0_1835, %c0_1836, %c9_1837, %c2_1838] : memref<1x1x8x14x38xbf16, #tpu.memory_space<vmem>>, vector<1x1x8x1x32xbf16>
    %805 = vector.shape_cast %804 : vector<1x1x8x1x32xbf16> to vector<8x32xbf16>
    %c0_1839 = arith.constant 0 : index
    %c0_1840 = arith.constant 0 : index
    %c0_1841 = arith.constant 0 : index
    %c9_1842 = arith.constant 9 : index
    %c3_1843 = arith.constant 3 : index
    %806 = vector.load %arg2[%c0_1839, %c0_1840, %c0_1841, %c9_1842, %c3_1843] : memref<1x1x8x14x38xbf16, #tpu.memory_space<vmem>>, vector<1x1x8x1x32xbf16>
    %807 = vector.shape_cast %806 : vector<1x1x8x1x32xbf16> to vector<8x32xbf16>
    %c0_1844 = arith.constant 0 : index
    %c0_1845 = arith.constant 0 : index
    %c0_1846 = arith.constant 0 : index
    %c9_1847 = arith.constant 9 : index
    %c4_1848 = arith.constant 4 : index
    %808 = vector.load %arg2[%c0_1844, %c0_1845, %c0_1846, %c9_1847, %c4_1848] : memref<1x1x8x14x38xbf16, #tpu.memory_space<vmem>>, vector<1x1x8x1x32xbf16>
    %809 = vector.shape_cast %808 : vector<1x1x8x1x32xbf16> to vector<8x32xbf16>
    %c0_1849 = arith.constant 0 : index
    %c0_1850 = arith.constant 0 : index
    %c0_1851 = arith.constant 0 : index
    %c9_1852 = arith.constant 9 : index
    %c5_1853 = arith.constant 5 : index
    %810 = vector.load %arg2[%c0_1849, %c0_1850, %c0_1851, %c9_1852, %c5_1853] : memref<1x1x8x14x38xbf16, #tpu.memory_space<vmem>>, vector<1x1x8x1x32xbf16>
    %811 = vector.shape_cast %810 : vector<1x1x8x1x32xbf16> to vector<8x32xbf16>
    %c0_1854 = arith.constant 0 : index
    %c0_1855 = arith.constant 0 : index
    %c0_1856 = arith.constant 0 : index
    %c9_1857 = arith.constant 9 : index
    %c6_1858 = arith.constant 6 : index
    %812 = vector.load %arg2[%c0_1854, %c0_1855, %c0_1856, %c9_1857, %c6_1858] : memref<1x1x8x14x38xbf16, #tpu.memory_space<vmem>>, vector<1x1x8x1x32xbf16>
    %813 = vector.shape_cast %812 : vector<1x1x8x1x32xbf16> to vector<8x32xbf16>
    %c0_1859 = arith.constant 0 : index
    %c0_1860 = arith.constant 0 : index
    %c0_1861 = arith.constant 0 : index
    %c10_1862 = arith.constant 10 : index
    %c0_1863 = arith.constant 0 : index
    %814 = vector.load %arg2[%c0_1859, %c0_1860, %c0_1861, %c10_1862, %c0_1863] : memref<1x1x8x14x38xbf16, #tpu.memory_space<vmem>>, vector<1x1x8x1x32xbf16>
    %815 = vector.shape_cast %814 : vector<1x1x8x1x32xbf16> to vector<8x32xbf16>
    %c0_1864 = arith.constant 0 : index
    %c0_1865 = arith.constant 0 : index
    %c0_1866 = arith.constant 0 : index
    %c10_1867 = arith.constant 10 : index
    %c1_1868 = arith.constant 1 : index
    %816 = vector.load %arg2[%c0_1864, %c0_1865, %c0_1866, %c10_1867, %c1_1868] : memref<1x1x8x14x38xbf16, #tpu.memory_space<vmem>>, vector<1x1x8x1x32xbf16>
    %817 = vector.shape_cast %816 : vector<1x1x8x1x32xbf16> to vector<8x32xbf16>
    %c0_1869 = arith.constant 0 : index
    %c0_1870 = arith.constant 0 : index
    %c0_1871 = arith.constant 0 : index
    %c10_1872 = arith.constant 10 : index
    %c2_1873 = arith.constant 2 : index
    %818 = vector.load %arg2[%c0_1869, %c0_1870, %c0_1871, %c10_1872, %c2_1873] : memref<1x1x8x14x38xbf16, #tpu.memory_space<vmem>>, vector<1x1x8x1x32xbf16>
    %819 = vector.shape_cast %818 : vector<1x1x8x1x32xbf16> to vector<8x32xbf16>
    %c0_1874 = arith.constant 0 : index
    %c0_1875 = arith.constant 0 : index
    %c0_1876 = arith.constant 0 : index
    %c10_1877 = arith.constant 10 : index
    %c3_1878 = arith.constant 3 : index
    %820 = vector.load %arg2[%c0_1874, %c0_1875, %c0_1876, %c10_1877, %c3_1878] : memref<1x1x8x14x38xbf16, #tpu.memory_space<vmem>>, vector<1x1x8x1x32xbf16>
    %821 = vector.shape_cast %820 : vector<1x1x8x1x32xbf16> to vector<8x32xbf16>
    %c0_1879 = arith.constant 0 : index
    %c0_1880 = arith.constant 0 : index
    %c0_1881 = arith.constant 0 : index
    %c10_1882 = arith.constant 10 : index
    %c4_1883 = arith.constant 4 : index
    %822 = vector.load %arg2[%c0_1879, %c0_1880, %c0_1881, %c10_1882, %c4_1883] : memref<1x1x8x14x38xbf16, #tpu.memory_space<vmem>>, vector<1x1x8x1x32xbf16>
    %823 = vector.shape_cast %822 : vector<1x1x8x1x32xbf16> to vector<8x32xbf16>
    %c0_1884 = arith.constant 0 : index
    %c0_1885 = arith.constant 0 : index
    %c0_1886 = arith.constant 0 : index
    %c10_1887 = arith.constant 10 : index
    %c5_1888 = arith.constant 5 : index
    %824 = vector.load %arg2[%c0_1884, %c0_1885, %c0_1886, %c10_1887, %c5_1888] : memref<1x1x8x14x38xbf16, #tpu.memory_space<vmem>>, vector<1x1x8x1x32xbf16>
    %825 = vector.shape_cast %824 : vector<1x1x8x1x32xbf16> to vector<8x32xbf16>
    %c0_1889 = arith.constant 0 : index
    %c0_1890 = arith.constant 0 : index
    %c0_1891 = arith.constant 0 : index
    %c10_1892 = arith.constant 10 : index
    %c6_1893 = arith.constant 6 : index
    %826 = vector.load %arg2[%c0_1889, %c0_1890, %c0_1891, %c10_1892, %c6_1893] : memref<1x1x8x14x38xbf16, #tpu.memory_space<vmem>>, vector<1x1x8x1x32xbf16>
    %827 = vector.shape_cast %826 : vector<1x1x8x1x32xbf16> to vector<8x32xbf16>
    %c0_1894 = arith.constant 0 : index
    %c0_1895 = arith.constant 0 : index
    %c0_1896 = arith.constant 0 : index
    %c11_1897 = arith.constant 11 : index
    %c0_1898 = arith.constant 0 : index
    %828 = vector.load %arg2[%c0_1894, %c0_1895, %c0_1896, %c11_1897, %c0_1898] : memref<1x1x8x14x38xbf16, #tpu.memory_space<vmem>>, vector<1x1x8x1x32xbf16>
    %829 = vector.shape_cast %828 : vector<1x1x8x1x32xbf16> to vector<8x32xbf16>
    %c0_1899 = arith.constant 0 : index
    %c0_1900 = arith.constant 0 : index
    %c0_1901 = arith.constant 0 : index
    %c11_1902 = arith.constant 11 : index
    %c1_1903 = arith.constant 1 : index
    %830 = vector.load %arg2[%c0_1899, %c0_1900, %c0_1901, %c11_1902, %c1_1903] : memref<1x1x8x14x38xbf16, #tpu.memory_space<vmem>>, vector<1x1x8x1x32xbf16>
    %831 = vector.shape_cast %830 : vector<1x1x8x1x32xbf16> to vector<8x32xbf16>
    %c0_1904 = arith.constant 0 : index
    %c0_1905 = arith.constant 0 : index
    %c0_1906 = arith.constant 0 : index
    %c11_1907 = arith.constant 11 : index
    %c2_1908 = arith.constant 2 : index
    %832 = vector.load %arg2[%c0_1904, %c0_1905, %c0_1906, %c11_1907, %c2_1908] : memref<1x1x8x14x38xbf16, #tpu.memory_space<vmem>>, vector<1x1x8x1x32xbf16>
    %833 = vector.shape_cast %832 : vector<1x1x8x1x32xbf16> to vector<8x32xbf16>
    %c0_1909 = arith.constant 0 : index
    %c0_1910 = arith.constant 0 : index
    %c0_1911 = arith.constant 0 : index
    %c11_1912 = arith.constant 11 : index
    %c3_1913 = arith.constant 3 : index
    %834 = vector.load %arg2[%c0_1909, %c0_1910, %c0_1911, %c11_1912, %c3_1913] : memref<1x1x8x14x38xbf16, #tpu.memory_space<vmem>>, vector<1x1x8x1x32xbf16>
    %835 = vector.shape_cast %834 : vector<1x1x8x1x32xbf16> to vector<8x32xbf16>
    %c0_1914 = arith.constant 0 : index
    %c0_1915 = arith.constant 0 : index
    %c0_1916 = arith.constant 0 : index
    %c11_1917 = arith.constant 11 : index
    %c4_1918 = arith.constant 4 : index
    %836 = vector.load %arg2[%c0_1914, %c0_1915, %c0_1916, %c11_1917, %c4_1918] : memref<1x1x8x14x38xbf16, #tpu.memory_space<vmem>>, vector<1x1x8x1x32xbf16>
    %837 = vector.shape_cast %836 : vector<1x1x8x1x32xbf16> to vector<8x32xbf16>
    %c0_1919 = arith.constant 0 : index
    %c0_1920 = arith.constant 0 : index
    %c0_1921 = arith.constant 0 : index
    %c11_1922 = arith.constant 11 : index
    %c5_1923 = arith.constant 5 : index
    %838 = vector.load %arg2[%c0_1919, %c0_1920, %c0_1921, %c11_1922, %c5_1923] : memref<1x1x8x14x38xbf16, #tpu.memory_space<vmem>>, vector<1x1x8x1x32xbf16>
    %839 = vector.shape_cast %838 : vector<1x1x8x1x32xbf16> to vector<8x32xbf16>
    %c0_1924 = arith.constant 0 : index
    %c0_1925 = arith.constant 0 : index
    %c0_1926 = arith.constant 0 : index
    %c11_1927 = arith.constant 11 : index
    %c6_1928 = arith.constant 6 : index
    %840 = vector.load %arg2[%c0_1924, %c0_1925, %c0_1926, %c11_1927, %c6_1928] : memref<1x1x8x14x38xbf16, #tpu.memory_space<vmem>>, vector<1x1x8x1x32xbf16>
    %841 = vector.shape_cast %840 : vector<1x1x8x1x32xbf16> to vector<8x32xbf16>
    %c0_1929 = arith.constant 0 : index
    %c0_1930 = arith.constant 0 : index
    %c0_1931 = arith.constant 0 : index
    %c12_1932 = arith.constant 12 : index
    %c0_1933 = arith.constant 0 : index
    %842 = vector.load %arg2[%c0_1929, %c0_1930, %c0_1931, %c12_1932, %c0_1933] : memref<1x1x8x14x38xbf16, #tpu.memory_space<vmem>>, vector<1x1x8x1x32xbf16>
    %843 = vector.shape_cast %842 : vector<1x1x8x1x32xbf16> to vector<8x32xbf16>
    %c0_1934 = arith.constant 0 : index
    %c0_1935 = arith.constant 0 : index
    %c0_1936 = arith.constant 0 : index
    %c12_1937 = arith.constant 12 : index
    %c1_1938 = arith.constant 1 : index
    %844 = vector.load %arg2[%c0_1934, %c0_1935, %c0_1936, %c12_1937, %c1_1938] : memref<1x1x8x14x38xbf16, #tpu.memory_space<vmem>>, vector<1x1x8x1x32xbf16>
    %845 = vector.shape_cast %844 : vector<1x1x8x1x32xbf16> to vector<8x32xbf16>
    %c0_1939 = arith.constant 0 : index
    %c0_1940 = arith.constant 0 : index
    %c0_1941 = arith.constant 0 : index
    %c12_1942 = arith.constant 12 : index
    %c2_1943 = arith.constant 2 : index
    %846 = vector.load %arg2[%c0_1939, %c0_1940, %c0_1941, %c12_1942, %c2_1943] : memref<1x1x8x14x38xbf16, #tpu.memory_space<vmem>>, vector<1x1x8x1x32xbf16>
    %847 = vector.shape_cast %846 : vector<1x1x8x1x32xbf16> to vector<8x32xbf16>
    %c0_1944 = arith.constant 0 : index
    %c0_1945 = arith.constant 0 : index
    %c0_1946 = arith.constant 0 : index
    %c12_1947 = arith.constant 12 : index
    %c3_1948 = arith.constant 3 : index
    %848 = vector.load %arg2[%c0_1944, %c0_1945, %c0_1946, %c12_1947, %c3_1948] : memref<1x1x8x14x38xbf16, #tpu.memory_space<vmem>>, vector<1x1x8x1x32xbf16>
    %849 = vector.shape_cast %848 : vector<1x1x8x1x32xbf16> to vector<8x32xbf16>
    %c0_1949 = arith.constant 0 : index
    %c0_1950 = arith.constant 0 : index
    %c0_1951 = arith.constant 0 : index
    %c12_1952 = arith.constant 12 : index
    %c4_1953 = arith.constant 4 : index
    %850 = vector.load %arg2[%c0_1949, %c0_1950, %c0_1951, %c12_1952, %c4_1953] : memref<1x1x8x14x38xbf16, #tpu.memory_space<vmem>>, vector<1x1x8x1x32xbf16>
    %851 = vector.shape_cast %850 : vector<1x1x8x1x32xbf16> to vector<8x32xbf16>
    %c0_1954 = arith.constant 0 : index
    %c0_1955 = arith.constant 0 : index
    %c0_1956 = arith.constant 0 : index
    %c12_1957 = arith.constant 12 : index
    %c5_1958 = arith.constant 5 : index
    %852 = vector.load %arg2[%c0_1954, %c0_1955, %c0_1956, %c12_1957, %c5_1958] : memref<1x1x8x14x38xbf16, #tpu.memory_space<vmem>>, vector<1x1x8x1x32xbf16>
    %853 = vector.shape_cast %852 : vector<1x1x8x1x32xbf16> to vector<8x32xbf16>
    %c0_1959 = arith.constant 0 : index
    %c0_1960 = arith.constant 0 : index
    %c0_1961 = arith.constant 0 : index
    %c12_1962 = arith.constant 12 : index
    %c6_1963 = arith.constant 6 : index
    %854 = vector.load %arg2[%c0_1959, %c0_1960, %c0_1961, %c12_1962, %c6_1963] : memref<1x1x8x14x38xbf16, #tpu.memory_space<vmem>>, vector<1x1x8x1x32xbf16>
    %855 = vector.shape_cast %854 : vector<1x1x8x1x32xbf16> to vector<8x32xbf16>
    %c0_1964 = arith.constant 0 : index
    %c0_1965 = arith.constant 0 : index
    %c0_1966 = arith.constant 0 : index
    %c13 = arith.constant 13 : index
    %c0_1967 = arith.constant 0 : index
    %856 = vector.load %arg2[%c0_1964, %c0_1965, %c0_1966, %c13, %c0_1967] : memref<1x1x8x14x38xbf16, #tpu.memory_space<vmem>>, vector<1x1x8x1x32xbf16>
    %857 = vector.shape_cast %856 : vector<1x1x8x1x32xbf16> to vector<8x32xbf16>
    %c0_1968 = arith.constant 0 : index
    %c0_1969 = arith.constant 0 : index
    %c0_1970 = arith.constant 0 : index
    %c13_1971 = arith.constant 13 : index
    %c1_1972 = arith.constant 1 : index
    %858 = vector.load %arg2[%c0_1968, %c0_1969, %c0_1970, %c13_1971, %c1_1972] : memref<1x1x8x14x38xbf16, #tpu.memory_space<vmem>>, vector<1x1x8x1x32xbf16>
    %859 = vector.shape_cast %858 : vector<1x1x8x1x32xbf16> to vector<8x32xbf16>
    %c0_1973 = arith.constant 0 : index
    %c0_1974 = arith.constant 0 : index
    %c0_1975 = arith.constant 0 : index
    %c13_1976 = arith.constant 13 : index
    %c2_1977 = arith.constant 2 : index
    %860 = vector.load %arg2[%c0_1973, %c0_1974, %c0_1975, %c13_1976, %c2_1977] : memref<1x1x8x14x38xbf16, #tpu.memory_space<vmem>>, vector<1x1x8x1x32xbf16>
    %861 = vector.shape_cast %860 : vector<1x1x8x1x32xbf16> to vector<8x32xbf16>
    %c0_1978 = arith.constant 0 : index
    %c0_1979 = arith.constant 0 : index
    %c0_1980 = arith.constant 0 : index
    %c13_1981 = arith.constant 13 : index
    %c3_1982 = arith.constant 3 : index
    %862 = vector.load %arg2[%c0_1978, %c0_1979, %c0_1980, %c13_1981, %c3_1982] : memref<1x1x8x14x38xbf16, #tpu.memory_space<vmem>>, vector<1x1x8x1x32xbf16>
    %863 = vector.shape_cast %862 : vector<1x1x8x1x32xbf16> to vector<8x32xbf16>
    %c0_1983 = arith.constant 0 : index
    %c0_1984 = arith.constant 0 : index
    %c0_1985 = arith.constant 0 : index
    %c13_1986 = arith.constant 13 : index
    %c4_1987 = arith.constant 4 : index
    %864 = vector.load %arg2[%c0_1983, %c0_1984, %c0_1985, %c13_1986, %c4_1987] : memref<1x1x8x14x38xbf16, #tpu.memory_space<vmem>>, vector<1x1x8x1x32xbf16>
    %865 = vector.shape_cast %864 : vector<1x1x8x1x32xbf16> to vector<8x32xbf16>
    %c0_1988 = arith.constant 0 : index
    %c0_1989 = arith.constant 0 : index
    %c0_1990 = arith.constant 0 : index
    %c13_1991 = arith.constant 13 : index
    %c5_1992 = arith.constant 5 : index
    %866 = vector.load %arg2[%c0_1988, %c0_1989, %c0_1990, %c13_1991, %c5_1992] : memref<1x1x8x14x38xbf16, #tpu.memory_space<vmem>>, vector<1x1x8x1x32xbf16>
    %867 = vector.shape_cast %866 : vector<1x1x8x1x32xbf16> to vector<8x32xbf16>
    %c0_1993 = arith.constant 0 : index
    %c0_1994 = arith.constant 0 : index
    %c0_1995 = arith.constant 0 : index
    %c13_1996 = arith.constant 13 : index
    %c6_1997 = arith.constant 6 : index
    %868 = vector.load %arg2[%c0_1993, %c0_1994, %c0_1995, %c13_1996, %c6_1997] : memref<1x1x8x14x38xbf16, #tpu.memory_space<vmem>>, vector<1x1x8x1x32xbf16>
    %869 = vector.shape_cast %868 : vector<1x1x8x1x32xbf16> to vector<8x32xbf16>
    %870 = tpu.concatenate %773, %775, %777, %779, %781, %783, %785, %787, %789, %791, %793, %795, %797, %799, %801, %803 in 0 : vector<8x32xbf16>, vector<8x32xbf16>, vector<8x32xbf16>, vector<8x32xbf16>, vector<8x32xbf16>, vector<8x32xbf16>, vector<8x32xbf16>, vector<8x32xbf16>, vector<8x32xbf16>, vector<8x32xbf16>, vector<8x32xbf16>, vector<8x32xbf16>, vector<8x32xbf16>, vector<8x32xbf16>, vector<8x32xbf16>, vector<8x32xbf16> -> vector<128x32xbf16>
    %871 = tpu.concatenate %805, %807, %809, %811, %813, %815, %817, %819, %821, %823, %825, %827, %829, %831, %833, %835 in 0 : vector<8x32xbf16>, vector<8x32xbf16>, vector<8x32xbf16>, vector<8x32xbf16>, vector<8x32xbf16>, vector<8x32xbf16>, vector<8x32xbf16>, vector<8x32xbf16>, vector<8x32xbf16>, vector<8x32xbf16>, vector<8x32xbf16>, vector<8x32xbf16>, vector<8x32xbf16>, vector<8x32xbf16>, vector<8x32xbf16>, vector<8x32xbf16> -> vector<128x32xbf16>
    %872 = tpu.concatenate %837, %839, %841, %843, %845, %847, %849, %851, %853, %855, %857, %859, %861, %863, %865, %867 in 0 : vector<8x32xbf16>, vector<8x32xbf16>, vector<8x32xbf16>, vector<8x32xbf16>, vector<8x32xbf16>, vector<8x32xbf16>, vector<8x32xbf16>, vector<8x32xbf16>, vector<8x32xbf16>, vector<8x32xbf16>, vector<8x32xbf16>, vector<8x32xbf16>, vector<8x32xbf16>, vector<8x32xbf16>, vector<8x32xbf16>, vector<8x32xbf16> -> vector<128x32xbf16>
    %873 = tpu.concatenate %870, %871, %872, %869 in 0 : vector<128x32xbf16>, vector<128x32xbf16>, vector<128x32xbf16>, vector<8x32xbf16> -> vector<392x32xbf16>
    %cst_1998 = arith.constant dense<0.000000e+00> : vector<32x32xf32>
    %874 = tpu.matmul %0, %873, %cst_1998 {dimension_numbers = #tpu.dot_dimension_numbers<[1], [0], [0], [1], [0, 0, 1, 1], [], []>} : vector<32x392xbf16>, vector<392x32xbf16>, vector<32x32xf32> -> vector<32x32xf32>
    %875 = vector.broadcast %1 : vector<32x1xf32> to vector<32x32xf32>
    %876 = arith.addf %874, %875 : vector<32x32xf32>
    %cst_1999 = arith.constant 0.000000e+00 : f32
    %877 = vector.broadcast %cst_1999 : f32 to vector<32x32xf32>
    %878 = arith.maximumf %876, %877 : vector<32x32xf32>
    %c0_2000 = arith.constant 0 : index
    %c0_2001 = arith.constant 0 : index
    %c0_2002 = arith.constant 0 : index
    %c7_2003 = arith.constant 7 : index
    %c0_2004 = arith.constant 0 : index
    %879 = vector.load %arg5[%c0_2000, %c0_2001, %c0_2002, %c7_2003, %c0_2004] : memref<1x32x1x8x32xf32, #tpu.memory_space<vmem>>, vector<1x32x1x1x32xf32>
    %880 = vector.shape_cast %879 : vector<1x32x1x1x32xf32> to vector<32x32xf32>
    %881 = vector.shape_cast %878 : vector<32x32xf32> to vector<1x32x1x1x32xf32>
    tpu.vector_store %arg5[%c0_2000, %c0_2001, %c0_2002, %c7_2003, %c0_2004], %881 {strides = array<i32>} : memref<1x32x1x8x32xf32, #tpu.memory_space<vmem>>, vector<1x32x1x1x32xf32>,
    return
  }
  func.func @transform_0(%arg0: i32, %arg1: i32) -> (i32, i32, i32, i32, i32) {
    %c0_i32 = arith.constant 0 : i32
    %c0_i32_0 = arith.constant 0 : i32
    %c0_i32_1 = arith.constant 0 : i32
    %c0_i32_2 = arith.constant 0 : i32
    return %arg0, %arg1, %c0_i32, %c0_i32_0, %c0_i32_1 : i32, i32, i32, i32, i32
  }
  func.func @transform_1(%arg0: i32, %arg1: i32) -> (i32, i32) {
    %c0_i32 = arith.constant 0 : i32
    %c0_i32_0 = arith.constant 0 : i32
    %c0_i32_1 = arith.constant 0 : i32
    return %c0_i32, %c0_i32_0 : i32, i32
  }
  func.func @transform_2(%arg0: i32, %arg1: i32) -> (i32, i32) {
    %c0_i32 = arith.constant 0 : i32
    %c0_i32_0 = arith.constant 0 : i32
    %c0_i32_1 = arith.constant 0 : i32
    return %c0_i32, %c0_i32_0 : i32, i32
  }
  func.func @transform_3(%arg0: i32, %arg1: i32) -> (i32, i32, i32, i32, i32) {
    %c0_i32 = arith.constant 0 : i32
    %c0_i32_0 = arith.constant 0 : i32
    %c0_i32_1 = arith.constant 0 : i32
    %c0_i32_2 = arith.constant 0 : i32
    return %arg0, %c0_i32, %arg1, %c0_i32_0, %c0_i32_1 : i32, i32, i32, i32, i32
  }
}

</mosaic_0001>

<bundles_post_ra>
// kernel: tpu_custom_call.1
= control target key start
LH: loop header
LB: loop body
LE: loop exit
PB: predicated region body
PF: predicated region fallthrough
CT: control target
= control target key end

     0   :  { %8 = vsyncpa [#allocation3], 0  ;;  %s12744_s0 = inlined_call_operand.vmem [shape: bf16[2,4,8,14,38], index: 0, kind: input, shape index: {}]   ;;  %s12745_s1 = inlined_call_operand.vmem [shape: bf16[32,392], index: 1, kind: input, shape index: {}]   ;;  %s12746_s2 = inlined_call_operand.vmem [shape: f32[32,1], index: 2, kind: input, shape index: {}]   ;;  %s12747_s3 = inlined_call_operand.hbm [shape: f32[2,32,4,8,32], index: 3, kind: output, shape index: {}]  }
   0x1   :  { %10 = vsyncpa [#allocation3 + $0x1], 0  ;;  %s8378_s12 = smov 0   ;;  %s8380_s13 = smov 0  }
   0x2   :  { %s8382_s14 = smov 0   ;;  %s8384_s15 = smov 0  }
   0x3   :  { %s8386_s16 = smov 0   ;;  %s8388_s17 = smov 0  }
   0x4   :  { %s8390_s18 = smov 0   ;;  %s8392_s19 = smov 0  }
   0x5 LB: > { %s7320_s20 = sadd.s32 4294967295, %s8340_s19   ;;  %s7321_s21 = sadd.s32 4294967294, %s8340_s19   ;;  %s8340_s19 = sphi %s8392_s19, %s16_s19   ;;  %s8336_s18 = sphi %s8390_s18, %s13020_s18   ;;  %s8332_s17 = sphi %s8388_s17, %s13019_s17   ;;  %s8328_s16 = sphi %s8386_s16, %s13018_s16   ;;  %s8324_s15 = sphi %s8384_s15, %s13017_s15   ;;  %s8320_s14 = sphi %s8382_s14, %s13016_s14   ;;  %s8316_s13 = sphi %s8380_s13, %s13015_s13   ;;  %s8312_s12 = sphi %s8378_s12, %s13014_s12  }
   0x6   : > { %s25_s22 = sadd.s32 1, %s8332_s17  ;;  %s28_s23 = sadd.s32 1, %s8336_s18 }
   0x7   : > { %p26_p0 = scmp.ge.s32.totalorder %s25_s22, 4  ;;  %p117_p1 = scmp.ne.s32.totalorder %s8320_s14, %s8316_s13 }
   0x8   : > { %p118_p2 = scmp.eq.s32.totalorder %s7320_s20, 7  ;;  %p123_p5 = scmp.ne.s32.totalorder %s8316_s13, %s8312_s12 }
   0x9   : > { %s13022_s22 = smov (%p26_p0, %s25_s22), 0  ;;  %s13024_s23 = smov (!%p26_p0, %s28_s23), %s8336_s18 }
   0xa   : > { %s103_s24 = ssub.s32 %s8332_s17, %s13022_s22  ;;  %p8429_p3 = por %p118_p2, %p117_p1 }
   0xb   : > { %p30_p4 = scmp.ge.s32.totalorder %s13024_s23, 2  ;;  %p124_p6 = scmp.eq.s32.totalorder %s7321_s21, 7 }
   0xc   : > { %p7324_p7 = scmp.ge.s32.totalorder %s8340_s19, 1  ;;  %p160_p9 = scmp.lt.s32.totalorder %s8340_s19, 9 }
   0xd   : > { %s13026_s23 = smov (%p30_p4, %s13024_s23), 0  ;;  %p8438_p8 = por %p124_p6, %p123_p5 }
   0xe   : > { %s102_s27 = ssub.s32 %s8336_s18, %s13026_s23  ;;  %s107_s28 = sadd.s32 1, %s8320_s14 }
   0xf   : > { %s104_s29 = sor.u32 %s103_s24, %s102_s27  ;;  %p161_p10 = pnand %p7324_p7, %p160_p9 }
  0x10   : > { %p105_p11 = scmp.eq.s32.totalorder %s104_s29, 0 }
  0x11   : > { %164 = sbr.rel (%p161_p10) target bundleno = 1598 (0x63e), region = 32 }
  0x12   : > { %s8447_s30 = scalar_select %p105_p11, %s8320_s14, %s107_s28  }
  0x18   : > { %p188_p12 = scmp.lt.s32.totalorder %s8328_s16, 1  ;;  %p190_p13 = scmp.lt.s32.totalorder %s8324_s15, 3  ;;  %v12752_v0 = vmov 0   ;;  %vm275_vm0 = vcmask 1041409   ;;  %vm278_vm1 = vcmask 1042434   ;;  %vm281_vm2 = vcmask 1043459  }
  0x19   : > { %7943 = vset.pattern.permute.xlu1 %v12752_v0  ;;  %7942 = vset.pattern.permute.xlu0 %v12752_v0  ;;  %vm284_vm3 = vcmask 1044484   ;;  %vm287_vm4 = vcmask 1045509   ;;  %vm290_vm5 = vcmask 1046534   ;;  %vm293_vm6 = vcmask 1047559   ;;  %s12830_s21 = smov 125   ;;  %s8344_s24 = smov 127  }
  0x1a   : > { %s189_s4 = scalar_select %p188_p12, %s8328_s16, 1  ;;  %836 = vmatprep.subr.bf16.mxu1 %v12752_v0  ;;  %vm407_vm7 = vcmask 1043456   ;;  %vm777_vm8 = vcmask 64512   ;;  %vm1121_vm9 = vcmask 253952  }
  0x1b   : > { %s191_s5 = scalar_select %p190_p13, %s8324_s15, 3 }
  0x1c   : > { %s7327_s6 = sshll.u32 %s189_s4, 6  ;;  %s12783_s27 = smov 124  }
  0x1d   : > { %s7326_s7 = sshll.u32 %s191_s5, 4  ;;  %s8346_s28 = smov 126  }
  0x1e   : > { %s194_s8 = sadd.s32 %s7327_s6, %s7326_s7  ;;  %s12781_s29 = smov 122  }
  0x1f   : > { %s7328_s9 = sshll.u32 %s194_s8, 2  ;;  %s8348_s4 = smov 123  }
  0x20   : > { %s8459_s20 = scalar_lea.vmem %s12744_s0, %s7328_s9  ;;  %s12807_s5 = smov 1  }
  0x21   : > { %v7944_v1 = vld [vmem:[%s8459_s20] ss:$0 sps:$4 sm:$0x11]   ;;  %v7945_v2 = vld [vmem:[%s8459_s20 + $0x8] ss:$0 sps:$4 sm:$0x11]  }
  0x22   : > { %v7946_v3 = vld [vmem:[%s8459_s20 + $0x10] ss:$0 sps:$4 sm:$0x11]   ;;  %v7947_v4 = vld [vmem:[%s8459_s20 + $0x18] ss:$0 sps:$4 sm:$0x11]   ;;  %v267_v7 = vunpack.c.l.b16 %v7945_v2  ;;  %v296_v8 = vunpack.c.h.b16 %v7944_v1  ;;  %v297_v9 = vunpack.c.h.b16 %v7945_v2  ;;  %v266_v15 = vunpack.c.l.b16 %v7944_v1 }
  0x23   : > { %v7948_v5 = vld [vmem:[%s8459_s20 + $0x20] ss:$0 sps:$4 sm:$0x11]   ;;  %v7949_v6 = vld [vmem:[%s8459_s20 + $0x28] ss:$0 sps:$4 sm:$0x11]   ;;  %v268_v12 = vunpack.c.l.b16 %v7946_v3  ;;  %v298_v13 = vunpack.c.h.b16 %v7946_v3  ;;  %v299_v14 = vunpack.c.h.b16 %v7947_v4  ;;  %v269_v16 = vunpack.c.l.b16 %v7947_v4 }
  0x24   : > { %v7950_v10 = vld [vmem:[%s8459_s20 + $0x30] ss:$0 sps:$4 sm:$0x11]   ;;  %v7951_v11 = vld [vmem:[%s8459_s20 + $0x38] ss:$0 sps:$4 sm:$0x11]   ;;  %v270_v17 = vunpack.c.l.b16 %v7948_v5  ;;  %v300_v18 = vunpack.c.h.b16 %v7948_v5  ;;  %v301_v19 = vunpack.c.h.b16 %v7949_v6  ;;  %v271_v20 = vunpack.c.l.b16 %v7949_v6 }
  0x25   : > { %v272_v21 = vunpack.c.l.b16 %v7950_v10  ;;  %v302_v22 = vunpack.c.h.b16 %v7950_v10  ;;  %v303_v23 = vunpack.c.h.b16 %v7951_v11  ;;  %v273_v24 = vunpack.c.l.b16 %v7951_v11  ;;  %v7952_v44 = vld [vmem:[%s8459_s20] ss:$0 sps:$4 sm:$0x22]   ;;  %v7953_v49 = vld [vmem:[%s8459_s20 + $0x8] ss:$0 sps:$4 sm:$0x22]  }
  0x26   : > { %v304_v25 = vrot.slane %v297_v9, 7  ;;  %v306_v26 = vrot.slane %v298_v13, 6  ;;  %v308_v27 = vrot.slane %v299_v14, 5  ;;  %v310_v28 = vrot.slane %v300_v18, 4  ;;  %s12828_s6 = smov 2   ;;  %s12748_s7 = smov 3  }
  0x27   : > { %v312_v29 = vrot.slane %v301_v19, 3  ;;  %v314_v30 = vrot.slane %v302_v22, 2  ;;  %v316_v31 = vrot.slane %v303_v23, 1  ;;  %v333_v33 = vrot.slane %v268_v12, 7  ;;  %s12750_s8 = smov 4   ;;  %s12852_s9 = smov 3  }
  0x28   : > { %v305_v32 = vsel %vm275_vm0, %v304_v25, %v296_v8  ;;  %v335_v34 = vrot.slane %v269_v16, 6  ;;  %v337_v35 = vrot.slane %v270_v17, 5  ;;  %v339_v37 = vrot.slane %v271_v20, 4  ;;  %v8480_v54 = vld [vmem:[%s8459_s20 + $0x18] ss:$0 sps:$4 sm:$0x22]  }
  0x29   : > { %v307_v36 = vsel %vm278_vm1, %v306_v26, %v305_v32  ;;  %v341_v38 = vrot.slane %v272_v21, 3  ;;  %v331_v39 = vrot.slane %v266_v15, 1  ;;  %v274_v41 = vrot.slane %v267_v7, 7  ;;  %v7956_v59 = vld [vmem:[%s8459_s20 + $0x20] ss:$0 sps:$4 sm:$0x22]  }
  0x2a   : > { %v309_v40 = vsel %vm281_vm2, %v308_v27, %v307_v36  ;;  %v277_v42 = vrot.slane %v268_v12, 6  ;;  %v280_v43 = vrot.slane %v269_v16, 5  ;;  %v283_v47 = vrot.slane %v270_v17, 4  ;;  %v7954_v63 = vld [vmem:[%s8459_s20 + $0x10] ss:$0 sps:$4 sm:$0x22]  }
  0x2b   : > { %v311_v45 = vsel %vm284_vm3, %v310_v28, %v309_v40  ;;  %v332_v46 = vsel %vm275_vm0, %v267_v7, %v331_v39  ;;  %v286_v48 = vrot.slane %v271_v20, 3  ;;  %v276_v52 = vsel %vm275_vm0, %v274_v41, %v266_v15  ;;  %v8491_v1 = vld [vmem:[%s8459_s20 + $0x28] ss:$0 sps:$4 sm:$0x22]   ;;  %s12853_s10 = smov 4  }
  0x2c   : > { %v313_v50 = vsel %vm287_vm4, %v312_v29, %v311_v45  ;;  %v334_v51 = vsel %vm278_vm1, %v333_v33, %v332_v46  ;;  %v289_v53 = vrot.slane %v272_v21, 2  ;;  %v279_v57 = vsel %vm278_vm1, %v277_v42, %v276_v52  ;;  %v7958_v17 = vld [vmem:[%s8459_s20 + $0x30] ss:$0 sps:$4 sm:$0x22]  }
  0x2d   : > { %v315_v55 = vsel %vm290_vm5, %v314_v30, %v313_v50  ;;  %v336_v56 = vsel %vm281_vm2, %v335_v34, %v334_v51  ;;  %v292_v58 = vrot.slane %v273_v24, 1  ;;  %v282_v62 = vsel %vm281_vm2, %v280_v43, %v279_v57  ;;  %v7959_v21 = vld [vmem:[%s8459_s20 + $0x38] ss:$0 sps:$4 sm:$0x22]  }
  0x2e   : > { %v317_v60 = vsel %vm293_vm6, %v316_v31, %v315_v55  ;;  %v338_v61 = vsel %vm284_vm3, %v337_v35, %v336_v56  ;;  %v382_v2 = vunpack.c.l.b16 %v7952_v44  ;;  %v285_v5 = vsel %vm284_vm3, %v283_v47, %v282_v62  ;;  %v7960_v28 = vld [vmem:[%s8459_s20] ss:$0 sps:$4 sm:$0x44]   ;;  %v7961_v29 = vld [vmem:[%s8459_s20 + $0x8] ss:$0 sps:$4 sm:$0x44]  }
  0x2f   : > { %v318_v3 = vpack.c.b16 %v317_v60, %v317_v60  ;;  %v340_v4 = vsel %vm287_vm4, %v339_v37, %v338_v61  ;;  %v383_v6 = vunpack.c.l.b16 %v7953_v49  ;;  %v288_v7 = vsel %vm287_vm4, %v286_v48, %v285_v5  ;;  %v7962_v34 = vld [vmem:[%s8459_s20 + $0x10] ss:$0 sps:$4 sm:$0x44]   ;;  %v7963_v48 = vld [vmem:[%s8459_s20 + $0x18] ss:$0 sps:$4 sm:$0x44]  }
  0x30   : > { %v385_v8 = vunpack.c.l.b16 %v8480_v54  ;;  %v343_v9 = vrot.slane %v273_v24, 2  ;;  %v291_v10 = vsel %vm290_vm5, %v289_v53, %v288_v7  ;;  %v386_v11 = vunpack.c.l.b16 %v7956_v59  ;;  %v7965_v59 = vld [vmem:[%s8459_s20 + $0x28] ss:$0 sps:$4 sm:$0x44]  }
  0x31   : > { %323 = vrot.lane.b32.xlu1 %v318_v3, %s12830_s21  ;;  %319 = vrot.lane.b32.xlu0 %v318_v3, %s8344_s24  ;;  %v342_v12 = vsel %vm290_vm5, %v341_v38, %v340_v4  ;;  %v294_v13 = vsel %vm293_vm6, %v292_v58, %v291_v10  ;;  %v384_v14 = vunpack.c.l.b16 %v7954_v63  ;;  %v387_v15 = vunpack.c.l.b16 %v8491_v1  ;;  %v7964_v62 = vld [vmem:[%s8459_s20 + $0x20] ss:$0 sps:$4 sm:$0x44]  }
  0x32   : > { %v8503_v16 = vpack.c.b16 %v294_v13, %v294_v13  ;;  %v390_v18 = vrot.slane %v382_v2, 2  ;;  %v391_v19 = vrot.slane %v383_v6, 1  ;;  %v394_v20 = vrot.slane %v385_v8, 7  ;;  %v7969_v13 = vld [vmem:[%s8459_s20 + $0x8] ss:$0 sps:$4 sm:$0x88]  }
  0x33   : > { %v396_v23 = vrot.slane %v386_v11, 6  ;;  %v446_v24 = vrot.slane %v382_v2, 3  ;;  %v447_v25 = vrot.slane %v383_v6, 2  ;;  %v344_v26 = vsel %vm293_vm6, %v343_v9, %v342_v12  ;;  %v7968_v12 = vld [vmem:[%s8459_s20] ss:$0 sps:$4 sm:$0x88]  }
  0x34   : > { %v392_v22 = vsel %vm275_vm0, %v391_v19, %v390_v18  ;;  %v388_v30 = vunpack.c.l.b16 %v7958_v17  ;;  %v398_v32 = vrot.slane %v387_v15, 5  ;;  %v449_v33 = vrot.slane %v384_v14, 1 }
  0x35   : > { %325 = vrot.lane.b32.xlu1 %v8503_v16, %s12783_s27  ;;  %321 = vrot.lane.b32.xlu0 %v8503_v16, %s8346_s28  ;;  %v393_v27 = vsel %vm278_vm1, %v384_v14, %v392_v22  ;;  %v448_v35 = vsel %vm275_vm0, %v447_v25, %v446_v24  ;;  %v8519_v36 = vpack.c.b16 %v344_v26, %v344_v26  ;;  %v389_v38 = vunpack.c.l.b16 %v7959_v21  ;;  %v7970_v25 = vld [vmem:[%s8459_s20 + $0x10] ss:$0 sps:$4 sm:$0x88]  }
  0x36   : > { %v395_v31 = vsel %vm281_vm2, %v394_v20, %v393_v27  ;;  %v400_v39 = vrot.slane %v388_v30, 4  ;;  %v450_v40 = vsel %vm278_vm1, %v449_v33, %v448_v35  ;;  %v497_v42 = vunpack.c.l.b16 %v7960_v28 }
  0x37   : > { %v397_v37 = vsel %vm284_vm3, %v396_v23, %v395_v31  ;;  %v498_v43 = vunpack.c.l.b16 %v7961_v29  ;;  %v452_v44 = vrot.slane %v386_v11, 7  ;;  %v499_v45 = vunpack.c.l.b16 %v7962_v34  ;;  %v7972_v34 = vld [vmem:[%s8459_s20 + $0x20] ss:$0 sps:$4 sm:$0x88]  }
  0x38   : > { %v399_v41 = vsel %vm287_vm4, %v398_v32, %v397_v37  ;;  %v402_v46 = vrot.slane %v389_v38, 3  ;;  %v451_v47 = vsel %vm281_vm2, %v385_v8, %v450_v40  ;;  %v454_v50 = vrot.slane %v387_v15, 6  ;;  %v7967_v8 = vld [vmem:[%s8459_s20 + $0x38] ss:$0 sps:$4 sm:$0x44]  }
  0x39   : > { %329 = vrot.lane.b32.xlu1 %v8503_v16, %s12781_s29  ;;  %327 = vrot.lane.b32.xlu0 %v318_v3, %s8348_s4  ;;  %v401_v49 = vsel %vm290_vm5, %v400_v39, %v399_v41  ;;  %v505_v51 = vrot.slane %v497_v42, 4  ;;  %v506_v52 = vrot.slane %v498_v43, 3  ;;  %v456_v53 = vrot.slane %v388_v30, 5  ;;  %v7966_v3 = vld [vmem:[%s8459_s20 + $0x30] ss:$0 sps:$4 sm:$0x44]  }
  0x3a   : > { %v453_v54 = vsel %vm284_vm3, %v452_v44, %v451_v47  ;;  %v508_v55 = vrot.slane %v499_v45, 2  ;;  %v403_v56 = vsel %vm293_vm6, %v402_v46, %v401_v49  ;;  %v500_v57 = vunpack.c.l.b16 %v7963_v48  ;;  %v7971_v30 = vld [vmem:[%s8459_s20 + $0x18] ss:$0 sps:$4 sm:$0x88]  }
  0x3b   : > { %v455_v58 = vsel %vm287_vm4, %v454_v50, %v453_v54  ;;  %v507_v60 = vsel %vm275_vm0, %v506_v52, %v505_v51  ;;  %v8547_v61 = vpack.c.b16 %v403_v56, %v403_v56  ;;  %v458_v63 = vrot.slane %v389_v38, 4  ;;  %v7973_v40 = vld [vmem:[%s8459_s20 + $0x28] ss:$0 sps:$4 sm:$0x88]  }
  0x3c   : > { %v510_v1 = vrot.slane %v500_v57, 1  ;;  %v457_v2 = vsel %vm290_vm5, %v456_v53, %v455_v58  ;;  %v509_v4 = vsel %vm278_vm1, %v508_v55, %v507_v60  ;;  %v502_v5 = vunpack.c.l.b16 %v7965_v59  ;;  %v7975_v53 = vld [vmem:[%s8459_s20 + $0x38] ss:$0 sps:$4 sm:$0x88]  }
  0x3d   : > { %348 = vrot.lane.b32.xlu1 %v8519_v36, %s8346_s28  ;;  %346 = vrot.lane.b32.xlu0 %v8519_v36, %s8344_s24  ;;  %v549_v6 = vrot.slane %v497_v42, 5  ;;  %v550_v7 = vrot.slane %v498_v43, 4  ;;  %v501_v9 = vunpack.c.l.b16 %v7964_v62  ;;  %v459_v10 = vsel %vm293_vm6, %v458_v63, %v457_v2  ;;  %v7974_v55 = vld [vmem:[%s8459_s20 + $0x30] ss:$0 sps:$4 sm:$0x88]  }
  0x3e   : > { %v511_v11 = vsel %vm281_vm2, %v510_v1, %v509_v4  ;;  %v503_v14 = vunpack.c.l.b16 %v7966_v3  ;;  %v552_v15 = vrot.slane %v499_v45, 3  ;;  %v513_v17 = vrot.slane %v502_v5, 7  ;;  %v7976_v60 = vld [vmem:[%s8459_s20] ss:$0 sps:$4 sm:$0x11]  }
  0x3f   : > { %v551_v18 = vsel %vm275_vm0, %v550_v7, %v549_v6  ;;  %v8567_v19 = vpack.c.b16 %v459_v10, %v459_v10  ;;  %v512_v20 = vsel %vm284_vm3, %v501_v9, %v511_v11  ;;  %v504_v21 = vunpack.c.l.b16 %v7967_v8  ;;  %v7978_v2 = vld [vmem:[%s8459_s20 + $0x10] ss:$0 sps:$4 sm:$0x11]   ;;  %v7977_v3 = vld [vmem:[%s8459_s20 + $0x8] ss:$0 sps:$4 sm:$0x11]  }
  0x40   : > { %v554_v22 = vrot.slane %v500_v57, 2  ;;  %v515_v23 = vrot.slane %v503_v14, 6  ;;  %v553_v24 = vsel %vm278_vm1, %v552_v15, %v551_v18  ;;  %v514_v26 = vsel %vm287_vm4, %v513_v17, %v512_v20  ;;  %v7979_v6 = vld [vmem:[%s8459_s20 + $0x18] ss:$0 sps:$4 sm:$0x11]  }
  0x41   : > { %352 = vrot.lane.b32.xlu1 %v8519_v36, %s12783_s27  ;;  %350 = vrot.lane.b32.xlu0 %v8519_v36, %s12830_s21  ;;  %v600_v27 = vunpack.c.l.b16 %v7968_v12  ;;  %v601_v28 = vunpack.c.l.b16 %v7969_v13  ;;  %v556_v29 = vrot.slane %v501_v9, 1  ;;  %v517_v31 = vrot.slane %v504_v21, 5  ;;  %v7980_v9 = vld [vmem:[%s8459_s20 + $0x20] ss:$0 sps:$4 sm:$0x11]  }
  0x42   : > { %v555_v32 = vsel %vm281_vm2, %v554_v22, %v553_v24  ;;  %v516_v33 = vsel %vm290_vm5, %v515_v23, %v514_v26  ;;  %v602_v35 = vunpack.c.l.b16 %v7970_v25  ;;  %v603_v41 = vunpack.c.l.b16 %v7971_v30  ;;  %v7981_v10 = vld [vmem:[%s8459_s20 + $0x28] ss:$0 sps:$4 sm:$0x11]   ;;  %v8626_v13 = vld [vmem:[%s8459_s20] ss:$0 sps:$4 sm:$0x22]  }
  0x43   : > { %v608_v37 = vrot.slane %v600_v27, 6  ;;  %v609_v38 = vrot.slane %v601_v28, 5  ;;  %v557_v39 = vsel %vm284_vm3, %v556_v29, %v555_v32  ;;  %v518_v42 = vsel %vm293_vm6, %v517_v31, %v516_v33  ;;  %v7985_v17 = vld [vmem:[%s8459_s20 + $0x8] ss:$0 sps:$4 sm:$0x22]  }
  0x44   : > { %v559_v43 = vrot.slane %v503_v14, 7  ;;  %v611_v44 = vrot.slane %v602_v35, 4  ;;  %v558_v45 = vsel %vm287_vm4, %v502_v5, %v557_v39  ;;  %v561_v46 = vrot.slane %v504_v21, 6  ;;  %v7982_v26 = vld [vmem:[%s8459_s20 + $0x30] ss:$0 sps:$4 sm:$0x11]  }
  0x45   : > { %356 = vrot.lane.b32.xlu1 %v8519_v36, %s12781_s29  ;;  %354 = vrot.lane.b32.xlu0 %v8519_v36, %s8348_s4  ;;  %v610_v47 = vsel %vm275_vm0, %v609_v38, %v608_v37  ;;  %v8594_v48 = vpack.c.b16 %v518_v42, %v518_v42  ;;  %v604_v49 = vunpack.c.l.b16 %v7972_v34  ;;  %v605_v50 = vunpack.c.l.b16 %v7973_v40  ;;  %v7983_v31 = vld [vmem:[%s8459_s20 + $0x38] ss:$0 sps:$4 sm:$0x11]   ;;  %v7986_v35 = vld [vmem:[%s8459_s20 + $0x10] ss:$0 sps:$4 sm:$0x22]  }
  0x46   : > { %v613_v51 = vrot.slane %v603_v41, 3  ;;  %v560_v52 = vsel %vm290_vm5, %v559_v43, %v558_v45  ;;  %v612_v54 = vsel %vm278_vm1, %v611_v44, %v610_v47  ;;  %v607_v63 = vunpack.c.l.b16 %v7975_v53  ;;  %v7987_v34 = vld [vmem:[%s8459_s20 + $0x18] ss:$0 sps:$4 sm:$0x22]   ;;  %v206_v53 = vld [vmem:[%s12746_s2] sm:$0xff] }
  0x47   : > { %v615_v56 = vrot.slane %v604_v49, 2  ;;  %v617_v57 = vrot.slane %v605_v50, 1  ;;  %v562_v58 = vsel %vm293_vm6, %v561_v46, %v560_v52  ;;  %v606_v4 = vunpack.c.l.b16 %v7974_v55  ;;  %v7988_v41 = vld [vmem:[%s8459_s20 + $0x20] ss:$0 sps:$4 sm:$0x22]   ;;  %v207_v49 = vld [vmem:[%s12746_s2 + $0x8] sm:$0xff] }
  0x48   : > { %v614_v59 = vsel %vm281_vm2, %v613_v51, %v612_v54  ;;  %v8611_v62 = vpack.c.b16 %v562_v58, %v562_v58  ;;  %v1210_v7 = vunpack.c.l.b16 %v7976_v60  ;;  %v620_v8 = vrot.slane %v607_v63, 7  ;;  %v7989_v44 = vld [vmem:[%s8459_s20 + $0x28] ss:$0 sps:$4 sm:$0x22]  }
  0x49   : > { %440 = vrot.lane.b32.xlu1 %v8547_v61, %s8346_s28  ;;  %405 = vrot.lane.b32.xlu0 %v8547_v61, %s8344_s24  ;;  %v616_v1 = vsel %vm284_vm3, %v615_v56, %v614_v59  ;;  %v1212_v12 = vunpack.c.l.b16 %v7978_v2  ;;  %v1211_v14 = vunpack.c.l.b16 %v7977_v3  ;;  %v1213_v20 = vunpack.c.l.b16 %v7979_v6  ;;  %v7990_v55 = vld [vmem:[%s8459_s20 + $0x30] ss:$0 sps:$4 sm:$0x22]   ;;  %v7991_v60 = vld [vmem:[%s8459_s20 + $0x38] ss:$0 sps:$4 sm:$0x22]  }
  0x4a   : > { %v618_v5 = vsel %vm287_vm4, %v617_v57, %v616_v1  ;;  %v1218_v15 = vrot.slane %v1210_v7, 1  ;;  %v1214_v22 = vunpack.c.l.b16 %v7980_v9  ;;  %v1215_v23 = vunpack.c.l.b16 %v7981_v10  ;;  %v208_v1 = vld [vmem:[%s12746_s2 + $0x10] sm:$0xff]  ;;  %v209_v3 = vld [vmem:[%s12746_s2 + $0x18] sm:$0xff] }
  0x4b   : > { %v619_v11 = vsel %vm290_vm5, %v606_v4, %v618_v5  ;;  %v1220_v21 = vrot.slane %v1212_v12, 7  ;;  %v1269_v27 = vunpack.c.l.b16 %v8626_v13  ;;  %v1270_v28 = vunpack.c.l.b16 %v7985_v17 }
  0x4c   : > { %v621_v18 = vsel %vm293_vm6, %v620_v8, %v619_v11  ;;  %v1219_v24 = vsel %vm275_vm0, %v1211_v14, %v1218_v15  ;;  %v1222_v29 = vrot.slane %v1213_v20, 6  ;;  %v1224_v32 = vrot.slane %v1214_v22, 5 }
  0x4d   : > { %444 = vrot.lane.b32.xlu1 %v8547_v61, %s12783_s27  ;;  %442 = vrot.lane.b32.xlu0 %v8547_v61, %s12830_s21  ;;  %v8639_v25 = vpack.c.b16 %v621_v18, %v621_v18  ;;  %v1221_v30 = vsel %vm278_vm1, %v1220_v21, %v1219_v24  ;;  %v1226_v33 = vrot.slane %v1215_v23, 4  ;;  %v1277_v37 = vrot.slane %v1269_v27, 2 }
  0x4e   : > { %v1278_v38 = vrot.slane %v1270_v28, 1  ;;  %v1223_v39 = vsel %vm281_vm2, %v1222_v29, %v1221_v30  ;;  %v1216_v40 = vunpack.c.l.b16 %v7982_v26  ;;  %v1217_v43 = vunpack.c.l.b16 %v7983_v31 }
  0x4f   : > { %v1225_v42 = vsel %vm284_vm3, %v1224_v32, %v1223_v39  ;;  %v1272_v45 = vunpack.c.l.b16 %v7987_v34  ;;  %v1271_v47 = vunpack.c.l.b16 %v7986_v35  ;;  %v1273_v52 = vunpack.c.l.b16 %v7988_v41 }
  0x50   : > { %v1228_v46 = vrot.slane %v1216_v40, 3  ;;  %v1227_v50 = vsel %vm287_vm4, %v1226_v33, %v1225_v42  ;;  %v1279_v51 = vsel %vm275_vm0, %v1278_v38, %v1277_v37  ;;  %v1230_v54 = vrot.slane %v1217_v43, 2 }
  0x51   : > { %463 = vrot.lane.b32.xlu1 %v8567_v19, %s12807_s5  ;;  %461 = vrot.lane.b32.xlu0 %v8567_v19, %s12828_s6  ;;  %v1281_v56 = vrot.slane %v1272_v45, 7  ;;  %v1280_v58 = vsel %vm278_vm1, %v1271_v47, %v1279_v51  ;;  %v1274_v59 = vunpack.c.l.b16 %v7989_v44  ;;  %v1283_v63 = vrot.slane %v1273_v52, 6 }
  0x52   : > { %v1229_v57 = vsel %vm290_vm5, %v1228_v46, %v1227_v50  ;;  %v1275_v4 = vunpack.c.l.b16 %v7990_v55  ;;  %v1304_v7 = vrot.slane %v1269_v27, 3  ;;  %v1305_v8 = vrot.slane %v1270_v28, 2 }
  0x53   : > { %v1231_v2 = vsel %vm293_vm6, %v1230_v54, %v1229_v57  ;;  %v1282_v5 = vsel %vm281_vm2, %v1281_v56, %v1280_v58  ;;  %v1285_v6 = vrot.slane %v1274_v59, 5  ;;  %v1276_v10 = vunpack.c.l.b16 %v7991_v60 }
  0x54   : > { %v8683_v9 = vpack.c.b16 %v1231_v2, %v1231_v2  ;;  %v1284_v11 = vsel %vm284_vm3, %v1283_v63, %v1282_v5  ;;  %v1287_v12 = vrot.slane %v1275_v4, 4  ;;  %v1307_v13 = vrot.slane %v1271_v47, 1  ;;  %v7993_v2 = vld [vmem:[%s8459_s20 + $0x8] ss:$0 sps:$4 sm:$0x44]  }
  0x55   : > { %467 = vrot.lane.b32.xlu1 %v8567_v19, %s8346_s28  ;;  %465 = vrot.lane.b32.xlu0 %v8567_v19, %s8344_s24  ;;  %v1286_v14 = vsel %vm287_vm4, %v1285_v6, %v1284_v11  ;;  %v1306_v15 = vsel %vm275_vm0, %v1305_v8, %v1304_v7  ;;  %v1289_v17 = vrot.slane %v1276_v10, 3  ;;  %v1310_v21 = vrot.slane %v1273_v52, 7  ;;  %v7995_v11 = vld [vmem:[%s8459_s20 + $0x18] ss:$0 sps:$4 sm:$0x44]  }
  0x56   : > { %v1288_v18 = vsel %vm290_vm5, %v1287_v12, %v1286_v14  ;;  %v1308_v20 = vsel %vm278_vm1, %v1307_v13, %v1306_v15  ;;  %v1312_v24 = vrot.slane %v1274_v59, 6  ;;  %v1314_v28 = vrot.slane %v1275_v4, 5  ;;  %v7994_v4 = vld [vmem:[%s8459_s20 + $0x10] ss:$0 sps:$4 sm:$0x44]  }
  0x57   : > { %v1290_v22 = vsel %vm293_vm6, %v1289_v17, %v1288_v18  ;;  %v1309_v23 = vsel %vm281_vm2, %v1272_v45, %v1308_v20  ;;  %v1316_v30 = vrot.slane %v1276_v10, 4  ;;  %v1384_v8 = vunpack.c.l.b16 %v7993_v2  ;;  %v8001_v2 = vld [vmem:[%s8459_s20 + $0x8] ss:$0 sps:$4 sm:$0x88]  }
  0x58   : > { %v8702_v26 = vpack.c.b16 %v1290_v22, %v1290_v22  ;;  %v1311_v27 = vsel %vm284_vm3, %v1310_v21, %v1309_v23  ;;  %v1385_v12 = vunpack.c.l.b16 %v7994_v4  ;;  %v1386_v20 = vunpack.c.l.b16 %v7995_v11 }
  0x59   : > { %471 = vrot.lane.b32.xlu1 %v8567_v19, %s12783_s27  ;;  %469 = vrot.lane.b32.xlu0 %v8567_v19, %s12830_s21  ;;  %v1313_v29 = vsel %vm287_vm4, %v1312_v24, %v1311_v27  ;;  %v1392_v17 = vrot.slane %v1384_v8, 3  ;;  %v8784_v24 = vld [vmem:[%s8459_s20 + $0x28] ss:$0 sps:$4 sm:$0x44]  }
  0x5a   : > { %v1315_v31 = vsel %vm290_vm5, %v1314_v28, %v1313_v29  ;;  %v1394_v21 = vrot.slane %v1385_v12, 2  ;;  %v7996_v29 = vld [vmem:[%s8459_s20 + $0x20] ss:$0 sps:$4 sm:$0x44]   ;;  %v1421_v11 = vrot.slane %v1385_v12, 3 }
  0x5b   : > { %v1317_v32 = vsel %vm293_vm6, %v1316_v30, %v1315_v31 }
  0x5c   : > { %v8720_v33 = vpack.c.b16 %v1317_v32, %v1317_v32 }
  0x5d   : > { %522 = vrot.lane.b32.xlu1 %v8594_v48, %s12807_s5  ;;  %520 = vrot.lane.b32.xlu0 %v8594_v48, %s12828_s6 }
  0x61   : > { %547 = vrot.lane.b32.xlu1 %v8594_v48, %s8346_s28  ;;  %524 = vrot.lane.b32.xlu0 %v8594_v48, %s8344_s24 }
  0x65   : > { %566 = vrot.lane.b32.xlu1 %v8611_v62, %s12748_s7  ;;  %564 = vrot.lane.b32.xlu0 %v8611_v62, %s12750_s8 }
  0x69   : > { %570 = vrot.lane.b32.xlu1 %v8611_v62, %s12807_s5  ;;  %568 = vrot.lane.b32.xlu0 %v8611_v62, %s12828_s6 }
  0x6d   : > { %574 = vrot.lane.b32.xlu1 %v8611_v62, %s8346_s28  ;;  %572 = vrot.lane.b32.xlu0 %v8611_v62, %s8344_s24 }
  0x71   : > { %625 = vrot.lane.b32.xlu1 %v8639_v25, %s12748_s7  ;;  %623 = vrot.lane.b32.xlu0 %v8639_v25, %s12750_s8 }
  0x75   : > { %629 = vrot.lane.b32.xlu1 %v8639_v25, %s12807_s5  ;;  %627 = vrot.lane.b32.xlu0 %v8639_v25, %s12828_s6 }
  0x79   : > { %631 = vrot.lane.b32.xlu0 %v8639_v25, %s8344_s24  ;;  %717 = vrot.lane.b32.xlu1 %v8639_v25, %s12781_s29 }
  0x7d   : > { %726 = vperm.xlu1 %7943, %v207_v49   ;;  %721 = vperm.xlu0 %7942, %v206_v53  }
  0x81   : > { %731 = vperm.xlu1 %7943, %v208_v1   ;;  %736 = vperm.xlu0 %7942, %v209_v3   ;;  %v7992_v1 = vld [vmem:[%s8459_s20] ss:$0 sps:$4 sm:$0x44]  }
  0x82   : > { %v1383_v7 = vunpack.c.l.b16 %v7992_v1  ;;  %v8000_v1 = vld [vmem:[%s8459_s20] ss:$0 sps:$4 sm:$0x88]  }
  0x84   : > { %v1391_v15 = vrot.slane %v1383_v7, 4 }
  0x85   : > { %1233 = vrot.lane.b32.xlu1 %v8683_v9, %s8344_s24  ;;  %1235 = vrot.lane.b32.xlu0 %v8683_v9, %s8346_s28 }
  0x86   : > { %v1393_v27 = vsel %vm275_vm0, %v1392_v17, %v1391_v15  ;;  %v1487_v15 = vunpack.c.l.b16 %v8001_v2 }
  0x87   : > { %v1395_v30 = vsel %vm278_vm1, %v1394_v21, %v1393_v27  ;;  %v8003_v21 = vld [vmem:[%s8459_s20 + $0x18] ss:$0 sps:$4 sm:$0x88]  }
  0x89   : > { %1237 = vrot.lane.b32.xlu1 %v8683_v9, %s12830_s21  ;;  %1239 = vrot.lane.b32.xlu0 %v8683_v9, %s12783_s27 }
  0x8d   : > { %1241 = vrot.lane.b32.xlu1 %v8683_v9, %s8348_s4  ;;  %1243 = vrot.lane.b32.xlu0 %v8683_v9, %s12781_s29 }
  0x91   : > { %1292 = vrot.lane.b32.xlu1 %v8702_v26, %s8344_s24  ;;  %1294 = vrot.lane.b32.xlu0 %v8702_v26, %s8346_s28 }
  0x95   : > { %1296 = vrot.lane.b32.xlu1 %v8702_v26, %s12830_s21  ;;  %1298 = vrot.lane.b32.xlu0 %v8702_v26, %s12783_s27 }
  0x99   : > { %1300 = vrot.lane.b32.xlu1 %v8702_v26, %s8348_s4  ;;  %1302 = vrot.lane.b32.xlu0 %v8702_v26, %s12781_s29 }
  0x9d   : > { %1319 = vrot.lane.b32.xlu1 %v8720_v33, %s8344_s24 }
  0xa3   : > { %v8726_v34 = vpop.permute.xlu1 %323  ;;  %v8728_v35 = vpop.permute.xlu0 %319 }
  0xa7   : > { %v8730_v37 = vpop.permute.xlu1 %325  ;;  %v8732_v38 = vpop.permute.xlu0 %321 }
  0xab   : > { %v8734_v39 = vpop.permute.xlu1 %329  ;;  %v8736_v40 = vpop.permute.xlu0 %327 }
  0xaf   : > { %v8738_v41 = vpop.permute.xlu1 %348  ;;  %v8740_v42 = vpop.permute.xlu0 %346 }
  0xb3   : > { %v8742_v43 = vpop.permute.xlu1 %352  ;;  %v8744_v44 = vpop.permute.xlu0 %350 }
  0xb7   : > { %v8746_v45 = vpop.permute.xlu1 %356  ;;  %v8748_v46 = vpop.permute.xlu0 %354 }
  0xbb   : > { %v441_v47 = vpop.permute.xlu1 %440  ;;  %v406_v49 = vpop.permute.xlu0 %405 }
  0xbc   : > { %v8752_v50 = vsel %vm407_vm7, %v8547_v61, %v406_v49  ;;  %v1388_v49 = vunpack.c.l.b16 %v8784_v24  ;;  %v1522_v24 = vrot.slane %v1487_v15, 6 }
  0xbd   : > { %662 = vrot.lane.b32.xlu1 %v8752_v50, %s8346_s28 }
  0xbf   : > { %v445_v51 = vpop.permute.xlu1 %444  ;;  %v443_v52 = vpop.permute.xlu0 %442 }
  0xc0   : > { %v528_v53 = vsel %vm407_vm7, %v441_v47, %v443_v52  ;;  %v8792_v47 = vld [vmem:[%s8459_s20 + $0x30] ss:$0 sps:$4 sm:$0x44]  }
  0xc1   : > { %664 = vrot.lane.b32.xlu0 %v528_v53, %s8346_s28  ;;  %v1387_v53 = vunpack.c.l.b16 %v7996_v29 }
  0xc3   : > { %v464_v54 = vpop.permute.xlu1 %463  ;;  %v462_v55 = vpop.permute.xlu0 %461 }
  0xc4   : > { %v531_v56 = vsel %vm407_vm7, %v445_v51, %v462_v55  ;;  %v534_v61 = vsel %vm407_vm7, %v464_v54, %v8567_v19  ;;  %v8772_v19 = vld [vmem:[%s12745_s1 + $0x4] ss:$16 sps:$4 sm:$0xff]   ;;  %v7999_v55 = vld [vmem:[%s8459_s20 + $0x38] ss:$0 sps:$4 sm:$0x44]  }
  0xc5   : > { %666 = vrot.lane.b32.xlu1 %v531_v56, %s8346_s28  ;;  %668 = vrot.lane.b32.xlu0 %v534_v61, %s8346_s28 }
  0xc6   : > { %819 = vmatprep.mubr.bf16.mxu0 %v8772_v19 }
  0xc7   : > { %v468_v57 = vpop.permute.xlu1 %467  ;;  %v466_v58 = vpop.permute.xlu0 %465 }
  0xc8   : > { %v537_v59 = vsel %vm407_vm7, %v466_v58, %v468_v57  ;;  %v1389_v57 = vunpack.c.l.b16 %v8792_v47  ;;  %v1399_v58 = vrot.slane %v1388_v49, 7 }
  0xc9   : > { %670 = vrot.lane.b32.xlu1 %v537_v59, %s8346_s28  ;;  %v1418_v59 = vrot.slane %v1383_v7, 5 }
  0xcb   : > { %v472_v60 = vpop.permute.xlu1 %471  ;;  %v470_v63 = vpop.permute.xlu0 %469 }
  0xcc   : > { %v540_v3 = vsel %vm407_vm7, %v470_v63, %v472_v60  ;;  %v1419_v60 = vrot.slane %v1384_v8, 4 }
  0xcd   : > { %672 = vrot.lane.b32.xlu0 %v540_v3, %s8346_s28  ;;  %v1390_v3 = vunpack.c.l.b16 %v7999_v55 }
  0xce   : > { %v1420_v8 = vsel %vm275_vm0, %v1419_v60, %v1418_v59 }
  0xcf   : > { %v523_v5 = vpop.permute.xlu1 %522  ;;  %v521_v6 = vpop.permute.xlu0 %520  ;;  %v1403_v17 = vrot.slane %v1390_v3, 5 }
  0xd0   : > { %v543_v10 = vsel %vm407_vm7, %v521_v6, %v523_v5 }
  0xd1   : > { %674 = vrot.lane.b32.xlu1 %v543_v10, %s8346_s28  ;;  %v1401_v10 = vrot.slane %v1389_v57, 6 }
  0xd3   : > { %v548_v13 = vpop.permute.xlu1 %547  ;;  %v525_v14 = vpop.permute.xlu0 %524 }
  0xd4   : > { %v546_v18 = vsel %vm407_vm7, %v8594_v48, %v525_v14  ;;  %v1396_v48 = vrot.slane %v1386_v20, 1  ;;  %v1486_v14 = vunpack.c.l.b16 %v8000_v1 }
  0xd5   : > { %693 = vrot.lane.b32.xlu1 %v546_v18, %s12783_s27  ;;  %676 = vrot.lane.b32.xlu0 %v546_v18, %s8346_s28  ;;  %v1423_v18 = vrot.slane %v1386_v20, 2  ;;  %v1425_v20 = vrot.slane %v1387_v53, 1 }
  0xd6   : > { %v1397_v54 = vsel %vm281_vm2, %v1396_v48, %v1395_v30  ;;  %v1494_v48 = vrot.slane %v1486_v14, 6  ;;  %v1495_v30 = vrot.slane %v1487_v15, 5 }
  0xd7   : > { %v567_v22 = vpop.permute.xlu1 %566  ;;  %v565_v23 = vpop.permute.xlu0 %564  ;;  %v1398_v63 = vsel %vm284_vm3, %v1387_v53, %v1397_v54 }
  0xd8   : > { %v635_v28 = vsel %vm407_vm7, %v548_v13, %v565_v23  ;;  %v1400_v6 = vsel %vm287_vm4, %v1399_v58, %v1398_v63  ;;  %v8002_v13 = vld [vmem:[%s8459_s20 + $0x10] ss:$0 sps:$4 sm:$0x88]   ;;  %v1496_v58 = vsel %vm275_vm0, %v1495_v30, %v1494_v48  ;;  %v1428_v63 = vrot.slane %v1389_v57, 7 }
  0xd9   : > { %695 = vrot.lane.b32.xlu0 %v635_v28, %s12783_s27  ;;  %v1402_v27 = vsel %vm290_vm5, %v1401_v10, %v1400_v6  ;;  %v1422_v28 = vsel %vm278_vm1, %v1421_v11, %v1420_v8  ;;  %v1488_v12 = vunpack.c.l.b16 %v8002_v13  ;;  %v8007_v6 = vld [vmem:[%s8459_s20 + $0x38] ss:$0 sps:$4 sm:$0x88]   ;;  %v8006_v11 = vld [vmem:[%s8459_s20 + $0x30] ss:$0 sps:$4 sm:$0x88]  }
  0xda   : > { %v1404_v47 = vsel %vm293_vm6, %v1403_v17, %v1402_v27  ;;  %v1493_v17 = vunpack.c.l.b16 %v8007_v6 }
  0xdb   : > { %v571_v31 = vpop.permute.xlu1 %570  ;;  %v569_v32 = vpop.permute.xlu0 %568  ;;  %v1497_v55 = vrot.slane %v1488_v12, 4  ;;  %v8837_v53 = vpack.c.b16 %v1404_v47, %v1404_v47 }
  0xdc   : > { %v638_v51 = vsel %vm407_vm7, %v567_v22, %v569_v32  ;;  %v641_v52 = vsel %vm407_vm7, %v571_v31, %v8611_v62  ;;  %v8822_v31 = vld [vmem:[%s12745_s1 + $0xc] ss:$16 sps:$4 sm:$0xff]   ;;  %v8004_v32 = vld [vmem:[%s8459_s20 + $0x20] ss:$0 sps:$4 sm:$0x88]  }
  0xdd   : > { %697 = vrot.lane.b32.xlu1 %v638_v51, %s12783_s27  ;;  %699 = vrot.lane.b32.xlu0 %v641_v52, %s12783_s27  ;;  %v1424_v51 = vsel %vm281_vm2, %v1423_v18, %v1422_v28  ;;  %v1489_v52 = vunpack.c.l.b16 %v8003_v21  ;;  %v1490_v60 = vunpack.c.l.b16 %v8004_v32  ;;  %v1498_v1 = vsel %vm278_vm1, %v1497_v55, %v1496_v58 }
  0xde   : > { %7369 = vmatprep.mubr.msk.bf16.mxu1 %vm777_vm8, %v8822_v31  ;;  %v1426_v59 = vsel %vm284_vm3, %v1425_v20, %v1424_v51  ;;  %v1492_v18 = vunpack.c.l.b16 %v8006_v11  ;;  %v1524_v21 = vrot.slane %v1488_v12, 5 }
  0xdf   : > { %v575_v56 = vpop.permute.xlu1 %574  ;;  %v573_v61 = vpop.permute.xlu0 %572  ;;  %v1526_v27 = vrot.slane %v1489_v52, 4  ;;  %v1528_v12 = vrot.slane %v1490_v60, 3 }
  0xe0   : > { %v644_v62 = vsel %vm407_vm7, %v573_v61, %v575_v56  ;;  %v8005_v61 = vld [vmem:[%s8459_s20 + $0x28] ss:$0 sps:$4 sm:$0x88]   ;;  %v1532_v55 = vrot.slane %v1492_v18, 1 }
  0xe1   : > { %701 = vrot.lane.b32.xlu1 %v644_v62, %s12783_s27  ;;  %v1499_v62 = vrot.slane %v1489_v52, 3  ;;  %v1491_v2 = vunpack.c.l.b16 %v8005_v61 }
  0xe3   : > { %v626_v4 = vpop.permute.xlu1 %625  ;;  %v624_v5 = vpop.permute.xlu0 %623  ;;  %v1500_v10 = vsel %vm281_vm2, %v1499_v62, %v1498_v1  ;;  %v1503_v13 = vrot.slane %v1491_v2, 1  ;;  %v1530_v47 = vrot.slane %v1491_v2, 2 }
  0xe4   : > { %v647_v7 = vsel %vm407_vm7, %v624_v5, %v626_v4  ;;  %v1501_v4 = vrot.slane %v1490_v60, 2  ;;  %v1430_v5 = vrot.slane %v1390_v3, 6 }
  0xe5   : > { %703 = vrot.lane.b32.xlu0 %v647_v7, %s12783_s27  ;;  %v1521_v7 = vrot.slane %v1486_v14, 7 }
  0xe7   : > { %v630_v22 = vpop.permute.xlu1 %629  ;;  %v628_v23 = vpop.permute.xlu0 %627  ;;  %v1523_v14 = vsel %vm275_vm0, %v1522_v24, %v1521_v7 }
  0xe8   : > { %v650_v29 = vsel %vm407_vm7, %v628_v23, %v630_v22  ;;  %v1506_v23 = vrot.slane %v1493_v17, 7 }
  0xe9   : > { %705 = vrot.lane.b32.xlu1 %v650_v29, %s12783_s27  ;;  %v1525_v29 = vsel %vm278_vm1, %v1524_v21, %v1523_v14 }
  0xea   : > { %v1527_v20 = vsel %vm281_vm2, %v1526_v27, %v1525_v29 }
  0xeb   : > { %v632_v54 = vpop.permute.xlu0 %631  ;;  %v8857_v8 = vpop.permute.xlu1 %717  ;;  %v1529_v52 = vsel %vm284_vm3, %v1528_v12, %v1527_v20 }
  0xec   : > { %v653_v56 = vsel %vm407_vm7, %v8639_v25, %v632_v54  ;;  %v1427_v25 = vsel %vm287_vm4, %v1388_v49, %v1426_v59  ;;  %v1502_v49 = vsel %vm284_vm3, %v1501_v4, %v1500_v10  ;;  %v1531_v61 = vsel %vm287_vm4, %v1530_v47, %v1529_v52 }
  0xed   : > { %707 = vrot.lane.b32.xlu0 %v653_v56, %s12783_s27  ;;  %1355 = vrot.lane.b32.xlu1 %v8720_v33, %s12830_s21  ;;  %v1429_v57 = vsel %vm290_vm5, %v1428_v63, %v1427_v25  ;;  %v1504_v22 = vsel %vm287_vm4, %v1503_v13, %v1502_v49  ;;  %v1533_v58 = vsel %vm290_vm5, %v1532_v55, %v1531_v61  ;;  %v785_v47 = vsel %vm407_vm7, %v8857_v8, 0  ;;  %v9008_v55 = vld [vmem:[%s12745_s1 + $0x8] ss:$16 sps:$4 sm:$0xff]  }
  0xee   : > { %v1431_v3 = vsel %vm293_vm6, %v1430_v5, %v1429_v57  ;;  %v1505_v28 = vsel %vm290_vm5, %v1492_v18, %v1504_v22  ;;  %v1534_v62 = vsel %vm293_vm6, %v1493_v17, %v1533_v58  ;;  %v418_v22 = vsel %vm407_vm7, %v8730_v37, %v8736_v40  ;;  %v9014_v58 = vld [vmem:[%s12745_s1 + $0x2c] ss:$16 sps:$4 sm:$0xff]  }
  0xef   : > { %v8866_v15 = vpack.c.b16 %v1431_v3, %v1431_v3  ;;  %v1507_v30 = vsel %vm293_vm6, %v1506_v23, %v1505_v28  ;;  %v8912_v1 = vpack.c.b16 %v1534_v62, %v1534_v62  ;;  %v410_v3 = vsel %vm407_vm7, %v8503_v16, %v8728_v35 }
  0xf0   : > { %v8884_v51 = vpack.c.b16 %v1507_v30, %v1507_v30  ;;  %v422_v16 = vsel %vm407_vm7, %v8734_v39, %v8519_v36  ;;  %v430_v37 = vsel %vm407_vm7, %v8744_v44, %v8742_v43  ;;  %v434_v36 = vsel %vm407_vm7, %v8748_v46, %v8746_v45  ;;  %v8992_v45 = vld [vmem:[%s12745_s1 + $0x20] ss:$16 sps:$4 sm:$0xff]  }
  0xf1   : > { %1353 = vrot.lane.b32.xlu0 %v8720_v33, %s8346_s28  ;;  %1406 = vrot.lane.b32.xlu1 %v8837_v53, %s12828_s6 }
  0xf5   : > { %1357 = vrot.lane.b32.xlu0 %v8720_v33, %s12783_s27  ;;  %1410 = vrot.lane.b32.xlu1 %v8837_v53, %s8344_s24 }
  0xf9   : > { %1408 = vrot.lane.b32.xlu0 %v8837_v53, %s12807_s5  ;;  %1414 = vrot.lane.b32.xlu1 %v8837_v53, %s12830_s21 }
  0xfc   : > { %v8870_v48 = vpop.permute.xlu1 %726  ;;  %v8887_v54 = vpop.permute.xlu0 %721 }
  0xfd   : > { %12848 = vst [vmem:[#allocation5_spill] sm:$0xff] %v8870_v48  ;;  %1412 = vrot.lane.b32.xlu0 %v8837_v53, %s8346_s28  ;;  %1433 = vrot.lane.b32.xlu1 %v8866_v15, %s12828_s6  ;;  %12850 = vst [vmem:[#allocation7_spill] sm:$0xff] %v8887_v54 }
 0x100   : > { %v8878_v32 = vpop.permute.xlu1 %731  ;;  %v8903_v60 = vpop.permute.xlu0 %736 }
 0x101   : > { %12849 = vst [vmem:[#allocation6_spill] sm:$0xff] %v8878_v32  ;;  %1416 = vrot.lane.b32.xlu0 %v8837_v53, %s12783_s27  ;;  %1437 = vrot.lane.b32.xlu1 %v8866_v15, %s8344_s24  ;;  %12851 = vst [vmem:[#allocation8_spill] sm:$0xff] %v8903_v60 }
 0x104   : > { %v8889_v56 = vpop.permute.xlu1 %1233  ;;  %v8914_v25 = vpop.permute.xlu0 %1235 }
 0x105   : > { %1435 = vrot.lane.b32.xlu0 %v8866_v15, %s12807_s5  ;;  %1509 = vrot.lane.b32.xlu1 %v8884_v51, %s12750_s8 }
 0x108   : > { %v8897_v59 = vpop.permute.xlu1 %1237  ;;  %v8928_v5 = vpop.permute.xlu0 %1239 }
 0x109   : > { %1460 = vrot.lane.b32.xlu0 %v8866_v15, %s8346_s28  ;;  %1513 = vrot.lane.b32.xlu1 %v8884_v51, %s12828_s6 }
 0x10c   : > { %v8906_v63 = vpop.permute.xlu1 %1241  ;;  %v8936_v10 = vpop.permute.xlu0 %1243 }
 0x10d   : > { %1511 = vrot.lane.b32.xlu0 %v8884_v51, %s12852_s9  ;;  %1517 = vrot.lane.b32.xlu1 %v8884_v51, %s8344_s24 }
 0x110   : > { %v8916_v2 = vpop.permute.xlu1 %1292  ;;  %v8946_v13 = vpop.permute.xlu0 %1294 }
 0x111   : > { %1515 = vrot.lane.b32.xlu0 %v8884_v51, %s12807_s5  ;;  %1536 = vrot.lane.b32.xlu1 %v8912_v1, %s12750_s8  ;;  %s12780_s8 = sand.u32 1, %s8316_s13  }
 0x112   : > { %s9512_s11 = sshll.u32 %s12780_s8, 8  ;;  %s12896_s8 = smov 124  }
 0x113   : > { %s9550_s7 = scalar_lea.vmem [#allocation2], %s9512_s11  ;;  %s12962_s11 = smov 1  }
 0x114   : > { %v8922_v4 = vpop.permute.xlu1 %1296  ;;  %v8948_v7 = vpop.permute.xlu0 %1298 }
 0x115   : > { %1519 = vrot.lane.b32.xlu0 %v8884_v51, %s8346_s28  ;;  %1540 = vrot.lane.b32.xlu1 %v8912_v1, %s12828_s6 }
 0x118   : > { %v8930_v6 = vpop.permute.xlu1 %1300  ;;  %v8950_v24 = vpop.permute.xlu0 %1302 }
 0x119   : > { %1538 = vrot.lane.b32.xlu0 %v8912_v1, %s12852_s9  ;;  %1544 = vrot.lane.b32.xlu1 %v8912_v1, %s8344_s24 }
 0x11c   : > { %v1320_v57 = vpop.permute.xlu1 %1319 }
 0x11d   : > { %1542 = vrot.lane.b32.xlu0 %v8912_v1, %s12807_s5  ;;  %v8942_v11 = vsel %vm407_vm7, %v8720_v33, %v1320_v57  ;;  %v414_v33 = vsel %vm407_vm7, %v8732_v38, %v8726_v34  ;;  %v426_v34 = vsel %vm407_vm7, %v8740_v42, %v8738_v41  ;;  %v8977_v41 = vld [vmem:[%s12745_s1] ss:$16 sps:$4 sm:$0xff]   ;;  %v8984_v42 = vld [vmem:[%s12745_s1 + $0x24] ss:$16 sps:$4 sm:$0xff]  }
 0x121   : > { %1575 = vrot.lane.b32.xlu0 %v8942_v11, %s8346_s28 }
 0x12f   : > { %v663_v49 = vpop.permute.xlu1 %662 }
 0x130   : > { %7614 = vmatprep.subr.bf16.mxu0 %v663_v49 }
 0x131   : > { %7615 = vmatpush3.bf16.msra.mxu0 %v410_v3 }
 0x133   : > { %v665_v17 = vpop.permute.xlu0 %664 }
 0x134   : > { %7616 = vmatprep.subr.bf16.mxu0 %v665_v17  ;;  %v9027_v17 = vld [vmem:[%s12745_s1 + $0x28] ss:$16 sps:$4 sm:$0xff]  }
 0x135   : > { %7617 = vmatpush3.bf16.msra.mxu0 %v414_v33 }
 0x137   : > { %v667_v18 = vpop.permute.xlu1 %666  ;;  %v669_v21 = vpop.permute.xlu0 %668 }
 0x138   : > { %7618 = vmatprep.subr.bf16.mxu0 %v667_v18  ;;  %v8020_v18 = vld [vmem:[%s8459_s20] ss:$0 sps:$4 sm:$0x22]  }
 0x139   : > { %7619 = vmatpush3.bf16.msra.mxu0 %v418_v22 }
 0x13a   : > { %7620 = vmatprep.subr.bf16.mxu0 %v669_v21  ;;  %v8021_v21 = vld [vmem:[%s8459_s20 + $0x8] ss:$0 sps:$4 sm:$0x22]  }
 0x13b   : > { %v671_v35 = vpop.permute.xlu1 %670 }
 0x13d   : > { %7621 = vmatpush3.bf16.msra.mxu0 %v422_v16 }
 0x13e   : > { %7622 = vmatprep.subr.bf16.mxu0 %v671_v35  ;;  %v2057_v35 = vunpack.c.l.b16 %v8020_v18 }
 0x13f   : > { %v673_v38 = vpop.permute.xlu0 %672 }
 0x141   : > { %7623 = vmatpush3.bf16.msra.mxu0 %v426_v34  ;;  %v2058_v34 = vunpack.c.l.b16 %v8021_v21 }
 0x142   : > { %7624 = vmatprep.subr.bf16.mxu0 %v673_v38 }
 0x143   : > { %v675_v14 = vpop.permute.xlu1 %674 }
 0x145   : > { %7625 = vmatpush3.bf16.msra.mxu0 %v430_v37 }
 0x146   : > { %7626 = vmatprep.subr.bf16.mxu0 %v675_v14  ;;  %v9041_v14 = vld [vmem:[%s8459_s20 + $0x18] ss:$0 sps:$4 sm:$0x22]  }
 0x147   : > { %v694_v40 = vpop.permute.xlu1 %693  ;;  %v677_v23 = vpop.permute.xlu0 %676 }
 0x148   : > { %837 = vmatpush1.bf16.msra.mxu1 %v694_v40 }
 0x149   : > { %7627 = vmatpush3.bf16.msra.mxu0 %v434_v36  ;;  %838 = vmatprep.subr.bf16.mxu1 %v12752_v0 }
 0x14a   : > { %7628 = vmatprep.subr.bf16.mxu0 %v677_v23  ;;  %v8022_v23 = vld [vmem:[%s8459_s20 + $0x10] ss:$0 sps:$4 sm:$0x22]  }
 0x14b   : > { %v696_v39 = vpop.permute.xlu0 %695 }
 0x14c   : > { %839 = vmatpush1.bf16.msra.mxu1 %v696_v39  ;;  %v2065_v39 = vrot.slane %v2057_v35, 2 }
 0x14d   : > { %7629 = vmatpush3.bf16.msra.mxu0 %v8752_v50  ;;  %840 = vmatprep.subr.bf16.mxu1 %v12752_v0 }
 0x14f   : > { %v698_v43 = vpop.permute.xlu1 %697  ;;  %v700_v44 = vpop.permute.xlu0 %699 }
 0x150   : > { %820 = vmatmul.mubr.bf16.vlgmr.msra.gmra.mrb[0].mxu0 %v8977_v41  ;;  %841 = vmatpush1.bf16.msra.mxu1 %v698_v43  ;;  %v2066_v43 = vrot.slane %v2058_v34, 1 }
 0x151   : > { %842 = vmatprep.subr.bf16.mxu1 %v12752_v0  ;;  %827 = vmatprep.mubr.bf16.mxu0 %v8984_v42 }
 0x153   : > { %v702_v46 = vpop.permute.xlu1 %701 }
 0x154   : > { %843 = vmatpush1.bf16.msra.mxu1 %v700_v44  ;;  %v2060_v44 = vunpack.c.l.b16 %v9041_v14 }
 0x155   : > { %844 = vmatprep.subr.bf16.mxu1 %v12752_v0 }
 0x157   : > { %v704_v50 = vpop.permute.xlu0 %703 }
 0x158   : > { %828 = vmatmul.mubr.bf16.gmra.mrb[4].mxu0 %v8992_v45  ;;  %845 = vmatpush1.bf16.msra.mxu1 %v702_v46 }
 0x159   : > { %846 = vmatprep.subr.bf16.mxu1 %v12752_v0  ;;  %1667 = vmatprep.mubr.bf16.mxu0 %v8772_v19 }
 0x15b   : > { %v706_v27 = vpop.permute.xlu1 %705 }
 0x15c   : > { %847 = vmatpush1.bf16.msra.mxu1 %v704_v50  ;;  %v2059_v50 = vunpack.c.l.b16 %v8022_v23 }
 0x15d   : > { %848 = vmatprep.subr.bf16.mxu1 %v12752_v0 }
 0x15f   : > { %v708_v28 = vpop.permute.xlu0 %707  ;;  %v1356_v29 = vpop.permute.xlu1 %1355 }
 0x160   : > { %849 = vmatpush1.bf16.msra.mxu1 %v706_v27 }
 0x161   : > { %850 = vmatprep.subr.bf16.mxu1 %v12752_v0 }
 0x163   : > { %v1354_v12 = vpop.permute.xlu0 %1353  ;;  %v1407_v30 = vpop.permute.xlu1 %1406 }
 0x164   : > { %851 = vmatpush1.bf16.msra.mxu1 %v708_v28  ;;  %v1441_v20 = vsel %vm407_vm7, %v1354_v12, %v1356_v29  ;;  %v8025_v28 = vld [vmem:[%s8459_s20 + $0x28] ss:$0 sps:$4 sm:$0x22]   ;;  %v2067_v29 = vsel %vm275_vm0, %v2066_v43, %v2065_v39 }
 0x165   : > { %1577 = vrot.lane.b32.xlu1 %v1441_v20, %s8346_s28  ;;  %852 = vmatprep.subr.bf16.mxu1 %v12752_v0 }
 0x167   : > { %v1358_v19 = vpop.permute.xlu0 %1357  ;;  %v1411_v52 = vpop.permute.xlu1 %1410 }
 0x168   : > { %853 = vmatpush1.bf16.msra.mxu1 %v785_v47  ;;  %v1444_v61 = vsel %vm407_vm7, %v1358_v19, %v1407_v30  ;;  %v2069_v30 = vrot.slane %v2060_v44, 7  ;;  %v8026_v47 = vld [vmem:[%s8459_s20 + $0x30] ss:$0 sps:$4 sm:$0x22]  }
 0x169   : > { %1579 = vrot.lane.b32.xlu0 %v1444_v61, %s8346_s28  ;;  %1684 = vmatprep.subr.bf16.mxu1 %v12752_v0  ;;  %v2063_v18 = vunpack.c.l.b16 %v8026_v47 }
 0x16b   : > { %869 = vmatmul.mubr.bf16.vlgmr.msra.gmra.mrb[0].mxu1 %v9008_v55  ;;  %v1409_v8 = vpop.permute.xlu0 %1408  ;;  %v1415_v62 = vpop.permute.xlu1 %1414  ;;  %v2075_v23 = vrot.slane %v2063_v18, 4 }
 0x16c   : > { %v1447_v57 = vsel %vm407_vm7, %v1409_v8, %v8837_v53  ;;  %7370 = vmatprep.mubr.msk.bf16.mxu1 %vm777_vm8, %v9014_v58  ;;  %v2062_v8 = vunpack.c.l.b16 %v8025_v28 }
 0x16d   : > { %1581 = vrot.lane.b32.xlu1 %v1447_v57, %s8346_s28  ;;  %v8027_v57 = vld [vmem:[%s8459_s20 + $0x38] ss:$0 sps:$4 sm:$0x22]  }
 0x16e   : > { %v2064_v14 = vunpack.c.l.b16 %v8027_v57 }
 0x16f   : > { %v1413_v49 = vpop.permute.xlu0 %1412  ;;  %v1434_v3 = vpop.permute.xlu1 %1433 }
 0x170   : > { %v1450_v33 = vsel %vm407_vm7, %v1411_v52, %v1413_v49  ;;  %v2068_v52 = vsel %vm278_vm1, %v2059_v50, %v2067_v29  ;;  %v8030_v29 = vld [vmem:[%s8459_s20 + $0x10] ss:$0 sps:$4 sm:$0x44]  }
 0x171   : > { %1583 = vrot.lane.b32.xlu0 %v1450_v33, %s8346_s28  ;;  %v2070_v49 = vsel %vm281_vm2, %v2069_v30, %v2068_v52 }
 0x173   : > { %877 = vmatmul.mubr.bf16.gmra.mrb[4].mxu1 %v9027_v17  ;;  %v1417_v53 = vpop.permute.xlu0 %1416  ;;  %v1438_v22 = vpop.permute.xlu1 %1437 }
 0x174   : > { %v1453_v16 = vsel %vm407_vm7, %v1415_v62, %v1417_v53  ;;  %7403 = vmatprep.mubr.msk.bf16.mxu1 %vm777_vm8, %v8822_v31  ;;  %v1459_v38 = vsel %vm407_vm7, %v8866_v15, %v1438_v22  ;;  %v8024_v31 = vld [vmem:[%s8459_s20 + $0x20] ss:$0 sps:$4 sm:$0x22]   ;;  %v2073_v53 = vrot.slane %v2062_v8, 5  ;;  %v2092_v22 = vrot.slane %v2057_v35, 3 }
 0x175   : > { %1585 = vrot.lane.b32.xlu1 %v1453_v16, %s8346_s28  ;;  %v2061_v12 = vunpack.c.l.b16 %v8024_v31  ;;  %v2093_v16 = vrot.slane %v2058_v34, 2  ;;  %v2077_v35 = vrot.slane %v2064_v14, 3 }
 0x177   : > { %v1436_v37 = vpop.permute.xlu0 %1435  ;;  %v1510_v40 = vpop.permute.xlu1 %1509  ;;  %v2071_v62 = vrot.slane %v2061_v12, 6  ;;  %v2094_v31 = vsel %vm275_vm0, %v2093_v16, %v2092_v22 }
 0x178   : > { %v1456_v36 = vsel %vm407_vm7, %v1434_v3, %v1436_v37 }
 0x179   : > { %1589 = vrot.lane.b32.xlu1 %v1459_v38, %s8346_s28  ;;  %1587 = vrot.lane.b32.xlu0 %v1456_v36, %s8346_s28  ;;  %v2095_v36 = vrot.slane %v2059_v50, 1 }
 0x17b   : > { %v1461_v46 = vpop.permute.xlu0 %1460  ;;  %v1514_v15 = vpop.permute.xlu1 %1513  ;;  %v2096_v28 = vsel %vm278_vm1, %v2095_v36, %v2094_v31  ;;  %v1323_v36 = vsel %vm407_vm7, %v8683_v9, %v8889_v56 }
 0x17c   : > { %v1548_v27 = vsel %vm407_vm7, %v1461_v46, %v1510_v40  ;;  %v8029_v46 = vld [vmem:[%s8459_s20 + $0x8] ss:$0 sps:$4 sm:$0x44]  }
 0x17d   : > { %1606 = vrot.lane.b32.xlu0 %v1459_v38, %s12783_s27  ;;  %1608 = vrot.lane.b32.xlu1 %v1548_v27, %s12783_s27  ;;  %v2072_v38 = vsel %vm284_vm3, %v2071_v62, %v2070_v49  ;;  %v8031_v62 = vld [vmem:[%s8459_s20 + $0x18] ss:$0 sps:$4 sm:$0x44]   ;;  %v2145_v49 = vunpack.c.l.b16 %v8030_v29 }
 0x17e   : > { %v2074_v43 = vsel %vm287_vm4, %v2073_v53, %v2072_v38  ;;  %v2146_v16 = vunpack.c.l.b16 %v8031_v62  ;;  %v2102_v38 = vrot.slane %v2063_v18, 5  ;;  %v2104_v18 = vrot.slane %v2064_v14, 4 }
 0x17f   : > { %v1512_v20 = vpop.permute.xlu0 %1511  ;;  %v1518_v19 = vpop.permute.xlu1 %1517  ;;  %v2076_v27 = vsel %vm290_vm5, %v2075_v23, %v2074_v43  ;;  %v2154_v23 = vrot.slane %v2145_v49, 2  ;;  %v2209_v29 = vrot.slane %v2145_v49, 3  ;;  %v8038_v49 = vld [vmem:[%s8459_s20 + $0x10] ss:$0 sps:$4 sm:$0x88]  }
 0x180   : > { %v1551_v61 = vsel %vm407_vm7, %v1512_v20, %v1514_v15  ;;  %v2144_v20 = vunpack.c.l.b16 %v8029_v46  ;;  %v2078_v52 = vsel %vm293_vm6, %v2077_v35, %v2076_v27  ;;  %v2156_v43 = vrot.slane %v2146_v16, 1 }
 0x181   : > { %1610 = vrot.lane.b32.xlu0 %v1551_v61, %s12783_s27  ;;  %v2097_v61 = vsel %vm281_vm2, %v2060_v44, %v2096_v28 }
 0x182   : > { %v2152_v53 = vrot.slane %v2144_v20, 3  ;;  %v2207_v56 = vrot.slane %v2144_v20, 4  ;;  %v8037_v20 = vld [vmem:[%s8459_s20 + $0x8] ss:$0 sps:$4 sm:$0x88]  }
 0x183   : > { %v1516_v3 = vpop.permute.xlu0 %1515  ;;  %v1537_v33 = vpop.permute.xlu1 %1536 }
 0x184   : > { %v1554_v21 = vsel %vm407_vm7, %v1516_v3, %v8884_v51  ;;  %v8028_v51 = vld [vmem:[%s8459_s20] ss:$0 sps:$4 sm:$0x44]  }
 0x185   : > { %1612 = vrot.lane.b32.xlu1 %v1554_v21, %s12783_s27  ;;  %v2143_v30 = vunpack.c.l.b16 %v8028_v51  ;;  %v2100_v21 = vrot.slane %v2062_v8, 6  ;;  %v8034_v51 = vld [vmem:[%s8459_s20 + $0x30] ss:$0 sps:$4 sm:$0x44]  }
 0x186   : > { %v2149_v27 = vunpack.c.l.b16 %v8034_v51 }
 0x187   : > { %v1520_v37 = vpop.permute.xlu0 %1519  ;;  %v1541_v40 = vpop.permute.xlu1 %1540  ;;  %v2206_v9 = vrot.slane %v2143_v30, 5 }
 0x188   : > { %v1557_v39 = vsel %vm407_vm7, %v1518_v19, %v1520_v37  ;;  %v2098_v19 = vrot.slane %v2061_v12, 7  ;;  %v9083_v12 = vpack.c.b16 %v2078_v52, %v2078_v52  ;;  %v8033_v37 = vld [vmem:[%s8459_s20 + $0x28] ss:$0 sps:$4 sm:$0x44]   ;;  %v2161_v62 = vrot.slane %v2149_v27, 6 }
 0x189   : > { %1614 = vrot.lane.b32.xlu0 %v1557_v39, %s12783_s27  ;;  %v8032_v39 = vld [vmem:[%s8459_s20 + $0x20] ss:$0 sps:$4 sm:$0x44]   ;;  %v2148_v46 = vunpack.c.l.b16 %v8033_v37  ;;  %v2259_v37 = vunpack.c.l.b16 %v8038_v49  ;;  %v8045_v49 = vld [vmem:[%s8459_s20 + $0xc] ss:$0 sps:$4 sm:$0x11]  }
 0x18a   : > { %v2099_v22 = vsel %vm284_vm3, %v2098_v19, %v2097_v61  ;;  %v2211_v61 = vrot.slane %v2146_v16, 2 }
 0x18b   : > { %v1539_v34 = vpop.permute.xlu0 %1538  ;;  %v1545_v15 = vpop.permute.xlu1 %1544  ;;  %v2101_v8 = vsel %vm287_vm4, %v2100_v21, %v2099_v22  ;;  %v2159_v28 = vrot.slane %v2148_v46, 7 }
 0x18c   : > { %v1560_v50 = vsel %vm407_vm7, %v1537_v33, %v1539_v34  ;;  %v1566_v47 = vsel %vm407_vm7, %v8912_v1, %v1545_v15  ;;  %v2151_v33 = vrot.slane %v2143_v30, 4  ;;  %v2103_v31 = vsel %vm290_vm5, %v2102_v38, %v2101_v8  ;;  %v8035_v34 = vld [vmem:[%s8459_s20 + $0x38] ss:$0 sps:$4 sm:$0x44]  }
 0x18d   : > { %1616 = vrot.lane.b32.xlu1 %v1560_v50, %s12783_s27  ;;  %v2105_v14 = vsel %vm293_vm6, %v2104_v18, %v2103_v31  ;;  %v2208_v50 = vsel %vm275_vm0, %v2207_v56, %v2206_v9  ;;  %v8036_v30 = vld [vmem:[%s8459_s20] ss:$0 sps:$4 sm:$0x88]   ;;  %v2150_v52 = vunpack.c.l.b16 %v8035_v34  ;;  %v2268_v31 = vrot.slane %v2259_v37, 4 }
 0x18e   : > { %v9114_v19 = vpack.c.b16 %v2105_v14, %v2105_v14  ;;  %v2257_v21 = vunpack.c.l.b16 %v8036_v30 }
 0x18f   : > { %v1543_v57 = vpop.permute.xlu0 %1542  ;;  %v2163_v22 = vrot.slane %v2150_v52, 5  ;;  %v2218_v14 = vrot.slane %v2150_v52, 6  ;;  %v8042_v52 = vld [vmem:[%s8459_s20 + $0x30] ss:$0 sps:$4 sm:$0x88]  }
 0x190   : > { %v1563_v3 = vsel %vm407_vm7, %v1541_v40, %v1543_v57  ;;  %v2153_v40 = vsel %vm275_vm0, %v2152_v53, %v2151_v33  ;;  %v2210_v57 = vsel %vm278_vm1, %v2209_v29, %v2208_v50  ;;  %v2258_v33 = vunpack.c.l.b16 %v8037_v20  ;;  %v9151_v20 = vld [vmem:[%s8459_s20 + $0x38] ss:$0 sps:$4 sm:$0x88]  }
 0x191   : > { %1620 = vrot.lane.b32.xlu1 %v1566_v47, %s12783_s27  ;;  %1618 = vrot.lane.b32.xlu0 %v1563_v3, %s12783_s27  ;;  %v2155_v35 = vsel %vm278_vm1, %v2154_v23, %v2153_v40  ;;  %v2212_v16 = vsel %vm281_vm2, %v2211_v61, %v2210_v57  ;;  %v2265_v23 = vrot.slane %v2257_v21, 6  ;;  %v2312_v61 = vrot.slane %v2259_v37, 5  ;;  %v8044_v37 = vld [vmem:[%s8459_s20 + $0x4] ss:$0 sps:$4 sm:$0x11]  }
 0x192   : > { %v2157_v15 = vsel %vm281_vm2, %v2156_v43, %v2155_v35  ;;  %v2266_v8 = vrot.slane %v2258_v33, 5  ;;  %v2216_v43 = vrot.slane %v2149_v27, 7  ;;  %v8041_v35 = vld [vmem:[%s8459_s20 + $0x28] ss:$0 sps:$4 sm:$0x88]   ;;  %v2310_v29 = vrot.slane %v2258_v33, 6 }
 0x193   : > { %v1576_v44 = vpop.permute.xlu0 %1575  ;;  %v2262_v27 = vunpack.c.l.b16 %v8041_v35  ;;  %v2264_v33 = vunpack.c.l.b16 %v9151_v20  ;;  %v2385_v20 = vunpack.c.h.b16 %v8044_v37 }
 0x194   : > { %7642 = vmatprep.subr.bf16.mxu0 %v1576_v44  ;;  %v8039_v44 = vld [vmem:[%s8459_s20 + $0x18] ss:$0 sps:$4 sm:$0x88]   ;;  %v2267_v9 = vsel %vm275_vm0, %v2266_v8, %v2265_v23  ;;  %v2361_v23 = vunpack.c.l.b16 %v8045_v49 }
 0x195   : > { %2080 = vrot.lane.b32.xlu1 %v9083_v12, %s8344_s24  ;;  %1630 = vrot.lane.b32.xlu0 %v8912_v1, %s12781_s29  ;;  %v2147_v1 = vunpack.c.l.b16 %v8032_v39  ;;  %v2260_v18 = vunpack.c.l.b16 %v8039_v44  ;;  %v8046_v44 = vld [vmem:[%s8459_s20 + $0x14] ss:$0 sps:$4 sm:$0x11]  }
 0x196   : > { %7643 = vmatpush3.bf16.msra.mxu0 %v1323_v36  ;;  %v8040_v36 = vld [vmem:[%s8459_s20 + $0x20] ss:$0 sps:$4 sm:$0x88]   ;;  %v2368_v35 = vrot.slane %v2361_v23, 7 }
 0x197   : > { %v2158_v47 = vsel %vm284_vm3, %v2147_v1, %v2157_v15  ;;  %v2213_v53 = vrot.slane %v2147_v1, 1  ;;  %v2261_v1 = vunpack.c.l.b16 %v8040_v36  ;;  %v2270_v34 = vrot.slane %v2260_v18, 3 }
 0x198   : > { %v2160_v3 = vsel %vm287_vm4, %v2159_v28, %v2158_v47  ;;  %v2309_v28 = vrot.slane %v2257_v21, 7 }
 0x199   : > { %2084 = vrot.lane.b32.xlu1 %v9083_v12, %s12830_s21  ;;  %2082 = vrot.lane.b32.xlu0 %v9083_v12, %s8346_s28  ;;  %v2162_v38 = vsel %vm290_vm5, %v2161_v62, %v2160_v3  ;;  %v2214_v40 = vsel %vm284_vm3, %v2213_v53, %v2212_v16  ;;  %v2272_v50 = vrot.slane %v2261_v1, 2  ;;  %v2274_v62 = vrot.slane %v2262_v27, 1 }
 0x19a   : > { %v2164_v39 = vsel %vm293_vm6, %v2163_v22, %v2162_v38  ;;  %v2215_v51 = vsel %vm287_vm4, %v2148_v46, %v2214_v40  ;;  %v2269_v46 = vsel %vm278_vm1, %v2268_v31, %v2267_v9  ;;  %v2311_v57 = vsel %vm275_vm0, %v2310_v29, %v2309_v28 }
 0x19b   : > { %v9141_v56 = vpack.c.b16 %v2164_v39, %v2164_v39  ;;  %v2217_v15 = vsel %vm290_vm5, %v2216_v43, %v2215_v51  ;;  %v2271_v47 = vsel %vm281_vm2, %v2270_v34, %v2269_v46  ;;  %v2314_v53 = vrot.slane %v2260_v18, 4  ;;  %v8047_v39 = vld [vmem:[%s8459_s20 + $0x1c] ss:$0 sps:$4 sm:$0x11]  }
 0x19c   : > { %v2219_v30 = vsel %vm293_vm6, %v2218_v14, %v2217_v15  ;;  %v2273_v21 = vsel %vm284_vm3, %v2272_v50, %v2271_v47  ;;  %v2263_v22 = vunpack.c.l.b16 %v8042_v52  ;;  %v2313_v16 = vsel %vm278_vm1, %v2312_v61, %v2311_v57  ;;  %v8048_v14 = vld [vmem:[%s8459_s20 + $0x24] ss:$0 sps:$4 sm:$0x11]   ;;  %v8049_v50 = vld [vmem:[%s8459_s20 + $0x2c] ss:$0 sps:$4 sm:$0x11]  }
 0x19d   : > { %2088 = vrot.lane.b32.xlu1 %v9083_v12, %s8348_s4  ;;  %2086 = vrot.lane.b32.xlu0 %v9083_v12, %s12783_s27  ;;  %v9161_v3 = vpack.c.b16 %v2219_v30, %v2219_v30  ;;  %v2275_v38 = vsel %vm287_vm4, %v2274_v62, %v2273_v21  ;;  %v2316_v8 = vrot.slane %v2261_v1, 3  ;;  %v2277_v40 = vrot.slane %v2264_v33, 7  ;;  %v8050_v21 = vld [vmem:[%s8459_s20 + $0x34] ss:$0 sps:$4 sm:$0x11]  }
 0x19e   : > { %v2315_v36 = vsel %vm281_vm2, %v2314_v53, %v2313_v16  ;;  %v2276_v18 = vsel %vm290_vm5, %v2263_v22, %v2275_v38  ;;  %v2362_v43 = vunpack.c.l.b16 %v8046_v44  ;;  %v2318_v31 = vrot.slane %v2262_v27, 2 }
 0x19f   : > { %v2360_v51 = vunpack.c.l.b16 %v8044_v37  ;;  %v2386_v9 = vunpack.c.h.b16 %v8045_v49  ;;  %v2317_v1 = vsel %vm284_vm3, %v2316_v8, %v2315_v36  ;;  %v2278_v34 = vsel %vm293_vm6, %v2277_v40, %v2276_v18  ;;  %v8051_v8 = vld [vmem:[%s8459_s20 + $0x3c] ss:$0 sps:$4 sm:$0x11]  }
 0x1a0   : > { %v2363_v15 = vunpack.c.l.b16 %v8047_v39  ;;  %v2320_v46 = vrot.slane %v2263_v22, 1  ;;  %v2370_v28 = vrot.slane %v2362_v43, 6  ;;  %v2387_v29 = vunpack.c.h.b16 %v8046_v44 }
 0x1a1   : > { %2107 = vrot.lane.b32.xlu1 %v9114_v19, %s8344_s24  ;;  %2090 = vrot.lane.b32.xlu0 %v9083_v12, %s12781_s29  ;;  %v2319_v27 = vsel %vm287_vm4, %v2318_v31, %v2317_v1  ;;  %v2369_v30 = vsel %vm275_vm0, %v2368_v35, %v2360_v51  ;;  %v2393_v47 = vrot.slane %v2386_v9, 7  ;;  %v9190_v52 = vpack.c.b16 %v2278_v34, %v2278_v34 }
 0x1a2   : > { %v2364_v61 = vunpack.c.l.b16 %v8048_v14  ;;  %v2372_v62 = vrot.slane %v2363_v15, 5  ;;  %v2388_v57 = vunpack.c.h.b16 %v8047_v39  ;;  %v2321_v49 = vsel %vm290_vm5, %v2320_v46, %v2319_v27 }
 0x1a3   : > { %v2371_v53 = vsel %vm278_vm1, %v2370_v28, %v2369_v30  ;;  %v2395_v22 = vrot.slane %v2387_v29, 6  ;;  %v2365_v16 = vunpack.c.l.b16 %v8049_v50  ;;  %v2394_v44 = vsel %vm275_vm0, %v2393_v47, %v2385_v20 }
 0x1a4   : > { %v2374_v38 = vrot.slane %v2364_v61, 4  ;;  %v2389_v37 = vunpack.c.h.b16 %v8048_v14  ;;  %v2322_v23 = vsel %vm293_vm6, %v2264_v33, %v2321_v49  ;;  %v2373_v40 = vsel %vm281_vm2, %v2372_v62, %v2371_v53  ;;  %v9237_v53 = vld [vmem:[%s8459_s20 + $0x8] ss:$0 sps:$4 sm:$0x44]  }
 0x1a5   : > { %2111 = vrot.lane.b32.xlu1 %v9114_v19, %s12830_s21  ;;  %2109 = vrot.lane.b32.xlu0 %v9114_v19, %s8346_s28  ;;  %v2397_v36 = vrot.slane %v2388_v57, 5  ;;  %v2366_v39 = vunpack.c.l.b16 %v8050_v21  ;;  %v2396_v18 = vsel %vm278_vm1, %v2395_v22, %v2394_v44  ;;  %v2376_v43 = vrot.slane %v2365_v16, 3  ;;  %v9240_v22 = vld [vmem:[%s8459_s20 + $0x10] ss:$0 sps:$4 sm:$0x44]  }
 0x1a6   : > { %v2390_v31 = vunpack.c.h.b16 %v8049_v50  ;;  %v9204_v51 = vpack.c.b16 %v2322_v23, %v2322_v23  ;;  %v2375_v35 = vsel %vm284_vm3, %v2374_v38, %v2373_v40  ;;  %v2399_v33 = vrot.slane %v2389_v37, 4  ;;  %v9243_v16 = vld [vmem:[%s8459_s20 + $0x18] ss:$0 sps:$4 sm:$0x44]  }
 0x1a7   : > { %v2367_v9 = vunpack.c.l.b16 %v8051_v8  ;;  %v2398_v1 = vsel %vm281_vm2, %v2397_v36, %v2396_v18  ;;  %v2378_v14 = vrot.slane %v2366_v39, 2  ;;  %v2391_v34 = vunpack.c.h.b16 %v8050_v21  ;;  %v9234_v21 = vld [vmem:[%s8459_s20] ss:$0 sps:$4 sm:$0x44]  }
 0x1a8   : > { %v2377_v15 = vsel %vm287_vm4, %v2376_v43, %v2375_v35  ;;  %v2401_v46 = vrot.slane %v2390_v31, 3  ;;  %v2400_v28 = vsel %vm284_vm3, %v2399_v33, %v2398_v1  ;;  %v2392_v27 = vunpack.c.h.b16 %v8051_v8  ;;  %v9250_v38 = vld [vmem:[%s8459_s20 + $0x28] ss:$0 sps:$4 sm:$0x44]  }
 0x1a9   : > { %2115 = vrot.lane.b32.xlu1 %v9114_v19, %s8348_s4  ;;  %2113 = vrot.lane.b32.xlu0 %v9114_v19, %s12783_s27  ;;  %v2380_v29 = vrot.slane %v2367_v9, 1  ;;  %v2379_v50 = vsel %vm290_vm5, %v2378_v14, %v2377_v15  ;;  %v2403_v30 = vrot.slane %v2391_v34, 2  ;;  %v2986_v23 = vunpack.c.l.b16 %v9234_v21  ;;  %v9263_v18 = vld [vmem:[%s8459_s20 + $0x20] ss:$0 sps:$4 sm:$0x44]  }
 0x1aa   : > { %v2402_v20 = vsel %vm287_vm4, %v2401_v46, %v2400_v28  ;;  %v2405_v61 = vrot.slane %v2392_v27, 1  ;;  %v2987_v8 = vunpack.c.l.b16 %v9237_v53  ;;  %v2988_v40 = vunpack.c.l.b16 %v9240_v22  ;;  %v9385_v21 = vld [vmem:[%s8459_s20 + $0x18] ss:$0 sps:$4 sm:$0x88]  }
 0x1ab   : > { %v2381_v47 = vsel %vm293_vm6, %v2380_v29, %v2379_v50  ;;  %v2404_v62 = vsel %vm290_vm5, %v2403_v30, %v2402_v20  ;;  %v2989_v36 = vunpack.c.l.b16 %v9243_v16  ;;  %v1327_v39 = vsel %vm407_vm7, %v8914_v25, %v8897_v59 }
 0x1ac   : > { %v9230_v57 = vpack.c.b16 %v2381_v47, %v2381_v47  ;;  %v2406_v49 = vsel %vm293_vm6, %v2405_v61, %v2404_v62  ;;  %v12755_v43 = vunpack.c.l.b16 %v9250_v38  ;;  %v2994_v31 = vrot.slane %v2986_v23, 4 }
 0x1ad   : > { %2166 = vrot.lane.b32.xlu1 %v9141_v56, %s8344_s24  ;;  %2117 = vrot.lane.b32.xlu0 %v9114_v19, %s12781_s29  ;;  %v2407_v44 = vpack.c.b16 %v2406_v49, %v2406_v49  ;;  %v2995_v35 = vrot.slane %v2987_v8, 3  ;;  %v2997_v33 = vrot.slane %v2988_v40, 2  ;;  %v2999_v59 = vrot.slane %v2989_v36, 1 }
 0x1ae   : > { %v3002_v1 = vrot.slane %v12755_v43, 7  ;;  %v1331_v14 = vsel %vm407_vm7, %v8928_v5, %v8906_v63  ;;  %v2990_v34 = vunpack.c.l.b16 %v9263_v18  ;;  %v1335_v63 = vsel %vm407_vm7, %v8936_v10, %v8702_v26 }
 0x1af   : > { %v2996_v9 = vsel %vm275_vm0, %v2995_v35, %v2994_v31  ;;  %v1339_v50 = vsel %vm407_vm7, %v8916_v2, %v8946_v13  ;;  %v1343_v20 = vsel %vm407_vm7, %v8922_v4, %v8948_v7  ;;  %v1347_v26 = vsel %vm407_vm7, %v8930_v6, %v8950_v24 }
 0x1b0   : > { %v2998_v15 = vsel %vm278_vm1, %v2997_v33, %v2996_v9  ;;  %v3024_v53 = vrot.slane %v2988_v40, 3 }
 0x1b1   : > { %2202 = vrot.lane.b32.xlu1 %v9141_v56, %s12830_s21  ;;  %2200 = vrot.lane.b32.xlu0 %v9141_v56, %s8346_s28  ;;  %v3000_v46 = vsel %vm281_vm2, %v2999_v59, %v2998_v15 }
 0x1b2   : > { %v3001_v29 = vsel %vm284_vm3, %v2990_v34, %v3000_v46  ;;  %v9359_v46 = vld [vmem:[%s8459_s20] ss:$0 sps:$4 sm:$0x88]  }
 0x1b3   : > { %v9289_v27 = vsel %vm287_vm4, %v3002_v1, %v3001_v29 }
 0x1b5   : > { %2221 = vrot.lane.b32.xlu1 %v9161_v3, %s12828_s6  ;;  %2204 = vrot.lane.b32.xlu0 %v9141_v56, %s12783_s27 }
 0x1b9   : > { %2225 = vrot.lane.b32.xlu1 %v9161_v3, %s8344_s24  ;;  %2223 = vrot.lane.b32.xlu0 %v9161_v3, %s12807_s5 }
 0x1bd   : > { %2229 = vrot.lane.b32.xlu1 %v9161_v3, %s12830_s21  ;;  %2227 = vrot.lane.b32.xlu0 %v9161_v3, %s8346_s28 }
 0x1c1   : > { %2280 = vrot.lane.b32.xlu1 %v9190_v52, %s12828_s6  ;;  %2231 = vrot.lane.b32.xlu0 %v9161_v3, %s12783_s27 }
 0x1c5   : > { %2284 = vrot.lane.b32.xlu1 %v9190_v52, %s8344_s24  ;;  %2282 = vrot.lane.b32.xlu0 %v9190_v52, %s12807_s5 }
 0x1c9   : > { %2324 = vrot.lane.b32.xlu1 %v9204_v51, %s12853_s10  ;;  %2307 = vrot.lane.b32.xlu0 %v9190_v52, %s8346_s28 }
 0x1cd   : > { %2328 = vrot.lane.b32.xlu1 %v9204_v51, %s12828_s6  ;;  %2326 = vrot.lane.b32.xlu0 %v9204_v51, %s12852_s9 }
 0x1d1   : > { %2332 = vrot.lane.b32.xlu1 %v9204_v51, %s8344_s24  ;;  %2330 = vrot.lane.b32.xlu0 %v9204_v51, %s12807_s5 }
 0x1d5   : > { %2383 = vrot.lane.b32.xlu1 %v9230_v57, %s12853_s10  ;;  %2334 = vrot.lane.b32.xlu0 %v9204_v51, %s8346_s28 }
 0x1d7   : > { %v1578_v37 = vpop.permute.xlu1 %1577 }
 0x1d8   : > { %7644 = vmatprep.subr.bf16.mxu0 %v1578_v37 }
 0x1d9   : > { %2410 = vrot.lane.b32.xlu1 %v9230_v57, %s12828_s6  ;;  %2408 = vrot.lane.b32.xlu0 %v2407_v44, %s12852_s9 }
 0x1da   : > { %7645 = vmatpush3.bf16.msra.mxu0 %v1327_v39 }
 0x1db   : > { %v1580_v25 = vpop.permute.xlu0 %1579 }
 0x1dc   : > { %7646 = vmatprep.subr.bf16.mxu0 %v1580_v25 }
 0x1dd   : > { %2414 = vrot.lane.b32.xlu1 %v2407_v44, %s8344_s24  ;;  %2412 = vrot.lane.b32.xlu0 %v2407_v44, %s12807_s5 }
 0x1de   : > { %7647 = vmatpush3.bf16.msra.mxu0 %v1331_v14 }
 0x1df   : > { %v1582_v28 = vpop.permute.xlu1 %1581 }
 0x1e0   : > { %7648 = vmatprep.subr.bf16.mxu0 %v1582_v28  ;;  %v9362_v28 = vld [vmem:[%s8459_s20 + $0x8] ss:$0 sps:$4 sm:$0x88]  }
 0x1e2   : > { %7649 = vmatpush3.bf16.msra.mxu0 %v1335_v63 }
 0x1e3   : > { %v1584_v5 = vpop.permute.xlu0 %1583 }
 0x1e4   : > { %7650 = vmatprep.subr.bf16.mxu0 %v1584_v5  ;;  %v8068_v5 = vld [vmem:[%s8459_s20] ss:$0 sps:$4 sm:$0x22]  }
 0x1e6   : > { %7651 = vmatpush3.bf16.msra.mxu0 %v1339_v50 }
 0x1e7   : > { %v1586_v30 = vpop.permute.xlu1 %1585 }
 0x1e8   : > { %7652 = vmatprep.subr.bf16.mxu0 %v1586_v30 }
 0x1ea   : > { %7653 = vmatpush3.bf16.msra.mxu0 %v1343_v20 }
 0x1eb   : > { %v1588_v47 = vpop.permute.xlu0 %1587  ;;  %v1590_v10 = vpop.permute.xlu1 %1589 }
 0x1ec   : > { %7654 = vmatprep.subr.bf16.mxu0 %v1588_v47 }
 0x1ee   : > { %7655 = vmatpush3.bf16.msra.mxu0 %v1347_v26 }
 0x1ef   : > { %v1607_v61 = vpop.permute.xlu0 %1606  ;;  %7656 = vmatprep.subr.bf16.mxu0 %v1590_v10  ;;  %v1609_v2 = vpop.permute.xlu1 %1608  ;;  %v3021_v10 = vrot.slane %v2986_v23, 5 }
 0x1f0   : > { %1685 = vmatpush1.bf16.msra.mxu1 %v1607_v61  ;;  %v9373_v61 = vld [vmem:[%s8459_s20 + $0x10] ss:$0 sps:$4 sm:$0x88]  }
 0x1f1   : > { %1686 = vmatprep.subr.bf16.mxu1 %v12752_v0 }
 0x1f2   : > { %7657 = vmatpush3.bf16.msra.mxu0 %v8942_v11  ;;  %v8212_v11 = vld [vmem:[%s12745_s1 + $0x4] ss:$16 sps:$4 sm:$0xff]  }
 0x1f3   : > { %v1611_v4 = vpop.permute.xlu0 %1610 }
 0x1f4   : > { %1687 = vmatpush1.bf16.msra.mxu1 %v1609_v2 }
 0x1f5   : > { %1668 = vmatmul.mubr.bf16.vlgmr.msra.gmra.mrb[8].mxu0 %v8977_v41  ;;  %1688 = vmatprep.subr.bf16.mxu1 %v12752_v0 }
 0x1f6   : > { %1675 = vmatprep.mubr.bf16.mxu0 %v8984_v42 }
 0x1f7   : > { %v1613_v6 = vpop.permute.xlu1 %1612 }
 0x1f8   : > { %1689 = vmatpush1.bf16.msra.mxu1 %v1611_v4 }
 0x1f9   : > { %1690 = vmatprep.subr.bf16.mxu1 %v12752_v0 }
 0x1fb   : > { %v1615_v13 = vpop.permute.xlu0 %1614 }
 0x1fc   : > { %1691 = vmatpush1.bf16.msra.mxu1 %v1613_v6  ;;  %v3022_v6 = vrot.slane %v2987_v8, 4  ;;  %v12754_v8 = vunpack.c.l.b16 %v9373_v61 }
 0x1fd   : > { %1676 = vmatmul.mubr.bf16.gmra.mrb[12].mxu0 %v8992_v45  ;;  %1692 = vmatprep.subr.bf16.mxu1 %v12752_v0 }
 0x1fe   : > { %2537 = vmatprep.mubr.bf16.mxu0 %v8212_v11  ;;  %v3100_v11 = vunpack.c.l.b16 %v9359_v46 }
 0x1ff   : > { %v1617_v7 = vpop.permute.xlu1 %1616 }
 0x200   : > { %1693 = vmatpush1.bf16.msra.mxu1 %v1615_v13  ;;  %v12757_v13 = vunpack.c.l.b16 %v9362_v28 }
 0x201   : > { %1694 = vmatprep.subr.bf16.mxu1 %v12752_v0 }
 0x203   : > { %v1621_v24 = vpop.permute.xlu1 %1620  ;;  %v1619_v41 = vpop.permute.xlu0 %1618 }
 0x204   : > { %1695 = vmatpush1.bf16.msra.mxu1 %v1617_v7  ;;  %v8070_v7 = vld [vmem:[%s8459_s20 + $0x10] ss:$0 sps:$4 sm:$0x22]  }
 0x205   : > { %1696 = vmatprep.subr.bf16.mxu1 %v12752_v0 }
 0x207   : > { %v9316_v42 = vpop.permute.xlu1 %2080  ;;  %v1631_v45 = vpop.permute.xlu0 %1630 }
 0x208   : > { %1697 = vmatpush1.bf16.msra.mxu1 %v1619_v41  ;;  %v1633_v44 = vsel %vm407_vm7, %v1631_v45, 0  ;;  %v2927_v41 = vunpack.c.l.b16 %v8068_v5 }
 0x209   : > { %1698 = vmatprep.subr.bf16.mxu1 %v12752_v0 }
 0x20b   : > { %v9319_v62 = vpop.permute.xlu1 %2084  ;;  %v9321_v49 = vpop.permute.xlu0 %2082 }
 0x20c   : > { %1699 = vmatpush1.bf16.msra.mxu1 %v1621_v24 }
 0x20d   : > { %1700 = vmatprep.subr.bf16.mxu1 %v12752_v0 }
 0x20f   : > { %v9325_v37 = vpop.permute.xlu1 %2088  ;;  %v9327_v39 = vpop.permute.xlu0 %2086 }
 0x210   : > { %1701 = vmatpush1.bf16.msra.mxu1 %v1633_v44 }
 0x211   : > { %2554 = vmatprep.subr.bf16.mxu1 %v12752_v0 }
 0x213   : > { %v9330_v31 = vpop.permute.xlu1 %2107  ;;  %1717 = vmatmul.mubr.bf16.vlgmr.msra.gmra.mrb[8].mxu1 %v9008_v55  ;;  %v9333_v35 = vpop.permute.xlu0 %2090  ;;  %v8213_v55 = vld [vmem:[%s12745_s1 + $0xc] ss:$16 sps:$4 sm:$0xff]  }
 0x214   : > { %7404 = vmatprep.mubr.msk.bf16.mxu1 %vm777_vm8, %v9014_v58 }
 0x217   : > { %v9337_v33 = vpop.permute.xlu1 %2111  ;;  %v9339_v59 = vpop.permute.xlu0 %2109 }
 0x21b   : > { %v9341_v25 = vpop.permute.xlu1 %2115  ;;  %1725 = vmatmul.mubr.bf16.gmra.mrb[12].mxu1 %v9027_v17  ;;  %v9344_v9 = vpop.permute.xlu0 %2113 }
 0x21c   : > { %7437 = vmatprep.mubr.msk.bf16.mxu1 %vm777_vm8, %v8213_v55 }
 0x21f   : > { %v2167_v1 = vpop.permute.xlu1 %2166  ;;  %v9350_v58 = vpop.permute.xlu0 %2117 }
 0x220   : > { %v9354_v14 = vsel %vm407_vm7, %v9141_v56, %v2167_v1  ;;  %v8069_v56 = vld [vmem:[%s8459_s20 + $0x8] ss:$0 sps:$4 sm:$0x22]  }
 0x221   : > { %2445 = vrot.lane.b32.xlu0 %v9354_v14, %s8346_s28  ;;  %v2928_v45 = vunpack.c.l.b16 %v8069_v56  ;;  %v9403_v56 = vld [vmem:[%s8459_s20 + $0x20] ss:$0 sps:$4 sm:$0x88]  }
 0x223   : > { %v2203_v17 = vpop.permute.xlu1 %2202  ;;  %v2201_v15 = vpop.permute.xlu0 %2200 }
 0x224   : > { %v2288_v29 = vsel %vm407_vm7, %v2201_v15, %v2203_v17  ;;  %v7630_v63 = vpop.f32.mrb[0].mxu0  ;;  %v3023_v17 = vsel %vm275_vm0, %v3022_v6, %v3021_v10  ;;  %v3108_v15 = vrot.slane %v3100_v11, 6  ;;  %v3026_v10 = vrot.slane %v2989_v36, 2 }
 0x225   : > { %v7631_v50 = vpop.f32.mrb[1].mxu0  ;;  %2447 = vrot.lane.b32.xlu1 %v2288_v29, %s8346_s28  ;;  %v3109_v29 = vrot.slane %v12757_v13, 5 }
 0x226   : > { %v9368_v30 = vadd.f32 %v7631_v50, %v7630_v63  ;;  %v7633_v20 = vpop.f32.mrb[2].mxu0  ;;  %v2929_v63 = vunpack.c.l.b16 %v8070_v7  ;;  %v9400_v50 = vld [vmem:[%s8459_s20 + $0x30] ss:$0 sps:$4 sm:$0x44]  }
 0x227   : > { %v7634_v47 = vpop.f32.mrb[3].mxu0  ;;  %v2222_v26 = vpop.permute.xlu1 %2221  ;;  %v3110_v16 = vsel %vm275_vm0, %v3109_v29, %v3108_v15  ;;  %v12759_v29 = vunpack.c.l.b16 %v9400_v50 }
 0x228   : > { %v9375_v2 = vadd.f32 %v7634_v47, %v7633_v20  ;;  %v2205_v4 = vpop.permute.xlu0 %2204  ;;  %v2935_v20 = vrot.slane %v2927_v41, 3  ;;  %v2936_v47 = vrot.slane %v2928_v45, 2  ;;  %v3111_v41 = vrot.slane %v12754_v8, 4  ;;  %v8071_v45 = vld [vmem:[%s8459_s20 + $0x18] ss:$0 sps:$4 sm:$0x22]  }
 0x229   : > { %v2291_v24 = vsel %vm407_vm7, %v2205_v4, %v2222_v26  ;;  %v8072_v4 = vld [vmem:[%s8459_s20 + $0x20] ss:$0 sps:$4 sm:$0x22]   ;;  %v9430_v8 = vld [vmem:[%s8459_s20 + $0x38] ss:$0 sps:$4 sm:$0x44]  }
 0x22a   : > { %2449 = vrot.lane.b32.xlu0 %v2291_v24, %s8346_s28  ;;  %v3025_v24 = vsel %vm278_vm1, %v3024_v53, %v3023_v17  ;;  %v2937_v53 = vsel %vm275_vm0, %v2936_v47, %v2935_v20  ;;  %v8353_v17 = vmov 1966171168   ;;  %v2930_v20 = vunpack.c.l.b16 %v8071_v45 }
 0x22b   : > { %v2226_v23 = vpop.permute.xlu1 %2225  ;;  %v7636_v44 = vpop.f32.mrb[4].mxu0  ;;  %v9427_v0 = vunpack.c.l.s4 %v8353_v17  ;;  %v3027_v15 = vsel %vm281_vm2, %v3026_v10, %v3025_v24  ;;  %v8074_v17 = vld [vmem:[%s8459_s20 + $0x30] ss:$0 sps:$4 sm:$0x22]  }
 0x22c   : > { %v2224_v55 = vpop.permute.xlu0 %2223  ;;  %v7637_v1 = vpop.f32.mrb[5].mxu0 }
 0x22d   : > { %v2294_v5 = vsel %vm407_vm7, %v2224_v55, %v9161_v3  ;;  %v9397_v22 = vadd.f32 %v7637_v1, %v7636_v44  ;;  %v7639_v40 = vpop.f32.mrb[6].mxu0  ;;  %v12756_v3 = vunpack.c.l.b16 %v9385_v21  ;;  %v9417_v55 = vld [vmem:[%s8459_s20 + $0x28] ss:$0 sps:$4 sm:$0x88]   ;;  %v2938_v1 = vrot.slane %v2929_v63, 1 }
 0x22e   : > { %2451 = vrot.lane.b32.xlu1 %v2294_v5, %s8346_s28  ;;  %v7640_v26 = vpop.f32.mrb[7].mxu0  ;;  %v3028_v5 = vrot.slane %v2990_v34, 1  ;;  %v2931_v34 = vunpack.c.l.b16 %v8072_v4  ;;  %v3112_v63 = vsel %vm278_vm1, %v3111_v41, %v3110_v16  ;;  %v9443_v4 = vld [vmem:[%s8459_s20 + $0x30] ss:$0 sps:$4 sm:$0x88]   ;;  %v896_v41 = vunpack.c.0.s8 %v9427_v0 }
 0x22f   : > { %v9410_v6 = vadd.f32 %v7640_v26, %v7639_v40  ;;  %v2230_v7 = vpop.permute.xlu1 %2229  ;;  %v12758_v40 = vunpack.c.l.b16 %v9403_v56  ;;  %v8073_v26 = vld [vmem:[%s8459_s20 + $0x28] ss:$0 sps:$4 sm:$0x22]   ;;  %v3113_v18 = vrot.slane %v12756_v3, 3  ;;  %v2939_v43 = vsel %vm278_vm1, %v2938_v1, %v2937_v53 }
 0x230   : > { %v2228_v44 = vpop.permute.xlu0 %2227  ;;  %v3029_v24 = vsel %vm284_vm3, %v3028_v5, %v3027_v15  ;;  %v2932_v13 = vunpack.c.l.b16 %v8073_v26  ;;  %v9451_v16 = vld [vmem:[%s8459_s20 + $0x38] ss:$0 sps:$4 sm:$0x88]   ;;  %v2941_v53 = vrot.slane %v2931_v34, 7  ;;  %v3031_v5 = vrot.slane %v12759_v29, 7 }
 0x231   : > { %v2297_v36 = vsel %vm407_vm7, %v2226_v23, %v2228_v44  ;;  %v897_v44 = vlaneseq  ;;  %v3115_v3 = vrot.slane %v12758_v40, 2  ;;  %v3114_v1 = vsel %vm281_vm2, %v3113_v18, %v3112_v63  ;;  %v8075_v15 = vld [vmem:[%s8459_s20 + $0x38] ss:$0 sps:$4 sm:$0x22]  }
 0x232   : > { %2453 = vrot.lane.b32.xlu0 %v2297_v36, %s8346_s28  ;;  %v3105_v36 = vunpack.c.l.b16 %v9417_v55  ;;  %v3135_v26 = vrot.slane %v3100_v11, 7  ;;  %v12855_v18 = vunpack.c.l.b16 %v9250_v38  ;;  %v2933_v29 = vunpack.c.l.b16 %v8074_v17 }
 0x233   : > { %v2281_v23 = vpop.permute.xlu1 %2280  ;;  %v3116_v46 = vsel %vm284_vm3, %v3115_v3, %v3114_v1  ;;  %v2943_v11 = vrot.slane %v2932_v13, 6  ;;  %v12760_v38 = vunpack.c.l.b16 %v9451_v16  ;;  %v3106_v13 = vunpack.c.l.b16 %v9443_v4 }
 0x234   : > { %v2232_v47 = vpop.permute.xlu0 %2231  ;;  %v3030_v34 = vsel %vm287_vm4, %v12855_v18, %v3029_v24  ;;  %v3117_v63 = vrot.slane %v3105_v36, 1  ;;  %v2934_v3 = vunpack.c.l.b16 %v8075_v15  ;;  %v2945_v18 = vrot.slane %v2933_v29, 5 }
 0x235   : > { %v2300_v10 = vsel %vm407_vm7, %v2230_v7, %v2232_v47  ;;  %v2940_v47 = vsel %vm281_vm2, %v2930_v20, %v2939_v43  ;;  %v898_v20 = vshrl.u32 %v897_v44, 7  ;;  %v3032_v44 = vsel %vm290_vm5, %v3031_v5, %v3030_v34 }
 0x236   : > { %2455 = vrot.lane.b32.xlu1 %v2300_v10, %s8346_s28  ;;  %v12854_v10 = vunpack.c.l.b16 %v9362_v28  ;;  %v2942_v24 = vsel %vm284_vm3, %v2941_v53, %v2940_v47  ;;  %v822_v53 = vadd.f32 %v9368_v30, %v8887_v54  ;;  %v12858_v47 = vunpack.c.l.b16 %v9385_v21 }
 0x237   : > { %v2285_v7 = vpop.permute.xlu1 %2284  ;;  %v9492_v15 = vsub.s32 %v896_v41, %v898_v20  ;;  %v3120_v30 = vrot.slane %v12760_v38, 7  ;;  %v9502_v41 = vld [vmem:[%s8459_s20 + $0x4] ss:$0 sps:$4 sm:$0x11]  }
 0x238   : > { %v3136_v0 = vrot.slane %v12854_v10, 6  ;;  %v2306_v40 = vsel %vm407_vm7, %v9190_v52, %v2285_v7  ;;  %v2283_v45 = vpop.permute.xlu0 %2282  ;;  %v12856_v52 = vunpack.c.l.b16 %v9430_v8  ;;  %v12857_v7 = vunpack.c.l.b16 %v9373_v61 }
 0x239   : > { %v2303_v43 = vsel %vm407_vm7, %v2281_v23, %v2283_v45  ;;  %v3118_v10 = vsel %vm287_vm4, %v3117_v63, %v3116_v46  ;;  %v2944_v61 = vsel %vm287_vm4, %v2943_v11, %v2942_v24  ;;  %v3140_v5 = vrot.slane %v12858_v47, 4  ;;  %12859 = vst [vmem:[#allocation9_spill] sm:$0xff] %v9492_v15 }
 0x23a   : > { %2459 = vrot.lane.b32.xlu1 %v2306_v40, %s8346_s28  ;;  %2457 = vrot.lane.b32.xlu0 %v2303_v43, %s8346_s28  ;;  %v3033_v28 = vrot.slane %v12856_v52, 6  ;;  %v3138_v17 = vrot.slane %v12857_v7, 5  ;;  %v3137_v45 = vsel %vm275_vm0, %v3136_v0, %v3135_v26  ;;  %v3119_v63 = vsel %vm290_vm5, %v3106_v13, %v3118_v10  ;;  %v9508_v7 = vld [vmem:[%s8459_s20 + $0xc] ss:$0 sps:$4 sm:$0x11]  }
 0x23b   : > { %v2325_v23 = vpop.permute.xlu1 %2324  ;;  %v2947_v46 = vrot.slane %v2934_v3, 4  ;;  %v2946_v52 = vsel %vm290_vm5, %v2945_v18, %v2944_v61  ;;  %v9526_v10 = vrot.slane %v3106_v13, 1  ;;  %v3204_v55 = vunpack.c.h.b16 %v9508_v7 }
 0x23c   : > { %v2308_v1 = vpop.permute.xlu0 %2307  ;;  %v3034_v29 = vsel %vm293_vm6, %v3033_v28, %v3032_v44  ;;  %v3139_v26 = vsel %vm278_vm1, %v3138_v17, %v3137_v45  ;;  %v12860_v28 = vunpack.c.l.b16 %v9403_v56  ;;  %v9524_v56 = vrot.slane %v3105_v36, 2 }
 0x23d   : > { %v2418_v43 = vsel %vm407_vm7, %v2308_v1, %v2325_v23  ;;  %v3141_v3 = vsel %vm281_vm2, %v3140_v5, %v3139_v26  ;;  %v9517_v45 = vpack.c.b16 %v3034_v29, %v3034_v29  ;;  %v9520_v1 = vsel %vm293_vm6, %v3120_v30, %v3119_v63 }
 0x23e   : > { %2476 = vrot.lane.b32.xlu0 %v2306_v40, %s12783_s27  ;;  %2478 = vrot.lane.b32.xlu1 %v2418_v43, %s12783_s27  ;;  %v870_v4 = vpop.f32.mrb[0].mxu1  ;;  %v825_v40 = vadd.f32 %v9375_v2, %v8870_v48  ;;  %v3142_v24 = vrot.slane %v12860_v28, 3  ;;  %v9530_v47 = vsel %vm293_vm6, %v2947_v46, %v2946_v52  ;;  %v3203_v29 = vunpack.c.h.b16 %v9502_v41 }
 0x23f   : > { %v871_v21 = vadd.f32 %v870_v4, %v822_v53  ;;  %v872_v0 = vpop.f32.mrb[1].mxu1  ;;  %v2329_v34 = vpop.permute.xlu1 %2328  ;;  %v833_v46 = vadd.f32 %v9410_v6, %v8903_v60  ;;  %v9556_v6 = vld [vmem:[%s8459_s20 + $0x14] ss:$0 sps:$4 sm:$0x11]  }
 0x240   : > { %v2327_v20 = vpop.permute.xlu0 %2326  ;;  %v873_v11 = vpop.f32.mrb[2].mxu1  ;;  %v9533_v4 = vsel %vm284_vm3, %v3142_v24, %v3141_v3  ;;  %v9761_v60 = vld [vmem:[%s8459_s20 + $0x10] ss:$0 sps:$4 sm:$0x88]  }
 0x241   : > { %v885_v17 = vmax.f32 %v871_v21, 0.0  ;;  %v2421_v2 = vsel %vm407_vm7, %v2327_v20, %v2329_v34  ;;  %v874_v23 = vadd.f32 %v873_v11, %v825_v40  ;;  %v875_v44 = vpop.f32.mrb[3].mxu1  ;;  %v830_v40 = vadd.f32 %v9397_v22, %v8878_v32 }
 0x242   : > { %2480 = vrot.lane.b32.xlu0 %v2421_v2, %s12783_s27  ;;  %v12871_v48 = vunpack.c.l.b16 %v9761_v60 }
 0x243   : > { %v893_v18 = vcombine.high %v885_v17, %v885_v17  ;;  %v900_v43 = vrot.slane %v885_v17, %v9492_v15  ;;  %v886_v53 = vmax.f32 %v874_v23, 0.0  ;;  %v2333_v61 = vpop.permute.xlu1 %2332 }
 0x244   : > { %v2331_v5 = vpop.permute.xlu0 %2330  ;;  %v3894_v54 = vrot.slane %v12871_v48, 4  ;;  %v12872_v48 = vunpack.c.l.b16 %v9400_v50 }
 0x245   : > { %v907_v13 = vrot.slane %v893_v18, %v9492_v15  ;;  %v908_v30 = vcombine.high %v900_v43, %v900_v43  ;;  %v916_v26 = vrot.slane %v900_v43, %v9492_v15  ;;  %v942_v21 = vcombine.high %v886_v53, %v886_v53  ;;  %v9561_v18 = vld [vmem:[%s8459_s20 + $0x1c] ss:$0 sps:$4 sm:$0x11]  }
 0x246   : > { %v949_v0 = vrot.slane %v886_v53, %v9492_v15  ;;  %v2424_v34 = vsel %vm407_vm7, %v2331_v5, %v9204_v51  ;;  %v878_v63 = vpop.f32.mrb[4].mxu1 }
 0x247   : > { %v909_v20 = vcombine.high %v907_v13, %v907_v13  ;;  %v923_v11 = vrot.slane %v907_v13, %v9492_v15  ;;  %v930_v52 = vrot.slane %v908_v30, %v9492_v15  ;;  %v938_v28 = vcombine.high %v916_v26, %v916_v26  ;;  %1122 = vst.msk [vmem:[%s9550_s7] sm:$0x1] %vm1121_vm9, %v916_v26  ;;  %v880_v51 = vpop.f32.mrb[5].mxu1  ;;  %v2384_v22 = vpop.permute.xlu1 %2383 }
 0x248   : > { %2482 = vrot.lane.b32.xlu1 %v2424_v34, %s12783_s27  ;;  %v956_v24 = vrot.slane %v942_v21, %v9492_v15  ;;  %v957_v17 = vcombine.high %v949_v0, %v949_v0  ;;  %v965_v2 = vrot.slane %v949_v0, %v9492_v15  ;;  %v879_v23 = vadd.f32 %v878_v63, %v830_v40  ;;  %v2335_v44 = vpop.permute.xlu0 %2334  ;;  %v881_v3 = vpop.f32.mrb[6].mxu1  ;;  %v9577_v34 = vld [vmem:[%s8459_s20 + $0x24] ss:$0 sps:$4 sm:$0x11]  }
 0x249   : > { %v937_v43 = vrot.slane %v909_v20, %v9492_v15  ;;  %v939_v53 = vcombine.high %v923_v11, %v923_v11  ;;  %v940_v5 = vcombine.high %v930_v52, %v930_v52  ;;  %1123 = vst.msk [vmem:[%s9550_s7 + $0x8] sm:$0x1] %vm1121_vm9, %v930_v52  ;;  %1124 = vst.msk [vmem:[%s9550_s7 + $0x10] sm:$0x1] %vm1121_vm9, %v938_v28  ;;  %v883_v40 = vpop.f32.mrb[7].mxu1  ;;  %v3205_v52 = vunpack.c.h.b16 %v9556_v6 }
 0x24a   : > { %1126 = vst.msk [vmem:[%s9550_s7 + $0x20] sm:$0x1] %vm1121_vm9, %v923_v11  ;;  %v2427_v13 = vsel %vm407_vm7, %v2333_v61, %v2335_v44  ;;  %v958_v30 = vcombine.high %v956_v24, %v956_v24  ;;  %v972_v26 = vrot.slane %v956_v24, %v9492_v15  ;;  %v979_v21 = vrot.slane %v957_v17, %v9492_v15 }
 0x24b   : > { %v987_v0 = vcombine.high %v965_v2, %v965_v2  ;;  %1130 = vst.msk [vmem:[%s9550_s7 + $0x40] sm:$0x1] %vm1121_vm9, %v965_v2  ;;  %2484 = vrot.lane.b32.xlu0 %v2427_v13, %s12783_s27  ;;  %v941_v63 = vcombine.high %v937_v43, %v937_v43  ;;  %1125 = vst.msk [vmem:[%s9550_s7 + $0x18] sm:$0x1] %vm1121_vm9, %v940_v5  ;;  %v887_v61 = vmax.f32 %v879_v23, 0.0  ;;  %v2411_v11 = vpop.permute.xlu1 %2410  ;;  %v3206_v2 = vunpack.c.h.b16 %v9561_v18 }
 0x24c   : > { %1127 = vst.msk [vmem:[%s9550_s7 + $0x28] sm:$0x1] %vm1121_vm9, %v937_v43  ;;  %1128 = vst.msk [vmem:[%s9550_s7 + $0x30] sm:$0x1] %vm1121_vm9, %v939_v53  ;;  %v882_v20 = vadd.f32 %v881_v3, %v833_v46  ;;  %v986_v28 = vrot.slane %v958_v30, %v9492_v15  ;;  %v988_v51 = vcombine.high %v972_v26, %v972_v26  ;;  %v2409_v17 = vpop.permute.xlu0 %2408  ;;  %v12767_v13 = vunpack.c.l.b16 %v9508_v7 }
 0x24d   : > { %v989_v24 = vcombine.high %v979_v21, %v979_v21  ;;  %1131 = vst.msk [vmem:[%s9550_s7 + $0x48] sm:$0x1] %vm1121_vm9, %v979_v21  ;;  %1132 = vst.msk [vmem:[%s9550_s7 + $0x50] sm:$0x1] %vm1121_vm9, %v987_v0  ;;  %v991_v23 = vcombine.high %v887_v61, %v887_v61  ;;  %v998_v44 = vrot.slane %v887_v61, %v9492_v15 }
 0x24e   : > { %1134 = vst.msk [vmem:[%s9550_s7 + $0x60] sm:$0x1] %vm1121_vm9, %v972_v26  ;;  %v9595_v46 = vld [vmem:[%s8459_s20] ss:$0 sps:$4 sm:$0x88]   ;;  %v888_v3 = vmax.f32 %v882_v20, 0.0  ;;  %v2430_v43 = vsel %vm407_vm7, %v2384_v22, %v2409_v17  ;;  %v990_v53 = vcombine.high %v986_v28, %v986_v28 }
 0x24f   : > { %1129 = vst.msk [vmem:[%s9550_s7 + $0x38] sm:$0x1] %vm1121_vm9, %v941_v63  ;;  %1133 = vst.msk [vmem:[%s9550_s7 + $0x58] sm:$0x1] %vm1121_vm9, %v989_v24  ;;  %2486 = vrot.lane.b32.xlu1 %v2430_v43, %s12783_s27  ;;  %v1005_v26 = vrot.slane %v991_v23, %v9492_v15  ;;  %v1006_v21 = vcombine.high %v998_v44, %v998_v44  ;;  %v1014_v22 = vrot.slane %v998_v44, %v9492_v15  ;;  %v2415_v40 = vpop.permute.xlu1 %2414 }
 0x250   : > { %1135 = vst.msk [vmem:[%s9550_s7 + $0x68] sm:$0x1] %vm1121_vm9, %v986_v28  ;;  %1136 = vst.msk [vmem:[%s9550_s7 + $0x70] sm:$0x1] %vm1121_vm9, %v988_v51  ;;  %v1040_v0 = vcombine.high %v888_v3, %v888_v3  ;;  %v1047_v61 = vrot.slane %v888_v3, %v9492_v15  ;;  %v2436_v20 = vsel %vm407_vm7, %v9230_v57, %v2415_v40  ;;  %v2413_v28 = vpop.permute.xlu0 %2412  ;;  %v3211_v51 = vrot.slane %v3204_v55, 7 }
 0x251   : > { %v9614_v63 = vld [vmem:[%s8459_s20 + $0x8] ss:$0 sps:$4 sm:$0x88]   ;;  %1137 = vst.msk [vmem:[%s9550_s7 + $0x78] sm:$0x1] %vm1121_vm9, %v990_v53  ;;  %v12766_v17 = vunpack.c.l.b16 %v9595_v46  ;;  %v1007_v23 = vcombine.high %v1005_v26, %v1005_v26  ;;  %v1021_v44 = vrot.slane %v1005_v26, %v9492_v15  ;;  %v1028_v43 = vrot.slane %v1006_v21, %v9492_v15 }
 0x252   : > { %v9624_v24 = vld [vmem:[%s8459_s20 + $0x10] ss:$0 sps:$4 sm:$0x88]   ;;  %v1036_v3 = vcombine.high %v1014_v22, %v1014_v22  ;;  %1138 = vst.msk [vmem:[%s9550_s7 + $0x80] sm:$0x1] %vm1121_vm9, %v1014_v22  ;;  %v1054_v55 = vrot.slane %v1040_v0, %v9492_v15  ;;  %v1055_v38 = vcombine.high %v1047_v61, %v1047_v61  ;;  %v1063_v36 = vrot.slane %v1047_v61, %v9492_v15 }
 0x253   : > { %v9632_v53 = vld [vmem:[%s8459_s20 + $0x18] ss:$0 sps:$4 sm:$0x88]   ;;  %v9635_v40 = vld [vmem:[%s8459_s20 + $0x20] ss:$0 sps:$4 sm:$0x88]   ;;  %v2433_v5 = vsel %vm407_vm7, %v2411_v11, %v2413_v28  ;;  %2490 = vrot.lane.b32.xlu1 %v2436_v20, %s12783_s27  ;;  %v1035_v26 = vrot.slane %v1007_v23, %v9492_v15  ;;  %v1037_v21 = vcombine.high %v1021_v44, %v1021_v44  ;;  %v1038_v22 = vcombine.high %v1028_v43, %v1028_v43 }
 0x254   : > { %1139 = vst.msk [vmem:[%s9550_s7 + $0x88] sm:$0x1] %vm1121_vm9, %v1028_v43  ;;  %1140 = vst.msk [vmem:[%s9550_s7 + $0x90] sm:$0x1] %vm1121_vm9, %v1036_v3  ;;  %2488 = vrot.lane.b32.xlu0 %v2433_v5, %s12783_s27  ;;  %v12765_v11 = vunpack.c.l.b16 %v9614_v63  ;;  %v1056_v61 = vcombine.high %v1054_v55, %v1054_v55  ;;  %v1070_v20 = vrot.slane %v1054_v55, %v9492_v15  ;;  %v12761_v3 = vunpack.c.l.b16 %v9632_v53 }
 0x255   : > { %1142 = vst.msk [vmem:[%s9550_s7 + $0xa0] sm:$0x1] %vm1121_vm9, %v1021_v44  ;;  %v9650_v0 = vld [vmem:[%s8459_s20 + $0x28] ss:$0 sps:$4 sm:$0x88]   ;;  %v1077_v28 = vrot.slane %v1055_v38, %v9492_v15  ;;  %v1085_v23 = vcombine.high %v1063_v36, %v1063_v36  ;;  %v1039_v43 = vcombine.high %v1035_v26, %v1035_v26  ;;  %v12762_v44 = vunpack.c.l.b16 %v9624_v24 }
 0x256   : > { %1146 = vst.msk [vmem:[%s9550_s7 + $0xc0] sm:$0x1] %vm1121_vm9, %v1063_v36  ;;  %1141 = vst.msk [vmem:[%s9550_s7 + $0x98] sm:$0x1] %vm1121_vm9, %v1038_v22  ;;  %v12764_v38 = vunpack.c.l.b16 %v9635_v40  ;;  %v1084_v55 = vrot.slane %v1056_v61, %v9492_v15  ;;  %v1086_v36 = vcombine.high %v1070_v20, %v1070_v20  ;;  %v4735_v22 = vrot.slane %v12765_v11, 5 }
 0x257   : > { %1143 = vst.msk [vmem:[%s9550_s7 + $0xa8] sm:$0x1] %vm1121_vm9, %v1035_v26  ;;  %1144 = vst.msk [vmem:[%s9550_s7 + $0xb0] sm:$0x1] %vm1121_vm9, %v1037_v21  ;;  %v1087_v30 = vcombine.high %v1077_v28, %v1077_v28  ;;  %2500 = vrot.lane.b32.xlu1 %v9230_v57, %s12781_s29  ;;  %v4734_v26 = vrot.slane %v12766_v17, 6  ;;  %v12763_v21 = vunpack.c.l.b16 %v9650_v0  ;;  %v4737_v61 = vrot.slane %v12762_v44, 4 }
 0x258   : > { %v9664_v5 = vld [vmem:[%s8459_s20 + $0x38] ss:$0 sps:$4 sm:$0x88]   ;;  %1147 = vst.msk [vmem:[%s9550_s7 + $0xc8] sm:$0x1] %vm1121_vm9, %v1077_v28  ;;  %3036 = vrot.lane.b32.xlu0 %v9517_v45, %s8344_s24  ;;  %v4739_v57 = vrot.slane %v12761_v3, 3  ;;  %v3212_v28 = vsel %vm275_vm0, %v3211_v51, %v3203_v29  ;;  %v9726_v51 = vpack.c.b16 %v9530_v47, %v9530_v47  ;;  %v12862_v47 = vunpack.c.h.b16 %v9577_v34 }
 0x259   : > { %1148 = vst.msk [vmem:[%s9550_s7 + $0xd0] sm:$0x1] %vm1121_vm9, %v1085_v23  ;;  %1150 = vst.msk [vmem:[%s9550_s7 + $0xe0] sm:$0x1] %vm1121_vm9, %v1070_v20  ;;  %v1088_v20 = vcombine.high %v1084_v55, %v1084_v55  ;;  %v3213_v23 = vrot.slane %v3205_v52, 6  ;;  %v4741_v3 = vrot.slane %v12764_v38, 2  ;;  %v9722_v52 = vpack.c.b16 %v9520_v1, %v9520_v1 }
 0x25a   : > { %1145 = vst.msk [vmem:[%s9550_s7 + $0xb8] sm:$0x1] %vm1121_vm9, %v1039_v43  ;;  %1149 = vst.msk [vmem:[%s9550_s7 + $0xd8] sm:$0x1] %vm1121_vm9, %v1087_v30  ;;  %v3236_v30 = vrot.slane %v12767_v13, 7  ;;  %v4743_v29 = vrot.slane %v12763_v21, 1 }
 0x25b   : > { %1151 = vst.msk [vmem:[%s9550_s7 + $0xe8] sm:$0x1] %vm1121_vm9, %v1084_v55  ;;  %1152 = vst.msk [vmem:[%s9550_s7 + $0xf0] sm:$0x1] %vm1121_vm9, %v1086_v36  ;;  %v12768_v55 = vunpack.c.l.b16 %v9664_v5  ;;  %v4736_v36 = vsel %vm275_vm0, %v4735_v22, %v4734_v26  ;;  %3072 = vrot.lane.b32.xlu1 %v9517_v45, %s12830_s21  ;;  %v3145_v26 = vsel %vm287_vm4, %v9524_v56, %v9533_v4  ;;  %v3215_v1 = vrot.slane %v3206_v2, 5 }
 0x25c   : > { %v9703_v43 = vld [vmem:[%s8459_s20 + $0x30] ss:$0 sps:$4 sm:$0x88]   ;;  %v9708_v44 = vld [vmem:[%s8459_s20 + $0x2c] ss:$0 sps:$4 sm:$0x11]   ;;  %3070 = vrot.lane.b32.xlu0 %v9517_v45, %s8346_s28  ;;  %v3214_v11 = vsel %vm278_vm1, %v3213_v23, %v3212_v28 }
 0x25d   : > { %1153 = vst.msk [vmem:[%s9550_s7 + $0xf8] sm:$0x1] %vm1121_vm9, %v1088_v20  ;;  %v9732_v22 = vld [vmem:[%s8459_s20] ss:$0 sps:$4 sm:$0x88]   ;;  %v4738_v20 = vsel %vm278_vm1, %v4737_v61, %v4736_v36  ;;  %v4746_v56 = vrot.slane %v12768_v55, 7  ;;  %v12861_v61 = vunpack.c.l.b16 %v9556_v6  ;;  %v12771_v17 = vunpack.c.l.b16 %v9703_v43 }
 0x25e   : > { %v9735_v21 = vld [vmem:[%s8459_s20 + $0x8] ss:$0 sps:$4 sm:$0x88]   ;;  %v4740_v38 = vsel %vm281_vm2, %v4739_v57, %v4738_v20  ;;  %v9747_v4 = vld [vmem:[%s8459_s20 + $0x34] ss:$0 sps:$4 sm:$0x11]   ;;  %v3208_v2 = vunpack.c.h.b16 %v9708_v44  ;;  %v12863_v20 = vunpack.c.l.b16 %v9502_v41 }
 0x25f   : > { %v3238_v36 = vrot.slane %v12861_v61, 6  ;;  %v4742_v13 = vsel %vm284_vm3, %v4741_v3, %v4740_v38  ;;  %v3217_v57 = vrot.slane %v12862_v47, 4  ;;  %3123 = vrot.lane.b32.xlu1 %v9722_v52, %s12828_s6  ;;  %v3209_v38 = vunpack.c.h.b16 %v9747_v4  ;;  %v9786_v23 = vld [vmem:[%s8459_s20 + $0x18] ss:$0 sps:$4 sm:$0x88]  }
 0x260   : > { %v3237_v55 = vsel %vm275_vm0, %v3236_v30, %v12863_v20  ;;  %v4744_v28 = vsel %vm287_vm4, %v4743_v29, %v4742_v13  ;;  %3074 = vrot.lane.b32.xlu0 %v9517_v45, %s12783_s27  ;;  %v9775_v30 = vld [vmem:[%s8459_s20 + $0x3c] ss:$0 sps:$4 sm:$0x11]   ;;  %v3216_v13 = vsel %vm281_vm2, %v3215_v1, %v3214_v11  ;;  %v12864_v29 = vunpack.c.l.b16 %v9561_v18  ;;  %v9806_v11 = vld [vmem:[%s8459_s20 + $0x20] ss:$0 sps:$4 sm:$0x88]  }
 0x261   : > { %v4745_v47 = vsel %vm290_vm5, %v12771_v17, %v4744_v28  ;;  %v3239_v3 = vsel %vm278_vm1, %v3238_v36, %v3237_v55  ;;  %v3147_v28 = vsel %vm290_vm5, %v9526_v10, %v3145_v26  ;;  %v3219_v17 = vrot.slane %v3208_v2, 3 }
 0x262   : > { %v3240_v61 = vrot.slane %v12864_v29, 5  ;;  %v9781_v20 = vsel %vm293_vm6, %v4746_v56, %v4745_v47  ;;  %v3218_v1 = vsel %vm284_vm3, %v3217_v57, %v3216_v13  ;;  %v12866_v56 = vunpack.c.l.b16 %v9577_v34 }
 0x263   : > { %12865 = vst [vmem:[#allocation10_spill] sm:$0xff] %v9781_v20  ;;  %2950 = vrot.lane.b32.xlu1 %v9726_v51, %s8344_s24  ;;  %v12867_v55 = vunpack.c.l.b16 %v9732_v22  ;;  %v12868_v29 = vunpack.c.l.b16 %v9735_v21  ;;  %v3210_v26 = vunpack.c.h.b16 %v9775_v30  ;;  %v12869_v57 = vunpack.c.l.b16 %v9451_v16 }
 0x264   : > { %v3242_v47 = vrot.slane %v12866_v56, 4  ;;  %3125 = vrot.lane.b32.xlu0 %v9722_v52, %s12807_s5  ;;  %v3241_v2 = vsel %vm281_vm2, %v3240_v61, %v3239_v3  ;;  %v3221_v56 = vrot.slane %v3209_v38, 2  ;;  %v3234_v32 = vunpack.c.l.b16 %v9747_v4  ;;  %v9822_v3 = vld [vmem:[%s8459_s20 + $0x28] ss:$0 sps:$4 sm:$0x88]  }
 0x265   : > { %v3891_v36 = vrot.slane %v12867_v55, 6  ;;  %v3892_v10 = vrot.slane %v12868_v29, 5  ;;  %v3148_v13 = vsel %vm293_vm6, %v12869_v57, %v3147_v28  ;;  %v3886_v55 = vunpack.c.l.b16 %v9786_v23 }
 0x266   : > { %v3220_v29 = vsel %vm287_vm4, %v3219_v17, %v3218_v1  ;;  %v12870_v20 = vunpack.c.l.b16 %v9708_v44  ;;  %v3243_v16 = vsel %vm284_vm3, %v3242_v47, %v3241_v2  ;;  %v9827_v4 = vpack.c.b16 %v3148_v13, %v3148_v13 }
 0x267   : > { %3129 = vrot.lane.b32.xlu1 %v9722_v52, %s8346_s28  ;;  %v3893_v38 = vsel %vm275_vm0, %v3892_v10, %v3891_v36  ;;  %v3223_v17 = vrot.slane %v3210_v26, 1  ;;  %v3235_v61 = vunpack.c.l.b16 %v9775_v30  ;;  %v3004_v28 = vrot.slane %v12872_v48, 6 }
 0x268   : > { %v3244_v15 = vrot.slane %v12870_v20, 3  ;;  %3127 = vrot.lane.b32.xlu0 %v9722_v52, %s8344_s24  ;;  %v3887_v20 = vunpack.c.l.b16 %v9806_v11  ;;  %v3222_v1 = vsel %vm290_vm5, %v3221_v56, %v3220_v29  ;;  %v3246_v47 = vrot.slane %v3234_v32, 2 }
 0x269   : > { %v3896_v36 = vrot.slane %v3886_v55, 3  ;;  %v12873_v10 = vunpack.c.l.b16 %v9430_v8  ;;  %v12874_v30 = vunpack.c.l.b16 %v9502_v41  ;;  %v3895_v11 = vsel %vm278_vm1, %v3894_v54, %v3893_v38 }
 0x26a   : > { %v3245_v26 = vsel %vm287_vm4, %v3244_v15, %v3243_v16  ;;  %v3888_v50 = vunpack.c.l.b16 %v9822_v3  ;;  %v3224_v13 = vsel %vm293_vm6, %v3223_v17, %v3222_v1  ;;  %v3248_v8 = vrot.slane %v3235_v61, 1  ;;  %v9852_v16 = vld [vmem:[%s8459_s20 + $0x38] ss:$0 sps:$4 sm:$0x88]  }
 0x26b   : > { %v3006_v2 = vrot.slane %v12873_v10, 5  ;;  %v3261_v57 = vrot.slane %v12874_v30, 1  ;;  %3131 = vrot.lane.b32.xlu1 %v9722_v52, %s12830_s21  ;;  %v3898_v56 = vrot.slane %v3887_v20, 2  ;;  %v3247_v29 = vsel %vm290_vm5, %v3246_v47, %v3245_v26  ;;  %v8090_v10 = vld [vmem:[%s8459_s20 + $0x30] ss:$0 sps:$4 sm:$0x88]  }
 0x26c   : > { %3154 = vrot.lane.b32.xlu0 %v9827_v4, %s8344_s24  ;;  %v12875_v15 = vunpack.c.l.b16 %v9556_v6  ;;  %v3897_v54 = vsel %vm281_vm2, %v3896_v36, %v3895_v11  ;;  %v3005_v38 = vsel %vm290_vm5, %v3004_v28, %v9289_v27  ;;  %v12876_v3 = vunpack.c.l.b16 %v9508_v7 }
 0x26d   : > { %v9862_v17 = vsel %vm293_vm6, %v3006_v2, %v3005_v38  ;;  %v3900_v6 = vrot.slane %v3888_v50, 1  ;;  %v9868_v1 = vpack.c.b16 %v3224_v13, %v3224_v13  ;;  %v3249_v47 = vsel %vm293_vm6, %v3248_v8, %v3247_v29 }
 0x26e   : > { %v3263_v41 = vrot.slane %v12875_v15, 7  ;;  %v3262_v48 = vsel %vm275_vm0, %v12876_v3, %v3261_v57  ;;  %v12877_v27 = vunpack.c.l.b16 %v9561_v18  ;;  %v3899_v28 = vsel %vm284_vm3, %v3898_v56, %v3897_v54 }
 0x26f   : > { %3177 = vrot.lane.b32.xlu1 %v9827_v4, %s8346_s28  ;;  %v3890_v2 = vunpack.c.l.b16 %v9852_v16  ;;  %v12878_v26 = vunpack.c.l.b16 %v9577_v34  ;;  %v3889_v57 = vunpack.c.l.b16 %v8090_v10  ;;  %v3250_v11 = vpack.c.b16 %v3249_v47, %v3249_v47  ;;  %v8099_v16 = vld [vmem:[%s8459_s20 + $0x3c] ss:$0 sps:$4 sm:$0x11]  }
 0x270   : > { %3133 = vrot.lane.b32.xlu0 %v9722_v52, %s12783_s27  ;;  %v3265_v7 = vrot.slane %v12877_v27, 6  ;;  %v3264_v36 = vsel %vm278_vm1, %v3263_v41, %v3262_v48  ;;  %v3901_v13 = vsel %vm287_vm4, %v3900_v6, %v3899_v28  ;;  %v12879_v8 = vunpack.c.l.b16 %v9732_v22  ;;  %v8093_v27 = vld [vmem:[%s8459_s20 + $0xc] ss:$0 sps:$4 sm:$0x11]  }
 0x271   : > { %v3267_v30 = vrot.slane %v12878_v26, 5  ;;  %v12880_v29 = vunpack.c.l.b16 %v9735_v21  ;;  %v3903_v15 = vrot.slane %v3890_v2, 7  ;;  %v12881_v41 = vunpack.c.l.b16 %v9708_v44  ;;  %v8092_v26 = vld [vmem:[%s8459_s20 + $0x4] ss:$0 sps:$4 sm:$0x11]  }
 0x272   : > { %v3946_v18 = vrot.slane %v12879_v8, 7  ;;  %v3266_v34 = vsel %vm281_vm2, %v3265_v7, %v3264_v36  ;;  %v3902_v38 = vsel %vm290_vm5, %v3889_v57, %v3901_v13  ;;  %v12882_v22 = vunpack.c.l.b16 %v9761_v60 }
 0x273   : > { %3150 = vrot.lane.b32.xlu1 %v9827_v4, %s12828_s6  ;;  %v3947_v56 = vrot.slane %v12880_v29, 6  ;;  %v3269_v54 = vrot.slane %v12881_v41, 4  ;;  %v3268_v21 = vsel %vm284_vm3, %v3267_v30, %v3266_v34  ;;  %v3271_v10 = vrot.slane %v3234_v32, 3 }
 0x274   : > { %3226 = vrot.lane.b32.xlu0 %v9868_v1, %s12853_s10  ;;  %v3949_v3 = vrot.slane %v12882_v22, 5  ;;  %v3904_v44 = vsel %vm293_vm6, %v3903_v15, %v3902_v38  ;;  %v3951_v6 = vrot.slane %v3886_v55, 4  ;;  %v3273_v7 = vrot.slane %v3235_v61, 2  ;;  %v8094_v55 = vld [vmem:[%s8459_s20 + $0x14] ss:$0 sps:$4 sm:$0x11]  }
 0x275   : > { %v3948_v48 = vsel %vm275_vm0, %v3947_v56, %v3946_v18  ;;  %v3270_v60 = vsel %vm287_vm4, %v3269_v54, %v3268_v21  ;;  %v9909_v28 = vpack.c.b16 %v3904_v44, %v3904_v44  ;;  %v3953_v32 = vrot.slane %v3887_v20, 3  ;;  %v8095_v20 = vld [vmem:[%s8459_s20 + $0x1c] ss:$0 sps:$4 sm:$0x11]  }
 0x276   : > { %v3950_v47 = vsel %vm278_vm1, %v3949_v3, %v3948_v48  ;;  %v3272_v36 = vsel %vm290_vm5, %v3271_v10, %v3270_v60  ;;  %v4023_v30 = vunpack.c.h.b16 %v8093_v27  ;;  %v3955_v13 = vrot.slane %v3888_v50, 2  ;;  %v8096_v50 = vld [vmem:[%s8459_s20 + $0x24] ss:$0 sps:$4 sm:$0x11]  }
 0x277   : > { %3251 = vrot.lane.b32.xlu1 %v3250_v11, %s12852_s9  ;;  %v3952_v23 = vsel %vm281_vm2, %v3951_v6, %v3950_v47  ;;  %v3274_v8 = vsel %vm293_vm6, %v3273_v7, %v3272_v36  ;;  %v4024_v18 = vunpack.c.h.b16 %v8094_v55  ;;  %v3957_v29 = vrot.slane %v3889_v57, 1  ;;  %v8097_v57 = vld [vmem:[%s8459_s20 + $0x2c] ss:$0 sps:$4 sm:$0x11]  }
 0x278   : > { %3152 = vrot.lane.b32.xlu0 %v9827_v4, %s12807_s5  ;;  %v3954_v61 = vsel %vm284_vm3, %v3953_v32, %v3952_v23  ;;  %v4022_v56 = vunpack.c.h.b16 %v8092_v26  ;;  %v4030_v34 = vrot.slane %v4023_v30, 7  ;;  %v9921_v15 = vpack.c.b16 %v3274_v8, %v3274_v8  ;;  %v8098_v47 = vld [vmem:[%s8459_s20 + $0x34] ss:$0 sps:$4 sm:$0x11]  }
 0x279   : > { %v3956_v41 = vsel %vm287_vm4, %v3955_v13, %v3954_v61  ;;  %v4025_v54 = vunpack.c.h.b16 %v8095_v20  ;;  %v4032_v38 = vrot.slane %v4024_v18, 6  ;;  %v3997_v3 = vunpack.c.l.b16 %v8092_v26 }
 0x27a   : > { %v3958_v22 = vsel %vm290_vm5, %v3957_v29, %v3956_v41  ;;  %v3999_v21 = vunpack.c.l.b16 %v8094_v55  ;;  %v4031_v48 = vsel %vm275_vm0, %v4030_v34, %v4022_v56  ;;  %v4026_v10 = vunpack.c.h.b16 %v8096_v50 }
 0x27b   : > { %3255 = vrot.lane.b32.xlu1 %v3250_v11, %s12807_s5  ;;  %v4034_v6 = vrot.slane %v4025_v54, 5  ;;  %v3959_v60 = vsel %vm293_vm6, %v3890_v2, %v3958_v22  ;;  %v4033_v7 = vsel %vm278_vm1, %v4032_v38, %v4031_v48  ;;  %v4027_v32 = vunpack.c.h.b16 %v8097_v57 }
 0x27c   : > { %3253 = vrot.lane.b32.xlu0 %v9868_v1, %s12828_s6  ;;  %v4072_v36 = vrot.slane %v3997_v3, 1  ;;  %v4007_v23 = vrot.slane %v3999_v21, 6  ;;  %v4036_v55 = vrot.slane %v4026_v10, 4  ;;  %v9944_v30 = vpack.c.b16 %v3959_v60, %v3959_v60 }
 0x27d   : > { %v4001_v2 = vunpack.c.l.b16 %v8096_v50  ;;  %v4035_v13 = vsel %vm281_vm2, %v4034_v6, %v4033_v7  ;;  %v4028_v8 = vunpack.c.h.b16 %v8098_v47  ;;  %v4074_v61 = vrot.slane %v3999_v21, 7 }
 0x27e   : > { %v4038_v18 = vrot.slane %v4027_v32, 3  ;;  %v4002_v34 = vunpack.c.l.b16 %v8097_v57  ;;  %v4037_v41 = vsel %vm284_vm3, %v4036_v55, %v4035_v13  ;;  %v4029_v50 = vunpack.c.h.b16 %v8099_v16 }
 0x27f   : > { %3257 = vrot.lane.b32.xlu1 %v3250_v11, %s8344_s24  ;;  %v3998_v11 = vunpack.c.l.b16 %v8093_v27  ;;  %v4000_v27 = vunpack.c.l.b16 %v8095_v20  ;;  %v4011_v38 = vrot.slane %v4001_v2, 4  ;;  %v4040_v22 = vrot.slane %v4028_v8, 2 }
 0x280   : > { %3906 = vrot.lane.b32.xlu0 %v9909_v28, %s8344_s24  ;;  %v4039_v48 = vsel %vm287_vm4, %v4038_v18, %v4037_v41  ;;  %v4078_v57 = vrot.slane %v4001_v2, 5  ;;  %v4013_v10 = vrot.slane %v4002_v34, 3  ;;  %v4042_v6 = vrot.slane %v4029_v50, 1 }
 0x281   : > { %v4005_v44 = vrot.slane %v3998_v11, 7  ;;  %v4009_v20 = vrot.slane %v4000_v27, 5  ;;  %v4073_v29 = vsel %vm275_vm0, %v3998_v11, %v4072_v36  ;;  %v4076_v54 = vrot.slane %v4000_v27, 6 }
 0x282   : > { %v4003_v11 = vunpack.c.l.b16 %v8098_v47  ;;  %v2170_v47 = vsel %vm407_vm7, %v9083_v12, %v9316_v42  ;;  %v4004_v7 = vunpack.c.l.b16 %v8099_v16  ;;  %v4041_v32 = vsel %vm290_vm5, %v4040_v22, %v4039_v48 }
 0x283   : > { %3940 = vrot.lane.b32.xlu1 %v9909_v28, %s8346_s28  ;;  %v4006_v26 = vsel %vm275_vm0, %v4005_v44, %v3997_v3  ;;  %v4075_v3 = vsel %vm278_vm1, %v4074_v61, %v4073_v29  ;;  %v4080_v36 = vrot.slane %v4002_v34, 4  ;;  %v4043_v12 = vsel %vm293_vm6, %v4042_v6, %v4041_v32 }
 0x284   : > { %3259 = vrot.lane.b32.xlu0 %v9868_v1, %s8346_s28  ;;  %v4008_v56 = vsel %vm278_vm1, %v4007_v23, %v4006_v26  ;;  %v4077_v60 = vsel %vm281_vm2, %v4076_v54, %v4075_v3  ;;  %v4015_v23 = vrot.slane %v4003_v11, 2  ;;  %v2174_v42 = vsel %vm407_vm7, %v9321_v49, %v9319_v62 }
 0x285   : > { %v4010_v21 = vsel %vm281_vm2, %v4009_v20, %v4008_v56  ;;  %v4079_v55 = vsel %vm284_vm3, %v4078_v57, %v4077_v60  ;;  %v4082_v16 = vrot.slane %v4003_v11, 3  ;;  %v4017_v13 = vrot.slane %v4004_v7, 1  ;;  %v8216_v60 = vld [vmem:[%s12745_s1 + $0x20] ss:$16 sps:$4 sm:$0xff]  }
 0x286   : > { %v4012_v27 = vsel %vm284_vm3, %v4011_v38, %v4010_v21  ;;  %v4081_v8 = vsel %vm287_vm4, %v4080_v36, %v4079_v55  ;;  %v4044_v20 = vpack.c.b16 %v4043_v12, %v4043_v12  ;;  %v4084_v18 = vrot.slane %v4004_v7, 2  ;;  %v8214_v21 = vld [vmem:[%s12745_s1] ss:$16 sps:$4 sm:$0xff]  }
 0x287   : > { %3276 = vrot.lane.b32.xlu1 %v9921_v15, %s12853_s10  ;;  %v4014_v26 = vsel %vm287_vm4, %v4013_v10, %v4012_v27  ;;  %v4083_v56 = vsel %vm290_vm5, %v4082_v16, %v4081_v8  ;;  %v2178_v49 = vsel %vm407_vm7, %v9327_v39, %v9325_v37  ;;  %v2182_v54 = vsel %vm407_vm7, %v9333_v35, %v9114_v19  ;;  %v8108_v16 = vld [vmem:[%s8459_s20 + $0x4] ss:$0 sps:$4 sm:$0x22]  }
 0x288   : > { %3942 = vrot.lane.b32.xlu0 %v9909_v28, %s12830_s21  ;;  %v4016_v61 = vsel %vm290_vm5, %v4015_v23, %v4014_v26  ;;  %v4085_v34 = vsel %vm293_vm6, %v4084_v18, %v4083_v56  ;;  %v2186_v39 = vsel %vm407_vm7, %v9330_v31, %v9339_v59  ;;  %v2190_v35 = vsel %vm407_vm7, %v9337_v33, %v9344_v9 }
 0x289   : > { %v4018_v62 = vsel %vm293_vm6, %v4017_v13, %v4016_v61  ;;  %v10000_v38 = vpack.c.b16 %v4085_v34, %v4085_v34  ;;  %v2194_v31 = vsel %vm407_vm7, %v9341_v25, %v9350_v58  ;;  %v12885_v33 = vmov 0   ;;  %v8215_v25 = vld [vmem:[%s12745_s1 + $0x24] ss:$16 sps:$4 sm:$0xff]   ;;  %v8109_v13 = vld [vmem:[%s8459_s20 + $0xc] ss:$0 sps:$4 sm:$0x22]  }
 0x28a   : > { %v9995_v41 = vpack.c.b16 %v4018_v62, %v4018_v62  ;;  %v12887_v48 = vunpack.c.l.b16 %v9614_v63  ;;  %v12889_v63 = vunpack.c.l.b16 %v9632_v53  ;;  %v12890_v36 = vunpack.c.l.b16 %v9635_v40 }
 0x28b   : > { %3944 = vrot.lane.b32.xlu1 %v9909_v28, %s12783_s27  ;;  %12884 = vst [vmem:[#allocation12_spill] sm:$0xff] %v10000_v38  ;;  %v12891_v12 = vunpack.c.l.b16 %v9650_v0  ;;  %v4123_v34 = vunpack.c.l.b16 %v8108_v16 }
 0x28c   : > { %3278 = vrot.lane.b32.xlu0 %v9921_v15, %s12852_s9  ;;  %12883 = vst [vmem:[#allocation11_spill] sm:$0xff] %v9995_v41  ;;  %v4762_v57 = vrot.slane %v12887_v48, 6  ;;  %v4768_v23 = vrot.slane %v12890_v36, 3  ;;  %v12894_v48 = vunpack.c.l.b16 %v9664_v5 }
 0x28d   : > { %v4770_v53 = vrot.slane %v12891_v12, 2 }
 0x28f   : > { %3280 = vrot.lane.b32.xlu1 %v9921_v15, %s12828_s6 }
 0x290   : > { %3961 = vrot.lane.b32.xlu0 %v9944_v30, %s12828_s6 }
 0x293   : > { %3963 = vrot.lane.b32.xlu1 %v9944_v30, %s12807_s5  ;;  %v2446_v44 = vpop.permute.xlu0 %2445 }
 0x294   : > { %3282 = vrot.lane.b32.xlu0 %v9921_v15, %s12807_s5  ;;  %7670 = vmatprep.subr.bf16.mxu0 %v2446_v44  ;;  %v12888_v44 = vunpack.c.l.b16 %v9624_v24  ;;  %v4766_v24 = vrot.slane %v12889_v63, 4 }
 0x295   : > { %7671 = vmatpush3.bf16.msra.mxu0 %v2170_v47 }
 0x296   : > { %v4764_v6 = vrot.slane %v12888_v44, 5 }
 0x297   : > { %3965 = vrot.lane.b32.xlu1 %v9944_v30, %s8344_s24  ;;  %v2448_v2 = vpop.permute.xlu1 %2447 }
 0x298   : > { %3284 = vrot.lane.b32.xlu0 %v9921_v15, %s8344_s24  ;;  %7672 = vmatprep.subr.bf16.mxu0 %v2448_v2 }
 0x299   : > { %7673 = vmatpush3.bf16.msra.mxu0 %v2174_v42 }
 0x29b   : > { %3969 = vrot.lane.b32.xlu1 %v9944_v30, %s12830_s21 }
 0x29c   : > { %3967 = vrot.lane.b32.xlu0 %v9944_v30, %s8346_s28  ;;  %v2450_v29 = vpop.permute.xlu0 %2449 }
 0x29d   : > { %7674 = vmatprep.subr.bf16.mxu0 %v2450_v29  ;;  %v12892_v29 = vunpack.c.l.b16 %v9703_v43 }
 0x29e   : > { %7675 = vmatpush3.bf16.msra.mxu0 %v2178_v49 }
 0x29f   : > { %4047 = vrot.lane.b32.xlu1 %v4044_v20, %s8344_s24  ;;  %v4772_v56 = vrot.slane %v12892_v29, 1 }
 0x2a0   : > { %3971 = vrot.lane.b32.xlu0 %v9944_v30, %s12783_s27  ;;  %v2452_v50 = vpop.permute.xlu1 %2451  ;;  %s12897_s27 = smov 122  }
 0x2a1   : > { %7676 = vmatprep.subr.bf16.mxu0 %v2452_v50  ;;  %v4124_v50 = vunpack.c.l.b16 %v8109_v13  ;;  %v10123_v13 = vld [vmem:[%s8459_s20 + $0x24] ss:$0 sps:$4 sm:$0x11]  }
 0x2a2   : > { %7677 = vmatpush3.bf16.msra.mxu0 %v2182_v54 }
 0x2a3   : > { %4045 = vrot.lane.b32.xlu1 %v4044_v20, %s12807_s5 }
 0x2a4   : > { %4020 = vrot.lane.b32.xlu0 %v9995_v41, %s12828_s6  ;;  %v2454_v37 = vpop.permute.xlu0 %2453 }
 0x2a5   : > { %7678 = vmatprep.subr.bf16.mxu0 %v2454_v37  ;;  %v10072_v37 = vld [vmem:[%s8459_s20 + $0xc] ss:$0 sps:$4 sm:$0x11]  }
 0x2a6   : > { %7679 = vmatpush3.bf16.msra.mxu0 %v2186_v39  ;;  %v8111_v39 = vld [vmem:[%s8459_s20 + $0x1c] ss:$0 sps:$4 sm:$0x22]   ;;  %v4866_v5 = vunpack.c.l.b16 %v10072_v37 }
 0x2a7   : > { %4087 = vrot.lane.b32.xlu1 %v10000_v38, %s12853_s10  ;;  %v4126_v44 = vunpack.c.l.b16 %v8111_v39 }
 0x2a8   : > { %4070 = vrot.lane.b32.xlu0 %v9995_v41, %s8346_s28  ;;  %v2456_v19 = vpop.permute.xlu1 %2455 }
 0x2a9   : > { %7680 = vmatprep.subr.bf16.mxu0 %v2456_v19 }
 0x2aa   : > { %7681 = vmatpush3.bf16.msra.mxu0 %v2190_v35 }
 0x2ab   : > { %4089 = vrot.lane.b32.xlu1 %v10000_v38, %s12852_s9 }
 0x2ac   : > { %v2458_v22 = vpop.permute.xlu0 %2457  ;;  %v2460_v59 = vpop.permute.xlu1 %2459 }
 0x2ad   : > { %7682 = vmatprep.subr.bf16.mxu0 %v2458_v22  ;;  %v8110_v22 = vld [vmem:[%s8459_s20 + $0x14] ss:$0 sps:$4 sm:$0x22]  }
 0x2ae   : > { %7683 = vmatpush3.bf16.msra.mxu0 %v2194_v31 }
 0x2af   : > { %2952 = vrot.lane.b32.xlu1 %v9726_v51, %s8346_s28  ;;  %7684 = vmatprep.subr.bf16.mxu0 %v2460_v59 }
 0x2b0   : > { %v2477_v3 = vpop.permute.xlu0 %2476  ;;  %v2479_v9 = vpop.permute.xlu1 %2478 }
 0x2b1   : > { %2555 = vmatpush1.bf16.msra.mxu1 %v2477_v3  ;;  %v4131_v3 = vrot.slane %v4123_v34, 2  ;;  %v4873_v34 = vrot.slane %v4866_v5, 7 }
 0x2b2   : > { %7685 = vmatpush3.bf16.msra.mxu0 %v9354_v14  ;;  %2556 = vmatprep.subr.bf16.mxu1 %v12885_v33  ;;  %v12886_v14 = vunpack.c.l.b16 %v9595_v46  ;;  %v8217_v46 = vld [vmem:[%s12745_s1 + $0x4] ss:$16 sps:$4 sm:$0xff]  }
 0x2b4   : > { %v2481_v58 = vpop.permute.xlu0 %2480  ;;  %v4761_v11 = vrot.slane %v12886_v14, 7  ;;  %v4841_v14 = vunpack.c.h.b16 %v10072_v37  ;;  %v10416_v37 = vld [vmem:[%s8459_s20 + $0x10] ss:$0 sps:$4 sm:$0x44]  }
 0x2b5   : > { %2538 = vmatmul.mubr.bf16.vlgmr.msra.gmra.mrb[16].mxu0 %v8214_v21  ;;  %2557 = vmatpush1.bf16.msra.mxu1 %v2479_v9  ;;  %v4132_v9 = vrot.slane %v4124_v50, 1  ;;  %v10083_v21 = vld [vmem:[%s8459_s20 + $0x14] ss:$0 sps:$4 sm:$0x11]  }
 0x2b6   : > { %2558 = vmatprep.subr.bf16.mxu1 %v12885_v33  ;;  %2545 = vmatprep.mubr.bf16.mxu0 %v8215_v25  ;;  %v4763_v27 = vsel %vm275_vm0, %v4762_v57, %v4761_v11  ;;  %v8112_v25 = vld [vmem:[%s8459_s20 + $0x24] ss:$0 sps:$4 sm:$0x22]  }
 0x2b7   : > { %v4765_v32 = vsel %vm278_vm1, %v4764_v6, %v4763_v27  ;;  %v10099_v27 = vld [vmem:[%s8459_s20 + $0x1c] ss:$0 sps:$4 sm:$0x11]  }
 0x2b8   : > { %v4767_v55 = vsel %vm281_vm2, %v4766_v24, %v4765_v32  ;;  %v8113_v24 = vld [vmem:[%s8459_s20 + $0x2c] ss:$0 sps:$4 sm:$0x22]  }
 0x2b9   : > { %2559 = vmatpush1.bf16.msra.mxu1 %v2481_v58  ;;  %v4769_v42 = vsel %vm284_vm3, %v4768_v23, %v4767_v55  ;;  %v10090_v58 = vld [vmem:[%s8459_s20 + $0x4] ss:$0 sps:$4 sm:$0x11]   ;;  %v4127_v55 = vunpack.c.l.b16 %v8112_v25  ;;  %v4128_v29 = vunpack.c.l.b16 %v8113_v24  ;;  %v8220_v24 = vld [vmem:[%s12745_s1 + $0x28] ss:$16 sps:$4 sm:$0xff]  }
 0x2ba   : > { %2560 = vmatprep.subr.bf16.mxu1 %v12885_v33  ;;  %v2483_v10 = vpop.permute.xlu1 %2482  ;;  %v4771_v18 = vsel %vm287_vm4, %v4770_v53, %v4769_v42  ;;  %v8218_v53 = vld [vmem:[%s12745_s1 + $0x8] ss:$16 sps:$4 sm:$0xff]   ;;  %v4135_v42 = vrot.slane %v4126_v44, 7 }
 0x2bb   : > { %v4773_v35 = vsel %vm290_vm5, %v4772_v56, %v4771_v18  ;;  %v4867_v18 = vunpack.c.l.b16 %v10083_v21 }
 0x2bc   : > { %v4774_v57 = vsel %vm293_vm6, %v12894_v48, %v4773_v35 }
 0x2bd   : > { %2546 = vmatmul.mubr.bf16.gmra.mrb[20].mxu0 %v8216_v60  ;;  %2561 = vmatpush1.bf16.msra.mxu1 %v2483_v10  ;;  %v2485_v47 = vpop.permute.xlu0 %2484  ;;  %v4125_v60 = vunpack.c.l.b16 %v8110_v22  ;;  %v10112_v36 = vpack.c.b16 %v4774_v57, %v4774_v57  ;;  %v4844_v22 = vunpack.c.h.b16 %v10123_v13  ;;  %v4875_v25 = vrot.slane %v4867_v18, 6 }
 0x2be   : > { %2562 = vmatprep.subr.bf16.mxu1 %v12885_v33  ;;  %3407 = vmatprep.mubr.bf16.mxu0 %v8217_v46 }
 0x2bf   : > { %12895 = vst [vmem:[#allocation14_spill] sm:$0xff] %v10112_v36 }
 0x2c1   : > { %v2487_v7 = vpop.permute.xlu1 %2486  ;;  %2563 = vmatpush1.bf16.msra.mxu1 %v2485_v47  ;;  %v4133_v47 = vsel %vm275_vm0, %v4132_v9, %v4131_v3 }
 0x2c2   : > { %2564 = vmatprep.subr.bf16.mxu1 %v12885_v33 }
 0x2c5   : > { %v2491_v26 = vpop.permute.xlu1 %2490  ;;  %2565 = vmatpush1.bf16.msra.mxu1 %v2487_v7  ;;  %v4842_v7 = vunpack.c.h.b16 %v10083_v21 }
 0x2c6   : > { %v2489_v2 = vpop.permute.xlu0 %2488  ;;  %2566 = vmatprep.subr.bf16.mxu1 %v12885_v33 }
 0x2c7   : > { %v4850_v56 = vrot.slane %v4842_v7, 6 }
 0x2c8   : > { %v7658_v61 = vpop.f32.mrb[8].mxu0 }
 0x2c9   : > { %v2501_v8 = vpop.permute.xlu1 %2500  ;;  %v7659_v40 = vpop.f32.mrb[9].mxu0  ;;  %2567 = vmatpush1.bf16.msra.mxu1 %v2489_v2  ;;  %v4848_v2 = vrot.slane %v4841_v14, 7  ;;  %v4139_v14 = vrot.slane %v4128_v29, 5 }
 0x2ca   : > { %v3037_v20 = vpop.permute.xlu0 %3036  ;;  %v10066_v62 = vadd.f32 %v7659_v40, %v7658_v61  ;;  %v7661_v49 = vpop.f32.mrb[10].mxu0  ;;  %2568 = vmatprep.subr.bf16.mxu1 %v12885_v33  ;;  %v2503_v31 = vsel %vm407_vm7, %v2501_v8, 0  ;;  %v8219_v8 = vld [vmem:[%s12745_s1 + $0x2c] ss:$16 sps:$4 sm:$0xff]   ;;  %v4843_v40 = vunpack.c.h.b16 %v10099_v27 }
 0x2cb   : > { %v10064_v0 = vsel %vm407_vm7, %v9517_v45, %v3037_v20  ;;  %v7662_v54 = vpop.f32.mrb[11].mxu0  ;;  %v8114_v61 = vld [vmem:[%s8459_s20 + $0x34] ss:$0 sps:$4 sm:$0x22]   ;;  %v4134_v20 = vsel %vm278_vm1, %v4125_v60, %v4133_v47 }
 0x2cc   : > { %12893 = vst [vmem:[#allocation13_spill] sm:$0xff] %v10064_v0  ;;  %3315 = vrot.lane.b32.xlu0 %v10064_v0, %s8346_s28  ;;  %v10074_v43 = vadd.f32 %v7662_v54, %v7661_v49  ;;  %v4865_v49 = vunpack.c.l.b16 %v10090_v58  ;;  %v4137_v54 = vrot.slane %v4127_v55, 6  ;;  %v4136_v35 = vsel %vm281_vm2, %v4135_v42, %v4134_v20 }
 0x2cd   : > { %v3073_v45 = vpop.permute.xlu1 %3072  ;;  %2569 = vmatpush1.bf16.msra.mxu1 %v2491_v26  ;;  %v4840_v26 = vunpack.c.h.b16 %v10090_v58  ;;  %v4129_v3 = vunpack.c.l.b16 %v8114_v61  ;;  %v4852_v9 = vrot.slane %v4843_v40, 5  ;;  %v8221_v61 = vld [vmem:[%s12745_s1 + $0xc] ss:$16 sps:$4 sm:$0xff]   ;;  %v4900_v58 = vrot.slane %v4867_v18, 7 }
 0x2ce   : > { %v3071_v19 = vpop.permute.xlu0 %3070  ;;  %2570 = vmatprep.subr.bf16.mxu1 %v12885_v33  ;;  %v4874_v57 = vsel %vm275_vm0, %v4873_v34, %v4865_v49  ;;  %v4138_v44 = vsel %vm284_vm3, %v4137_v54, %v4136_v35 }
 0x2cf   : > { %v3158_v59 = vsel %vm407_vm7, %v3071_v19, %v3073_v45  ;;  %v10143_v45 = vld [vmem:[%s8459_s20 + $0x2c] ss:$0 sps:$4 sm:$0x11]   ;;  %v4849_v39 = vsel %vm275_vm0, %v4848_v2, %v4840_v26  ;;  %v8115_v19 = vld [vmem:[%s8459_s20 + $0x3c] ss:$0 sps:$4 sm:$0x22]  }
 0x2d0   : > { %4091 = vrot.lane.b32.xlu0 %v10000_v38, %s12828_s6  ;;  %3317 = vrot.lane.b32.xlu1 %v3158_v59, %s8346_s28  ;;  %v7664_v11 = vpop.f32.mrb[12].mxu0  ;;  %v4868_v59 = vunpack.c.l.b16 %v10099_v27  ;;  %v4851_v48 = vsel %vm278_vm1, %v4850_v56, %v4849_v39  ;;  %v4130_v7 = vunpack.c.l.b16 %v8115_v19  ;;  %v4141_v2 = vrot.slane %v4129_v3, 4 }
 0x2d1   : > { %v10096_v10 = vpop.permute.xlu1 %3123  ;;  %v7665_v6 = vpop.f32.mrb[13].mxu0  ;;  %2571 = vmatpush1.bf16.msra.mxu1 %v2503_v31  ;;  %v4853_v42 = vsel %vm281_vm2, %v4852_v9, %v4851_v48  ;;  %v4870_v20 = vunpack.c.l.b16 %v10143_v45 }
 0x2d2   : > { %v10101_v46 = vadd.f32 %v7665_v6, %v7664_v11  ;;  %v7667_v63 = vpop.f32.mrb[14].mxu0  ;;  %3424 = vmatprep.subr.bf16.mxu1 %v12885_v33  ;;  %v3075_v23 = vpop.permute.xlu0 %3074  ;;  %v10155_v11 = vld [vmem:[%s8459_s20 + $0x34] ss:$0 sps:$4 sm:$0x11]   ;;  %v4845_v6 = vunpack.c.h.b16 %v10143_v45  ;;  %v4877_v55 = vrot.slane %v4868_v59, 5  ;;  %v4143_v34 = vrot.slane %v4130_v7, 3 }
 0x2d3   : > { %v7668_v32 = vpop.f32.mrb[15].mxu0  ;;  %v3161_v47 = vsel %vm407_vm7, %v3075_v23, %v10096_v10  ;;  %v4140_v10 = vsel %vm287_vm4, %v4139_v14, %v4138_v44  ;;  %v4846_v23 = vunpack.c.h.b16 %v10155_v11  ;;  %v12786_v3 = vunpack.c.l.b16 %v10155_v11  ;;  %v10450_v45 = vld [vmem:[%s8459_s20 + $0xc] ss:$0 sps:$4 sm:$0x22]  }
 0x2d4   : > { %2954 = vrot.lane.b32.xlu0 %v9726_v51, %s12830_s21  ;;  %4093 = vrot.lane.b32.xlu1 %v10000_v38, %s12807_s5  ;;  %v10115_v12 = vadd.f32 %v7668_v32, %v7667_v63  ;;  %v4869_v63 = vunpack.c.l.b16 %v10123_v13  ;;  %v4854_v32 = vrot.slane %v4844_v22, 4  ;;  %v4856_v40 = vrot.slane %v4845_v6, 3 }
 0x2d5   : > { %2587 = vmatmul.mubr.bf16.vlgmr.msra.gmra.mrb[16].mxu1 %v8218_v53  ;;  %v10120_v16 = vpop.permute.xlu1 %2950  ;;  %v10180_v53 = vld [vmem:[%s8459_s20 + $0x3c] ss:$0 sps:$4 sm:$0x11]   ;;  %v4142_v35 = vsel %vm290_vm5, %v4141_v2, %v4140_v10  ;;  %v4858_v9 = vrot.slane %v4846_v23, 2  ;;  %v4906_v13 = vrot.slane %v4870_v20, 4 }
 0x2d6   : > { %7438 = vmatprep.mubr.msk.bf16.mxu1 %vm777_vm8, %v8219_v8  ;;  %v10140_v50 = vpop.permute.xlu0 %3125  ;;  %v4876_v8 = vsel %vm278_vm1, %v4875_v25, %v4874_v57  ;;  %v4879_v29 = vrot.slane %v4869_v63, 4  ;;  %v4855_v54 = vsel %vm284_vm3, %v4854_v32, %v4853_v42  ;;  %v4847_v22 = vunpack.c.h.b16 %v10180_v53 }
 0x2d7   : > { %v4878_v39 = vsel %vm281_vm2, %v4877_v55, %v4876_v8  ;;  %v4881_v25 = vrot.slane %v4870_v20, 3  ;;  %v4857_v14 = vsel %vm287_vm4, %v4856_v40, %v4855_v54  ;;  %v4144_v57 = vsel %vm293_vm6, %v4143_v34, %v4142_v35 }
 0x2d8   : > { %4776 = vrot.lane.b32.xlu0 %v10112_v36, %s8344_s24  ;;  %2958 = vrot.lane.b32.xlu1 %v9726_v51, %s8348_s4  ;;  %v4880_v48 = vsel %vm284_vm3, %v4879_v29, %v4878_v39  ;;  %v12785_v44 = vunpack.c.l.b16 %v10180_v53  ;;  %v4860_v7 = vrot.slane %v4847_v22, 1  ;;  %v4883_v32 = vrot.slane %v12786_v3, 2 }
 0x2d9   : > { %v10149_v31 = vpop.permute.xlu1 %3129  ;;  %v4859_v42 = vsel %vm290_vm5, %v4858_v9, %v4857_v14  ;;  %v4882_v8 = vsel %vm287_vm4, %v4881_v25, %v4880_v48  ;;  %v10231_v40 = vpack.c.b16 %v4144_v57, %v4144_v57  ;;  %v3164_v29 = vsel %vm407_vm7, %v10140_v50, %v9722_v52  ;;  %v12901_v48 = vld [vmem:[#allocation9_spill] sm:$0xff] }
 0x2da   : > { %v10167_v60 = vpop.permute.xlu0 %3127  ;;  %v4885_v54 = vrot.slane %v12785_v44, 1  ;;  %v4861_v25 = vsel %vm293_vm6, %v4860_v7, %v4859_v42  ;;  %v4884_v14 = vsel %vm290_vm5, %v4883_v32, %v4882_v8  ;;  %v10248_v52 = vpack.c.b16 %v9862_v17, %v9862_v17 }
 0x2db   : > { %12900 = vst [vmem:[#allocation15_spill] sm:$0xff] %v10231_v40 }
 0x2dc   : > { %2956 = vrot.lane.b32.xlu0 %v9726_v51, %s12896_s8  ;;  %4810 = vrot.lane.b32.xlu1 %v10112_v36, %s8346_s28  ;;  %v4886_v7 = vsel %vm293_vm6, %v4885_v54, %v4884_v14 }
 0x2dd   : > { %2595 = vmatmul.mubr.bf16.gmra.mrb[20].mxu1 %v8220_v24  ;;  %v10177_v26 = vpop.permute.xlu1 %3131  ;;  %v12898_v24 = vld [vmem:[#allocation7_spill] sm:$0xff] }
 0x2de   : > { %7471 = vmatprep.mubr.msk.bf16.mxu1 %vm777_vm8, %v8221_v61  ;;  %v10196_v56 = vpop.permute.xlu0 %3154 }
 0x2e0   : > { %4095 = vrot.lane.b32.xlu1 %v10000_v38, %s8344_s24  ;;  %3319 = vrot.lane.b32.xlu0 %v3161_v47, %s8346_s28  ;;  %v1670_v47 = vadd.f32 %v10066_v62, %v12898_v24  ;;  %v12899_v62 = vld [vmem:[#allocation5_spill] sm:$0xff] }
 0x2e1   : > { %v10200_v19 = vpop.permute.xlu1 %3177  ;;  %v1673_v23 = vadd.f32 %v10074_v43, %v12899_v62 }
 0x2e2   : > { %v10221_v55 = vpop.permute.xlu0 %3133 }
 0x2e3   : > { %v3170_v27 = vsel %vm407_vm7, %v10177_v26, %v10221_v55 }
 0x2e4   : > { %2960 = vrot.lane.b32.xlu1 %v9726_v51, %s12897_s27  ;;  %4812 = vrot.lane.b32.xlu0 %v10112_v36, %s12830_s21 }
 0x2e5   : > { %v10215_v6 = vpop.permute.xlu1 %3150 }
 0x2e6   : > { %v1718_v2 = vpop.f32.mrb[8].mxu1  ;;  %v10250_v50 = vpop.permute.xlu0 %3226 }
 0x2e7   : > { %v1719_v61 = vadd.f32 %v1718_v2, %v1670_v47  ;;  %v1720_v10 = vpop.f32.mrb[9].mxu1  ;;  %v10252_v2 = vpack.c.b16 %v4861_v25, %v4861_v25 }
 0x2e8   : > { %4814 = vrot.lane.b32.xlu1 %v10112_v36, %s12896_s8  ;;  %4097 = vrot.lane.b32.xlu0 %v10000_v38, %s8346_s28  ;;  %v1721_v34 = vpop.f32.mrb[10].mxu1 }
 0x2e9   : > { %v10238_v39 = vpop.permute.xlu1 %3251  ;;  %v1733_v35 = vmax.f32 %v1719_v61, 0.0  ;;  %v1722_v22 = vadd.f32 %v1721_v34, %v1673_v23  ;;  %v1723_v9 = vpop.f32.mrb[11].mxu1  ;;  %12902 = vst [vmem:[#allocation16_spill] sm:$0xff] %v10252_v2 }
 0x2eb   : > { %v1741_v43 = vcombine.high %v1733_v35, %v1733_v35  ;;  %v1748_v57 = vrot.slane %v1733_v35, %v12901_v48  ;;  %v1734_v47 = vmax.f32 %v1722_v22, 0.0  ;;  %v3167_v35 = vsel %vm407_vm7, %v10167_v60, %v10149_v31  ;;  %v12904_v22 = vld [vmem:[#allocation8_spill] sm:$0xff] }
 0x2ec   : > { %4146 = vrot.lane.b32.xlu1 %v10231_v40, %s12853_s10  ;;  %3321 = vrot.lane.b32.xlu0 %v3164_v29, %s8346_s28  ;;  %v12903_v29 = vld [vmem:[#allocation6_spill] sm:$0xff]  ;;  %v1681_v54 = vadd.f32 %v10115_v12, %v12904_v22 }
 0x2ed   : > { %v1755_v32 = vrot.slane %v1741_v43, %v12901_v48  ;;  %v1756_v42 = vcombine.high %v1748_v57, %v1748_v57  ;;  %v1764_v8 = vrot.slane %v1748_v57, %v12901_v48  ;;  %v1790_v61 = vcombine.high %v1734_v47, %v1734_v47  ;;  %v10257_v10 = vpop.permute.xlu1 %3255  ;;  %v10273_v57 = vpop.permute.xlu0 %3152 }
 0x2ee   : > { %v1797_v23 = vrot.slane %v1734_v47, %v12901_v48  ;;  %v1678_v17 = vadd.f32 %v10101_v46, %v12903_v29  ;;  %v1726_v34 = vpop.f32.mrb[12].mxu1 }
 0x2ef   : > { %v1757_v9 = vcombine.high %v1755_v32, %v1755_v32  ;;  %v1771_v25 = vrot.slane %v1755_v32, %v12901_v48  ;;  %v1778_v14 = vrot.slane %v1756_v42, %v12901_v48  ;;  %v1786_v43 = vcombine.high %v1764_v8, %v1764_v8  ;;  %1969 = vst.msk [vmem:[%s9550_s7 + $0x1] sm:$0x1] %vm1121_vm9, %v1764_v8  ;;  %v1728_v46 = vpop.f32.mrb[13].mxu1 }
 0x2f0   : > { %3009 = vrot.lane.b32.xlu1 %v10248_v52, %s8344_s24  ;;  %v1804_v31 = vrot.slane %v1790_v61, %v12901_v48  ;;  %v1805_v12 = vcombine.high %v1797_v23, %v1797_v23  ;;  %v1813_v60 = vrot.slane %v1797_v23, %v12901_v48  ;;  %4863 = vrot.lane.b32.xlu0 %v10252_v2, %s12828_s6  ;;  %v1729_v32 = vpop.f32.mrb[14].mxu1 }
 0x2f1   : > { %v1727_v47 = vadd.f32 %v1726_v34, %v1678_v17  ;;  %v1785_v42 = vrot.slane %v1757_v9, %v12901_v48  ;;  %v1787_v8 = vcombine.high %v1771_v25, %v1771_v25  ;;  %v1788_v46 = vcombine.high %v1778_v14, %v1778_v14  ;;  %1970 = vst.msk [vmem:[%s9550_s7 + $0x9] sm:$0x1] %vm1121_vm9, %v1778_v14  ;;  %v1731_v23 = vpop.f32.mrb[15].mxu1 }
 0x2f2   : > { %1971 = vst.msk [vmem:[%s9550_s7 + $0x11] sm:$0x1] %vm1121_vm9, %v1786_v43  ;;  %1973 = vst.msk [vmem:[%s9550_s7 + $0x21] sm:$0x1] %vm1121_vm9, %v1771_v25  ;;  %v1730_v61 = vadd.f32 %v1729_v32, %v1681_v54  ;;  %v1806_v44 = vcombine.high %v1804_v31, %v1804_v31  ;;  %v1820_v3 = vrot.slane %v1804_v31, %v12901_v48  ;;  %v10299_v43 = vpop.permute.xlu1 %3257  ;;  %v10314_v32 = vpop.permute.xlu0 %3253 }
 0x2f3   : > { %v1827_v17 = vrot.slane %v1805_v12, %v12901_v48  ;;  %v1835_v34 = vcombine.high %v1813_v60, %v1813_v60  ;;  %1977 = vst.msk [vmem:[%s9550_s7 + $0x41] sm:$0x1] %vm1121_vm9, %v1813_v60  ;;  %v1789_v9 = vcombine.high %v1785_v42, %v1785_v42  ;;  %1972 = vst.msk [vmem:[%s9550_s7 + $0x19] sm:$0x1] %vm1121_vm9, %v1788_v46  ;;  %v1735_v54 = vmax.f32 %v1727_v47, 0.0 }
 0x2f4   : > { %1974 = vst.msk [vmem:[%s9550_s7 + $0x29] sm:$0x1] %vm1121_vm9, %v1785_v42  ;;  %1975 = vst.msk [vmem:[%s9550_s7 + $0x31] sm:$0x1] %vm1121_vm9, %v1787_v8  ;;  %v1736_v25 = vmax.f32 %v1730_v61, 0.0  ;;  %3323 = vrot.lane.b32.xlu1 %v3167_v35, %s8346_s28  ;;  %v10297_v14 = vpack.c.b16 %v4886_v7, %v4886_v7  ;;  %v1834_v31 = vrot.slane %v1806_v44, %v12901_v48  ;;  %4148 = vrot.lane.b32.xlu0 %v10231_v40, %s12852_s9 }
 0x2f5   : > { %v1836_v12 = vcombine.high %v1820_v3, %v1820_v3  ;;  %v1837_v60 = vcombine.high %v1827_v17, %v1827_v17  ;;  %1978 = vst.msk [vmem:[%s9550_s7 + $0x49] sm:$0x1] %vm1121_vm9, %v1827_v17  ;;  %1979 = vst.msk [vmem:[%s9550_s7 + $0x51] sm:$0x1] %vm1121_vm9, %v1835_v34  ;;  %v1839_v7 = vcombine.high %v1735_v54, %v1735_v54 }
 0x2f6   : > { %1981 = vst.msk [vmem:[%s9550_s7 + $0x61] sm:$0x1] %vm1121_vm9, %v1820_v3  ;;  %1976 = vst.msk [vmem:[%s9550_s7 + $0x39] sm:$0x1] %vm1121_vm9, %v1789_v9  ;;  %v1846_v35 = vrot.slane %v1735_v54, %v12901_v48  ;;  %v1888_v47 = vcombine.high %v1736_v25, %v1736_v25  ;;  %v1895_v44 = vrot.slane %v1736_v25, %v12901_v48 }
 0x2f7   : > { %v1838_v42 = vcombine.high %v1834_v31, %v1834_v31  ;;  %1980 = vst.msk [vmem:[%s9550_s7 + $0x59] sm:$0x1] %vm1121_vm9, %v1837_v60  ;;  %1982 = vst.msk [vmem:[%s9550_s7 + $0x69] sm:$0x1] %vm1121_vm9, %v1834_v31  ;;  %v1853_v3 = vrot.slane %v1839_v7, %v12901_v48  ;;  %v10335_v34 = vsel %vm407_vm7, %v9827_v4, %v10196_v56 }
 0x2f8   : > { %1983 = vst.msk [vmem:[%s9550_s7 + $0x71] sm:$0x1] %vm1121_vm9, %v1836_v12  ;;  %v1854_v8 = vcombine.high %v1846_v35, %v1846_v35  ;;  %v1862_v46 = vrot.slane %v1846_v35, %v12901_v48  ;;  %v1902_v61 = vrot.slane %v1888_v47, %v12901_v48  ;;  %4888 = vrot.lane.b32.xlu1 %v10297_v14, %s12807_s5  ;;  %v10341_v12 = vpop.permute.xlu1 %3940 }
 0x2f9   : > { %1984 = vst.msk [vmem:[%s9550_s7 + $0x79] sm:$0x1] %vm1121_vm9, %v1838_v42  ;;  %v1903_v23 = vcombine.high %v1895_v44, %v1895_v44  ;;  %v1911_v17 = vrot.slane %v1895_v44, %v12901_v48  ;;  %3011 = vrot.lane.b32.xlu0 %v10248_v52, %s8346_s28  ;;  %v1855_v9 = vcombine.high %v1853_v3, %v1853_v3  ;;  %v10356_v42 = vpop.permute.xlu0 %3906 }
 0x2fa   : > { %v1869_v54 = vrot.slane %v1853_v3, %v12901_v48  ;;  %v1876_v25 = vrot.slane %v1854_v8, %v12901_v48  ;;  %v1884_v31 = vcombine.high %v1862_v46, %v1862_v46  ;;  %1985 = vst.msk [vmem:[%s9550_s7 + $0x81] sm:$0x1] %vm1121_vm9, %v1862_v46  ;;  %v1904_v60 = vcombine.high %v1902_v61, %v1902_v61 }
 0x2fb   : > { %v1918_v7 = vrot.slane %v1902_v61, %v12901_v48  ;;  %v1925_v4 = vrot.slane %v1903_v23, %v12901_v48  ;;  %v1933_v56 = vcombine.high %v1911_v17, %v1911_v17  ;;  %1993 = vst.msk [vmem:[%s9550_s7 + $0xc1] sm:$0x1] %vm1121_vm9, %v1911_v17  ;;  %v1883_v35 = vrot.slane %v1855_v9, %v12901_v48 }
 0x2fc   : > { %v1885_v47 = vcombine.high %v1869_v54, %v1869_v54  ;;  %v1886_v44 = vcombine.high %v1876_v25, %v1876_v25  ;;  %1986 = vst.msk [vmem:[%s9550_s7 + $0x89] sm:$0x1] %vm1121_vm9, %v1876_v25  ;;  %1987 = vst.msk [vmem:[%s9550_s7 + $0x91] sm:$0x1] %vm1121_vm9, %v1884_v31  ;;  %4152 = vrot.lane.b32.xlu1 %v10231_v40, %s12807_s5  ;;  %v1932_v3 = vrot.slane %v1904_v60, %v12901_v48  ;;  %v10385_v9 = vpop.permute.xlu1 %3276 }
 0x2fd   : > { %1989 = vst.msk [vmem:[%s9550_s7 + $0xa1] sm:$0x1] %vm1121_vm9, %v1869_v54  ;;  %v1934_v8 = vcombine.high %v1918_v7, %v1918_v7  ;;  %v1935_v46 = vcombine.high %v1925_v4, %v1925_v4  ;;  %1994 = vst.msk [vmem:[%s9550_s7 + $0xc9] sm:$0x1] %vm1121_vm9, %v1925_v4  ;;  %3346 = vrot.lane.b32.xlu0 %v10335_v34, %s12896_s8  ;;  %v1887_v61 = vcombine.high %v1883_v35, %v1883_v35 }
 0x2fe   : > { %1995 = vst.msk [vmem:[%s9550_s7 + $0xd1] sm:$0x1] %vm1121_vm9, %v1933_v56  ;;  %1997 = vst.msk [vmem:[%s9550_s7 + $0xe1] sm:$0x1] %vm1121_vm9, %v1918_v7  ;;  %v1936_v23 = vcombine.high %v1932_v3, %v1932_v3  ;;  %v4898_v17 = vrot.slane %v4865_v49, 1  ;;  %v3288_v54 = vsel %vm407_vm7, %v10200_v19, %v10250_v50  ;;  %v10396_v49 = vpop.permute.xlu0 %3259  ;;  %v4902_v7 = vrot.slane %v4868_v59, 6 }
 0x2ff   : > { %1988 = vst.msk [vmem:[%s9550_s7 + $0x99] sm:$0x1] %vm1121_vm9, %v1886_v44  ;;  %1990 = vst.msk [vmem:[%s9550_s7 + $0xa9] sm:$0x1] %vm1121_vm9, %v1883_v35  ;;  %v4904_v50 = vrot.slane %v4869_v63, 5  ;;  %v12788_v63 = vunpack.c.l.b16 %v10416_v37  ;;  %v3291_v29 = vsel %vm407_vm7, %v10238_v39, %v10314_v32  ;;  %v10618_v33 = vsel %vm407_vm7, %v9909_v28, %v10356_v42 }
 0x300   : > { %1991 = vst.msk [vmem:[%s9550_s7 + $0xb1] sm:$0x1] %vm1121_vm9, %v1885_v47  ;;  %1996 = vst.msk [vmem:[%s9550_s7 + $0xd9] sm:$0x1] %vm1121_vm9, %v1935_v46  ;;  %3015 = vrot.lane.b32.xlu1 %v10248_v52, %s12896_s8  ;;  %v4899_v25 = vsel %vm275_vm0, %v4866_v5, %v4898_v17  ;;  %v10412_v21 = vpop.permute.xlu1 %3944 }
 0x301   : > { %1998 = vst.msk [vmem:[%s9550_s7 + $0xe9] sm:$0x1] %vm1121_vm9, %v1932_v3  ;;  %1999 = vst.msk [vmem:[%s9550_s7 + $0xf1] sm:$0x1] %vm1121_vm9, %v1934_v8  ;;  %4150 = vrot.lane.b32.xlu0 %v10231_v40, %s12828_s6  ;;  %v4901_v18 = vsel %vm278_vm1, %v4900_v58, %v4899_v25  ;;  %v12905_v3 = vunpack.c.l.b16 %v10155_v11 }
 0x302   : > { %1992 = vst.msk [vmem:[%s9550_s7 + $0xb9] sm:$0x1] %vm1121_vm9, %v1887_v61  ;;  %2000 = vst.msk [vmem:[%s9550_s7 + $0xf9] sm:$0x1] %vm1121_vm9, %v1936_v23  ;;  %v10427_v59 = vpop.permute.xlu0 %3942  ;;  %v4903_v4 = vsel %vm281_vm2, %v4902_v7, %v4901_v18  ;;  %v3173_v23 = vsel %vm407_vm7, %v10215_v6, %v10273_v57  ;;  %v12792_v6 = vunpack.c.l.b16 %v10450_v45  ;;  %v12906_v57 = vunpack.c.l.b16 %v10180_v53 }
 0x303   : > { %v10402_v31 = vld [vmem:[%s8459_s20] ss:$0 sps:$4 sm:$0x44]   ;;  %v10405_v60 = vld [vmem:[%s8459_s20 + $0x8] ss:$0 sps:$4 sm:$0x44]   ;;  %v4905_v35 = vsel %vm284_vm3, %v4904_v50, %v4903_v4 }
 0x304   : > { %3348 = vrot.lane.b32.xlu1 %v3288_v54, %s12896_s8  ;;  %v12790_v5 = vunpack.c.l.b16 %v10402_v31  ;;  %v12789_v19 = vunpack.c.l.b16 %v10405_v60  ;;  %v10432_v56 = vld [vmem:[%s8459_s20 + $0x18] ss:$0 sps:$4 sm:$0x44]   ;;  %v10444_v47 = vpop.permute.xlu1 %3280  ;;  %v10447_v44 = vld [vmem:[%s8459_s20 + $0x4] ss:$0 sps:$4 sm:$0x22]   ;;  %v4907_v17 = vsel %vm287_vm4, %v4906_v13, %v4905_v35 }
 0x305   : > { %3013 = vrot.lane.b32.xlu0 %v10248_v52, %s12830_s21  ;;  %v12787_v20 = vunpack.c.l.b16 %v10432_v56  ;;  %v4908_v8 = vrot.slane %v12905_v3, 3  ;;  %v10460_v61 = vld [vmem:[%s8459_s20 + $0x28] ss:$0 sps:$4 sm:$0x44]   ;;  %v3808_v54 = vrot.slane %v12788_v63, 2  ;;  %v12791_v7 = vunpack.c.l.b16 %v10447_v44 }
 0x306   : > { %v3805_v26 = vrot.slane %v12790_v5, 4  ;;  %v3806_v55 = vrot.slane %v12789_v19, 3  ;;  %v10457_v46 = vpop.permute.xlu0 %3278  ;;  %v10469_v58 = vld [vmem:[%s8459_s20 + $0xc] ss:$0 sps:$4 sm:$0x11]   ;;  %v4910_v18 = vrot.slane %v12906_v57, 2 }
 0x307   : > { %v10473_v11 = vld [vmem:[%s8459_s20 + $0x20] ss:$0 sps:$4 sm:$0x44]   ;;  %v10483_v50 = vld [vmem:[%s8459_s20 + $0x30] ss:$0 sps:$4 sm:$0x44]   ;;  %v4909_v4 = vsel %vm290_vm5, %v4908_v8, %v4907_v17  ;;  %v5647_v57 = vunpack.c.h.b16 %v10469_v58 }
 0x308   : > { %4892 = vrot.lane.b32.xlu1 %v10252_v2, %s8346_s28  ;;  %v3807_v25 = vsel %vm275_vm0, %v3806_v55, %v3805_v26  ;;  %v10488_v13 = vpop.permute.xlu1 %3963  ;;  %v10491_v26 = vld [vmem:[%s8459_s20 + $0x1c] ss:$0 sps:$4 sm:$0x22]   ;;  %v10494_v55 = vld [vmem:[%s8459_s20 + $0x14] ss:$0 sps:$4 sm:$0x11]   ;;  %v12908_v39 = vunpack.c.l.b16 %v10473_v11  ;;  %v12909_v48 = vunpack.c.l.b16 %v10483_v50 }
 0x309   : > { %3325 = vrot.lane.b32.xlu0 %v3170_v27, %s8346_s28  ;;  %v3810_v27 = vrot.slane %v12787_v20, 1  ;;  %v3809_v35 = vsel %vm278_vm1, %v3808_v54, %v3807_v25  ;;  %v10499_v3 = vld [vmem:[%s8459_s20 + $0x14] ss:$0 sps:$4 sm:$0x22]   ;;  %v4974_v20 = vrot.slane %v12791_v7, 2  ;;  %v4975_v63 = vrot.slane %v12792_v6, 1 }
 0x30a   : > { %v10507_v8 = vpop.permute.xlu0 %3961  ;;  %v10510_v17 = vld [vmem:[%s8459_s20 + $0x38] ss:$0 sps:$4 sm:$0x44]   ;;  %v4911_v54 = vsel %vm293_vm6, %v4910_v18, %v4909_v4  ;;  %v10521_v19 = vld [vmem:[%s8459_s20 + $0x24] ss:$0 sps:$4 sm:$0x22]   ;;  %v5648_v6 = vunpack.c.h.b16 %v10494_v55  ;;  %v12911_v24 = vunpack.c.l.b16 %v10499_v3 }
 0x30b   : > { %v3811_v7 = vsel %vm281_vm2, %v3810_v27, %v3809_v35  ;;  %v5654_v25 = vrot.slane %v5647_v57, 7  ;;  %v10539_v27 = vpack.c.b16 %v4911_v54, %v4911_v54  ;;  %v10544_v53 = vld [vmem:[%s8459_s20 + $0x2c] ss:$0 sps:$4 sm:$0x22]   ;;  %v3815_v62 = vrot.slane %v12909_v48, 6 }
 0x30c   : > { %3017 = vrot.lane.b32.xlu1 %v10248_v52, %s8348_s4  ;;  %v10541_v35 = vpop.permute.xlu1 %3965  ;;  %v10548_v18 = vld [vmem:[%s8459_s20 + $0x24] ss:$0 sps:$4 sm:$0x11]   ;;  %v3812_v32 = vsel %vm284_vm3, %v12908_v39, %v3811_v7  ;;  %v10564_v57 = vld [vmem:[%s8459_s20 + $0x34] ss:$0 sps:$4 sm:$0x22]  }
 0x30d   : > { %4890 = vrot.lane.b32.xlu0 %v10297_v14, %s8344_s24  ;;  %v10570_v39 = vld [vmem:[%s8459_s20 + $0x2c] ss:$0 sps:$4 sm:$0x11]  }
 0x30e   : > { %v10557_v5 = vpop.permute.xlu0 %3282 }
 0x310   : > { %3327 = vrot.lane.b32.xlu1 %v3173_v23, %s8346_s28  ;;  %v10502_v23 = vld [vmem:[%s8459_s20 + $0x4] ss:$0 sps:$4 sm:$0x11]  }
 0x311   : > { %4154 = vrot.lane.b32.xlu0 %v10231_v40, %s8344_s24  ;;  %v12907_v40 = vunpack.c.l.b16 %v10460_v61  ;;  %v5646_v4 = vunpack.c.h.b16 %v10502_v23 }
 0x313   : > { %v3813_v22 = vrot.slane %v12907_v40, 7  ;;  %v4976_v40 = vsel %vm275_vm0, %v4975_v63, %v4974_v20  ;;  %v12910_v63 = vunpack.c.l.b16 %v10491_v26 }
 0x314   : > { %4894 = vrot.lane.b32.xlu1 %v10297_v14, %s12830_s21  ;;  %v10524_v14 = vld [vmem:[%s8459_s20 + $0x1c] ss:$0 sps:$4 sm:$0x11]   ;;  %v4977_v7 = vsel %vm278_vm1, %v12911_v24, %v4976_v40  ;;  %v12913_v24 = vunpack.c.l.b16 %v10521_v19 }
 0x315   : > { %3019 = vrot.lane.b32.xlu0 %v10248_v52, %s12897_s27  ;;  %v5649_v54 = vunpack.c.h.b16 %v10524_v14  ;;  %v4978_v20 = vrot.slane %v12910_v63, 7  ;;  %v3814_v48 = vsel %vm287_vm4, %v3813_v22, %v3812_v32  ;;  %v12912_v63 = vunpack.c.l.b16 %v10510_v17  ;;  %v10591_v32 = vld [vmem:[%s8459_s20 + $0x34] ss:$0 sps:$4 sm:$0x11]  }
 0x316   : > { %v4980_v40 = vrot.slane %v12913_v24, 6  ;;  %v10602_v24 = vpop.permute.xlu0 %3284 }
 0x317   : > { %v3817_v0 = vrot.slane %v12912_v63, 5  ;;  %v5658_v36 = vrot.slane %v5649_v54, 5  ;;  %v4979_v22 = vsel %vm281_vm2, %v4978_v20, %v4977_v7  ;;  %v5651_v63 = vunpack.c.h.b16 %v10570_v39 }
 0x318   : > { %3329 = vrot.lane.b32.xlu1 %v10335_v34, %s8346_s28  ;;  %v5655_v34 = vsel %vm275_vm0, %v5654_v25, %v5646_v4  ;;  %v10584_v25 = vpop.permute.xlu1 %3969  ;;  %v10587_v4 = vld [vmem:[%s8459_s20 + $0x3c] ss:$0 sps:$4 sm:$0x22]   ;;  %v3294_v54 = vsel %vm407_vm7, %v10257_v10, %v9868_v1  ;;  %v12914_v20 = vunpack.c.l.b16 %v10544_v53  ;;  %v5652_v10 = vunpack.c.h.b16 %v10591_v32 }
 0x319   : > { %3350 = vrot.lane.b32.xlu0 %v3291_v29, %s12896_s8  ;;  %v5656_v29 = vrot.slane %v5648_v6, 6  ;;  %v5650_v6 = vunpack.c.h.b16 %v10548_v18  ;;  %v4973_v1 = vunpack.c.l.b16 %v10587_v4 }
 0x31a   : > { %v4982_v7 = vrot.slane %v12914_v20, 5  ;;  %v5662_v20 = vrot.slane %v5651_v63, 3 }
 0x31b   : > { %v5657_v38 = vsel %vm278_vm1, %v5656_v29, %v5655_v34  ;;  %v5660_v41 = vrot.slane %v5650_v6, 4  ;;  %v10609_v34 = vld [vmem:[%s8459_s20 + $0x3c] ss:$0 sps:$4 sm:$0x11]   ;;  %v12915_v6 = vunpack.c.l.b16 %v10564_v57  ;;  %v4986_v42 = vrot.slane %v4973_v1, 3 }
 0x31c   : > { %4913 = vrot.lane.b32.xlu1 %v10539_v27, %s12828_s6  ;;  %v5659_v29 = vsel %vm281_vm2, %v5658_v36, %v5657_v38  ;;  %v5653_v28 = vunpack.c.h.b16 %v10609_v34 }
 0x31d   : > { %4896 = vrot.lane.b32.xlu0 %v10252_v2, %s12896_s8  ;;  %v3816_v2 = vsel %vm290_vm5, %v3815_v62, %v3814_v48  ;;  %v4981_v62 = vsel %vm284_vm3, %v4980_v40, %v4979_v22  ;;  %v10624_v40 = vpop.permute.xlu1 %4047  ;;  %v5664_v22 = vrot.slane %v5652_v10, 2  ;;  %v5625_v10 = vunpack.c.l.b16 %v10494_v55 }
 0x31e   : > { %v3818_v48 = vsel %vm293_vm6, %v3817_v0, %v3816_v2  ;;  %v4983_v38 = vsel %vm287_vm4, %v4982_v7, %v4981_v62  ;;  %v5661_v0 = vsel %vm284_vm3, %v5660_v41, %v5659_v29  ;;  %v10633_v2 = vpop.permute.xlu0 %3967  ;;  %v5624_v7 = vunpack.c.l.b16 %v10469_v58 }
 0x31f   : > { %v10630_v36 = vpack.c.b16 %v3818_v48, %v3818_v48  ;;  %v5666_v41 = vrot.slane %v5653_v28, 1  ;;  %v3297_v58 = vsel %vm407_vm7, %v10299_v43, %v10396_v49  ;;  %v5626_v55 = vunpack.c.l.b16 %v10524_v14 }
 0x320   : > { %4917 = vrot.lane.b32.xlu1 %v10539_v27, %s8344_s24  ;;  %v4060_v4 = vsel %vm407_vm7, %v10541_v35, %v10633_v2 }
 0x321   : > { %3352 = vrot.lane.b32.xlu0 %v3294_v54, %s12896_s8  ;;  %v4984_v54 = vrot.slane %v12915_v6, 4  ;;  %v5663_v6 = vsel %vm287_vm4, %v5662_v20, %v5661_v0  ;;  %v10645_v29 = vpop.permute.xlu1 %4045  ;;  %v5631_v20 = vrot.slane %v5624_v7, 7 }
 0x322   : > { %v5665_v48 = vsel %vm290_vm5, %v5664_v22, %v5663_v6  ;;  %v5635_v6 = vrot.slane %v5626_v55, 5 }
 0x323   : > { %v4985_v63 = vsel %vm290_vm5, %v4984_v54, %v4983_v38  ;;  %v5623_v54 = vunpack.c.l.b16 %v10502_v23  ;;  %v10655_v38 = vpop.permute.xlu0 %3971  ;;  %v5667_v28 = vsel %vm293_vm6, %v5666_v41, %v5665_v48  ;;  %v4051_v23 = vsel %vm407_vm7, %v10341_v12, %v10427_v59 }
 0x324   : > { %4185 = vrot.lane.b32.xlu1 %v10618_v33, %s8346_s28  ;;  %v4987_v62 = vsel %vm293_vm6, %v4986_v42, %v4985_v63  ;;  %v5633_v42 = vrot.slane %v5625_v10, 6  ;;  %v5668_v49 = vpack.c.b16 %v5667_v28, %v5667_v28  ;;  %v5627_v63 = vunpack.c.l.b16 %v10548_v18 }
 0x325   : > { %4915 = vrot.lane.b32.xlu0 %v10539_v27, %s12807_s5  ;;  %v10658_v0 = vpack.c.b16 %v4987_v62, %v4987_v62  ;;  %v5632_v43 = vsel %vm275_vm0, %v5631_v20, %v5623_v54  ;;  %v10667_v22 = vpop.permute.xlu1 %4087  ;;  %v5628_v62 = vunpack.c.l.b16 %v10570_v39  ;;  %v5709_v12 = vrot.slane %v5623_v54, 1 }
 0x326   : > { %v5634_v14 = vsel %vm278_vm1, %v5633_v42, %v5632_v43  ;;  %v5637_v59 = vrot.slane %v5627_v63, 4  ;;  %v5629_v20 = vunpack.c.l.b16 %v10591_v32  ;;  %v3300_v39 = vsel %vm407_vm7, %v10385_v9, %v10457_v46 }
 0x327   : > { %v10672_v41 = vpop.permute.xlu0 %4020  ;;  %v5636_v48 = vsel %vm281_vm2, %v5635_v6, %v5634_v14  ;;  %v5639_v28 = vrot.slane %v5628_v62, 3  ;;  %v5713_v43 = vrot.slane %v5626_v55, 6  ;;  %v5630_v32 = vunpack.c.l.b16 %v10609_v34 }
 0x328   : > { %4940 = vrot.lane.b32.xlu1 %v10539_v27, %s8346_s28  ;;  %v5638_v42 = vsel %vm284_vm3, %v5637_v59, %v5636_v48  ;;  %v12916_v14 = vunpack.c.l.b16 %v10402_v31  ;;  %v12917_v46 = vunpack.c.l.b16 %v10405_v60  ;;  %v5715_v48 = vrot.slane %v5627_v63, 5 }
 0x329   : > { %3820 = vrot.lane.b32.xlu0 %v10630_v36, %s8344_s24  ;;  %v10680_v18 = vpop.permute.xlu1 %4089  ;;  %v12918_v31 = vunpack.c.l.b16 %v10416_v37  ;;  %v3040_v60 = vsel %vm407_vm7, %v9726_v51, %v10120_v16  ;;  %v3303_v63 = vsel %vm407_vm7, %v10444_v47, %v10557_v5  ;;  %v12919_v37 = vunpack.c.l.b16 %v10432_v56 }
 0x32a   : > { %v3832_v9 = vrot.slane %v12916_v14, 5  ;;  %v5719_v47 = vrot.slane %v5629_v20, 3  ;;  %v4054_v56 = vsel %vm407_vm7, %v10412_v21, %v10507_v8 }
 0x32b   : > { %v10689_v54 = vpop.permute.xlu0 %4070 }
 0x32c   : > { %3822 = vrot.lane.b32.xlu1 %v10630_v36, %s8346_s28 }
 0x32d   : > { %3354 = vrot.lane.b32.xlu0 %v3297_v58, %s12896_s8  ;;  %v5711_v58 = vrot.slane %v5625_v10, 7  ;;  %v5641_v10 = vrot.slane %v5629_v20, 2  ;;  %v2953_v59 = vpop.permute.xlu1 %2952 }
 0x330   : > { %4187 = vrot.lane.b32.xlu1 %v4051_v23, %s8346_s28  ;;  %v5710_v23 = vsel %vm275_vm0, %v5624_v7, %v5709_v12  ;;  %v5640_v7 = vsel %vm287_vm4, %v5639_v28, %v5638_v42  ;;  %v3833_v12 = vrot.slane %v12917_v46, 4  ;;  %v5643_v28 = vrot.slane %v5630_v32, 1 }
 0x331   : > { %4989 = vrot.lane.b32.xlu0 %v10658_v0, %s12853_s10  ;;  %v5712_v6 = vsel %vm278_vm1, %v5711_v58, %v5710_v23  ;;  %v5642_v58 = vsel %vm290_vm5, %v5641_v10, %v5640_v7  ;;  %v3835_v23 = vrot.slane %v12918_v31, 3  ;;  %v3837_v10 = vrot.slane %v12919_v37, 2 }
 0x332   : > { %v5714_v34 = vsel %vm281_vm2, %v5713_v43, %v5712_v6  ;;  %v3834_v42 = vsel %vm275_vm0, %v3833_v12, %v3832_v9  ;;  %v5644_v5 = vsel %vm293_vm6, %v5643_v28, %v5642_v58  ;;  %v12920_v7 = vunpack.c.l.b16 %v10447_v44 }
 0x333   : > { %v5716_v43 = vsel %vm284_vm3, %v5715_v48, %v5714_v34  ;;  %v12921_v9 = vunpack.c.l.b16 %v10450_v45  ;;  %v12922_v12 = vunpack.c.l.b16 %v10473_v11  ;;  %v10737_v48 = vpack.c.b16 %v5644_v5, %v5644_v5 }
 0x334   : > { %5669 = vrot.lane.b32.xlu1 %v5668_v49, %s8344_s24  ;;  %v5001_v14 = vrot.slane %v12920_v7, 3  ;;  %v5721_v34 = vrot.slane %v5630_v32, 2  ;;  %v12923_v28 = vunpack.c.l.b16 %v10499_v3  ;;  %v12924_v3 = vunpack.c.l.b16 %v10483_v50 }
 0x335   : > { %3824 = vrot.lane.b32.xlu0 %v10630_v36, %s12830_s21  ;;  %v5002_v46 = vrot.slane %v12921_v9, 2  ;;  %v3839_v20 = vrot.slane %v12922_v12, 1  ;;  %v12926_v37 = vunpack.c.l.b16 %v10521_v19  ;;  %v12927_v50 = vunpack.c.l.b16 %v10510_v17 }
 0x336   : > { %v5004_v21 = vrot.slane %v12923_v28, 1  ;;  %v12928_v5 = vunpack.c.l.b16 %v10491_v26  ;;  %v4057_v19 = vsel %vm407_vm7, %v10488_v13, %v9944_v30  ;;  %v5013_v12 = vrot.slane %v4973_v1, 4 }
 0x337   : > { %v5003_v11 = vsel %vm275_vm0, %v5002_v46, %v5001_v14  ;;  %v12930_v46 = vunpack.c.l.b16 %v10564_v57 }
 0x338   : > { %4993 = vrot.lane.b32.xlu1 %v10658_v0, %s12828_s6 }
 0x339   : > { %3356 = vrot.lane.b32.xlu0 %v3300_v39, %s12896_s8  ;;  %v5717_v39 = vrot.slane %v5628_v62, 4  ;;  %v3836_v62 = vsel %vm278_vm1, %v3835_v23, %v3834_v42 }
 0x33a   : > { %v3838_v44 = vsel %vm281_vm2, %v3837_v10, %v3836_v62  ;;  %v5007_v10 = vrot.slane %v12926_v37, 7 }
 0x33b   : > { %v5718_v6 = vsel %vm287_vm4, %v5717_v39, %v5716_v43  ;;  %v12925_v39 = vunpack.c.l.b16 %v10460_v61 }
 0x33c   : > { %3828 = vrot.lane.b32.xlu1 %v10630_v36, %s8348_s4  ;;  %v5720_v58 = vsel %vm290_vm5, %v5719_v47, %v5718_v6  ;;  %v12929_v6 = vunpack.c.l.b16 %v10544_v53  ;;  %v5011_v53 = vrot.slane %v12930_v46, 5 }
 0x33d   : > { %4991 = vrot.lane.b32.xlu0 %v10658_v0, %s12852_s9  ;;  %v5722_v32 = vsel %vm293_vm6, %v5721_v34, %v5720_v58 }
 0x33e   : > { %v3316_v55 = vpop.permute.xlu0 %3315  ;;  %v10764_v43 = vpack.c.b16 %v5722_v32, %v5722_v32  ;;  %v5009_v7 = vrot.slane %v12929_v6, 6 }
 0x33f   : > { %7698 = vmatprep.subr.bf16.mxu0 %v3316_v55 }
 0x340   : > { %3358 = vrot.lane.b32.xlu1 %v3303_v63, %s12896_s8  ;;  %7699 = vmatpush3.bf16.msra.mxu0 %v3040_v60  ;;  %v3842_v60 = vrot.slane %v12924_v3, 7  ;;  %v3306_v63 = vsel %vm407_vm7, %v9921_v15, %v10602_v24 }
 0x341   : > { %3826 = vrot.lane.b32.xlu0 %v10630_v36, %s12896_s8 }
 0x342   : > { %v3318_v51 = vpop.permute.xlu1 %3317  ;;  %v10721_v16 = vpop.permute.xlu0 %4091 }
 0x343   : > { %7700 = vmatprep.subr.bf16.mxu0 %v3318_v51  ;;  %v3844_v51 = vrot.slane %v12927_v50, 6  ;;  %v8157_v50 = vld [vmem:[%s8459_s20 + $0x8] ss:$0 sps:$4 sm:$0x44]  }
 0x344   : > { %5705 = vrot.lane.b32.xlu1 %v5668_v49, %s12830_s21  ;;  %v3840_v49 = vsel %vm284_vm3, %v3839_v20, %v3838_v44  ;;  %v4668_v46 = vunpack.c.l.b16 %v8157_v50 }
 0x345   : > { %4189 = vrot.lane.b32.xlu0 %v4054_v56, %s8346_s28  ;;  %v3841_v42 = vsel %vm287_vm4, %v12925_v39, %v3840_v49  ;;  %v4063_v49 = vsel %vm407_vm7, %v10584_v25, %v10655_v38  ;;  %v10859_v25 = vld [vmem:[%s8459_s20 + $0x14] ss:$0 sps:$4 sm:$0x22]  }
 0x346   : > { %v10740_v55 = vpop.permute.xlu1 %4093  ;;  %v2955_v45 = vpop.permute.xlu0 %2954  ;;  %v3843_v62 = vsel %vm290_vm5, %v3842_v60, %v3841_v42  ;;  %v10854_v60 = vld [vmem:[%s8459_s20 + $0x1c] ss:$0 sps:$4 sm:$0x22]  }
 0x347   : > { %v3044_v8 = vsel %vm407_vm7, %v2953_v59, %v2955_v45  ;;  %v5005_v59 = vsel %vm278_vm1, %v5004_v21, %v5003_v11  ;;  %v3845_v26 = vsel %vm293_vm6, %v3844_v51, %v3843_v62  ;;  %v5763_v51 = vunpack.c.l.b16 %v10854_v60  ;;  %v10880_v62 = vld [vmem:[%s8459_s20 + $0x2c] ss:$0 sps:$4 sm:$0x22]  }
 0x348   : > { %3830 = vrot.lane.b32.xlu1 %v10630_v36, %s12897_s27  ;;  %7701 = vmatpush3.bf16.msra.mxu0 %v3044_v8  ;;  %v5006_v24 = vsel %vm281_vm2, %v12928_v5, %v5005_v59  ;;  %v10797_v13 = vpack.c.b16 %v3845_v26, %v3845_v26 }
 0x349   : > { %5703 = vrot.lane.b32.xlu0 %v10737_v48, %s8346_s28  ;;  %v5008_v17 = vsel %vm284_vm3, %v5007_v10, %v5006_v24  ;;  %v8156_v10 = vld [vmem:[%s8459_s20] ss:$0 sps:$4 sm:$0x44]   ;;  %v5762_v24 = vunpack.c.l.b16 %v10859_v25 }
 0x34a   : > { %v2959_v31 = vpop.permute.xlu1 %2958  ;;  %v10753_v23 = vpop.permute.xlu0 %4776  ;;  %v5010_v30 = vsel %vm287_vm4, %v5009_v7, %v5008_v17  ;;  %v8158_v7 = vld [vmem:[%s8459_s20 + $0x10] ss:$0 sps:$4 sm:$0x44]  }
 0x34b   : > { %v5012_v34 = vsel %vm290_vm5, %v5011_v53, %v5010_v30  ;;  %v12932_v53 = vmov 0   ;;  %v10898_v30 = vld [vmem:[%s8459_s20 + $0x34] ss:$0 sps:$4 sm:$0x22]  }
 0x34c   : > { %3360 = vrot.lane.b32.xlu1 %v3306_v63, %s12896_s8  ;;  %v5014_v44 = vsel %vm293_vm6, %v5013_v12, %v5012_v34  ;;  %v10862_v63 = vld [vmem:[%s8459_s20 + $0x24] ss:$0 sps:$4 sm:$0x22]  }
 0x34d   : > { %4995 = vrot.lane.b32.xlu0 %v10658_v0, %s12807_s5  ;;  %v10819_v1 = vpack.c.b16 %v5014_v44, %v5014_v44  ;;  %v5764_v26 = vunpack.c.l.b16 %v10862_v63  ;;  %v12812_v44 = vunpack.c.l.b16 %v10880_v62 }
 0x34e   : > { %v10776_v61 = vpop.permute.xlu1 %4810  ;;  %v2957_v47 = vpop.permute.xlu0 %2956 }
 0x34f   : > { %v3048_v56 = vsel %vm407_vm7, %v2957_v47, %v2959_v31 }
 0x350   : > { %5724 = vrot.lane.b32.xlu1 %v10764_v43, %s12828_s6 }
 0x351   : > { %4191 = vrot.lane.b32.xlu0 %v4057_v19, %s8346_s28  ;;  %v12931_v19 = vld [vmem:[#allocation11_spill] sm:$0xff] }
 0x352   : > { %v10789_v14 = vpop.permute.xlu1 %4095  ;;  %v3320_v9 = vpop.permute.xlu0 %3319  ;;  %v10887_v17 = vsel %vm407_vm7, %v12931_v19, %v10624_v40 }
 0x353   : > { %7702 = vmatprep.subr.bf16.mxu0 %v3320_v9  ;;  %v4667_v9 = vunpack.c.l.b16 %v8156_v10  ;;  %v4066_v10 = vsel %vm407_vm7, %v10672_v41, %v10645_v29 }
 0x354   : > { %4999 = vrot.lane.b32.xlu1 %v10658_v0, %s8346_s28  ;;  %7703 = vmatpush3.bf16.msra.mxu0 %v3048_v56  ;;  %v5772_v56 = vrot.slane %v5763_v51, 7 }
 0x355   : > { %5707 = vrot.lane.b32.xlu0 %v10737_v48, %s12896_s8 }
 0x356   : > { %v2961_v20 = vpop.permute.xlu1 %2960  ;;  %v10803_v57 = vpop.permute.xlu0 %4812 }
 0x357   : > { %v3052_v28 = vsel %vm407_vm7, %v2961_v20, %v10248_v52  ;;  %v10834_v52 = vld [vmem:[%s8459_s20 + $0x4] ss:$0 sps:$4 sm:$0x22]   ;;  %v8159_v20 = vld [vmem:[%s8459_s20 + $0x18] ss:$0 sps:$4 sm:$0x44]  }
 0x358   : > { %3847 = vrot.lane.b32.xlu1 %v10797_v13, %s8344_s24  ;;  %v5760_v31 = vunpack.c.l.b16 %v10834_v52 }
 0x359   : > { %4997 = vrot.lane.b32.xlu0 %v10658_v0, %s8344_s24 }
 0x35a   : > { %v10811_v45 = vpop.permute.xlu1 %4814  ;;  %v10813_v58 = vpop.permute.xlu0 %4097  ;;  %v5768_v39 = vrot.slane %v5760_v31, 2 }
 0x35c   : > { %4193 = vrot.lane.b32.xlu1 %v4060_v4, %s8346_s28  ;;  %v4669_v4 = vunpack.c.l.b16 %v8158_v7 }
 0x35d   : > { %3370 = vrot.lane.b32.xlu0 %v9921_v15, %s12897_s27  ;;  %v10837_v15 = vld [vmem:[%s8459_s20 + $0xc] ss:$0 sps:$4 sm:$0x22]  }
 0x35e   : > { %v10825_v21 = vpop.permute.xlu1 %4146  ;;  %v3322_v8 = vpop.permute.xlu0 %3321  ;;  %v5761_v3 = vunpack.c.l.b16 %v10837_v15 }
 0x35f   : > { %7704 = vmatprep.subr.bf16.mxu0 %v3322_v8  ;;  %v4675_v8 = vrot.slane %v4667_v9, 5 }
 0x360   : > { %5016 = vrot.lane.b32.xlu1 %v10819_v1, %s12853_s10  ;;  %7705 = vmatpush3.bf16.msra.mxu0 %v3052_v28  ;;  %v5769_v42 = vrot.slane %v5761_v3, 1  ;;  %v5774_v28 = vrot.slane %v5764_v26, 6 }
 0x361   : > { %3849 = vrot.lane.b32.xlu0 %v10797_v13, %s8346_s28 }
 0x362   : > { %v3010_v35 = vpop.permute.xlu1 %3009  ;;  %v10831_v2 = vpop.permute.xlu0 %4863  ;;  %v5770_v6 = vsel %vm275_vm0, %v5769_v42, %v5768_v39  ;;  %v12811_v42 = vunpack.c.l.b16 %v10898_v30 }
 0x363   : > { %v5771_v12 = vsel %vm278_vm1, %v5762_v24, %v5770_v6  ;;  %v4678_v6 = vrot.slane %v4669_v4, 3  ;;  %v8162_v4 = vld [vmem:[%s8459_s20 + $0x30] ss:$0 sps:$4 sm:$0x44]  }
 0x364   : > { %3851 = vrot.lane.b32.xlu1 %v10797_v13, %s12830_s21 }
 0x365   : > { %5726 = vrot.lane.b32.xlu0 %v10764_v43, %s12807_s5 }
 0x366   : > { %v3324_v11 = vpop.permute.xlu1 %3323  ;;  %v10846_v32 = vpop.permute.xlu0 %4148 }
 0x367   : > { %7706 = vmatprep.subr.bf16.mxu0 %v3324_v11  ;;  %v10914_v11 = vld [vmem:[%s8459_s20 + $0x3c] ss:$0 sps:$4 sm:$0x22]  }
 0x368   : > { %4195 = vrot.lane.b32.xlu1 %v4063_v49, %s8346_s28  ;;  %v5773_v49 = vsel %vm281_vm2, %v5772_v56, %v5771_v12  ;;  %v12802_v29 = vunpack.c.l.b16 %v10914_v11 }
 0x369   : > { %5018 = vrot.lane.b32.xlu0 %v10819_v1, %s12852_s9  ;;  %v5775_v7 = vsel %vm284_vm3, %v5774_v28, %v5773_v49  ;;  %v10943_v49 = vld [vmem:[%s8459_s20 + $0x4] ss:$0 sps:$4 sm:$0x11]  }
 0x36a   : > { %v10856_v59 = vpop.permute.xlu1 %4888  ;;  %12933 = vst [vmem:[#allocation11_spill] sm:$0xff] %v10943_v49 }
 0x36b   : > { %v3012_v38 = vpop.permute.xlu0 %3011 }
 0x36c   : > { %v3056_v37 = vsel %vm407_vm7, %v3010_v35, %v3012_v38  ;;  %5728 = vrot.lane.b32.xlu1 %v10764_v43, %s8344_s24  ;;  %v4676_v35 = vrot.slane %v4668_v46, 4  ;;  %v8160_v38 = vld [vmem:[%s8459_s20 + $0x20] ss:$0 sps:$4 sm:$0x44]   ;;  %v5778_v46 = vrot.slane %v12811_v42, 4 }
 0x36d   : > { %3853 = vrot.lane.b32.xlu0 %v10797_v13, %s12896_s8  ;;  %7707 = vmatpush3.bf16.msra.mxu0 %v3056_v37  ;;  %v4670_v37 = vunpack.c.l.b16 %v8159_v20  ;;  %v4671_v41 = vunpack.c.l.b16 %v8160_v38  ;;  %v5780_v38 = vrot.slane %v12802_v29, 3  ;;  %v11103_v42 = vld [vmem:[%s8459_s20 + $0x14] ss:$0 sps:$4 sm:$0x22]  }
 0x36e   : > { %v10876_v5 = vpop.permute.xlu1 %4152  ;;  %v4677_v19 = vsel %vm275_vm0, %v4676_v35, %v4675_v8  ;;  %v8161_v35 = vld [vmem:[%s8459_s20 + $0x28] ss:$0 sps:$4 sm:$0x44]  }
 0x36f   : > { %v3347_v47 = vpop.permute.xlu0 %3346  ;;  %v4680_v56 = vrot.slane %v4670_v37, 2  ;;  %v4679_v28 = vsel %vm278_vm1, %v4678_v6, %v4677_v19  ;;  %v4673_v6 = vunpack.c.l.b16 %v8162_v4  ;;  %v4158_v19 = vsel %vm407_vm7, %v10689_v54, %v10667_v22 }
 0x370   : > { %3425 = vmatpush1.bf16.msra.mxu1 %v3347_v47  ;;  %5020 = vrot.lane.b32.xlu1 %v10819_v1, %s12828_s6  ;;  %v5776_v47 = vrot.slane %v12812_v44, 5  ;;  %v4161_v22 = vsel %vm407_vm7, %v10680_v18, %v10721_v16 }
 0x371   : > { %4216 = vrot.lane.b32.xlu0 %v10887_v17, %s12896_s8  ;;  %3426 = vmatprep.subr.bf16.mxu1 %v12932_v53 }
 0x372   : > { %v3016_v40 = vpop.permute.xlu1 %3015  ;;  %v5777_v20 = vsel %vm287_vm4, %v5776_v47, %v5775_v7  ;;  %v10955_v7 = vld [vmem:[%s8459_s20 + $0x14] ss:$0 sps:$4 sm:$0x11]  }
 0x373   : > { %v10904_v34 = vpop.permute.xlu0 %4150  ;;  %12934 = vst [vmem:[#allocation17_spill] sm:$0xff] %v10955_v7  ;;  %v12804_v29 = vunpack.c.l.b16 %v10955_v7 }
 0x374   : > { %3855 = vrot.lane.b32.xlu1 %v10797_v13, %s8348_s4 }
 0x375   : > { %5730 = vrot.lane.b32.xlu0 %v10764_v43, %s8346_s28 }
 0x376   : > { %v3349_v39 = vpop.permute.xlu1 %3348 }
 0x377   : > { %v3014_v50 = vpop.permute.xlu0 %3013  ;;  %3427 = vmatpush1.bf16.msra.mxu1 %v3349_v39  ;;  %v4682_v39 = vrot.slane %v4671_v41, 1  ;;  %v4672_v41 = vunpack.c.l.b16 %v8161_v35  ;;  %v4685_v35 = vrot.slane %v4673_v6, 7 }
 0x378   : > { %4197 = vrot.lane.b32.xlu1 %v4066_v10, %s8346_s28  ;;  %3428 = vmatprep.subr.bf16.mxu1 %v12932_v53  ;;  %v3060_v8 = vsel %vm407_vm7, %v3014_v50, %v3016_v40  ;;  %v5779_v10 = vsel %vm290_vm5, %v5778_v46, %v5777_v20  ;;  %v8163_v40 = vld [vmem:[%s8459_s20 + $0x38] ss:$0 sps:$4 sm:$0x44]   ;;  %v4681_v50 = vsel %vm281_vm2, %v4680_v56, %v4679_v28  ;;  %v12803_v46 = vunpack.c.l.b16 %v10943_v49  ;;  %v8181_v49 = vld [vmem:[%s8459_s20 + $0xc] ss:$0 sps:$4 sm:$0x44]  }
 0x379   : > { %5022 = vrot.lane.b32.xlu0 %v10819_v1, %s12807_s5  ;;  %v5781_v56 = vsel %vm293_vm6, %v5780_v38, %v5779_v10  ;;  %v4683_v20 = vsel %vm284_vm3, %v4682_v39, %v4681_v50  ;;  %v4674_v28 = vunpack.c.l.b16 %v8163_v40  ;;  %v10983_v39 = vld [vmem:[%s8459_s20 + $0x24] ss:$0 sps:$4 sm:$0x11]  }
 0x37a   : > { %v10931_v9 = vpop.permute.xlu1 %4892  ;;  %v4684_v38 = vsel %vm287_vm4, %v4672_v41, %v4683_v20  ;;  %12938 = vst [vmem:[#allocation21_spill] sm:$0xff] %v10983_v39  ;;  %v6524_v18 = vrot.slane %v12803_v46, 1  ;;  %v6526_v20 = vrot.slane %v12804_v29, 7  ;;  %v12806_v46 = vunpack.c.l.b16 %v10983_v39 }
 0x37b   : > { %v3326_v12 = vpop.permute.xlu0 %3325  ;;  %v4687_v40 = vrot.slane %v4674_v28, 6  ;;  %v4686_v41 = vsel %vm290_vm5, %v4685_v35, %v4684_v38  ;;  %v11004_v28 = vld [vmem:[%s8459_s20 + $0x2c] ss:$0 sps:$4 sm:$0x11]  }
 0x37c   : > { %7708 = vmatprep.subr.bf16.mxu0 %v3326_v12  ;;  %5732 = vrot.lane.b32.xlu1 %v10764_v43, %s12830_s21  ;;  %v10963_v12 = vld [vmem:[%s8459_s20 + $0xc] ss:$0 sps:$4 sm:$0x11]   ;;  %12939 = vst [vmem:[#allocation22_spill] sm:$0xff] %v11004_v28  ;;  %v12809_v25 = vunpack.c.l.b16 %v11004_v28 }
 0x37d   : > { %3857 = vrot.lane.b32.xlu0 %v10797_v13, %s12897_s27  ;;  %7709 = vmatpush3.bf16.msra.mxu0 %v3060_v8  ;;  %12935 = vst [vmem:[#allocation18_spill] sm:$0xff] %v10963_v12  ;;  %v10970_v8 = vld [vmem:[%s8459_s20 + $0x1c] ss:$0 sps:$4 sm:$0x11]   ;;  %v12805_v10 = vunpack.c.l.b16 %v10963_v12  ;;  %v12940_v38 = vld [vmem:[#allocation14_spill] sm:$0xff] }
 0x37e   : > { %v3018_v37 = vpop.permute.xlu1 %3017  ;;  %12936 = vst [vmem:[#allocation19_spill] sm:$0xff] %v10970_v8  ;;  %v12810_v50 = vunpack.c.l.b16 %v10970_v8  ;;  %v11117_v28 = vld [vmem:[%s8459_s20 + $0x24] ss:$0 sps:$4 sm:$0x22]  }
 0x37f   : > { %v10952_v47 = vpop.permute.xlu0 %4890  ;;  %v6525_v52 = vsel %vm275_vm0, %v12805_v10, %v6524_v18  ;;  %v5815_v18 = vrot.slane %v5762_v24, 1  ;;  %v11025_v10 = vld [vmem:[%s8459_s20 + $0x34] ss:$0 sps:$4 sm:$0x11]   ;;  %v6530_v24 = vrot.slane %v12806_v46, 5 }
 0x380   : > { %5024 = vrot.lane.b32.xlu1 %v10819_v1, %s8344_s24  ;;  %v6528_v35 = vrot.slane %v12810_v50, 6  ;;  %12942 = vst [vmem:[#allocation23_spill] sm:$0xff] %v11025_v10 }
 0x381   : > { %4218 = vrot.lane.b32.xlu0 %v4158_v19, %s12896_s8  ;;  %v10979_v19 = vpack.c.b16 %v5781_v56, %v5781_v56  ;;  %v5812_v56 = vrot.slane %v5760_v31, 3 }
 0x382   : > { %v3328_v4 = vpop.permute.xlu1 %3327 }
 0x383   : > { %v10975_v54 = vpop.permute.xlu0 %4154  ;;  %7710 = vmatprep.subr.bf16.mxu0 %v3328_v4  ;;  %12937 = vst [vmem:[#allocation20_spill] sm:$0xff] %v10979_v19 }
 0x384   : > { %4220 = vrot.lane.b32.xlu1 %v4161_v22, %s12896_s8  ;;  %v5813_v22 = vrot.slane %v5761_v3, 2  ;;  %v4688_v3 = vsel %vm293_vm6, %v4687_v40, %v4686_v41  ;;  %v6527_v40 = vsel %vm278_vm1, %v6526_v20, %v6525_v52  ;;  %v11051_v52 = vld [vmem:[%s8459_s20 + $0x3c] ss:$0 sps:$4 sm:$0x11]  }
 0x385   : > { %5734 = vrot.lane.b32.xlu0 %v10764_v43, %s12896_s8  ;;  %v11039_v20 = vpack.c.b16 %v4688_v3, %v4688_v3  ;;  %v11061_v3 = vld [vmem:[%s12745_s1] ss:$16 sps:$4 sm:$0xff]  }
 0x386   : > { %v10990_v16 = vpop.permute.xlu1 %4894  ;;  %v5814_v41 = vsel %vm275_vm0, %v5813_v22, %v5812_v56  ;;  %v11042_v56 = vld [vmem:[%s8459_s20 + $0x4] ss:$0 sps:$4 sm:$0x22]  }
 0x387   : > { %v3020_v6 = vpop.permute.xlu0 %3019 }
 0x388   : > { %v3064_v4 = vsel %vm407_vm7, %v3018_v37, %v3020_v6  ;;  %5785 = vrot.lane.b32.xlu1 %v10979_v19, %s12807_s5  ;;  %v7686_v31 = vpop.f32.mrb[16].mxu0  ;;  %v11018_v6 = vsel %vm407_vm7, %v12940_v38, %v10753_v23  ;;  %v5816_v38 = vsel %vm278_vm1, %v5815_v18, %v5814_v41 }
 0x389   : > { %4199 = vrot.lane.b32.xlu0 %v10887_v17, %s8346_s28  ;;  %7711 = vmatpush3.bf16.msra.mxu0 %v3064_v4  ;;  %v7687_v15 = vpop.f32.mrb[17].mxu0  ;;  %12941 = vst [vmem:[#allocation14_spill] sm:$0xff] %v11018_v6  ;;  %v5817_v63 = vsel %vm281_vm2, %v5763_v51, %v5816_v38  ;;  %v12947_v51 = vunpack.c.l.b16 %v10880_v62  ;;  %v12948_v62 = vunpack.c.l.b16 %v11042_v56 }
 0x38a   : > { %v3330_v37 = vpop.permute.xlu1 %3329  ;;  %v11022_v17 = vadd.f32 %v7687_v15, %v7686_v31  ;;  %v7689_v4 = vpop.f32.mrb[18].mxu0  ;;  %v12943_v31 = vld [vmem:[#allocation13_spill] sm:$0xff]  ;;  %v6529_v15 = vsel %vm281_vm2, %v6528_v35, %v6527_v40  ;;  %v5818_v35 = vrot.slane %v5764_v26, 7 }
 0x38b   : > { %v3351_v29 = vpop.permute.xlu0 %3350  ;;  %7712 = vmatprep.subr.bf16.mxu0 %v3330_v37  ;;  %v7690_v23 = vpop.f32.mrb[19].mxu0  ;;  %12944 = vst [vmem:[#allocation13_spill] sm:$0xff] %v11051_v52  ;;  %v11075_v40 = vld [vmem:[%s12745_s1 + $0x24] ss:$16 sps:$4 sm:$0xff]   ;;  %v6531_v41 = vsel %vm284_vm3, %v6530_v24, %v6529_v15  ;;  %v12945_v24 = vunpack.c.l.b16 %v11025_v10  ;;  %v5820_v38 = vrot.slane %v12947_v51, 6 }
 0x38c   : > { %3429 = vmatpush1.bf16.msra.mxu1 %v3351_v29  ;;  %5055 = vrot.lane.b32.xlu1 %v11018_v6, %s8346_s28  ;;  %v11037_v37 = vadd.f32 %v7690_v23, %v7689_v4  ;;  %v11045_v29 = vld [vmem:[%s8459_s20 + $0xc] ss:$0 sps:$4 sm:$0x22]   ;;  %v6532_v23 = vrot.slane %v12809_v25, 4  ;;  %v12946_v25 = vld [vmem:[#allocation12_spill] sm:$0xff] }
 0x38d   : > { %5783 = vrot.lane.b32.xlu0 %v10979_v19, %s12828_s6  ;;  %7713 = vmatpush3.bf16.msra.mxu0 %v12943_v31  ;;  %v6534_v15 = vrot.slane %v12945_v24, 3  ;;  %v11092_v31 = vld [vmem:[%s8459_s20 + $0x1c] ss:$0 sps:$4 sm:$0x22]   ;;  %v4164_v60 = vsel %vm407_vm7, %v10740_v55, %v12946_v25  ;;  %v5819_v55 = vsel %vm284_vm3, %v5818_v35, %v5817_v63  ;;  %v6611_v25 = vrot.slane %v12948_v62, 2 }
 0x38e   : > { %v11047_v22 = vpop.permute.xlu1 %4913  ;;  %3430 = vmatprep.subr.bf16.mxu1 %v12932_v53  ;;  %v12816_v62 = vunpack.c.l.b16 %v11092_v31 }
 0x38f   : > { %v11055_v46 = vpop.permute.xlu0 %4896 }
 0x390   : > { %3408 = vmatmul.mubr.bf16.vlgmr.msra.gmra.mrb[24].mxu0 %v11061_v3  ;;  %5787 = vrot.lane.b32.xlu1 %v10979_v19, %s8344_s24  ;;  %v7692_v18 = vpop.f32.mrb[20].mxu0 }
 0x391   : > { %4690 = vrot.lane.b32.xlu0 %v11039_v20, %s8344_s24  ;;  %3415 = vmatprep.mubr.bf16.mxu0 %v11075_v40  ;;  %v7693_v50 = vpop.f32.mrb[21].mxu0 }
 0x392   : > { %v11084_v26 = vpop.permute.xlu1 %4917  ;;  %v11087_v4 = vadd.f32 %v7693_v50, %v7692_v18  ;;  %v7695_v6 = vpop.f32.mrb[22].mxu0  ;;  %v6533_v18 = vsel %vm287_vm4, %v6532_v23, %v6531_v41  ;;  %v12950_v23 = vunpack.c.l.b16 %v11051_v52 }
 0x393   : > { %v3353_v44 = vpop.permute.xlu0 %3352  ;;  %v7696_v50 = vpop.f32.mrb[23].mxu0 }
 0x394   : > { %3431 = vmatpush1.bf16.msra.mxu1 %v3353_v44  ;;  %4694 = vrot.lane.b32.xlu1 %v11039_v20, %s12830_s21  ;;  %v11106_v24 = vadd.f32 %v7696_v50, %v7695_v6  ;;  %v12949_v44 = vunpack.c.l.b16 %v11045_v29  ;;  %v6536_v41 = vrot.slane %v12950_v23, 2  ;;  %v4167_v6 = vsel %vm407_vm7, %v10789_v14, %v10813_v58 }
 0x395   : > { %4222 = vrot.lane.b32.xlu0 %v4164_v60, %s12896_s8  ;;  %3432 = vmatprep.subr.bf16.mxu1 %v12932_v53  ;;  %v12951_v60 = vunpack.c.l.b16 %v10898_v30  ;;  %v6535_v50 = vsel %vm290_vm5, %v6534_v15, %v6533_v18  ;;  %v5821_v14 = vsel %vm287_vm4, %v5820_v38, %v5819_v55  ;;  %v11140_v30 = vld [vmem:[%s8459_s20 + $0x2c] ss:$0 sps:$4 sm:$0x22]   ;;  %v11146_v15 = vld [vmem:[%s12745_s1 + $0x4] ss:$16 sps:$4 sm:$0xff]   ;;  %v12952_v18 = vunpack.c.l.b16 %v10914_v11 }
 0x396   : > { %v6612_v51 = vrot.slane %v12949_v44, 1  ;;  %v4186_v10 = vpop.permute.xlu1 %4185  ;;  %v11131_v44 = vld [vmem:[%s12745_s1 + $0x20] ss:$16 sps:$4 sm:$0xff]   ;;  %v6537_v23 = vsel %vm293_vm6, %v6536_v41, %v6535_v50  ;;  %v4921_v58 = vsel %vm407_vm7, %v10776_v61, %v10803_v57  ;;  %v11166_v41 = vld [vmem:[%s8459_s20 + $0x34] ss:$0 sps:$4 sm:$0x22]   ;;  %v12953_v50 = vunpack.c.l.b16 %v11103_v42 }
 0x397   : > { %v5822_v35 = vrot.slane %v12951_v60, 5  ;;  %v11124_v63 = vpop.permute.xlu0 %4915  ;;  %7726 = vmatprep.subr.bf16.mxu0 %v4186_v10  ;;  %v5824_v38 = vrot.slane %v12952_v18, 4 }
 0x398   : > { %3416 = vmatmul.mubr.bf16.gmra.mrb[28].mxu0 %v11131_v44  ;;  %4224 = vrot.lane.b32.xlu1 %v4167_v6, %s12896_s8  ;;  %v6613_v10 = vsel %vm275_vm0, %v6612_v51, %v6611_v25  ;;  %v12820_v6 = vunpack.c.l.b16 %v11117_v28  ;;  %v6615_v51 = vrot.slane %v12816_v62, 7  ;;  %v11179_v62 = vld [vmem:[%s8459_s20 + $0x3c] ss:$0 sps:$4 sm:$0x22]  }
 0x399   : > { %4692 = vrot.lane.b32.xlu0 %v11039_v20, %s8346_s28  ;;  %4277 = vmatprep.mubr.bf16.mxu0 %v11146_v15  ;;  %v5823_v25 = vsel %vm290_vm5, %v5822_v35, %v5821_v14  ;;  %v6614_v18 = vsel %vm278_vm1, %v12953_v50, %v6613_v10  ;;  %v11172_v35 = vpack.c.b16 %v6537_v23, %v6537_v23  ;;  %v12819_v14 = vunpack.c.l.b16 %v11140_v30 }
 0x39a   : > { %v11151_v55 = vpop.permute.xlu1 %4940  ;;  %v5825_v57 = vsel %vm293_vm6, %v5824_v38, %v5823_v25  ;;  %v6616_v52 = vsel %vm281_vm2, %v6615_v51, %v6614_v18  ;;  %v4924_v51 = vsel %vm407_vm7, %v10811_v45, %v10831_v2  ;;  %v12821_v50 = vunpack.c.l.b16 %v11179_v62 }
 0x39b   : > { %v3821_v60 = vpop.permute.xlu0 %3820  ;;  %v11187_v10 = vpack.c.b16 %v5825_v57, %v5825_v57  ;;  %v6619_v38 = vrot.slane %v12819_v14, 5  ;;  %v12956_v14 = vld [vmem:[#allocation5_spill] sm:$0xff] }
 0x39c   : > { %v3910_v11 = vsel %vm407_vm7, %v10630_v36, %v3821_v60  ;;  %5810 = vrot.lane.b32.xlu1 %v10979_v19, %s8346_s28  ;;  %v6617_v36 = vrot.slane %v12820_v6, 6  ;;  %v6623_v2 = vrot.slane %v12821_v50, 3 }
 0x39d   : > { %5057 = vrot.lane.b32.xlu0 %v4921_v58, %s8346_s28  ;;  %7727 = vmatpush3.bf16.msra.mxu0 %v3910_v11  ;;  %v12818_v58 = vunpack.c.l.b16 %v11166_v41  ;;  %12954 = vst [vmem:[#allocation12_spill] sm:$0xff] %v11187_v10 }
 0x39e   : > { %v3823_v61 = vpop.permute.xlu1 %3822  ;;  %v6618_v25 = vsel %vm284_vm3, %v6617_v36, %v6616_v52 }
 0x39f   : > { %v3355_v60 = vpop.permute.xlu0 %3354  ;;  %v6621_v18 = vrot.slane %v12818_v58, 4  ;;  %v6620_v57 = vsel %vm287_vm4, %v6619_v38, %v6618_v25 }
 0x3a0   : > { %3433 = vmatpush1.bf16.msra.mxu1 %v3355_v60  ;;  %4696 = vrot.lane.b32.xlu1 %v11039_v20, %s12896_s8  ;;  %v12955_v60 = vld [vmem:[#allocation7_spill] sm:$0xff] }
 0x3a1   : > { %6539 = vrot.lane.b32.xlu0 %v11172_v35, %s8344_s24  ;;  %3434 = vmatprep.subr.bf16.mxu1 %v12932_v53  ;;  %v2540_v45 = vadd.f32 %v11022_v17, %v12955_v60  ;;  %v6622_v58 = vsel %vm290_vm5, %v6621_v18, %v6620_v57  ;;  %v2543_v17 = vadd.f32 %v11037_v37, %v12956_v14 }
 0x3a2   : > { %v4188_v23 = vpop.permute.xlu1 %4187  ;;  %v6624_v8 = vsel %vm293_vm6, %v6623_v2, %v6622_v58  ;;  %v4170_v18 = vsel %vm407_vm7, %v10825_v21, %v10846_v32 }
 0x3a3   : > { %v11196_v11 = vpop.permute.xlu0 %4989  ;;  %7728 = vmatprep.subr.bf16.mxu0 %v4188_v23  ;;  %v11236_v2 = vpack.c.b16 %v6624_v8, %v6624_v8  ;;  %v12959_v8 = vld [vmem:[#allocation6_spill] sm:$0xff] }
 0x3a4   : > { %5059 = vrot.lane.b32.xlu1 %v4924_v51, %s8346_s28 }
 0x3a5   : > { %5827 = vrot.lane.b32.xlu0 %v11187_v10, %s12853_s10 }
 0x3a6   : > { %v11205_v52 = vpop.permute.xlu1 %5669 }
 0x3a7   : > { %v3825_v36 = vpop.permute.xlu0 %3824 }
 0x3a8   : > { %v3914_v23 = vsel %vm407_vm7, %v3823_v61, %v3825_v36  ;;  %6573 = vrot.lane.b32.xlu1 %v11172_v35, %s8346_s28  ;;  %v2588_v51 = vpop.f32.mrb[16].mxu1 }
 0x3a9   : > { %4698 = vrot.lane.b32.xlu0 %v11039_v20, %s8348_s4  ;;  %7729 = vmatpush3.bf16.msra.mxu0 %v3914_v23  ;;  %v2589_v38 = vadd.f32 %v2588_v51, %v2540_v45  ;;  %v2590_v25 = vpop.f32.mrb[17].mxu1  ;;  %v12957_v45 = vld [vmem:[#allocation9_spill] sm:$0xff] }
 0x3aa   : > { %v11219_v6 = vpop.permute.xlu1 %4993  ;;  %v2591_v50 = vpop.f32.mrb[18].mxu1  ;;  %v4173_v25 = vsel %vm407_vm7, %v10904_v34, %v10876_v5 }
 0x3ab   : > { %v2603_v60 = vmax.f32 %v2589_v38, 0.0  ;;  %v3357_v61 = vpop.permute.xlu0 %3356  ;;  %v2592_v36 = vadd.f32 %v2591_v50, %v2543_v17  ;;  %v2593_v39 = vpop.f32.mrb[19].mxu1  ;;  %v12958_v50 = vld [vmem:[#allocation10_spill] sm:$0xff] }
 0x3ac   : > { %3435 = vmatpush1.bf16.msra.mxu1 %v3357_v61  ;;  %5829 = vrot.lane.b32.xlu1 %v11187_v10, %s12852_s9  ;;  %v11232_v39 = vpack.c.b16 %v12958_v50, %v12958_v50  ;;  %v2548_v61 = vadd.f32 %v11087_v4, %v12959_v8  ;;  %v11259_v4 = vld [vmem:[%s8459_s20 + $0x4] ss:$0 sps:$4 sm:$0x44]  }
 0x3ad   : > { %v2611_v57 = vcombine.high %v2603_v60, %v2603_v60  ;;  %v2618_v37 = vrot.slane %v2603_v60, %v12957_v45  ;;  %v2604_v23 = vmax.f32 %v2592_v36, 0.0  ;;  %4226 = vrot.lane.b32.xlu0 %v4170_v18, %s12896_s8  ;;  %3436 = vmatprep.subr.bf16.mxu1 %v12932_v53  ;;  %v12960_v18 = vld [vmem:[#allocation8_spill] sm:$0xff] }
 0x3ae   : > { %v11234_v58 = vpop.permute.xlu1 %3828 }
 0x3af   : > { %v2625_v21 = vrot.slane %v2611_v57, %v12957_v45  ;;  %v2626_v32 = vcombine.high %v2618_v37, %v2618_v37  ;;  %v2634_v51 = vrot.slane %v2618_v37, %v12957_v45  ;;  %v2660_v60 = vcombine.high %v2604_v23, %v2604_v23  ;;  %v11240_v38 = vpop.permute.xlu0 %4991 }
 0x3b0   : > { %v2667_v17 = vrot.slane %v2604_v23, %v12957_v45  ;;  %4700 = vrot.lane.b32.xlu1 %v11039_v20, %s12897_s27  ;;  %v2596_v36 = vpop.f32.mrb[20].mxu1  ;;  %v2551_v57 = vadd.f32 %v11106_v24, %v12960_v18 }
 0x3b1   : > { %v2627_v37 = vcombine.high %v2625_v21, %v2625_v21  ;;  %v2641_v50 = vrot.slane %v2625_v21, %v12957_v45  ;;  %v2648_v14 = vrot.slane %v2626_v32, %v12957_v45  ;;  %v2656_v5 = vcombine.high %v2634_v51, %v2634_v51  ;;  %2839 = vst.msk [vmem:[%s9550_s7 + $0x2] sm:$0x1] %vm1121_vm9, %v2634_v51  ;;  %v2598_v34 = vpop.f32.mrb[21].mxu1 }
 0x3b2   : > { %6575 = vrot.lane.b32.xlu0 %v11172_v35, %s12830_s21  ;;  %v2674_v23 = vrot.slane %v2660_v60, %v12957_v45  ;;  %v2675_v24 = vcombine.high %v2667_v17, %v2667_v17  ;;  %v2683_v18 = vrot.slane %v2667_v17, %v12957_v45  ;;  %v2597_v21 = vadd.f32 %v2596_v36, %v2548_v61  ;;  %v3359_v8 = vpop.permute.xlu1 %3358  ;;  %v2599_v32 = vpop.f32.mrb[22].mxu1 }
 0x3b3   : > { %v2655_v7 = vrot.slane %v2627_v37, %v12957_v45  ;;  %v2657_v51 = vcombine.high %v2641_v50, %v2641_v50  ;;  %v2658_v12 = vcombine.high %v2648_v14, %v2648_v14  ;;  %2840 = vst.msk [vmem:[%s9550_s7 + $0xa] sm:$0x1] %vm1121_vm9, %v2648_v14  ;;  %2841 = vst.msk [vmem:[%s9550_s7 + $0x12] sm:$0x1] %vm1121_vm9, %v2656_v5  ;;  %v3827_v60 = vpop.permute.xlu0 %3826  ;;  %3437 = vmatpush1.bf16.msra.mxu1 %v3359_v8  ;;  %v2601_v61 = vpop.f32.mrb[23].mxu1 }
 0x3b4   : > { %2843 = vst.msk [vmem:[%s9550_s7 + $0x22] sm:$0x1] %vm1121_vm9, %v2641_v50  ;;  %v2600_v17 = vadd.f32 %v2599_v32, %v2551_v57  ;;  %v2676_v36 = vcombine.high %v2674_v23, %v2674_v23  ;;  %v2690_v34 = vrot.slane %v2674_v23, %v12957_v45  ;;  %v2697_v37 = vrot.slane %v2675_v24, %v12957_v45  ;;  %v11277_v14 = vld [vmem:[%s8459_s20 + $0x14] ss:$0 sps:$4 sm:$0x44]  }
 0x3b5   : > { %v2705_v19 = vcombine.high %v2683_v18, %v2683_v18  ;;  %2847 = vst.msk [vmem:[%s9550_s7 + $0x42] sm:$0x1] %vm1121_vm9, %v2683_v18  ;;  %4228 = vrot.lane.b32.xlu1 %v4173_v25, %s12896_s8  ;;  %v2659_v50 = vcombine.high %v2655_v7, %v2655_v7  ;;  %2842 = vst.msk [vmem:[%s9550_s7 + $0x1a] sm:$0x1] %vm1121_vm9, %v2658_v12  ;;  %v2605_v8 = vmax.f32 %v2597_v21, 0.0  ;;  %3438 = vmatprep.subr.bf16.mxu1 %v12932_v53 }
 0x3b6   : > { %2844 = vst.msk [vmem:[%s9550_s7 + $0x2a] sm:$0x1] %vm1121_vm9, %v2655_v7  ;;  %2845 = vst.msk [vmem:[%s9550_s7 + $0x32] sm:$0x1] %vm1121_vm9, %v2657_v51  ;;  %v2606_v57 = vmax.f32 %v2600_v17, 0.0  ;;  %5831 = vrot.lane.b32.xlu0 %v11187_v10, %s12828_s6  ;;  %v5863_v25 = vunpack.c.l.b16 %v11259_v4  ;;  %v2704_v18 = vrot.slane %v2676_v36, %v12957_v45  ;;  %v2706_v5 = vcombine.high %v2690_v34, %v2690_v34  ;;  %v11296_v7 = vpop.permute.xlu1 %5705  ;;  %v12961_v17 = vld [vmem:[#allocation16_spill] sm:$0xff] }
 0x3b7   : > { %v2707_v12 = vcombine.high %v2697_v37, %v2697_v37  ;;  %2848 = vst.msk [vmem:[%s9550_s7 + $0x4a] sm:$0x1] %vm1121_vm9, %v2697_v37  ;;  %2849 = vst.msk [vmem:[%s9550_s7 + $0x52] sm:$0x1] %vm1121_vm9, %v2705_v19  ;;  %v5864_v23 = vunpack.c.l.b16 %v8181_v49  ;;  %v2709_v24 = vcombine.high %v2605_v8, %v2605_v8  ;;  %v2716_v4 = vrot.slane %v2605_v8, %v12957_v45  ;;  %v4190_v51 = vpop.permute.xlu0 %4189 }
 0x3b8   : > { %2851 = vst.msk [vmem:[%s9550_s7 + $0x62] sm:$0x1] %vm1121_vm9, %v2690_v34  ;;  %2846 = vst.msk [vmem:[%s9550_s7 + $0x3a] sm:$0x1] %vm1121_vm9, %v2659_v50  ;;  %v2758_v21 = vcombine.high %v2606_v57, %v2606_v57  ;;  %v2765_v32 = vrot.slane %v2606_v57, %v12957_v45  ;;  %v4927_v19 = vsel %vm407_vm7, %v10856_v59, %v12961_v17  ;;  %7730 = vmatprep.subr.bf16.mxu0 %v4190_v51 }
 0x3b9   : > { %v2708_v61 = vcombine.high %v2704_v18, %v2704_v18  ;;  %2850 = vst.msk [vmem:[%s9550_s7 + $0x5a] sm:$0x1] %vm1121_vm9, %v2707_v12  ;;  %2852 = vst.msk [vmem:[%s9550_s7 + $0x6a] sm:$0x1] %vm1121_vm9, %v2704_v18  ;;  %v3918_v49 = vsel %vm407_vm7, %v3827_v60, %v11234_v58  ;;  %6626 = vrot.lane.b32.xlu1 %v11236_v2, %s12828_s6  ;;  %v5865_v36 = vunpack.c.l.b16 %v11277_v14  ;;  %v5871_v14 = vrot.slane %v5863_v25, 4  ;;  %s12974_s6 = smov 2  }
 0x3ba   : > { %2853 = vst.msk [vmem:[%s9550_s7 + $0x72] sm:$0x1] %vm1121_vm9, %v2706_v5  ;;  %v2723_v34 = vrot.slane %v2709_v24, %v12957_v45  ;;  %v2724_v37 = vcombine.high %v2716_v4, %v2716_v4  ;;  %v2732_v59 = vrot.slane %v2716_v4, %v12957_v45  ;;  %v2772_v50 = vrot.slane %v2758_v21, %v12957_v45  ;;  %v8183_v8 = vld [vmem:[%s8459_s20 + $0x1c] ss:$0 sps:$4 sm:$0x44]   ;;  %v3831_v57 = vpop.permute.xlu1 %3830 }
 0x3bb   : > { %5061 = vrot.lane.b32.xlu0 %v4927_v19, %s8346_s28  ;;  %2854 = vst.msk [vmem:[%s9550_s7 + $0x7a] sm:$0x1] %vm1121_vm9, %v2708_v61  ;;  %v2773_v58 = vcombine.high %v2765_v32, %v2765_v32  ;;  %v2781_v60 = vrot.slane %v2765_v32, %v12957_v45  ;;  %7731 = vmatpush3.bf16.msra.mxu0 %v3918_v49  ;;  %v5872_v18 = vrot.slane %v5864_v23, 3  ;;  %v11328_v21 = vpop.permute.xlu0 %5703  ;;  %v5866_v49 = vunpack.c.l.b16 %v8183_v8 }
 0x3bc   : > { %v2725_v5 = vcombine.high %v2723_v34, %v2723_v34  ;;  %v2739_v12 = vrot.slane %v2723_v34, %v12957_v45  ;;  %v2746_v24 = vrot.slane %v2724_v37, %v12957_v45  ;;  %v2754_v4 = vcombine.high %v2732_v59, %v2732_v59  ;;  %2855 = vst.msk [vmem:[%s9550_s7 + $0x82] sm:$0x1] %vm1121_vm9, %v2732_v59 }
 0x3bd   : > { %v2774_v51 = vcombine.high %v2772_v50, %v2772_v50  ;;  %v2788_v32 = vrot.slane %v2772_v50, %v12957_v45  ;;  %v2795_v25 = vrot.slane %v2773_v58, %v12957_v45  ;;  %v2803_v23 = vcombine.high %v2781_v60, %v2781_v60  ;;  %2863 = vst.msk [vmem:[%s9550_s7 + $0xc2] sm:$0x1] %vm1121_vm9, %v2781_v60 }
 0x3be   : > { %4749 = vrot.lane.b32.xlu1 %v11232_v39, %s8344_s24  ;;  %v2753_v17 = vrot.slane %v2725_v5, %v12957_v45  ;;  %v2755_v19 = vcombine.high %v2739_v12, %v2739_v12  ;;  %v2756_v61 = vcombine.high %v2746_v24, %v2746_v24  ;;  %2856 = vst.msk [vmem:[%s9550_s7 + $0x8a] sm:$0x1] %vm1121_vm9, %v2746_v24  ;;  %2857 = vst.msk [vmem:[%s9550_s7 + $0x92] sm:$0x1] %vm1121_vm9, %v2754_v4  ;;  %v3361_v50 = vpop.permute.xlu1 %3360 }
 0x3bf   : > { %2859 = vst.msk [vmem:[%s9550_s7 + $0xa2] sm:$0x1] %vm1121_vm9, %v2739_v12  ;;  %6577 = vrot.lane.b32.xlu0 %v11172_v35, %s12896_s8  ;;  %v2802_v34 = vrot.slane %v2774_v51, %v12957_v45  ;;  %v2804_v37 = vcombine.high %v2788_v32, %v2788_v32  ;;  %v2805_v59 = vcombine.high %v2795_v25, %v2795_v25  ;;  %2864 = vst.msk [vmem:[%s9550_s7 + $0xca] sm:$0x1] %vm1121_vm9, %v2795_v25  ;;  %v11361_v5 = vpop.permute.xlu0 %4995 }
 0x3c0   : > { %2865 = vst.msk [vmem:[%s9550_s7 + $0xd2] sm:$0x1] %vm1121_vm9, %v2803_v23  ;;  %2867 = vst.msk [vmem:[%s9550_s7 + $0xe2] sm:$0x1] %vm1121_vm9, %v2788_v32  ;;  %v5874_v58 = vrot.slane %v5865_v36, 2  ;;  %v4930_v8 = vsel %vm407_vm7, %v10952_v47, %v10931_v9  ;;  %v2757_v60 = vcombine.high %v2753_v17, %v2753_v17  ;;  %3439 = vmatpush1.bf16.msra.mxu1 %v3361_v50  ;;  %v5876_v47 = vrot.slane %v5866_v49, 1 }
 0x3c1   : > { %2858 = vst.msk [vmem:[%s9550_s7 + $0x9a] sm:$0x1] %vm1121_vm9, %v2756_v61  ;;  %2860 = vst.msk [vmem:[%s9550_s7 + $0xaa] sm:$0x1] %vm1121_vm9, %v2753_v17  ;;  %v5873_v36 = vsel %vm275_vm0, %v5872_v18, %v5871_v14  ;;  %v2806_v24 = vcombine.high %v2802_v34, %v2802_v34  ;;  %3440 = vmatprep.subr.bf16.mxu1 %v12932_v53  ;;  %v3922_v14 = vsel %vm407_vm7, %v3831_v57, %v10797_v13 }
 0x3c2   : > { %2861 = vst.msk [vmem:[%s9550_s7 + $0xb2] sm:$0x1] %vm1121_vm9, %v2755_v19  ;;  %v8185_v12 = vld [vmem:[%s8459_s20 + $0x2c] ss:$0 sps:$4 sm:$0x44]   ;;  %5063 = vrot.lane.b32.xlu1 %v4930_v8, %s8346_s28  ;;  %v11382_v18 = vpop.permute.xlu1 %5724  ;;  %v5875_v51 = vsel %vm278_vm1, %v5874_v58, %v5873_v36 }
 0x3c3   : > { %2866 = vst.msk [vmem:[%s9550_s7 + $0xda] sm:$0x1] %vm1121_vm9, %v2805_v59  ;;  %2868 = vst.msk [vmem:[%s9550_s7 + $0xea] sm:$0x1] %vm1121_vm9, %v2802_v34  ;;  %5833 = vrot.lane.b32.xlu0 %v11187_v10, %s12962_s11  ;;  %v4192_v32 = vpop.permute.xlu0 %4191  ;;  %v5868_v25 = vunpack.c.l.b16 %v8185_v12  ;;  %v5877_v19 = vsel %vm281_vm2, %v5876_v47, %v5875_v51  ;;  %v12963_v34 = vld [vmem:[#allocation15_spill] sm:$0xff] }
 0x3c4   : > { %2869 = vst.msk [vmem:[%s9550_s7 + $0xf2] sm:$0x1] %vm1121_vm9, %v2804_v37  ;;  %v8184_v9 = vld [vmem:[%s8459_s20 + $0x24] ss:$0 sps:$4 sm:$0x44]   ;;  %7732 = vmatprep.subr.bf16.mxu0 %v4192_v32  ;;  %v4176_v37 = vsel %vm407_vm7, %v12963_v34, %v10975_v54 }
 0x3c5   : > { %2862 = vst.msk [vmem:[%s9550_s7 + $0xba] sm:$0x1] %vm1121_vm9, %v2757_v60  ;;  %2870 = vst.msk [vmem:[%s9550_s7 + $0xfa] sm:$0x1] %vm1121_vm9, %v2806_v24  ;;  %v5867_v23 = vunpack.c.l.b16 %v8184_v9  ;;  %7733 = vmatpush3.bf16.msra.mxu0 %v3922_v14  ;;  %v5879_v49 = vrot.slane %v5868_v25, 7  ;;  %v4933_v9 = vsel %vm407_vm7, %v10990_v16, %v11055_v46 }
 0x3c6   : > { %v8186_v4 = vld [vmem:[%s8459_s20 + $0x34] ss:$0 sps:$4 sm:$0x44]   ;;  %6628 = vrot.lane.b32.xlu1 %v11236_v2, %s12962_s11  ;;  %v8187_v17 = vld [vmem:[%s8459_s20 + $0x3c] ss:$0 sps:$4 sm:$0x44]   ;;  %v11392_v13 = vpop.permute.xlu1 %4999 }
 0x3c7   : > { %4751 = vrot.lane.b32.xlu0 %v11232_v39, %s8346_s28  ;;  %v5869_v57 = vunpack.c.l.b16 %v8186_v4  ;;  %v11394_v61 = vpop.permute.xlu0 %5707  ;;  %v5878_v59 = vsel %vm284_vm3, %v5867_v23, %v5877_v19  ;;  %v5870_v50 = vunpack.c.l.b16 %v8187_v17  ;;  %v11415_v14 = vld [vmem:[%s8459_s20] ss:$0 sps:$4 sm:$0x88]   ;;  %v11418_v4 = vld [vmem:[%s8459_s20 + $0x8] ss:$0 sps:$4 sm:$0x88]   ;;  %v12964_v23 = vunpack.c.l.b16 %v11042_v56 }
 0x3c8   : > { %v5880_v12 = vsel %vm287_vm4, %v5879_v49, %v5878_v59  ;;  %v11429_v46 = vld [vmem:[%s8459_s20 + $0x10] ss:$0 sps:$4 sm:$0x88]   ;;  %v12965_v19 = vunpack.c.l.b16 %v11045_v29  ;;  %v12835_v49 = vunpack.c.l.b16 %v11415_v14  ;;  %v11441_v59 = vld [vmem:[%s12745_s1 + $0x8] ss:$16 sps:$4 sm:$0xff]  }
 0x3c9   : > { %v5881_v8 = vrot.slane %v5869_v57, 6  ;;  %v5883_v54 = vrot.slane %v5870_v50, 5  ;;  %v6638_v17 = vrot.slane %v12964_v23, 3  ;;  %v11451_v29 = vld [vmem:[%s8459_s20 + $0x18] ss:$0 sps:$4 sm:$0x88]  }
 0x3ca   : > { %5837 = vrot.lane.b32.xlu1 %v11187_v10, %s8346_s28  ;;  %v3848_v58 = vpop.permute.xlu1 %3847  ;;  %v6639_v57 = vrot.slane %v12965_v19, 2  ;;  %v11484_v19 = vld [vmem:[%s8459_s20 + $0x28] ss:$0 sps:$4 sm:$0x88]  }
 0x3cb   : > { %4230 = vrot.lane.b32.xlu0 %v4176_v37, %s12896_s8  ;;  %v11403_v60 = vpop.permute.xlu0 %4997  ;;  %v5882_v24 = vsel %vm290_vm5, %v5881_v8, %v5880_v12  ;;  %v12966_v8 = vunpack.c.l.b16 %v11103_v42  ;;  %v12833_v42 = vunpack.c.l.b16 %v11451_v29 }
 0x3cc   : > { %v5884_v32 = vsel %vm293_vm6, %v5883_v54, %v5882_v24  ;;  %v12832_v54 = vunpack.c.l.b16 %v11429_v46  ;;  %v6640_v24 = vsel %vm275_vm0, %v6639_v57, %v6638_v17 }
 0x3cd   : > { %v11446_v56 = vpack.c.b16 %v5884_v32, %v5884_v32  ;;  %v6641_v12 = vrot.slane %v12966_v8, 1  ;;  %v12967_v8 = vunpack.c.l.b16 %v11117_v28 }
 0x3ce   : > { %4753 = vrot.lane.b32.xlu1 %v11232_v39, %s12830_s21  ;;  %v4194_v36 = vpop.permute.xlu1 %4193  ;;  %v5548_v23 = vrot.slane %v12832_v54, 4  ;;  %v11508_v54 = vld [vmem:[%s12745_s1 + $0xc] ss:$16 sps:$4 sm:$0xff]   ;;  %s12973_s21 = smov 125  }
 0x3cf   : > { %5835 = vrot.lane.b32.xlu0 %v11187_v10, %s8344_s24  ;;  %v3371_v47 = vpop.permute.xlu0 %3370  ;;  %7734 = vmatprep.subr.bf16.mxu0 %v4194_v36 }
 0x3d0   : > { %v3373_v51 = vsel %vm407_vm7, %v3371_v47, 0 }
 0x3d1   : > { %3441 = vmatpush1.bf16.msra.mxu1 %v3373_v51  ;;  %v11473_v51 = vld [vmem:[%s8459_s20 + $0x20] ss:$0 sps:$4 sm:$0x88]  }
 0x3d2   : > { %5065 = vrot.lane.b32.xlu1 %v4933_v9, %s8346_s28  ;;  %v11425_v25 = vpop.permute.xlu1 %5016  ;;  %4294 = vmatprep.subr.bf16.mxu1 %v12932_v53  ;;  %v5545_v9 = vrot.slane %v12835_v49, 6  ;;  %v12970_v45 = vunpack.c.l.b16 %v11473_v51 }
 0x3d3   : > { %4240 = vrot.lane.b32.xlu0 %v12963_v34, %s12897_s27  ;;  %v3850_v16 = vpop.permute.xlu0 %3849  ;;  %v12834_v34 = vunpack.c.l.b16 %v11418_v4 }
 0x3d4   : > { %v3926_v37 = vsel %vm407_vm7, %v3848_v58, %v3850_v16  ;;  %3457 = vmatmul.mubr.bf16.vlgmr.msra.gmra.mrb[24].mxu1 %v11441_v59  ;;  %v11456_v58 = vld [vmem:[%s12745_s1 + $0x2c] ss:$16 sps:$4 sm:$0xff]   ;;  %v6642_v16 = vsel %vm278_vm1, %v6641_v12, %v6640_v24  ;;  %v6644_v12 = vrot.slane %v12967_v8, 7  ;;  %v5552_v10 = vrot.slane %v12970_v45, 2 }
 0x3d5   : > { %7735 = vmatpush3.bf16.msra.mxu0 %v3926_v37  ;;  %7472 = vmatprep.mubr.msk.bf16.mxu1 %vm777_vm8, %v11456_v58  ;;  %v5546_v47 = vrot.slane %v12834_v34, 5  ;;  %v11490_v37 = vld [vmem:[%s12745_s1 + $0x28] ss:$16 sps:$4 sm:$0xff]   ;;  %v12844_v34 = vunpack.c.l.b16 %v11484_v19 }
 0x3d6   : > { %6632 = vrot.lane.b32.xlu1 %v11236_v2, %s8346_s28  ;;  %v3852_v50 = vpop.permute.xlu1 %3851 }
 0x3d7   : > { %4755 = vrot.lane.b32.xlu0 %v11232_v39, %s12896_s8  ;;  %v11463_v36 = vpop.permute.xlu0 %5726  ;;  %v5547_v57 = vsel %vm275_vm0, %v5546_v47, %v5545_v9  ;;  %v12968_v9 = vunpack.c.l.b16 %v11092_v31  ;;  %v4939_v31 = vsel %vm407_vm7, %v10539_v27, %v11084_v26  ;;  %v11529_v27 = vld [vmem:[%s8459_s20 + $0x38] ss:$0 sps:$4 sm:$0x88]   ;;  %v5554_v45 = vrot.slane %v12844_v34, 1 }
 0x3d8   : > { %v5549_v8 = vsel %vm278_vm1, %v5548_v23, %v5547_v57  ;;  %v12971_v23 = vunpack.c.l.b16 %v11166_v41  ;;  %v11537_v57 = vld [vmem:[%s8459_s20 + $0x30] ss:$0 sps:$4 sm:$0x88]   ;;  %v12972_v41 = vunpack.c.l.b16 %v11179_v62  ;;  %v12977_v34 = vunpack.c.l.b16 %v11418_v4 }
 0x3d9   : > { %v6643_v47 = vsel %vm281_vm2, %v12968_v9, %v6642_v16  ;;  %v12969_v9 = vunpack.c.l.b16 %v11140_v30 }
 0x3da   : > { %5888 = vrot.lane.b32.xlu1 %v11446_v56, %s12852_s9  ;;  %v4196_v32 = vpop.permute.xlu1 %4195  ;;  %v6645_v24 = vsel %vm284_vm3, %v6644_v12, %v6643_v47 }
 0x3db   : > { %6630 = vrot.lane.b32.xlu0 %v11236_v2, %s8344_s24  ;;  %v11481_v17 = vpop.permute.xlu0 %5018  ;;  %7736 = vmatprep.subr.bf16.mxu0 %v4196_v32  ;;  %v5550_v32 = vrot.slane %v12833_v42, 3  ;;  %v6646_v42 = vrot.slane %v12969_v9, 6 }
 0x3dc   : > { %3465 = vmatmul.mubr.bf16.gmra.mrb[28].mxu1 %v11490_v37 }
 0x3dd   : > { %7505 = vmatprep.mubr.msk.bf16.mxu1 %vm777_vm8, %v11508_v54  ;;  %v5551_v26 = vsel %vm281_vm2, %v5550_v32, %v5549_v8  ;;  %v6647_v12 = vsel %vm287_vm4, %v6646_v42, %v6645_v24  ;;  %v6650_v32 = vrot.slane %v12972_v41, 4  ;;  %v12840_v42 = vunpack.c.l.b16 %v11529_v27 }
 0x3de   : > { %4759 = vrot.lane.b32.xlu1 %v11232_v39, %s12897_s27  ;;  %v11512_v28 = vpop.permute.xlu1 %5728  ;;  %v5553_v47 = vsel %vm284_vm3, %v5552_v10, %v5551_v26 }
 0x3df   : > { %5886 = vrot.lane.b32.xlu0 %v11446_v56, %s12853_s10  ;;  %v3854_v16 = vpop.permute.xlu0 %3853  ;;  %v5555_v9 = vsel %vm287_vm4, %v5554_v45, %v5553_v47  ;;  %v5557_v10 = vrot.slane %v12840_v42, 7  ;;  %v11642_v42 = vld [vmem:[%s8459_s20 + $0x24] ss:$0 sps:$4 sm:$0x44]  }
 0x3e0   : > { %v3930_v49 = vsel %vm407_vm7, %v3852_v50, %v3854_v16  ;;  %v6648_v50 = vrot.slane %v12971_v23, 5 }
 0x3e1   : > { %7737 = vmatpush3.bf16.msra.mxu0 %v3930_v49  ;;  %v4936_v49 = vsel %vm407_vm7, %v11047_v22, %v11124_v63  ;;  %v12842_v22 = vunpack.c.l.b16 %v11537_v57 }
 0x3e2   : > { %5086 = vrot.lane.b32.xlu1 %v4939_v31, %s12896_s8  ;;  %v11532_v30 = vpop.permute.xlu1 %5020  ;;  %v6649_v8 = vsel %vm290_vm5, %v6648_v50, %v6647_v12  ;;  %v5028_v50 = vsel %vm407_vm7, %v11151_v55, %v11196_v11  ;;  %v11587_v11 = vld [vmem:[%s8459_s20 + $0x4] ss:$0 sps:$4 sm:$0x44]  }
 0x3e3   : > { %4757 = vrot.lane.b32.xlu0 %v11232_v39, %s8348_s4  ;;  %v4217_v16 = vpop.permute.xlu0 %4216  ;;  %v6651_v62 = vsel %vm293_vm6, %v6650_v32, %v6649_v8  ;;  %v5556_v23 = vsel %vm290_vm5, %v12842_v22, %v5555_v9  ;;  %v11590_v32 = vld [vmem:[%s8459_s20 + $0xc] ss:$0 sps:$4 sm:$0x44]   ;;  %v12976_v22 = vunpack.c.l.b16 %v11415_v14 }
 0x3e4   : > { %4295 = vmatpush1.bf16.msra.mxu1 %v4217_v16  ;;  %v11574_v12 = vpack.c.b16 %v6651_v62, %v6651_v62  ;;  %v5558_v45 = vsel %vm293_vm6, %v5557_v10, %v5556_v23  ;;  %v11596_v62 = vld [vmem:[%s8459_s20 + $0x14] ss:$0 sps:$4 sm:$0x44]   ;;  %v12838_v10 = vunpack.c.l.b16 %v11590_v32  ;;  %v5031_v23 = vsel %vm407_vm7, %v11240_v38, %v11219_v6 }
 0x3e5   : > { %4296 = vmatprep.subr.bf16.mxu1 %v12932_v53  ;;  %v11584_v55 = vpack.c.b16 %v5558_v45, %v5558_v45  ;;  %v12841_v45 = vunpack.c.l.b16 %v11596_v62 }
 0x3e6   : > { %6636 = vrot.lane.b32.xlu1 %v11236_v2, %s12896_s8  ;;  %v3856_v24 = vpop.permute.xlu1 %3855 }
 0x3e7   : > { %5067 = vrot.lane.b32.xlu0 %v4936_v49, %s8346_s28  ;;  %v11555_v63 = vpop.permute.xlu0 %5730 }
 0x3ea   : > { %5892 = vrot.lane.b32.xlu1 %v11446_v56, %s12962_s11  ;;  %v4198_v26 = vpop.permute.xlu1 %4197 }
 0x3eb   : > { %6634 = vrot.lane.b32.xlu0 %v11236_v2, %s12973_s21  ;;  %v11571_v16 = vpop.permute.xlu0 %5022  ;;  %7738 = vmatprep.subr.bf16.mxu0 %v4198_v26  ;;  %v11606_v26 = vld [vmem:[%s8459_s20 + $0x1c] ss:$0 sps:$4 sm:$0x44]  }
 0x3ec   : > { %v12843_v38 = vunpack.c.l.b16 %v11606_v26 }
 0x3ee   : > { %5088 = vrot.lane.b32.xlu1 %v5028_v50, %s12896_s8  ;;  %v11579_v49 = vpop.permute.xlu1 %5732 }
 0x3ef   : > { %5890 = vrot.lane.b32.xlu0 %v11446_v56, %s12974_s6  ;;  %v3858_v47 = vpop.permute.xlu0 %3857 }
 0x3f0   : > { %v3934_v41 = vsel %vm407_vm7, %v3856_v24, %v3858_v47  ;;  %v12839_v24 = vunpack.c.l.b16 %v11587_v11 }
 0x3f1   : > { %7739 = vmatpush3.bf16.msra.mxu0 %v3934_v41  ;;  %v6715_v41 = vrot.slane %v12838_v10, 3  ;;  %v11635_v10 = vld [vmem:[%s8459_s20 + $0x2c] ss:$0 sps:$4 sm:$0x44]  }
 0x3f2   : > { %6655 = vrot.lane.b32.xlu1 %v11574_v12, %s12962_s11  ;;  %v11593_v8 = vpop.permute.xlu1 %5024  ;;  %v6714_v47 = vrot.slane %v12839_v24, 4 }
 0x3f3   : > { %5069 = vrot.lane.b32.xlu0 %v4939_v31, %s8346_s28  ;;  %v4219_v9 = vpop.permute.xlu0 %4218 }
 0x3f4   : > { %4297 = vmatpush1.bf16.msra.mxu1 %v4219_v9  ;;  %v6716_v24 = vsel %vm275_vm0, %v6715_v41, %v6714_v47  ;;  %v11652_v47 = vld [vmem:[%s8459_s20 + $0x34] ss:$0 sps:$4 sm:$0x44]  }
 0x3f5   : > { %4298 = vmatprep.subr.bf16.mxu1 %v12932_v53  ;;  %v6712_v14 = vunpack.c.l.b16 %v11652_v47 }
 0x3f6   : > { %5560 = vrot.lane.b32.xlu1 %v11584_v55, %s8344_s24  ;;  %v4221_v31 = vpop.permute.xlu1 %4220 }
 0x3f7   : > { %6653 = vrot.lane.b32.xlu0 %v11574_v12, %s12974_s6  ;;  %v11611_v50 = vpop.permute.xlu0 %5734 }
 0x3f8   : > { %4299 = vmatpush1.bf16.msra.mxu1 %v4221_v31  ;;  %v6717_v31 = vrot.slane %v12841_v45, 2 }
 0x3f9   : > { %4300 = vmatprep.subr.bf16.mxu1 %v12932_v53 }
 0x3fa   : > { %5090 = vrot.lane.b32.xlu1 %v5031_v23, %s12896_s8  ;;  %v11622_v6 = vpop.permute.xlu1 %5785  ;;  %v11630_v23 = vsel %vm407_vm7, %v10737_v48, %v11205_v52  ;;  %v6719_v48 = vrot.slane %v12843_v38, 1  ;;  %v5791_v52 = vsel %vm407_vm7, %v11328_v21, %v11296_v7  ;;  %v6718_v41 = vsel %vm278_vm1, %v6717_v31, %v6716_v24 }
 0x3fb   : > { %5894 = vrot.lane.b32.xlu0 %v11446_v56, %s8344_s24  ;;  %v4200_v9 = vpop.permute.xlu0 %4199  ;;  %12975 = vst [vmem:[#allocation10_spill] sm:$0xff] %v11630_v23  ;;  %v5572_v38 = vrot.slane %v12976_v22, 7  ;;  %v6710_v7 = vunpack.c.l.b16 %v11642_v42  ;;  %v12978_v22 = vunpack.c.l.b16 %v11429_v46 }
 0x3fc   : > { %7740 = vmatprep.subr.bf16.mxu0 %v4200_v9  ;;  %v6720_v24 = vsel %vm281_vm2, %v6719_v48, %v6718_v41 }
 0x3fd   : > { %7741 = vmatpush3.bf16.msra.mxu0 %v10618_v33  ;;  %v6711_v33 = vunpack.c.l.b16 %v11635_v10  ;;  %v5575_v4 = vrot.slane %v12978_v22, 5  ;;  %v6721_v46 = vsel %vm284_vm3, %v6710_v7, %v6720_v24  ;;  %v6724_v22 = vrot.slane %v6712_v14, 6 }
 0x3fe   : > { %5562 = vrot.lane.b32.xlu1 %v11584_v55, %s8346_s28  ;;  %v5056_v45 = vpop.permute.xlu1 %5055  ;;  %v5794_v24 = vsel %vm407_vm7, %v11394_v61, %v11382_v18  ;;  %v12981_v61 = vunpack.c.l.b16 %v11484_v19  ;;  %v5037_v19 = vsel %vm407_vm7, %v11403_v60, %v11392_v13  ;;  %v5040_v13 = vsel %vm407_vm7, %v11425_v25, %v11481_v17 }
 0x3ff   : > { %5925 = vrot.lane.b32.xlu0 %v11630_v23, %s8346_s28  ;;  %v11649_v9 = vpop.permute.xlu0 %5783  ;;  %7754 = vmatprep.subr.bf16.mxu0 %v5056_v45  ;;  %v5573_v23 = vrot.slane %v12977_v34, 6 }
 0x400   : > { %4278 = vmatmul.mubr.bf16.vlgmr.msra.gmra.mrb[32].mxu0 %v11061_v3  ;;  %v11669_v3 = vld [vmem:[%s8459_s20 + $0x3c] ss:$0 sps:$4 sm:$0x44]  }
 0x401   : > { %4285 = vmatprep.mubr.bf16.mxu0 %v11075_v40  ;;  %v6722_v40 = vrot.slane %v6711_v33, 7  ;;  %v5574_v31 = vsel %vm275_vm0, %v5573_v23, %v5572_v38  ;;  %v5034_v23 = vsel %vm407_vm7, %v11361_v5, %v10658_v0 }
 0x402   : > { %5927 = vrot.lane.b32.xlu1 %v5791_v52, %s8346_s28  ;;  %v11666_v21 = vpop.permute.xlu1 %5787  ;;  %v6713_v52 = vunpack.c.l.b16 %v11669_v3  ;;  %v5576_v38 = vsel %vm278_vm1, %v5575_v4, %v5574_v31 }
 0x403   : > { %6657 = vrot.lane.b32.xlu0 %v11574_v12, %s8344_s24  ;;  %v4691_v45 = vpop.permute.xlu0 %4690 }
 0x404   : > { %v4780_v34 = vsel %vm407_vm7, %v11039_v20, %v4691_v45  ;;  %v12979_v20 = vunpack.c.l.b16 %v11451_v29  ;;  %v6723_v29 = vsel %vm287_vm4, %v6722_v40, %v6721_v46  ;;  %v6726_v0 = vrot.slane %v6713_v52, 5 }
 0x405   : > { %7755 = vmatpush3.bf16.msra.mxu0 %v4780_v34  ;;  %v12980_v34 = vunpack.c.l.b16 %v11473_v51  ;;  %v6725_v18 = vsel %vm290_vm5, %v6724_v22, %v6723_v29  ;;  %v5581_v40 = vrot.slane %v12981_v61, 2  ;;  %v6753_v47 = vrot.slane %v6713_v52, 6 }
 0x406   : > { %5566 = vrot.lane.b32.xlu1 %v11584_v55, %s12896_s8  ;;  %v4695_v48 = vpop.permute.xlu1 %4694  ;;  %v5577_v41 = vrot.slane %v12979_v20, 4  ;;  %v6727_v20 = vsel %vm293_vm6, %v6726_v0, %v6725_v18  ;;  %v12985_v18 = vunpack.c.l.b16 %v11590_v32 }
 0x407   : > { %5564 = vrot.lane.b32.xlu0 %v11584_v55, %s12973_s21  ;;  %v4223_v45 = vpop.permute.xlu0 %4222  ;;  %v5579_v4 = vrot.slane %v12980_v34, 3 }
 0x408   : > { %4286 = vmatmul.mubr.bf16.gmra.mrb[36].mxu0 %v11131_v44  ;;  %4301 = vmatpush1.bf16.msra.mxu1 %v4223_v45  ;;  %v5578_v5 = vsel %vm281_vm2, %v5577_v41, %v5576_v38  ;;  %v12982_v41 = vunpack.c.l.b16 %v11537_v57 }
 0x409   : > { %4302 = vmatprep.subr.bf16.mxu1 %v12932_v53  ;;  %5147 = vmatprep.mubr.bf16.mxu0 %v11146_v15  ;;  %v5580_v51 = vsel %vm284_vm3, %v5579_v4, %v5578_v5  ;;  %v12984_v5 = vunpack.c.l.b16 %v11587_v11  ;;  %v5043_v11 = vsel %vm407_vm7, %v11532_v30, %v11571_v16  ;;  %v8206_v16 = vld [vmem:[%s8459_s20 + $0x10] ss:$0 sps:$4 sm:$0x88]  }
 0x40a   : > { %5929 = vrot.lane.b32.xlu1 %v5794_v24, %s8346_s28  ;;  %v4225_v31 = vpop.permute.xlu1 %4224  ;;  %v5583_v45 = vrot.slane %v12982_v41, 1  ;;  %v5582_v22 = vsel %vm287_vm4, %v5581_v40, %v5580_v51  ;;  %v12986_v40 = vunpack.c.l.b16 %v11596_v62  ;;  %v12987_v62 = vunpack.c.l.b16 %v11606_v26 }
 0x40b   : > { %5092 = vrot.lane.b32.xlu0 %v5034_v23, %s12896_s8  ;;  %v4693_v44 = vpop.permute.xlu0 %4692  ;;  %v11732_v23 = vpack.c.b16 %v6727_v20, %v6727_v20  ;;  %v8204_v20 = vld [vmem:[%s8459_s20] ss:$0 sps:$4 sm:$0x88]   ;;  %v6748_v26 = vrot.slane %v6710_v7, 1 }
 0x40c   : > { %4303 = vmatpush1.bf16.msra.mxu1 %v4225_v31  ;;  %v4784_v38 = vsel %vm407_vm7, %v4693_v44, %v4695_v48  ;;  %v5584_v29 = vsel %vm290_vm5, %v5583_v45, %v5582_v22  ;;  %v12983_v48 = vunpack.c.l.b16 %v11529_v27  ;;  %v5797_v31 = vsel %vm407_vm7, %v11463_v36, %v10764_v43  ;;  %v8208_v7 = vld [vmem:[%s8459_s20 + $0x20] ss:$0 sps:$4 sm:$0x88]  }
 0x40d   : > { %4304 = vmatprep.subr.bf16.mxu1 %v12932_v53  ;;  %v6741_v44 = vrot.slane %v12984_v5, 5  ;;  %v6742_v43 = vrot.slane %v12985_v18, 4  ;;  %v6744_v51 = vrot.slane %v12986_v40, 3  ;;  %v6746_v45 = vrot.slane %v12987_v62, 2 }
 0x40e   : > { %6680 = vrot.lane.b32.xlu1 %v11574_v12, %s8346_s28  ;;  %v11718_v46 = vpop.permute.xlu1 %5810  ;;  %v5585_v34 = vsel %vm293_vm6, %v12983_v48, %v5584_v29  ;;  %v5800_v22 = vsel %vm407_vm7, %v11512_v28, %v11555_v63  ;;  %v5803_v28 = vsel %vm407_vm7, %v11579_v49, %v11611_v50  ;;  %v6751_v50 = vrot.slane %v6712_v14, 7 }
 0x40f   : > { %5568 = vrot.lane.b32.xlu0 %v11584_v55, %s8348_s4  ;;  %v5058_v15 = vpop.permute.xlu0 %5057  ;;  %v11754_v25 = vpack.c.b16 %v5585_v34, %v5585_v34  ;;  %v6743_v32 = vsel %vm275_vm0, %v6742_v43, %v6741_v44  ;;  %v6409_v34 = vunpack.c.l.b16 %v8206_v16  ;;  %v8209_v43 = vld [vmem:[%s8459_s20 + $0x28] ss:$0 sps:$4 sm:$0x88]  }
 0x410   : > { %7756 = vmatprep.subr.bf16.mxu0 %v5058_v15  ;;  %v8205_v15 = vld [vmem:[%s8459_s20 + $0x8] ss:$0 sps:$4 sm:$0x88]   ;;  %v6745_v30 = vsel %vm278_vm1, %v6744_v51, %v6743_v32  ;;  %v5046_v32 = vsel %vm407_vm7, %v10819_v1, %v11593_v8 }
 0x411   : > { %7757 = vmatpush3.bf16.msra.mxu0 %v4784_v38  ;;  %v6407_v38 = vunpack.c.l.b16 %v8204_v20  ;;  %v6418_v44 = vrot.slane %v6409_v34, 5  ;;  %v6412_v20 = vunpack.c.l.b16 %v8209_v43 }
 0x412   : > { %5570 = vrot.lane.b32.xlu1 %v11584_v55, %s12897_s27  ;;  %v4697_v24 = vpop.permute.xlu1 %4696 }
 0x413   : > { %5094 = vrot.lane.b32.xlu0 %v5037_v19, %s12896_s8  ;;  %v11734_v57 = vpop.permute.xlu0 %6539  ;;  %v6415_v63 = vrot.slane %v6407_v38, 7 }
 0x416   : > { %5096 = vrot.lane.b32.xlu1 %v5040_v13, %s12896_s8  ;;  %v5060_v60 = vpop.permute.xlu1 %5059  ;;  %v6747_v13 = vsel %vm281_vm2, %v6746_v45, %v6745_v30  ;;  %v6424_v30 = vrot.slane %v6412_v20, 2 }
 0x417   : > { %6729 = vrot.lane.b32.xlu0 %v11732_v23, %s12853_s10  ;;  %v11746_v4 = vpop.permute.xlu0 %5827  ;;  %7758 = vmatprep.subr.bf16.mxu0 %v5060_v60  ;;  %v8207_v60 = vld [vmem:[%s8459_s20 + $0x18] ss:$0 sps:$4 sm:$0x88]   ;;  %v6749_v42 = vsel %vm284_vm3, %v6748_v26, %v6747_v13 }
 0x418   : > { %v6750_v18 = vsel %vm287_vm4, %v6711_v33, %v6749_v42  ;;  %v8210_v33 = vld [vmem:[%s8459_s20 + $0x30] ss:$0 sps:$4 sm:$0x88]  }
 0x419   : > { %v6752_v10 = vsel %vm290_vm5, %v6751_v50, %v6750_v18  ;;  %v6413_v45 = vunpack.c.l.b16 %v8210_v33  ;;  %v8230_v50 = vld [vmem:[%s8459_s20 + $0xc] ss:$0 sps:$4 sm:$0x11]  }
 0x41a   : > { %6733 = vrot.lane.b32.xlu1 %v11732_v23, %s12974_s6  ;;  %v11756_v17 = vpop.permute.xlu1 %6573 }
 0x41b   : > { %5931 = vrot.lane.b32.xlu0 %v5797_v31, %s8346_s28  ;;  %v4699_v27 = vpop.permute.xlu0 %4698 }
 0x41c   : > { %v4788_v0 = vsel %vm407_vm7, %v4697_v24, %v4699_v27  ;;  %v6408_v24 = vunpack.c.l.b16 %v8205_v15  ;;  %v6754_v15 = vsel %vm293_vm6, %v6753_v47, %v6752_v10  ;;  %v5898_v47 = vsel %vm407_vm7, %v11718_v46, %v11746_v4  ;;  %v8233_v46 = vld [vmem:[%s8459_s20 + $0x1c] ss:$0 sps:$4 sm:$0x11]  }
 0x41d   : > { %7759 = vmatpush3.bf16.msra.mxu0 %v4788_v0  ;;  %v6410_v0 = vunpack.c.l.b16 %v8207_v60  ;;  %v11844_v8 = vpack.c.b16 %v6754_v15, %v6754_v15  ;;  %v6469_v4 = vunpack.c.h.b16 %v8233_v46 }
 0x41e   : > { %5589 = vrot.lane.b32.xlu1 %v11754_v25, %s8346_s28  ;;  %v11767_v36 = vpop.permute.xlu1 %5829  ;;  %v6416_v31 = vrot.slane %v6408_v24, 6  ;;  %v6426_v24 = vrot.slane %v6413_v45, 1  ;;  %v8234_v45 = vld [vmem:[%s8459_s20 + $0x24] ss:$0 sps:$4 sm:$0x11]  }
 0x41f   : > { %6731 = vrot.lane.b32.xlu0 %v11732_v23, %s12852_s9  ;;  %v4227_v61 = vpop.permute.xlu0 %4226  ;;  %v6420_v14 = vrot.slane %v6410_v0, 4 }
 0x420   : > { %4305 = vmatpush1.bf16.msra.mxu1 %v4227_v61  ;;  %v6417_v61 = vsel %vm275_vm0, %v6416_v31, %v6415_v63  ;;  %v5806_v63 = vsel %vm407_vm7, %v11649_v9, %v11622_v6  ;;  %v12988_v31 = vld [vmem:[#allocation20_spill] sm:$0xff] }
 0x421   : > { %4306 = vmatprep.subr.bf16.mxu1 %v12932_v53  ;;  %v5809_v42 = vsel %vm407_vm7, %v12988_v31, %v11666_v21 }
 0x422   : > { %5098 = vrot.lane.b32.xlu1 %v5043_v11, %s12896_s8  ;;  %v4701_v41 = vpop.permute.xlu1 %4700  ;;  %v6419_v11 = vsel %vm278_vm1, %v6418_v44, %v6417_v61  ;;  %v6467_v44 = vunpack.c.h.b16 %v8230_v50 }
 0x423   : > { %5587 = vrot.lane.b32.xlu0 %v11754_v25, %s8344_s24  ;;  %v4792_v5 = vsel %vm407_vm7, %v4701_v41, %v11232_v39  ;;  %v6411_v39 = vunpack.c.l.b16 %v8208_v7  ;;  %v6421_v41 = vsel %vm281_vm2, %v6420_v14, %v6419_v11  ;;  %v8232_v14 = vld [vmem:[%s8459_s20 + $0x4] ss:$0 sps:$4 sm:$0x11]  }
 0x424   : > { %v11783_v19 = vpop.permute.xlu0 %6575  ;;  %v6466_v10 = vunpack.c.h.b16 %v8232_v14  ;;  %v6474_v33 = vrot.slane %v6467_v44, 7  ;;  %v12997_v44 = vld [vmem:[#allocation21_spill] sm:$0xff]  ;;  %v8237_v14 = vld [vmem:[%s8459_s20 + $0x3c] ss:$0 sps:$4 sm:$0x11]  }
 0x425   : > { %v6422_v3 = vrot.slane %v6411_v39, 3  ;;  %v8231_v39 = vld [vmem:[%s8459_s20 + $0x14] ss:$0 sps:$4 sm:$0x11]  }
 0x426   : > { %5591 = vrot.lane.b32.xlu1 %v11754_v25, %s12973_s21 }
 0x427   : > { %5933 = vrot.lane.b32.xlu0 %v5800_v22, %s8346_s28  ;;  %v4229_v29 = vpop.permute.xlu1 %4228  ;;  %v8211_v22 = vld [vmem:[%s8459_s20 + $0x38] ss:$0 sps:$4 sm:$0x88]  }
 0x428   : > { %v11797_v48 = vpop.permute.xlu0 %5831  ;;  %4307 = vmatpush1.bf16.msra.mxu1 %v4229_v29  ;;  %v6414_v60 = vunpack.c.l.b16 %v8211_v22 }
 0x429   : > { %4308 = vmatprep.subr.bf16.mxu1 %v12932_v53 }
 0x42a   : > { %5935 = vrot.lane.b32.xlu1 %v5803_v28, %s8346_s28 }
 0x42b   : > { %6735 = vrot.lane.b32.xlu0 %v11732_v23, %s12962_s11  ;;  %v11808_v27 = vpop.permute.xlu1 %6626 }
 0x42d   : > { %v5062_v49 = vpop.permute.xlu0 %5061 }
 0x42e   : > { %7760 = vmatprep.subr.bf16.mxu0 %v5062_v49  ;;  %6737 = vrot.lane.b32.xlu1 %v11732_v23, %s8344_s24 }
 0x42f   : > { %5593 = vrot.lane.b32.xlu0 %v11754_v25, %s12896_s8  ;;  %7761 = vmatpush3.bf16.msra.mxu0 %v4792_v5 }
 0x430   : > { %v4750_v40 = vpop.permute.xlu1 %4749 }
 0x431   : > { %v11825_v51 = vpop.permute.xlu0 %6577 }
 0x432   : > { %5110 = vrot.lane.b32.xlu1 %v10819_v1, %s12897_s27  ;;  %v6423_v1 = vsel %vm284_vm3, %v6422_v3, %v6421_v41  ;;  %v12989_v3 = vld [vmem:[#allocation18_spill] sm:$0xff]  ;;  %v6475_v41 = vsel %vm275_vm0, %v6474_v33, %v6466_v10  ;;  %v6473_v10 = vunpack.c.h.b16 %v8237_v14  ;;  %v5901_v33 = vsel %vm407_vm7, %v11767_v36, %v11797_v48 }
 0x433   : > { %5100 = vrot.lane.b32.xlu0 %v5046_v32, %s12896_s8  ;;  %v6425_v29 = vsel %vm287_vm4, %v6424_v30, %v6423_v1  ;;  %v6470_v30 = vunpack.c.h.b16 %v8234_v45 }
 0x434   : > { %v5064_v52 = vpop.permute.xlu1 %5063  ;;  %v6427_v28 = vsel %vm290_vm5, %v6426_v24, %v6425_v29 }
 0x435   : > { %v11838_v62 = vpop.permute.xlu0 %5833  ;;  %7762 = vmatprep.subr.bf16.mxu0 %v5064_v52  ;;  %v6428_v0 = vsel %vm293_vm6, %v6414_v60, %v6427_v28  ;;  %v12990_v52 = vunpack.c.l.b16 %v12989_v3  ;;  %v8235_v28 = vld [vmem:[%s8459_s20 + $0x2c] ss:$0 sps:$4 sm:$0x11]  }
 0x436   : > { %5597 = vrot.lane.b32.xlu1 %v11754_v25, %s12897_s27  ;;  %v11875_v6 = vpack.c.b16 %v6428_v0, %v6428_v0 }
 0x437   : > { %6739 = vrot.lane.b32.xlu0 %v11732_v23, %s8346_s28  ;;  %v6497_v15 = vrot.slane %v12990_v52, 7 }
 0x438   : > { %v11847_v16 = vpop.permute.xlu1 %6628 }
 0x439   : > { %v4752_v38 = vpop.permute.xlu0 %4751 }
 0x43a   : > { %v4796_v26 = vsel %vm407_vm7, %v4750_v40, %v4752_v38  ;;  %6756 = vrot.lane.b32.xlu1 %v11844_v8, %s12853_s10  ;;  %v6468_v40 = vunpack.c.h.b16 %v8231_v39 }
 0x43b   : > { %5595 = vrot.lane.b32.xlu0 %v11754_v25, %s8348_s4  ;;  %7763 = vmatpush3.bf16.msra.mxu0 %v4796_v26  ;;  %v12993_v26 = vld [vmem:[#allocation11_spill] sm:$0xff] }
 0x43c   : > { %v11856_v13 = vpop.permute.xlu1 %5837  ;;  %v6476_v20 = vrot.slane %v6468_v40, 6  ;;  %v12994_v29 = vunpack.c.l.b16 %v12993_v26 }
 0x43d   : > { %v4231_v34 = vpop.permute.xlu0 %4230 }
 0x43e   : > { %4309 = vmatpush1.bf16.msra.mxu1 %v4231_v34  ;;  %5939 = vrot.lane.b32.xlu1 %v5809_v42, %s8346_s28  ;;  %v6477_v24 = vsel %vm278_vm1, %v6476_v20, %v6475_v41  ;;  %v6498_v60 = vsel %vm275_vm0, %v6497_v15, %v12994_v29  ;;  %v6661_v34 = vsel %vm407_vm7, %v11756_v17, %v11783_v19  ;;  %v8236_v19 = vld [vmem:[%s8459_s20 + $0x34] ss:$0 sps:$4 sm:$0x11]   ;;  %v12999_v20 = vld [vmem:[#allocation22_spill] sm:$0xff]  ;;  %s8354_s20 = smov [#allocation2]  }
 0x43f   : > { %5937 = vrot.lane.b32.xlu0 %v5806_v63, %s8346_s28  ;;  %4310 = vmatprep.subr.bf16.mxu1 %v12932_v53  ;;  %v6471_v63 = vunpack.c.h.b16 %v8235_v28  ;;  %v13000_v3 = vunpack.c.l.b16 %v12999_v20  ;;  %v6664_v15 = vsel %vm407_vm7, %v11825_v51, %v11808_v27  ;;  %v13005_v28 = vld [vmem:[#allocation12_spill] sm:$0xff] }
 0x440   : > { %v4754_v7 = vpop.permute.xlu1 %4753 }
 0x441   : > { %v11869_v5 = vpop.permute.xlu0 %5835  ;;  %v6482_v50 = vrot.slane %v6471_v63, 3  ;;  %v6505_v52 = vrot.slane %v13000_v3, 3  ;;  %v5904_v63 = vsel %vm407_vm7, %v11838_v62, %v13005_v28  ;;  %v6667_v62 = vsel %vm407_vm7, %v11847_v16, %v11236_v2  ;;  %v12007_v2 = vld [vmem:[%s12745_s1] ss:$16 sps:$4 sm:$0xff]  }
 0x442   : > { %6760 = vrot.lane.b32.xlu1 %v11844_v8, %s12974_s6 }
 0x443   : > { %6758 = vrot.lane.b32.xlu0 %v11844_v8, %s12852_s9  ;;  %s8250_s9 = sshll.u32 %s8354_s20, 4  ;;  %s8251_s9 = int_to_ptr.vmem [resolvable:$false] %s8250_s9 }
 0x444   : > { %v5066_v9 = vpop.permute.xlu1 %5065  ;;  %s8252_s10 = scalar_lea.vmem %s8251_s9, 8192 }
 0x445   : > { %v4241_v21 = vpop.permute.xlu0 %4240  ;;  %7764 = vmatprep.subr.bf16.mxu0 %v5066_v9 }
 0x446   : > { %v4243_v49 = vsel %vm407_vm7, %v4241_v21, 0  ;;  %6430 = vrot.lane.b32.xlu1 %v11875_v6, %s8344_s24 }
 0x447   : > { %5956 = vrot.lane.b32.xlu0 %v5809_v42, %s12896_s8  ;;  %4311 = vmatpush1.bf16.msra.mxu1 %v4243_v49  ;;  %v6480_v42 = vrot.slane %v6470_v30, 4  ;;  %v6472_v49 = vunpack.c.h.b16 %v8236_v19  ;;  %v13001_v30 = vld [vmem:[#allocation23_spill] sm:$0xff] }
 0x448   : > { %v11882_v18 = vpop.permute.xlu1 %6632  ;;  %5164 = vmatprep.subr.bf16.mxu1 %v12932_v53 }
 0x449   : > { %v4756_v43 = vpop.permute.xlu0 %4755 }
 0x44a   : > { %v4800_v61 = vsel %vm407_vm7, %v4754_v7, %v4756_v43  ;;  %4327 = vmatmul.mubr.bf16.vlgmr.msra.gmra.mrb[32].mxu1 %v11441_v59  ;;  %5958 = vrot.lane.b32.xlu1 %v5898_v47, %s12896_s8  ;;  %v11905_v59 = vsel %vm407_vm7, %v11172_v35, %v11734_v57  ;;  %v6478_v35 = vrot.slane %v6469_v4, 5  ;;  %v12991_v57 = vld [vmem:[#allocation17_spill] sm:$0xff]  ;;  %v12995_v7 = vld [vmem:[#allocation19_spill] sm:$0xff]  ;;  %v12998_v43 = vunpack.c.l.b16 %v12997_v44 }
 0x44b   : > { %6762 = vrot.lane.b32.xlu0 %v11844_v8, %s12962_s11  ;;  %7765 = vmatpush3.bf16.msra.mxu0 %v4800_v61  ;;  %v12992_v22 = vunpack.c.l.b16 %v12991_v57  ;;  %v12996_v0 = vunpack.c.l.b16 %v12995_v7  ;;  %v6484_v4 = vrot.slane %v6472_v49, 2 }
 0x44c   : > { %v11895_v11 = vpop.permute.xlu1 %5888  ;;  %7506 = vmatprep.mubr.msk.bf16.mxu1 %vm777_vm8, %v11456_v58  ;;  %v6503_v61 = vrot.slane %v12998_v43, 4 }
 0x44d   : > { %v11897_v32 = vpop.permute.xlu0 %6630  ;;  %v6499_v38 = vrot.slane %v12992_v22, 6  ;;  %v6501_v9 = vrot.slane %v12996_v0, 5 }
 0x44e   : > { %6432 = vrot.lane.b32.xlu1 %v11875_v6, %s8346_s28  ;;  %v6670_v14 = vsel %vm407_vm7, %v11897_v32, %v11882_v18  ;;  %v12037_v18 = vld [vmem:[%s12745_s1 + $0x20] ss:$16 sps:$4 sm:$0xff]  }
 0x44f   : > { %6795 = vrot.lane.b32.xlu0 %v11905_v59, %s8346_s28  ;;  %v6500_v17 = vsel %vm278_vm1, %v6499_v38, %v6498_v60  ;;  %v13003_v38 = vld [vmem:[#allocation13_spill] sm:$0xff] }
 0x450   : > { %v4760_v58 = vpop.permute.xlu1 %4759  ;;  %v6502_v40 = vsel %vm281_vm2, %v6501_v9, %v6500_v17 }
 0x451   : > { %v11915_v1 = vpop.permute.xlu0 %5886  ;;  %v6504_v45 = vsel %vm284_vm3, %v6503_v61, %v6502_v40  ;;  %v12017_v61 = vld [vmem:[%s12745_s1 + $0x24] ss:$16 sps:$4 sm:$0xff]  }
 0x452   : > { %4335 = vmatmul.mubr.bf16.gmra.mrb[36].mxu1 %v11490_v37  ;;  %6797 = vrot.lane.b32.xlu1 %v6661_v34, %s8346_s28  ;;  %v6479_v37 = vsel %vm281_vm2, %v6478_v35, %v6477_v24  ;;  %v13002_v35 = vunpack.c.l.b16 %v13001_v30  ;;  %v6506_v27 = vsel %vm287_vm4, %v6505_v52, %v6504_v45  ;;  %v13004_v24 = vunpack.c.l.b16 %v13003_v38  ;;  %v12047_v52 = vld [vmem:[%s12745_s1 + $0x4] ss:$16 sps:$4 sm:$0xff]  }
 0x453   : > { %6764 = vrot.lane.b32.xlu0 %v11844_v8, %s8344_s24  ;;  %7539 = vmatprep.mubr.msk.bf16.mxu1 %vm777_vm8, %v11508_v54  ;;  %v6481_v39 = vsel %vm284_vm3, %v6480_v42, %v6479_v37  ;;  %v5910_v16 = vsel %vm407_vm7, %v11915_v1, %v11895_v11 }
 0x454   : > { %v5087_v31 = vpop.permute.xlu1 %5086  ;;  %v6483_v41 = vsel %vm287_vm4, %v6482_v50, %v6481_v39  ;;  %v6507_v57 = vrot.slane %v13002_v35, 2  ;;  %v6509_v26 = vrot.slane %v13004_v24, 1 }
 0x455   : > { %v4758_v21 = vpop.permute.xlu0 %4757  ;;  %5165 = vmatpush1.bf16.msra.mxu1 %v5087_v31  ;;  %v6485_v22 = vsel %vm290_vm5, %v6484_v4, %v6483_v41  ;;  %v5907_v31 = vsel %vm407_vm7, %v11869_v5, %v11856_v13  ;;  %v13006_v5 = vld [vmem:[#allocation14_spill] sm:$0xff] }
 0x456   : > { %5166 = vmatprep.subr.bf16.mxu1 %v12932_v53  ;;  %6436 = vrot.lane.b32.xlu1 %v11875_v6, %s12896_s8  ;;  %v4804_v46 = vsel %vm407_vm7, %v4758_v21, %v4760_v58  ;;  %v6486_v58 = vrot.slane %v6473_v10, 1  ;;  %v6508_v34 = vsel %vm290_vm5, %v6507_v57, %v6506_v27 }
 0x457   : > { %6434 = vrot.lane.b32.xlu0 %v11875_v6, %s12973_s21  ;;  %v6510_v0 = vsel %vm293_vm6, %v6509_v26, %v6508_v34 }
 0x458   : > { %v11945_v54 = vpop.permute.xlu1 %6636  ;;  %v6487_v60 = vsel %vm293_vm6, %v6486_v58, %v6485_v22  ;;  %v6511_v19 = vpack.c.b16 %v6510_v0, %v6510_v0 }
 0x459   : > { %v5068_v47 = vpop.permute.xlu0 %5067  ;;  %v11990_v7 = vpack.c.b16 %v6487_v60, %v6487_v60 }
 0x45a   : > { %7766 = vmatprep.subr.bf16.mxu0 %v5068_v47  ;;  %6799 = vrot.lane.b32.xlu1 %v6664_v15, %s8346_s28 }
 0x45b   : > { %5960 = vrot.lane.b32.xlu0 %v5901_v33, %s12896_s8  ;;  %7767 = vmatpush3.bf16.msra.mxu0 %v4804_v46 }
 0x45c   : > { %v11963_v36 = vpop.permute.xlu1 %5892 }
 0x45d   : > { %v11965_v48 = vpop.permute.xlu0 %6634 }
 0x45e   : > { %6440 = vrot.lane.b32.xlu1 %v11875_v6, %s12897_s27  ;;  %v6673_v41 = vsel %vm407_vm7, %v11965_v48, %v11945_v54 }
 0x45f   : > { %6438 = vrot.lane.b32.xlu0 %v11875_v6, %s8348_s4 }
 0x460   : > { %v5089_v51 = vpop.permute.xlu1 %5088 }
 0x461   : > { %v5891_v29 = vpop.permute.xlu0 %5890  ;;  %5167 = vmatpush1.bf16.msra.mxu1 %v5089_v51 }
 0x462   : > { %5168 = vmatprep.subr.bf16.mxu1 %v12932_v53  ;;  %5964 = vrot.lane.b32.xlu1 %v5907_v31, %s12896_s8  ;;  %v5913_v32 = vsel %vm407_vm7, %v5891_v29, %v11963_v36 }
 0x463   : > { %5962 = vrot.lane.b32.xlu0 %v5904_v63, %s12896_s8  ;;  %v7714_v21 = vpop.f32.mrb[24].mxu0 }
 0x464   : > { %v11988_v42 = vpop.permute.xlu1 %6655  ;;  %v7715_v37 = vpop.f32.mrb[25].mxu0 }
 0x465   : > { %v5070_v9 = vpop.permute.xlu0 %5069  ;;  %v11996_v17 = vadd.f32 %v7715_v37, %v7714_v21  ;;  %v7717_v13 = vpop.f32.mrb[26].mxu0 }
 0x466   : > { %7768 = vmatprep.subr.bf16.mxu0 %v5070_v9  ;;  %6514 = vrot.lane.b32.xlu1 %v11990_v7, %s8346_s28  ;;  %v7718_v49 = vpop.f32.mrb[27].mxu0 }
 0x467   : > { %6801 = vrot.lane.b32.xlu0 %v6667_v62, %s8346_s28  ;;  %7769 = vmatpush3.bf16.msra.mxu0 %v13006_v5  ;;  %v12002_v44 = vadd.f32 %v7718_v49, %v7717_v13 }
 0x468   : > { %v5561_v50 = vpop.permute.xlu1 %5560 }
 0x469   : > { %v6654_v43 = vpop.permute.xlu0 %6653  ;;  %v5673_v33 = vsel %vm407_vm7, %v11584_v55, %v5561_v50 }
 0x46a   : > { %5148 = vmatmul.mubr.bf16.vlgmr.msra.gmra.mrb[40].mxu0 %v12007_v2  ;;  %5966 = vrot.lane.b32.xlu1 %v5910_v16, %s12896_s8  ;;  %v6676_v54 = vsel %vm407_vm7, %v6654_v43, %v11988_v42 }
 0x46b   : > { %6512 = vrot.lane.b32.xlu0 %v6511_v19, %s8344_s24  ;;  %5155 = vmatprep.mubr.bf16.mxu0 %v12017_v61  ;;  %v7720_v47 = vpop.f32.mrb[28].mxu0 }
 0x46c   : > { %v5091_v39 = vpop.permute.xlu1 %5090  ;;  %v7721_v11 = vpop.f32.mrb[29].mxu0 }
 0x46d   : > { %v5895_v40 = vpop.permute.xlu0 %5894  ;;  %5169 = vmatpush1.bf16.msra.mxu1 %v5091_v39  ;;  %v12025_v1 = vadd.f32 %v7721_v11, %v7720_v47  ;;  %v7723_v10 = vpop.f32.mrb[30].mxu0  ;;  %v13007_v39 = vld [vmem:[#allocation7_spill] sm:$0xff] }
 0x46e   : > { %5170 = vmatprep.subr.bf16.mxu1 %v12932_v53  ;;  %6518 = vrot.lane.b32.xlu1 %v11990_v7, %s12896_s8  ;;  %v7724_v46 = vpop.f32.mrb[31].mxu0  ;;  %v5916_v30 = vsel %vm407_vm7, %v11446_v56, %v5895_v40  ;;  %v3410_v40 = vadd.f32 %v11996_v17, %v13007_v39 }
 0x46f   : > { %6803 = vrot.lane.b32.xlu0 %v6670_v14, %s8346_s28  ;;  %v12032_v20 = vadd.f32 %v7724_v46, %v7723_v10 }
 0x470   : > { %v5563_v4 = vpop.permute.xlu1 %5562 }
 0x471   : > { %v5926_v3 = vpop.permute.xlu0 %5925 }
 0x472   : > { %5156 = vmatmul.mubr.bf16.gmra.mrb[44].mxu0 %v12037_v18  ;;  %7782 = vmatprep.subr.bf16.mxu0 %v5926_v3 }
 0x473   : > { %6516 = vrot.lane.b32.xlu0 %v6511_v19, %s12973_s21  ;;  %7783 = vmatpush3.bf16.msra.mxu0 %v5673_v33  ;;  %v13008_v33 = vld [vmem:[#allocation5_spill] sm:$0xff] }
 0x474   : > { %5968 = vrot.lane.b32.xlu1 %v5913_v32, %s12896_s8  ;;  %v5928_v55 = vpop.permute.xlu1 %5927  ;;  %6017 = vmatprep.mubr.bf16.mxu0 %v12047_v52  ;;  %v3413_v46 = vadd.f32 %v12002_v44, %v13008_v33 }
 0x475   : > { %v6658_v15 = vpop.permute.xlu0 %6657  ;;  %7784 = vmatprep.subr.bf16.mxu0 %v5928_v55 }
 0x476   : > { %v6679_v48 = vsel %vm407_vm7, %v11574_v12, %v6658_v15 }
 0x477   : > { %6805 = vrot.lane.b32.xlu0 %v6673_v41, %s8346_s28  ;;  %v12100_v41 = vld [vmem:[%s12745_s1 + $0x8] ss:$16 sps:$4 sm:$0xff]  }
 0x478   : > { %6522 = vrot.lane.b32.xlu1 %v11990_v7, %s12897_s27  ;;  %v5567_v45 = vpop.permute.xlu1 %5566 }
 0x479   : > { %v5565_v36 = vpop.permute.xlu0 %5564 }
 0x47a   : > { %v5677_v58 = vsel %vm407_vm7, %v5563_v4, %v5565_v36 }
 0x47b   : > { %6520 = vrot.lane.b32.xlu0 %v6511_v19, %s8348_s4  ;;  %7785 = vmatpush3.bf16.msra.mxu0 %v5677_v58 }
 0x47c   : > { %5970 = vrot.lane.b32.xlu1 %v5916_v30, %s12896_s8  ;;  %v5930_v35 = vpop.permute.xlu1 %5929 }
 0x47d   : > { %v5093_v57 = vpop.permute.xlu0 %5092  ;;  %7786 = vmatprep.subr.bf16.mxu0 %v5930_v35  ;;  %v12107_v35 = vld [vmem:[%s12745_s1 + $0x2c] ss:$16 sps:$4 sm:$0xff]  }
 0x47e   : > { %5171 = vmatpush1.bf16.msra.mxu1 %v5093_v57 }
 0x47f   : > { %6807 = vrot.lane.b32.xlu0 %v6676_v54, %s8346_s28  ;;  %5172 = vmatprep.subr.bf16.mxu1 %v12932_v53 }
 0x480   : > { %6809 = vrot.lane.b32.xlu1 %v6679_v48, %s8346_s28  ;;  %v6681_v22 = vpop.permute.xlu1 %6680  ;;  %s13013_s28 = sand.u32 1, %s8316_s13  }
 0x481   : > { %v5569_v27 = vpop.permute.xlu0 %5568  ;;  %s12692_s4 = scalar_lea.sflag [#allocation3], %s13013_s28 }
 0x482   : > { %v5681_v51 = vsel %vm407_vm7, %v5567_v45, %v5569_v27  ;;  %v13009_v45 = vld [vmem:[#allocation9_spill] sm:$0xff] }
 0x483   : > { %5980 = vrot.lane.b32.xlu0 %v11446_v56, %s12897_s27  ;;  %7787 = vmatpush3.bf16.msra.mxu0 %v5681_v51 }
 0x484   : > { %v5571_v38 = vpop.permute.xlu1 %5570 }
 0x485   : > { %v5095_v24 = vpop.permute.xlu0 %5094  ;;  %v5685_v56 = vsel %vm407_vm7, %v5571_v38, %v11754_v25  ;;  %v13010_v38 = vld [vmem:[#allocation6_spill] sm:$0xff] }
 0x486   : > { %5173 = vmatpush1.bf16.msra.mxu1 %v5095_v24  ;;  %v3418_v24 = vadd.f32 %v12025_v1, %v13010_v38 }
 0x487   : > { %6826 = vrot.lane.b32.xlu0 %v6679_v48, %s12896_s8  ;;  %5174 = vmatprep.subr.bf16.mxu1 %v12932_v53 }
 0x488   : > { %v5097_v12 = vpop.permute.xlu1 %5096 }
 0x489   : > { %v6730_v26 = vpop.permute.xlu0 %6729 }
 0x48a   : > { %v6768_v29 = vsel %vm407_vm7, %v6681_v22, %v6730_v26  ;;  %5175 = vmatpush1.bf16.msra.mxu1 %v5097_v12 }
 0x48b   : > { %6828 = vrot.lane.b32.xlu1 %v6768_v29, %s12896_s8  ;;  %5176 = vmatprep.subr.bf16.mxu1 %v12932_v53  ;;  %v13011_v29 = vld [vmem:[#allocation8_spill] sm:$0xff] }
 0x48c   : > { %v6734_v60 = vpop.permute.xlu1 %6733 }
 0x48d   : > { %v5932_v34 = vpop.permute.xlu0 %5931 }
 0x48e   : > { %7788 = vmatprep.subr.bf16.mxu0 %v5932_v34 }
 0x48f   : > { %7789 = vmatpush3.bf16.msra.mxu0 %v5685_v56  ;;  %v3421_v56 = vadd.f32 %v12032_v20, %v13011_v29 }
 0x490   : > { %v5590_v28 = vpop.permute.xlu1 %5589 }
 0x491   : > { %v6732_v63 = vpop.permute.xlu0 %6731 }
 0x492   : > { %v6771_v31 = vsel %vm407_vm7, %v6732_v63, %v6734_v60 }
 0x493   : > { %6830 = vrot.lane.b32.xlu0 %v6771_v31, %s12896_s8 }
 0x494   : > { %v5099_v42 = vpop.permute.xlu1 %5098 }
 0x495   : > { %v5588_v0 = vpop.permute.xlu0 %5587  ;;  %5177 = vmatpush1.bf16.msra.mxu1 %v5099_v42 }
 0x496   : > { %5178 = vmatprep.subr.bf16.mxu1 %v12932_v53  ;;  %v5689_v62 = vsel %vm407_vm7, %v5588_v0, %v5590_v28 }
 0x498   : > { %v5592_v9 = vpop.permute.xlu1 %5591 }
 0x499   : > { %v5934_v21 = vpop.permute.xlu0 %5933 }
 0x49a   : > { %7790 = vmatprep.subr.bf16.mxu0 %v5934_v21 }
 0x49b   : > { %7791 = vmatpush3.bf16.msra.mxu0 %v5689_v62 }
 0x49c   : > { %v5936_v25 = vpop.permute.xlu1 %5935 }
 0x49d   : > { %v6736_v37 = vpop.permute.xlu0 %6735  ;;  %7792 = vmatprep.subr.bf16.mxu0 %v5936_v25 }
 0x49e   : > { %v6774_v13 = vsel %vm407_vm7, %v6736_v37, %v11732_v23 }
 0x49f   : > { %6832 = vrot.lane.b32.xlu1 %v6774_v13, %s12896_s8 }
 0x4a0   : > { %v6738_v5 = vpop.permute.xlu1 %6737 }
 0x4a1   : > { %v5594_v19 = vpop.permute.xlu0 %5593 }
 0x4a2   : > { %v5693_v49 = vsel %vm407_vm7, %v5592_v9, %v5594_v19 }
 0x4a3   : > { %7793 = vmatpush3.bf16.msra.mxu0 %v5693_v49 }
 0x4a4   : > { %v5111_v50 = vpop.permute.xlu1 %5110 }
 0x4a5   : > { %v5101_v43 = vpop.permute.xlu0 %5100  ;;  %v5113_v16 = vsel %vm407_vm7, %v5111_v50, 0 }
 0x4a6   : > { %5179 = vmatpush1.bf16.msra.mxu1 %v5101_v43 }
 0x4a7   : > { %5180 = vmatprep.subr.bf16.mxu1 %v12932_v53  ;;  %v3458_v47 = vpop.f32.mrb[24].mxu1 }
 0x4a8   : > { %v5598_v23 = vpop.permute.xlu1 %5597  ;;  %v3459_v14 = vadd.f32 %v3458_v47, %v3410_v40  ;;  %v3460_v10 = vpop.f32.mrb[25].mxu1 }
 0x4a9   : > { %v6740_v11 = vpop.permute.xlu0 %6739  ;;  %v3461_v3 = vpop.f32.mrb[26].mxu1 }
 0x4aa   : > { %5181 = vmatpush1.bf16.msra.mxu1 %v5113_v16  ;;  %v6777_v4 = vsel %vm407_vm7, %v6738_v5, %v6740_v11  ;;  %v3473_v32 = vmax.f32 %v3459_v14, 0.0  ;;  %v3462_v55 = vadd.f32 %v3461_v3, %v3413_v46  ;;  %v3463_v15 = vpop.f32.mrb[27].mxu1  ;;  %v12147_v14 = vld [vmem:[%s12745_s1 + $0x28] ss:$16 sps:$4 sm:$0xff]  }
 0x4ab   : > { %6034 = vmatprep.subr.bf16.mxu1 %v12932_v53  ;;  %6834 = vrot.lane.b32.xlu0 %v6777_v4, %s12896_s8 }
 0x4ac   : > { %v12095_v17 = vpop.permute.xlu1 %6756  ;;  %v3481_v44 = vcombine.high %v3473_v32, %v3473_v32  ;;  %v3488_v36 = vrot.slane %v3473_v32, %v13009_v45  ;;  %v3474_v58 = vmax.f32 %v3462_v55, 0.0  ;;  %v12162_v32 = vld [vmem:[%s12745_s1 + $0xc] ss:$16 sps:$4 sm:$0xff]  }
 0x4ad   : > { %5197 = vmatmul.mubr.bf16.vlgmr.msra.gmra.mrb[40].mxu1 %v12100_v41  ;;  %v5596_v30 = vpop.permute.xlu0 %5595 }
 0x4ae   : > { %7540 = vmatprep.mubr.msk.bf16.mxu1 %vm777_vm8, %v12107_v35  ;;  %v3495_v57 = vrot.slane %v3481_v44, %v13009_v45  ;;  %v3496_v54 = vcombine.high %v3488_v36, %v3488_v36  ;;  %v3504_v48 = vrot.slane %v3488_v36, %v13009_v45  ;;  %v3530_v22 = vcombine.high %v3474_v58, %v3474_v58 }
 0x4af   : > { %v3537_v27 = vrot.slane %v3474_v58, %v13009_v45  ;;  %v5697_v51 = vsel %vm407_vm7, %v5596_v30, %v5598_v23  ;;  %v3466_v12 = vpop.f32.mrb[28].mxu1  ;;  %v13012_v58 = vld [vmem:[#allocation10_spill] sm:$0xff] }
 0x4b0   : > { %v5940_v26 = vpop.permute.xlu1 %5939  ;;  %v3497_v60 = vcombine.high %v3495_v57, %v3495_v57  ;;  %v3511_v34 = vrot.slane %v3495_v57, %v13009_v45  ;;  %v3518_v28 = vrot.slane %v3496_v54, %v13009_v45  ;;  %v3526_v63 = vcombine.high %v3504_v48, %v3504_v48  ;;  %3709 = vst.msk [vmem:[%s9550_s7 + $0x3] sm:$0x1] %vm1121_vm9, %v3504_v48  ;;  %v3468_v42 = vpop.f32.mrb[29].mxu1 }
 0x4b1   : > { %v5938_v31 = vpop.permute.xlu0 %5937  ;;  %v3544_v1 = vrot.slane %v3530_v22, %v13009_v45  ;;  %v3545_v0 = vcombine.high %v3537_v27, %v3537_v27  ;;  %v3553_v9 = vrot.slane %v3537_v27, %v13009_v45  ;;  %v3467_v21 = vadd.f32 %v3466_v12, %v3418_v24  ;;  %v3469_v20 = vpop.f32.mrb[30].mxu1 }
 0x4b2   : > { %7794 = vmatprep.subr.bf16.mxu0 %v5938_v31  ;;  %v3525_v62 = vrot.slane %v3497_v60, %v13009_v45  ;;  %v3527_v25 = vcombine.high %v3511_v34, %v3511_v34  ;;  %v3528_v37 = vcombine.high %v3518_v28, %v3518_v28  ;;  %3710 = vst.msk [vmem:[%s9550_s7 + $0xb] sm:$0x1] %vm1121_vm9, %v3518_v28  ;;  %3711 = vst.msk [vmem:[%s9550_s7 + $0x13] sm:$0x1] %vm1121_vm9, %v3526_v63  ;;  %v3471_v5 = vpop.f32.mrb[31].mxu1 }
 0x4b3   : > { %3713 = vst.msk [vmem:[%s9550_s7 + $0x23] sm:$0x1] %vm1121_vm9, %v3511_v34  ;;  %v3470_v13 = vadd.f32 %v3469_v20, %v3421_v56  ;;  %7795 = vmatpush3.bf16.msra.mxu0 %v5697_v51  ;;  %v3546_v19 = vcombine.high %v3544_v1, %v3544_v1  ;;  %v3560_v49 = vrot.slane %v3544_v1, %v13009_v45  ;;  %3717 = vst.msk [vmem:[%s9550_s7 + $0x43] sm:$0x1] %vm1121_vm9, %v3553_v9 }
 0x4b4   : > { %v3567_v50 = vrot.slane %v3545_v0, %v13009_v45  ;;  %v3575_v43 = vcombine.high %v3553_v9, %v3553_v9  ;;  %7796 = vmatprep.subr.bf16.mxu0 %v5940_v26  ;;  %v12136_v16 = vpop.permute.xlu1 %6760  ;;  %v3529_v40 = vcombine.high %v3525_v62, %v3525_v62  ;;  %3712 = vst.msk [vmem:[%s9550_s7 + $0x1b] sm:$0x1] %vm1121_vm9, %v3528_v37  ;;  %3714 = vst.msk [vmem:[%s9550_s7 + $0x2b] sm:$0x1] %vm1121_vm9, %v3525_v62 }
 0x4b5   : > { %3715 = vst.msk [vmem:[%s9550_s7 + $0x33] sm:$0x1] %vm1121_vm9, %v3527_v25  ;;  %v3475_v47 = vmax.f32 %v3467_v21, 0.0  ;;  %v3476_v23 = vmax.f32 %v3470_v13, 0.0  ;;  %5205 = vmatmul.mubr.bf16.gmra.mrb[44].mxu1 %v12147_v14  ;;  %v6759_v11 = vpop.permute.xlu0 %6758  ;;  %v3574_v10 = vrot.slane %v3546_v19, %v13009_v45  ;;  %v3576_v46 = vcombine.high %v3560_v49, %v3560_v49  ;;  %3721 = vst.msk [vmem:[%s9550_s7 + $0x63] sm:$0x1] %vm1121_vm9, %v3560_v49 }
 0x4b6   : > { %v3577_v4 = vcombine.high %v3567_v50, %v3567_v50  ;;  %3718 = vst.msk [vmem:[%s9550_s7 + $0x4b] sm:$0x1] %vm1121_vm9, %v3567_v50  ;;  %3719 = vst.msk [vmem:[%s9550_s7 + $0x53] sm:$0x1] %vm1121_vm9, %v3575_v43  ;;  %v6780_v3 = vsel %vm407_vm7, %v12095_v17, %v6759_v11  ;;  %7573 = vmatprep.mubr.msk.bf16.mxu1 %vm777_vm8, %v12162_v32 }
 0x4b7   : > { %3716 = vst.msk [vmem:[%s9550_s7 + $0x3b] sm:$0x1] %vm1121_vm9, %v3529_v40  ;;  %v3579_v55 = vcombine.high %v3475_v47, %v3475_v47  ;;  %v3586_v15 = vrot.slane %v3475_v47, %v13009_v45  ;;  %v3628_v44 = vcombine.high %v3476_v23, %v3476_v23  ;;  %v3635_v36 = vrot.slane %v3476_v23, %v13009_v45 }
 0x4b8   : > { %6836 = vrot.lane.b32.xlu1 %v6780_v3, %s12896_s8  ;;  %v3578_v17 = vcombine.high %v3574_v10, %v3574_v10  ;;  %3720 = vst.msk [vmem:[%s9550_s7 + $0x5b] sm:$0x1] %vm1121_vm9, %v3577_v4  ;;  %3722 = vst.msk [vmem:[%s9550_s7 + $0x6b] sm:$0x1] %vm1121_vm9, %v3574_v10  ;;  %7797 = vmatpush3.bf16.msra.mxu0 %v13012_v58  ;;  %v6431_v30 = vpop.permute.xlu1 %6430 }
 0x4b9   : > { %3723 = vst.msk [vmem:[%s9550_s7 + $0x73] sm:$0x1] %vm1121_vm9, %v3576_v46  ;;  %v3593_v57 = vrot.slane %v3579_v55, %v13009_v45  ;;  %v3594_v54 = vcombine.high %v3586_v15, %v3586_v15  ;;  %v3602_v48 = vrot.slane %v3586_v15, %v13009_v45  ;;  %v3642_v22 = vrot.slane %v3628_v44, %v13009_v45  ;;  %v5957_v27 = vpop.permute.xlu0 %5956 }
 0x4ba   : > { %3724 = vst.msk [vmem:[%s9550_s7 + $0x7b] sm:$0x1] %vm1121_vm9, %v3578_v17  ;;  %v3643_v51 = vcombine.high %v3635_v36, %v3635_v36  ;;  %v3651_v24 = vrot.slane %v3635_v36, %v13009_v45  ;;  %6035 = vmatpush1.bf16.msra.mxu1 %v5957_v27  ;;  %v6543_v19 = vsel %vm407_vm7, %v11875_v6, %v6431_v30 }
 0x4bb   : > { %v3595_v12 = vcombine.high %v3593_v57, %v3593_v57  ;;  %v3609_v26 = vrot.slane %v3593_v57, %v13009_v45  ;;  %v3616_v56 = vrot.slane %v3594_v54, %v13009_v45  ;;  %v3624_v60 = vcombine.high %v3602_v48, %v3602_v48  ;;  %3725 = vst.msk [vmem:[%s9550_s7 + $0x83] sm:$0x1] %vm1121_vm9, %v3602_v48 }
 0x4bc   : > { %6018 = vmatmul.mubr.bf16.vlgmr.msra.gmra.mrb[48].mxu0 %v12007_v2  ;;  %v3644_v34 = vcombine.high %v3642_v22, %v3642_v22  ;;  %v3658_v28 = vrot.slane %v3642_v22, %v13009_v45  ;;  %v3665_v63 = vrot.slane %v3643_v51, %v13009_v45  ;;  %v3673_v31 = vcombine.high %v3651_v24, %v3651_v24  ;;  %v5959_v9 = vpop.permute.xlu1 %5958 }
 0x4bd   : > { %3733 = vst.msk [vmem:[%s9550_s7 + $0xc3] sm:$0x1] %vm1121_vm9, %v3651_v24  ;;  %6036 = vmatprep.subr.bf16.mxu1 %v12932_v53  ;;  %v3623_v42 = vrot.slane %v3595_v12, %v13009_v45  ;;  %v3625_v1 = vcombine.high %v3609_v26, %v3609_v26  ;;  %v3626_v0 = vcombine.high %v3616_v56, %v3616_v56  ;;  %3726 = vst.msk [vmem:[%s9550_s7 + $0x8b] sm:$0x1] %vm1121_vm9, %v3616_v56  ;;  %v6763_v21 = vpop.permute.xlu0 %6762 }
 0x4be   : > { %3727 = vst.msk [vmem:[%s9550_s7 + $0x93] sm:$0x1] %vm1121_vm9, %v3624_v60  ;;  %3729 = vst.msk [vmem:[%s9550_s7 + $0xa3] sm:$0x1] %vm1121_vm9, %v3609_v26  ;;  %6025 = vmatprep.mubr.bf16.mxu0 %v12017_v61  ;;  %v3672_v20 = vrot.slane %v3644_v34, %v13009_v45  ;;  %v3674_v62 = vcombine.high %v3658_v28, %v3658_v28  ;;  %v3675_v25 = vcombine.high %v3665_v63, %v3665_v63 }
 0x4bf   : > { %3734 = vst.msk [vmem:[%s9550_s7 + $0xcb] sm:$0x1] %vm1121_vm9, %v3665_v63  ;;  %3735 = vst.msk [vmem:[%s9550_s7 + $0xd3] sm:$0x1] %vm1121_vm9, %v3673_v31  ;;  %v6783_v37 = vsel %vm407_vm7, %v12136_v16, %v6763_v21  ;;  %6037 = vmatpush1.bf16.msra.mxu1 %v5959_v9  ;;  %v3627_v13 = vcombine.high %v3623_v42, %v3623_v42 }
 0x4c0   : > { %3737 = vst.msk [vmem:[%s9550_s7 + $0xe3] sm:$0x1] %vm1121_vm9, %v3658_v28  ;;  %3728 = vst.msk [vmem:[%s9550_s7 + $0x9b] sm:$0x1] %vm1121_vm9, %v3626_v0  ;;  %6838 = vrot.lane.b32.xlu0 %v6783_v37, %s12896_s8  ;;  %6038 = vmatprep.subr.bf16.mxu1 %v12932_v53  ;;  %v3676_v5 = vcombine.high %v3672_v20, %v3672_v20  ;;  %v6433_v49 = vpop.permute.xlu1 %6432 }
 0x4c1   : > { %3730 = vst.msk [vmem:[%s9550_s7 + $0xab] sm:$0x1] %vm1121_vm9, %v3623_v42  ;;  %3731 = vst.msk [vmem:[%s9550_s7 + $0xb3] sm:$0x1] %vm1121_vm9, %v3625_v1  ;;  %v6796_v50 = vpop.permute.xlu0 %6795 }
 0x4c2   : > { %3736 = vst.msk [vmem:[%s9550_s7 + $0xdb] sm:$0x1] %vm1121_vm9, %v3675_v25  ;;  %3738 = vst.msk [vmem:[%s9550_s7 + $0xeb] sm:$0x1] %vm1121_vm9, %v3672_v20  ;;  %7810 = vmatprep.subr.bf16.mxu0 %v6796_v50 }
 0x4c3   : > { %3739 = vst.msk [vmem:[%s9550_s7 + $0xf3] sm:$0x1] %vm1121_vm9, %v3674_v62  ;;  %3732 = vst.msk [vmem:[%s9550_s7 + $0xbb] sm:$0x1] %vm1121_vm9, %v3627_v13  ;;  %7811 = vmatpush3.bf16.msra.mxu0 %v6543_v19 }
 0x4c4   : > { %3740 = vst.msk [vmem:[%s9550_s7 + $0xfb] sm:$0x1] %vm1121_vm9, %v3676_v5  ;;  %6026 = vmatmul.mubr.bf16.gmra.mrb[52].mxu0 %v12037_v18  ;;  %6850 = vrot.lane.b32.xlu0 %v11844_v8, %s12897_s27  ;;  %v6798_v43 = vpop.permute.xlu1 %6797  ;;  %s7236_s27 = sshll.u32 %s9550_s7, 4  ;;  %s12680_s27 = int_to_ptr.vmem [resolvable:$true] %s7236_s27 }
 0x4c5   : > { %6887 = vmatprep.mubr.bf16.mxu0 %v12047_v52  ;;  %v6765_v16 = vpop.permute.xlu0 %6764  ;;  %7812 = vmatprep.subr.bf16.mxu0 %v6798_v43  ;;  %s8246_s21 = scalar_lea.vmem %s12680_s27, 4096  ;;  %p8253_p4 = scmp.lt.s32.totalorder %s12680_s27, %s8251_s9 }
 0x4c6   : > { %v6786_v40 = vsel %vm407_vm7, %v11844_v8, %v6765_v16  ;;  %p8247_p0 = scmp.ne.s32.totalorder %s12680_s27, %s8246_s21  ;;  %p8254_p5 = scmp.lt.s32.totalorder %s8252_s10, %s8246_s21 }
 0x4c7   : > { %6840 = vrot.lane.b32.xlu1 %v6786_v40, %s12896_s8  ;;  %s7610_s8 = sshll.u32 %s8328_s16, 7 }
 0x4c8   : > { %v6437_v6 = vpop.permute.xlu1 %6436  ;;  %s12637_s16 = sadd.s32 %s8324_s15, %s7610_s8  ;;  %p8248_p1 = pnand %p8247_p0, %p8429_p3 }
 0x4c9   : > { %v6435_v47 = vpop.permute.xlu0 %6434  ;;  %s7611_s15 = sshll.u32 %s12637_s16, 7  ;;  %p8255_p6 = por %p8254_p5, %p8253_p4 }
 0x4ca   : > { %v6547_v23 = vsel %vm407_vm7, %v6433_v49, %v6435_v47  ;;  %s12678_s6 = scalar_lea.hbm %s12747_s3, %s7611_s15  ;;  %p8249_p2 = pneg %p8248_p1 }
 0x4cb   : > { %7813 = vmatpush3.bf16.msra.mxu0 %v6547_v23 }
 0x4cc   : > { %v6800_v11 = vpop.permute.xlu1 %6799  ;;  %p8256_p7 = pnand %p8255_p6, %p8249_p2 }
 0x4cd   : > { %v5961_v10 = vpop.permute.xlu0 %5960  ;;  %7814 = vmatprep.subr.bf16.mxu0 %v6800_v11 }
 0x4ce   : > { %6039 = vmatpush1.bf16.msra.mxu1 %v5961_v10 }
 0x4cf   : > { %6040 = vmatprep.subr.bf16.mxu1 %v12932_v53 }
 0x4d0   : > { %v6441_v52 = vpop.permute.xlu1 %6440 }
 0x4d1   : > { %v6439_v46 = vpop.permute.xlu0 %6438  ;;  %v6555_v17 = vsel %vm407_vm7, %v6441_v52, %v11990_v7 }
 0x4d2   : > { %v6551_v4 = vsel %vm407_vm7, %v6437_v6, %v6439_v46 }
 0x4d3   : > { %7815 = vmatpush3.bf16.msra.mxu0 %v6551_v4  ;;  %v7742_v8 = vpop.f32.mrb[32].mxu0 }
 0x4d4   : > { %v5965_v3 = vpop.permute.xlu1 %5964  ;;  %v7743_v15 = vpop.f32.mrb[33].mxu0 }
 0x4d5   : > { %v5963_v55 = vpop.permute.xlu0 %5962  ;;  %v12241_v44 = vadd.f32 %v7743_v15, %v7742_v8  ;;  %v7745_v36 = vpop.f32.mrb[34].mxu0 }
 0x4d6   : > { %6041 = vmatpush1.bf16.msra.mxu1 %v5963_v55  ;;  %v7746_v58 = vpop.f32.mrb[35].mxu0 }
 0x4d7   : > { %6042 = vmatprep.subr.bf16.mxu1 %v12932_v53  ;;  %v12246_v30 = vadd.f32 %v7746_v58, %v7745_v36 }
 0x4d8   : > { %v6515_v57 = vpop.permute.xlu1 %6514 }
 0x4d9   : > { %v6802_v54 = vpop.permute.xlu0 %6801  ;;  %v4283_v49 = vadd.f32 %v12246_v30, %v13008_v33 }
 0x4da   : > { %6043 = vmatpush1.bf16.msra.mxu1 %v5965_v3  ;;  %7816 = vmatprep.subr.bf16.mxu0 %v6802_v54 }
 0x4db   : > { %6044 = vmatprep.subr.bf16.mxu1 %v12932_v53  ;;  %7817 = vmatpush3.bf16.msra.mxu0 %v6555_v17  ;;  %v7748_v48 = vpop.f32.mrb[36].mxu0 }
 0x4dc   : > { %v5967_v22 = vpop.permute.xlu1 %5966  ;;  %v7749_v51 = vpop.f32.mrb[37].mxu0 }
 0x4dd   : > { %v6513_v27 = vpop.permute.xlu0 %6512  ;;  %v12249_v24 = vadd.f32 %v7749_v51, %v7748_v48  ;;  %v7751_v12 = vpop.f32.mrb[38].mxu0 }
 0x4de   : > { %6045 = vmatpush1.bf16.msra.mxu1 %v5967_v22  ;;  %v6559_v7 = vsel %vm407_vm7, %v6513_v27, %v6515_v57  ;;  %v7752_v26 = vpop.f32.mrb[39].mxu0 }
 0x4df   : > { %6046 = vmatprep.subr.bf16.mxu1 %v12932_v53  ;;  %v12253_v56 = vadd.f32 %v7752_v26, %v7751_v12  ;;  %v4288_v8 = vadd.f32 %v12249_v24, %v13010_v38 }
 0x4e0   : > { %v6519_v60 = vpop.permute.xlu1 %6518 }
 0x4e1   : > { %v6804_v34 = vpop.permute.xlu0 %6803  ;;  %v4291_v55 = vadd.f32 %v12253_v56, %v13011_v29 }
 0x4e2   : > { %7818 = vmatprep.subr.bf16.mxu0 %v6804_v34 }
 0x4e3   : > { %7819 = vmatpush3.bf16.msra.mxu0 %v6559_v7 }
 0x4e5   : > { %v6517_v63 = vpop.permute.xlu0 %6516 }
 0x4e6   : > { %v5969_v28 = vpop.permute.xlu1 %5968  ;;  %v6563_v31 = vsel %vm407_vm7, %v6517_v63, %v6519_v60 }
 0x4e7   : > { %6047 = vmatpush1.bf16.msra.mxu1 %v5969_v28 }
 0x4e8   : > { %6048 = vmatprep.subr.bf16.mxu1 %v12932_v53 }
 0x4e9   : > { %v6806_v1 = vpop.permute.xlu0 %6805 }
 0x4ea   : > { %v6523_v42 = vpop.permute.xlu1 %6522  ;;  %7820 = vmatprep.subr.bf16.mxu0 %v6806_v1 }
 0x4eb   : > { %7821 = vmatpush3.bf16.msra.mxu0 %v6563_v31 }
 0x4ed   : > { %v6521_v9 = vpop.permute.xlu0 %6520 }
 0x4ee   : > { %v5971_v0 = vpop.permute.xlu1 %5970  ;;  %v6567_v21 = vsel %vm407_vm7, %v6521_v9, %v6523_v42 }
 0x4ef   : > { %6049 = vmatpush1.bf16.msra.mxu1 %v5971_v0 }
 0x4f0   : > { %6050 = vmatprep.subr.bf16.mxu1 %v12932_v53 }
 0x4f1   : > { %v6808_v20 = vpop.permute.xlu0 %6807 }
 0x4f2   : > { %7822 = vmatprep.subr.bf16.mxu0 %v6808_v20  ;;  %v6810_v62 = vpop.permute.xlu1 %6809 }
 0x4f3   : > { %7823 = vmatpush3.bf16.msra.mxu0 %v6567_v21 }
 0x4f4   : > { %7824 = vmatprep.subr.bf16.mxu0 %v6810_v62 }
 0x4f5   : > { %v5981_v25 = vpop.permute.xlu0 %5980 }
 0x4f6   : > { %v5983_v37 = vsel %vm407_vm7, %v5981_v25, 0 }
 0x4f7   : > { %6051 = vmatpush1.bf16.msra.mxu1 %v5983_v37  ;;  %7825 = vmatpush3.bf16.msra.mxu0 %v11905_v59 }
 0x4f8   : > { %6904 = vmatprep.subr.bf16.mxu0 %v12932_v53  ;;  %7838 = vmatprep.subr.bf16.mxu1 %v12932_v53 }
 0x4f9   : > { %v6827_v13 = vpop.permute.xlu0 %6826 }
 0x4fa   : > { %6067 = vmatmul.mubr.bf16.vlgmr.msra.gmra.mrb[48].mxu1 %v12100_v41  ;;  %6888 = vmatmul.mubr.bf16.vlgmr.msra.gmra.mrb[56].mxu0 %v12007_v2 }
 0x4fb   : > { %6905 = vmatpush1.bf16.msra.mxu0 %v6827_v13  ;;  %7847 = vmatpush1.bf16.msra.mxu1 %v6827_v13 }
 0x4fc   : > { %6906 = vmatprep.subr.bf16.mxu0 %v12932_v53  ;;  %7839 = vmatprep.subr.bf16.mxu1 %v12932_v53 }
 0x4fd   : > { %v6829_v5 = vpop.permute.xlu1 %6828  ;;  %7574 = vmatprep.mubr.msk.bf16.mxu1 %vm777_vm8, %v12107_v35  ;;  %6895 = vmatprep.mubr.bf16.mxu0 %v12017_v61  ;;  %v4280_v61 = vadd.f32 %v12241_v44, %v13007_v39 }
 0x4ff   : > { %6907 = vmatpush1.bf16.msra.mxu0 %v6829_v5  ;;  %7848 = vmatpush1.bf16.msra.mxu1 %v6829_v5 }
 0x500   : > { %7840 = vmatprep.subr.bf16.mxu1 %v12932_v53  ;;  %6908 = vmatprep.subr.bf16.mxu0 %v12932_v53 }
 0x502   : > { %6075 = vmatmul.mubr.bf16.gmra.mrb[52].mxu1 %v12147_v14  ;;  %6896 = vmatmul.mubr.bf16.gmra.mrb[60].mxu0 %v12037_v18 }
 0x503   : > { %7607 = vmatprep.mubr.msk.bf16.mxu0 %vm777_vm8, %v12162_v32  ;;  %7608 = vmatprep.mubr.msk.bf16.mxu1 %vm777_vm8, %v12107_v35 }
 0x505   : > { %v6831_v59 = vpop.permute.xlu0 %6830 }
 0x506   : > { %6909 = vmatpush1.bf16.msra.mxu0 %v6831_v59  ;;  %7849 = vmatpush1.bf16.msra.mxu1 %v6831_v59 }
 0x507   : > { %6910 = vmatprep.subr.bf16.mxu0 %v12932_v53  ;;  %7841 = vmatprep.subr.bf16.mxu1 %v12932_v53 }
 0x511   : > { %v6833_v2 = vpop.permute.xlu1 %6832 }
 0x512   : > { %6911 = vmatpush1.bf16.msra.mxu0 %v6833_v2  ;;  %7850 = vmatpush1.bf16.msra.mxu1 %v6833_v2 }
 0x513   : > { %7842 = vmatprep.subr.bf16.mxu1 %v12932_v53  ;;  %6912 = vmatprep.subr.bf16.mxu0 %v12932_v53 }
 0x51d   : > { %v4328_v18 = vpop.f32.mrb[32].mxu1  ;;  %v6835_v32 = vpop.permute.xlu0 %6834 }
 0x51e   : > { %v4329_v35 = vadd.f32 %v4328_v18, %v4280_v61  ;;  %v4330_v19 = vpop.f32.mrb[33].mxu1  ;;  %6913 = vmatpush1.bf16.msra.mxu0 %v6835_v32  ;;  %7851 = vmatpush1.bf16.msra.mxu1 %v6835_v32 }
 0x51f   : > { %v4331_v50 = vpop.f32.mrb[34].mxu1  ;;  %6914 = vmatprep.subr.bf16.mxu0 %v12932_v53  ;;  %7843 = vmatprep.subr.bf16.mxu1 %v12932_v53 }
 0x520   : > { %v4343_v43 = vmax.f32 %v4329_v35, 0.0  ;;  %v4332_v16 = vadd.f32 %v4331_v50, %v4283_v49  ;;  %v4333_v40 = vpop.f32.mrb[35].mxu1 }
 0x522   : > { %v4351_v6 = vcombine.high %v4343_v43, %v4343_v43  ;;  %v4358_v47 = vrot.slane %v4343_v43, %v13009_v45  ;;  %v4344_v23 = vmax.f32 %v4332_v16, 0.0 }
 0x524   : > { %v4365_v11 = vrot.slane %v4351_v6, %v13009_v45  ;;  %v4366_v10 = vcombine.high %v4358_v47, %v4358_v47  ;;  %v4374_v52 = vrot.slane %v4358_v47, %v13009_v45  ;;  %v4400_v46 = vcombine.high %v4344_v23, %v4344_v23 }
 0x525   : > { %v4407_v4 = vrot.slane %v4344_v23, %v13009_v45  ;;  %v4336_v3 = vpop.f32.mrb[36].mxu1 }
 0x526   : > { %v4367_v15 = vcombine.high %v4365_v11, %v4365_v11  ;;  %v4381_v44 = vrot.slane %v4365_v11, %v13009_v45  ;;  %v4388_v36 = vrot.slane %v4366_v10, %v13009_v45  ;;  %v4396_v17 = vcombine.high %v4374_v52, %v4374_v52  ;;  %4579 = vst.msk [vmem:[%s9550_s7 + $0x4] sm:$0x1] %vm1121_vm9, %v4374_v52  ;;  %v4338_v58 = vpop.f32.mrb[37].mxu1 }
 0x527   : > { %v4414_v30 = vrot.slane %v4400_v46, %v13009_v45  ;;  %v4415_v57 = vcombine.high %v4407_v4, %v4407_v4  ;;  %v4423_v54 = vrot.slane %v4407_v4, %v13009_v45  ;;  %v4337_v48 = vadd.f32 %v4336_v3, %v4288_v8  ;;  %v4339_v22 = vpop.f32.mrb[38].mxu1 }
 0x528   : > { %v4395_v27 = vrot.slane %v4367_v15, %v13009_v45  ;;  %v4397_v51 = vcombine.high %v4381_v44, %v4381_v44  ;;  %v4398_v24 = vcombine.high %v4388_v36, %v4388_v36  ;;  %4580 = vst.msk [vmem:[%s9550_s7 + $0xc] sm:$0x1] %vm1121_vm9, %v4388_v36  ;;  %4581 = vst.msk [vmem:[%s9550_s7 + $0x14] sm:$0x1] %vm1121_vm9, %v4396_v17  ;;  %v4341_v7 = vpop.f32.mrb[39].mxu1 }
 0x529   : > { %4583 = vst.msk [vmem:[%s9550_s7 + $0x24] sm:$0x1] %vm1121_vm9, %v4381_v44  ;;  %v4340_v12 = vadd.f32 %v4339_v22, %v4291_v55  ;;  %v4416_v26 = vcombine.high %v4414_v30, %v4414_v30  ;;  %v4430_v56 = vrot.slane %v4414_v30, %v13009_v45  ;;  %v4437_v60 = vrot.slane %v4415_v57, %v13009_v45 }
 0x52a   : > { %v4445_v34 = vcombine.high %v4423_v54, %v4423_v54  ;;  %4587 = vst.msk [vmem:[%s9550_s7 + $0x44] sm:$0x1] %vm1121_vm9, %v4423_v54  ;;  %v6837_v28 = vpop.permute.xlu1 %6836  ;;  %v4399_v63 = vcombine.high %v4395_v27, %v4395_v27  ;;  %4582 = vst.msk [vmem:[%s9550_s7 + $0x1c] sm:$0x1] %vm1121_vm9, %v4398_v24  ;;  %v4345_v31 = vmax.f32 %v4337_v48, 0.0 }
 0x52b   : > { %4584 = vst.msk [vmem:[%s9550_s7 + $0x2c] sm:$0x1] %vm1121_vm9, %v4395_v27  ;;  %4585 = vst.msk [vmem:[%s9550_s7 + $0x34] sm:$0x1] %vm1121_vm9, %v4397_v51  ;;  %v4346_v42 = vmax.f32 %v4340_v12, 0.0  ;;  %6915 = vmatpush1.bf16.msra.mxu0 %v6837_v28  ;;  %7852 = vmatpush1.bf16.msra.mxu1 %v6837_v28  ;;  %v4444_v1 = vrot.slane %v4416_v26, %v13009_v45  ;;  %v4446_v0 = vcombine.high %v4430_v56, %v4430_v56 }
 0x52c   : > { %v4447_v9 = vcombine.high %v4437_v60, %v4437_v60  ;;  %4588 = vst.msk [vmem:[%s9550_s7 + $0x4c] sm:$0x1] %vm1121_vm9, %v4437_v60  ;;  %4589 = vst.msk [vmem:[%s9550_s7 + $0x54] sm:$0x1] %vm1121_vm9, %v4445_v34  ;;  %7844 = vmatprep.subr.bf16.mxu1 %v12932_v53  ;;  %6916 = vmatprep.subr.bf16.mxu0 %v12932_v53  ;;  %v4449_v21 = vcombine.high %v4345_v31, %v4345_v31 }
 0x52d   : > { %4591 = vst.msk [vmem:[%s9550_s7 + $0x64] sm:$0x1] %vm1121_vm9, %v4430_v56  ;;  %4586 = vst.msk [vmem:[%s9550_s7 + $0x3c] sm:$0x1] %vm1121_vm9, %v4399_v63  ;;  %v4456_v20 = vrot.slane %v4345_v31, %v13009_v45  ;;  %v4498_v62 = vcombine.high %v4346_v42, %v4346_v42  ;;  %v4505_v25 = vrot.slane %v4346_v42, %v13009_v45 }
 0x52e   : > { %v4448_v37 = vcombine.high %v4444_v1, %v4444_v1  ;;  %4590 = vst.msk [vmem:[%s9550_s7 + $0x5c] sm:$0x1] %vm1121_vm9, %v4447_v9  ;;  %4592 = vst.msk [vmem:[%s9550_s7 + $0x6c] sm:$0x1] %vm1121_vm9, %v4444_v1  ;;  %v4463_v13 = vrot.slane %v4449_v21, %v13009_v45 }
 0x52f   : > { %4593 = vst.msk [vmem:[%s9550_s7 + $0x74] sm:$0x1] %vm1121_vm9, %v4446_v0  ;;  %v4464_v5 = vcombine.high %v4456_v20, %v4456_v20  ;;  %v4472_v59 = vrot.slane %v4456_v20, %v13009_v45  ;;  %v4512_v2 = vrot.slane %v4498_v62, %v13009_v45  ;;  %v4513_v61 = vcombine.high %v4505_v25, %v4505_v25 }
 0x530   : > { %4594 = vst.msk [vmem:[%s9550_s7 + $0x7c] sm:$0x1] %vm1121_vm9, %v4448_v37  ;;  %v4521_v18 = vrot.slane %v4505_v25, %v13009_v45  ;;  %v4465_v32 = vcombine.high %v4463_v13, %v4463_v13  ;;  %v4479_v35 = vrot.slane %v4463_v13, %v13009_v45 }
 0x531   : > { %v4486_v19 = vrot.slane %v4464_v5, %v13009_v45  ;;  %v4494_v49 = vcombine.high %v4472_v59, %v4472_v59  ;;  %4595 = vst.msk [vmem:[%s9550_s7 + $0x84] sm:$0x1] %vm1121_vm9, %v4472_v59  ;;  %v4514_v50 = vcombine.high %v4512_v2, %v4512_v2  ;;  %v4528_v43 = vrot.slane %v4512_v2, %v13009_v45 }
 0x532   : > { %v4535_v16 = vrot.slane %v4513_v61, %v13009_v45  ;;  %v4543_v40 = vcombine.high %v4521_v18, %v4521_v18  ;;  %4603 = vst.msk [vmem:[%s9550_s7 + $0xc4] sm:$0x1] %vm1121_vm9, %v4521_v18  ;;  %v6839_v6 = vpop.permute.xlu0 %6838  ;;  %v4493_v47 = vrot.slane %v4465_v32, %v13009_v45  ;;  %v4495_v23 = vcombine.high %v4479_v35, %v4479_v35 }
 0x533   : > { %v4496_v11 = vcombine.high %v4486_v19, %v4486_v19  ;;  %4596 = vst.msk [vmem:[%s9550_s7 + $0x8c] sm:$0x1] %vm1121_vm9, %v4486_v19  ;;  %4597 = vst.msk [vmem:[%s9550_s7 + $0x94] sm:$0x1] %vm1121_vm9, %v4494_v49  ;;  %6917 = vmatpush1.bf16.msra.mxu0 %v6839_v6  ;;  %7853 = vmatpush1.bf16.msra.mxu1 %v6839_v6  ;;  %v4542_v10 = vrot.slane %v4514_v50, %v13009_v45 }
 0x534   : > { %4599 = vst.msk [vmem:[%s9550_s7 + $0xa4] sm:$0x1] %vm1121_vm9, %v4479_v35  ;;  %v4544_v52 = vcombine.high %v4528_v43, %v4528_v43  ;;  %v4545_v46 = vcombine.high %v4535_v16, %v4535_v16  ;;  %4604 = vst.msk [vmem:[%s9550_s7 + $0xcc] sm:$0x1] %vm1121_vm9, %v4535_v16  ;;  %6918 = vmatprep.subr.bf16.mxu0 %v12932_v53  ;;  %7845 = vmatprep.subr.bf16.mxu1 %v12932_v53 }
 0x535   : > { %4605 = vst.msk [vmem:[%s9550_s7 + $0xd4] sm:$0x1] %vm1121_vm9, %v4543_v40  ;;  %4607 = vst.msk [vmem:[%s9550_s7 + $0xe4] sm:$0x1] %vm1121_vm9, %v4528_v43  ;;  %v4497_v4 = vcombine.high %v4493_v47, %v4493_v47  ;;  %v4546_v8 = vcombine.high %v4542_v10, %v4542_v10 }
 0x536   : > { %4598 = vst.msk [vmem:[%s9550_s7 + $0x9c] sm:$0x1] %vm1121_vm9, %v4496_v11  ;;  %4600 = vst.msk [vmem:[%s9550_s7 + $0xac] sm:$0x1] %vm1121_vm9, %v4493_v47  ;;  %v6851_v3 = vpop.permute.xlu0 %6850 }
 0x537   : > { %4601 = vst.msk [vmem:[%s9550_s7 + $0xb4] sm:$0x1] %vm1121_vm9, %v4495_v23  ;;  %4606 = vst.msk [vmem:[%s9550_s7 + $0xdc] sm:$0x1] %vm1121_vm9, %v4545_v46  ;;  %v6853_v15 = vsel %vm407_vm7, %v6851_v3, 0 }
 0x538   : > { %4608 = vst.msk [vmem:[%s9550_s7 + $0xec] sm:$0x1] %vm1121_vm9, %v4542_v10  ;;  %4609 = vst.msk [vmem:[%s9550_s7 + $0xf4] sm:$0x1] %vm1121_vm9, %v4544_v52 }
 0x539   : > { %4602 = vst.msk [vmem:[%s9550_s7 + $0xbc] sm:$0x1] %vm1121_vm9, %v4497_v4  ;;  %4610 = vst.msk [vmem:[%s9550_s7 + $0xfc] sm:$0x1] %vm1121_vm9, %v4546_v8  ;;  %v6841_v55 = vpop.permute.xlu1 %6840 }
 0x53a   : > { %6919 = vmatpush1.bf16.msra.mxu0 %v6841_v55  ;;  %7854 = vmatpush1.bf16.msra.mxu1 %v6841_v55 }
 0x53b   : > { %6920 = vmatprep.subr.bf16.mxu0 %v12932_v53  ;;  %7846 = vmatprep.subr.bf16.mxu1 %v12932_v53 }
 0x53d   : > { %v7770_v44 = vpop.f32.mrb[40].mxu0 }
 0x53e   : > { %v7771_v36 = vpop.f32.mrb[41].mxu0  ;;  %6921 = vmatpush1.bf16.msra.mxu0 %v6853_v15  ;;  %7855 = vmatpush1.bf16.msra.mxu1 %v6853_v15 }
 0x53f   : > { %v7772_v17 = vadd.f32 %v7771_v36, %v7770_v44  ;;  %v7773_v58 = vpop.f32.mrb[42].mxu0 }
 0x540   : > { %v7774_v30 = vpop.f32.mrb[43].mxu0 }
 0x541   : > { %v7775_v57 = vadd.f32 %v7774_v30, %v7773_v58  ;;  %6937 = vmatmul.mubr.bf16.vlgmr.msra.gmra.mrb[64].mxu0 %v12100_v41  ;;  %6945 = vmatmul.mubr.bf16.vlgmr.msra.gmra.mrb[56].mxu1 %v12147_v14  ;;  %v5150_v53 = vadd.f32 %v7772_v17, %v13007_v39 }
 0x543   : > { %v5153_v56 = vadd.f32 %v7775_v57, %v13008_v33 }
 0x545   : > { %v7776_v54 = vpop.f32.mrb[44].mxu0 }
 0x546   : > { %v7777_v48 = vpop.f32.mrb[45].mxu0 }
 0x547   : > { %v7778_v22 = vadd.f32 %v7777_v48, %v7776_v54  ;;  %v7779_v27 = vpop.f32.mrb[46].mxu0 }
 0x548   : > { %v7780_v51 = vpop.f32.mrb[47].mxu0 }
 0x549   : > { %v7781_v24 = vadd.f32 %v7780_v51, %v7779_v27  ;;  %v5158_v20 = vadd.f32 %v7778_v22, %v13010_v38 }
 0x54b   : > { %v5161_v50 = vadd.f32 %v7781_v24, %v13011_v29 }
 0x580   : > { %v5198_v12 = vpop.f32.mrb[40].mxu1 }
 0x581   : > { %v5199_v7 = vadd.f32 %v5198_v12, %v5150_v53  ;;  %v5200_v26 = vpop.f32.mrb[41].mxu1 }
 0x582   : > { %v5201_v60 = vpop.f32.mrb[42].mxu1 }
 0x583   : > { %v5213_v34 = vmax.f32 %v5199_v7, 0.0  ;;  %v5202_v28 = vadd.f32 %v5201_v60, %v5153_v56  ;;  %v5203_v41 = vpop.f32.mrb[43].mxu1 }
 0x585   : > { %v5221_v63 = vcombine.high %v5213_v34, %v5213_v34  ;;  %v5228_v14 = vrot.slane %v5213_v34, %v13009_v45  ;;  %v5214_v31 = vmax.f32 %v5202_v28, 0.0 }
 0x587   : > { %v5235_v42 = vrot.slane %v5221_v63, %v13009_v45  ;;  %v5236_v1 = vcombine.high %v5228_v14, %v5228_v14  ;;  %v5244_v0 = vrot.slane %v5228_v14, %v13009_v45  ;;  %v5270_v9 = vcombine.high %v5214_v31, %v5214_v31 }
 0x588   : > { %v5277_v21 = vrot.slane %v5214_v31, %v13009_v45  ;;  %v5206_v5 = vpop.f32.mrb[44].mxu1 }
 0x589   : > { %v5237_v62 = vcombine.high %v5235_v42, %v5235_v42  ;;  %v5251_v25 = vrot.slane %v5235_v42, %v13009_v45  ;;  %v5258_v37 = vrot.slane %v5236_v1, %v13009_v45  ;;  %v5266_v13 = vcombine.high %v5244_v0, %v5244_v0  ;;  %5449 = vst.msk [vmem:[%s9550_s7 + $0x5] sm:$0x1] %vm1121_vm9, %v5244_v0  ;;  %v5208_v32 = vpop.f32.mrb[45].mxu1 }
 0x58a   : > { %v5284_v59 = vrot.slane %v5270_v9, %v13009_v45  ;;  %v5285_v2 = vcombine.high %v5277_v21, %v5277_v21  ;;  %v5293_v61 = vrot.slane %v5277_v21, %v13009_v45  ;;  %v5207_v18 = vadd.f32 %v5206_v5, %v5158_v20  ;;  %v5209_v43 = vpop.f32.mrb[46].mxu1 }
 0x58b   : > { %v5265_v35 = vrot.slane %v5237_v62, %v13009_v45  ;;  %v5267_v19 = vcombine.high %v5251_v25, %v5251_v25  ;;  %v5268_v49 = vcombine.high %v5258_v37, %v5258_v37  ;;  %5450 = vst.msk [vmem:[%s9550_s7 + $0xd] sm:$0x1] %vm1121_vm9, %v5258_v37  ;;  %5451 = vst.msk [vmem:[%s9550_s7 + $0x15] sm:$0x1] %vm1121_vm9, %v5266_v13  ;;  %v5211_v23 = vpop.f32.mrb[47].mxu1 }
 0x58c   : > { %5453 = vst.msk [vmem:[%s9550_s7 + $0x25] sm:$0x1] %vm1121_vm9, %v5251_v25  ;;  %v5286_v16 = vcombine.high %v5284_v59, %v5284_v59  ;;  %v5300_v40 = vrot.slane %v5284_v59, %v13009_v45  ;;  %v5307_v6 = vrot.slane %v5285_v2, %v13009_v45  ;;  %v5315_v47 = vcombine.high %v5293_v61, %v5293_v61 }
 0x58d   : > { %5457 = vst.msk [vmem:[%s9550_s7 + $0x45] sm:$0x1] %vm1121_vm9, %v5293_v61  ;;  %v5269_v11 = vcombine.high %v5265_v35, %v5265_v35  ;;  %5452 = vst.msk [vmem:[%s9550_s7 + $0x1d] sm:$0x1] %vm1121_vm9, %v5268_v49  ;;  %v5215_v10 = vmax.f32 %v5207_v18, 0.0  ;;  %v5210_v52 = vadd.f32 %v5209_v43, %v5161_v50 }
 0x58e   : > { %5454 = vst.msk [vmem:[%s9550_s7 + $0x2d] sm:$0x1] %vm1121_vm9, %v5265_v35  ;;  %5455 = vst.msk [vmem:[%s9550_s7 + $0x35] sm:$0x1] %vm1121_vm9, %v5267_v19  ;;  %v5314_v46 = vrot.slane %v5286_v16, %v13009_v45  ;;  %v5316_v4 = vcombine.high %v5300_v40, %v5300_v40  ;;  %v5317_v8 = vcombine.high %v5307_v6, %v5307_v6 }
 0x58f   : > { %5458 = vst.msk [vmem:[%s9550_s7 + $0x4d] sm:$0x1] %vm1121_vm9, %v5307_v6  ;;  %5459 = vst.msk [vmem:[%s9550_s7 + $0x55] sm:$0x1] %vm1121_vm9, %v5315_v47  ;;  %v5319_v3 = vcombine.high %v5215_v10, %v5215_v10  ;;  %v5326_v55 = vrot.slane %v5215_v10, %v13009_v45  ;;  %v5216_v15 = vmax.f32 %v5210_v52, 0.0  ;;  %v7798_v44 = vpop.f32.mrb[48].mxu0 }
 0x590   : > { %5461 = vst.msk [vmem:[%s9550_s7 + $0x65] sm:$0x1] %vm1121_vm9, %v5300_v40  ;;  %5456 = vst.msk [vmem:[%s9550_s7 + $0x3d] sm:$0x1] %vm1121_vm9, %v5269_v11  ;;  %v5318_v36 = vcombine.high %v5314_v46, %v5314_v46  ;;  %v7799_v17 = vpop.f32.mrb[49].mxu0 }
 0x591   : > { %5460 = vst.msk [vmem:[%s9550_s7 + $0x5d] sm:$0x1] %vm1121_vm9, %v5317_v8  ;;  %5462 = vst.msk [vmem:[%s9550_s7 + $0x6d] sm:$0x1] %vm1121_vm9, %v5314_v46  ;;  %v5333_v58 = vrot.slane %v5319_v3, %v13009_v45  ;;  %v5334_v30 = vcombine.high %v5326_v55, %v5326_v55  ;;  %v5342_v57 = vrot.slane %v5326_v55, %v13009_v45  ;;  %v7801_v48 = vpop.f32.mrb[50].mxu0 }
 0x592   : > { %5463 = vst.msk [vmem:[%s9550_s7 + $0x75] sm:$0x1] %vm1121_vm9, %v5316_v4  ;;  %v5368_v54 = vcombine.high %v5216_v15, %v5216_v15  ;;  %5464 = vst.msk [vmem:[%s9550_s7 + $0x7d] sm:$0x1] %vm1121_vm9, %v5318_v36  ;;  %v5375_v22 = vrot.slane %v5216_v15, %v13009_v45  ;;  %v7800_v27 = vadd.f32 %v7799_v17, %v7798_v44  ;;  %v7802_v51 = vpop.f32.mrb[51].mxu0 }
 0x593   : > { %v5335_v24 = vcombine.high %v5333_v58, %v5333_v58  ;;  %v5349_v53 = vrot.slane %v5333_v58, %v13009_v45  ;;  %v5356_v12 = vrot.slane %v5334_v30, %v13009_v45  ;;  %v5364_v7 = vcombine.high %v5342_v57, %v5342_v57  ;;  %5465 = vst.msk [vmem:[%s9550_s7 + $0x85] sm:$0x1] %vm1121_vm9, %v5342_v57 }
 0x594   : > { %v5382_v26 = vrot.slane %v5368_v54, %v13009_v45  ;;  %v5383_v56 = vcombine.high %v5375_v22, %v5375_v22  ;;  %v5391_v60 = vrot.slane %v5375_v22, %v13009_v45  ;;  %v7803_v34 = vadd.f32 %v7802_v51, %v7801_v48 }
 0x595   : > { %v5363_v28 = vrot.slane %v5335_v24, %v13009_v45  ;;  %v5365_v41 = vcombine.high %v5349_v53, %v5349_v53  ;;  %v5366_v63 = vcombine.high %v5356_v12, %v5356_v12  ;;  %5466 = vst.msk [vmem:[%s9550_s7 + $0x8d] sm:$0x1] %vm1121_vm9, %v5356_v12  ;;  %5467 = vst.msk [vmem:[%s9550_s7 + $0x95] sm:$0x1] %vm1121_vm9, %v5364_v7 }
 0x596   : > { %5469 = vst.msk [vmem:[%s9550_s7 + $0xa5] sm:$0x1] %vm1121_vm9, %v5349_v53  ;;  %v5384_v14 = vcombine.high %v5382_v26, %v5382_v26  ;;  %v5398_v31 = vrot.slane %v5382_v26, %v13009_v45  ;;  %v5405_v42 = vrot.slane %v5383_v56, %v13009_v45  ;;  %v5413_v1 = vcombine.high %v5391_v60, %v5391_v60 }
 0x597   : > { %5473 = vst.msk [vmem:[%s9550_s7 + $0xc5] sm:$0x1] %vm1121_vm9, %v5391_v60  ;;  %v5367_v0 = vcombine.high %v5363_v28, %v5363_v28  ;;  %5468 = vst.msk [vmem:[%s9550_s7 + $0x9d] sm:$0x1] %vm1121_vm9, %v5366_v63  ;;  %v7804_v9 = vpop.f32.mrb[52].mxu0  ;;  %v6020_v61 = vadd.f32 %v7800_v27, %v13007_v39  ;;  %v6023_v50 = vadd.f32 %v7803_v34, %v13008_v33 }
 0x598   : > { %5470 = vst.msk [vmem:[%s9550_s7 + $0xad] sm:$0x1] %vm1121_vm9, %v5363_v28  ;;  %5471 = vst.msk [vmem:[%s9550_s7 + $0xb5] sm:$0x1] %vm1121_vm9, %v5365_v41  ;;  %v5412_v21 = vrot.slane %v5384_v14, %v13009_v45  ;;  %v5414_v20 = vcombine.high %v5398_v31, %v5398_v31  ;;  %v5415_v62 = vcombine.high %v5405_v42, %v5405_v42  ;;  %v7805_v25 = vpop.f32.mrb[53].mxu0 }
 0x599   : > { %5474 = vst.msk [vmem:[%s9550_s7 + $0xcd] sm:$0x1] %vm1121_vm9, %v5405_v42  ;;  %5475 = vst.msk [vmem:[%s9550_s7 + $0xd5] sm:$0x1] %vm1121_vm9, %v5413_v1  ;;  %v7806_v37 = vadd.f32 %v7805_v25, %v7804_v9  ;;  %v7807_v13 = vpop.f32.mrb[54].mxu0 }
 0x59a   : > { %5477 = vst.msk [vmem:[%s9550_s7 + $0xe5] sm:$0x1] %vm1121_vm9, %v5398_v31  ;;  %5472 = vst.msk [vmem:[%s9550_s7 + $0xbd] sm:$0x1] %vm1121_vm9, %v5367_v0  ;;  %v5416_v5 = vcombine.high %v5412_v21, %v5412_v21  ;;  %v7808_v59 = vpop.f32.mrb[55].mxu0 }
 0x59b   : > { %5476 = vst.msk [vmem:[%s9550_s7 + $0xdd] sm:$0x1] %vm1121_vm9, %v5415_v62  ;;  %5478 = vst.msk [vmem:[%s9550_s7 + $0xed] sm:$0x1] %vm1121_vm9, %v5412_v21  ;;  %v7809_v2 = vadd.f32 %v7808_v59, %v7807_v13  ;;  %v6028_v36 = vadd.f32 %v7806_v37, %v13010_v38 }
 0x59c   : > { %5479 = vst.msk [vmem:[%s9550_s7 + $0xf5] sm:$0x1] %vm1121_vm9, %v5414_v20  ;;  %5480 = vst.msk [vmem:[%s9550_s7 + $0xfd] sm:$0x1] %vm1121_vm9, %v5416_v5 }
 0x59d   : > { %v6031_v30 = vadd.f32 %v7809_v2, %v13011_v29 }
 0x5cd   : > { %v6068_v18 = vpop.f32.mrb[48].mxu1  ;;  %v7826_v32 = vpop.f32.mrb[56].mxu0 }
 0x5ce   : > { %v6069_v35 = vadd.f32 %v6068_v18, %v6020_v61  ;;  %v6070_v19 = vpop.f32.mrb[49].mxu1  ;;  %v7827_v49 = vpop.f32.mrb[57].mxu0 }
 0x5cf   : > { %v12483_v43 = vadd.f32 %v7827_v49, %v7826_v32  ;;  %v6071_v16 = vpop.f32.mrb[50].mxu1  ;;  %v7829_v40 = vpop.f32.mrb[58].mxu0 }
 0x5d0   : > { %v6083_v6 = vmax.f32 %v6069_v35, 0.0  ;;  %v6072_v47 = vadd.f32 %v6071_v16, %v6023_v50  ;;  %v7830_v23 = vpop.f32.mrb[59].mxu0  ;;  %v6073_v11 = vpop.f32.mrb[51].mxu1 }
 0x5d1   : > { %v12485_v10 = vadd.f32 %v7830_v23, %v7829_v40 }
 0x5d2   : > { %v6091_v52 = vcombine.high %v6083_v6, %v6083_v6  ;;  %v6098_v46 = vrot.slane %v6083_v6, %v13009_v45  ;;  %v6084_v4 = vmax.f32 %v6072_v47, 0.0 }
 0x5d4   : > { %v6105_v8 = vrot.slane %v6091_v52, %v13009_v45  ;;  %v6106_v3 = vcombine.high %v6098_v46, %v6098_v46  ;;  %v6114_v55 = vrot.slane %v6098_v46, %v13009_v45  ;;  %v6140_v15 = vcombine.high %v6084_v4, %v6084_v4 }
 0x5d5   : > { %v6147_v44 = vrot.slane %v6084_v4, %v13009_v45  ;;  %v6076_v17 = vpop.f32.mrb[52].mxu1  ;;  %v7832_v58 = vpop.f32.mrb[60].mxu0 }
 0x5d6   : > { %v6107_v57 = vcombine.high %v6105_v8, %v6105_v8  ;;  %v6121_v54 = vrot.slane %v6105_v8, %v13009_v45  ;;  %v6128_v48 = vrot.slane %v6106_v3, %v13009_v45  ;;  %v6136_v22 = vcombine.high %v6114_v55, %v6114_v55  ;;  %6319 = vst.msk [vmem:[%s9550_s7 + $0x6] sm:$0x1] %vm1121_vm9, %v6114_v55  ;;  %v6078_v27 = vpop.f32.mrb[53].mxu1  ;;  %v7833_v51 = vpop.f32.mrb[61].mxu0 }
 0x5d7   : > { %v6154_v24 = vrot.slane %v6140_v15, %v13009_v45  ;;  %v6155_v53 = vcombine.high %v6147_v44, %v6147_v44  ;;  %v6163_v12 = vrot.slane %v6147_v44, %v13009_v45  ;;  %v6077_v7 = vadd.f32 %v6076_v17, %v6028_v36  ;;  %v6079_v26 = vpop.f32.mrb[54].mxu1  ;;  %v7835_v56 = vpop.f32.mrb[62].mxu0 }
 0x5d8   : > { %v6135_v60 = vrot.slane %v6107_v57, %v13009_v45  ;;  %v6137_v34 = vcombine.high %v6121_v54, %v6121_v54  ;;  %v6138_v28 = vcombine.high %v6128_v48, %v6128_v48  ;;  %6320 = vst.msk [vmem:[%s9550_s7 + $0xe] sm:$0x1] %vm1121_vm9, %v6128_v48  ;;  %6321 = vst.msk [vmem:[%s9550_s7 + $0x16] sm:$0x1] %vm1121_vm9, %v6136_v22  ;;  %v7836_v63 = vpop.f32.mrb[63].mxu0  ;;  %v6081_v14 = vpop.f32.mrb[55].mxu1 }
 0x5d9   : > { %6323 = vst.msk [vmem:[%s9550_s7 + $0x26] sm:$0x1] %vm1121_vm9, %v6121_v54  ;;  %v12506_v41 = vadd.f32 %v7833_v51, %v7832_v58  ;;  %v6156_v31 = vcombine.high %v6154_v24, %v6154_v24  ;;  %v6170_v42 = vrot.slane %v6154_v24, %v13009_v45  ;;  %v6177_v1 = vrot.slane %v6155_v53, %v13009_v45 }
 0x5da   : > { %v6185_v0 = vcombine.high %v6163_v12, %v6163_v12  ;;  %6327 = vst.msk [vmem:[%s9550_s7 + $0x46] sm:$0x1] %vm1121_vm9, %v6163_v12  ;;  %v6139_v9 = vcombine.high %v6135_v60, %v6135_v60  ;;  %6322 = vst.msk [vmem:[%s9550_s7 + $0x1e] sm:$0x1] %vm1121_vm9, %v6138_v28  ;;  %v6085_v21 = vmax.f32 %v6077_v7, 0.0  ;;  %v6080_v20 = vadd.f32 %v6079_v26, %v6031_v30 }
 0x5db   : > { %6324 = vst.msk [vmem:[%s9550_s7 + $0x2e] sm:$0x1] %vm1121_vm9, %v6135_v60  ;;  %6325 = vst.msk [vmem:[%s9550_s7 + $0x36] sm:$0x1] %vm1121_vm9, %v6137_v34  ;;  %v12518_v62 = vadd.f32 %v7836_v63, %v7835_v56  ;;  %v6184_v25 = vrot.slane %v6156_v31, %v13009_v45  ;;  %v6186_v37 = vcombine.high %v6170_v42, %v6170_v42 }
 0x5dc   : > { %v6187_v13 = vcombine.high %v6177_v1, %v6177_v1  ;;  %6328 = vst.msk [vmem:[%s9550_s7 + $0x4e] sm:$0x1] %vm1121_vm9, %v6177_v1  ;;  %6329 = vst.msk [vmem:[%s9550_s7 + $0x56] sm:$0x1] %vm1121_vm9, %v6185_v0  ;;  %v6189_v5 = vcombine.high %v6085_v21, %v6085_v21  ;;  %v6196_v59 = vrot.slane %v6085_v21, %v13009_v45  ;;  %v6086_v2 = vmax.f32 %v6080_v20, 0.0 }
 0x5dd   : > { %6331 = vst.msk [vmem:[%s9550_s7 + $0x66] sm:$0x1] %vm1121_vm9, %v6170_v42  ;;  %6326 = vst.msk [vmem:[%s9550_s7 + $0x3e] sm:$0x1] %vm1121_vm9, %v6139_v9  ;;  %v6188_v61 = vcombine.high %v6184_v25, %v6184_v25  ;;  %v6890_v57 = vadd.f32 %v12483_v43, %v13007_v39  ;;  %v6898_v54 = vadd.f32 %v12506_v41, %v13010_v38 }
 0x5de   : > { %6330 = vst.msk [vmem:[%s9550_s7 + $0x5e] sm:$0x1] %vm1121_vm9, %v6187_v13  ;;  %6332 = vst.msk [vmem:[%s9550_s7 + $0x6e] sm:$0x1] %vm1121_vm9, %v6184_v25  ;;  %v6203_v18 = vrot.slane %v6189_v5, %v13009_v45  ;;  %v6204_v32 = vcombine.high %v6196_v59, %v6196_v59  ;;  %v6212_v35 = vrot.slane %v6196_v59, %v13009_v45 }
 0x5df   : > { %6333 = vst.msk [vmem:[%s9550_s7 + $0x76] sm:$0x1] %vm1121_vm9, %v6186_v37  ;;  %v6238_v19 = vcombine.high %v6086_v2, %v6086_v2  ;;  %6334 = vst.msk [vmem:[%s9550_s7 + $0x7e] sm:$0x1] %vm1121_vm9, %v6188_v61  ;;  %v6245_v49 = vrot.slane %v6086_v2, %v13009_v45  ;;  %v6893_v12 = vadd.f32 %v12485_v10, %v13008_v33 }
 0x5e0   : > { %v6205_v50 = vcombine.high %v6203_v18, %v6203_v18  ;;  %v6219_v16 = vrot.slane %v6203_v18, %v13009_v45  ;;  %v6226_v40 = vrot.slane %v6204_v32, %v13009_v45  ;;  %v6234_v6 = vcombine.high %v6212_v35, %v6212_v35  ;;  %6335 = vst.msk [vmem:[%s9550_s7 + $0x86] sm:$0x1] %vm1121_vm9, %v6212_v35 }
 0x5e1   : > { %v6252_v47 = vrot.slane %v6238_v19, %v13009_v45  ;;  %v6253_v23 = vcombine.high %v6245_v49, %v6245_v49  ;;  %v6261_v11 = vrot.slane %v6245_v49, %v13009_v45  ;;  %v6901_v7 = vadd.f32 %v12518_v62, %v13011_v29 }
 0x5e2   : > { %v6233_v52 = vrot.slane %v6205_v50, %v13009_v45  ;;  %v6235_v46 = vcombine.high %v6219_v16, %v6219_v16  ;;  %v6236_v4 = vcombine.high %v6226_v40, %v6226_v40  ;;  %6336 = vst.msk [vmem:[%s9550_s7 + $0x8e] sm:$0x1] %vm1121_vm9, %v6226_v40  ;;  %6337 = vst.msk [vmem:[%s9550_s7 + $0x96] sm:$0x1] %vm1121_vm9, %v6234_v6 }
 0x5e3   : > { %6339 = vst.msk [vmem:[%s9550_s7 + $0xa6] sm:$0x1] %vm1121_vm9, %v6219_v16  ;;  %v6254_v8 = vcombine.high %v6252_v47, %v6252_v47  ;;  %v6268_v3 = vrot.slane %v6252_v47, %v13009_v45  ;;  %v6275_v55 = vrot.slane %v6253_v23, %v13009_v45  ;;  %v6283_v15 = vcombine.high %v6261_v11, %v6261_v11 }
 0x5e4   : > { %6343 = vst.msk [vmem:[%s9550_s7 + $0xc6] sm:$0x1] %vm1121_vm9, %v6261_v11  ;;  %v6237_v44 = vcombine.high %v6233_v52, %v6233_v52  ;;  %6338 = vst.msk [vmem:[%s9550_s7 + $0x9e] sm:$0x1] %vm1121_vm9, %v6236_v4 }
 0x5e5   : > { %6340 = vst.msk [vmem:[%s9550_s7 + $0xae] sm:$0x1] %vm1121_vm9, %v6233_v52  ;;  %6341 = vst.msk [vmem:[%s9550_s7 + $0xb6] sm:$0x1] %vm1121_vm9, %v6235_v46  ;;  %v6282_v36 = vrot.slane %v6254_v8, %v13009_v45  ;;  %v6284_v17 = vcombine.high %v6268_v3, %v6268_v3  ;;  %v6285_v58 = vcombine.high %v6275_v55, %v6275_v55 }
 0x5e6   : > { %6344 = vst.msk [vmem:[%s9550_s7 + $0xce] sm:$0x1] %vm1121_vm9, %v6275_v55  ;;  %6345 = vst.msk [vmem:[%s9550_s7 + $0xd6] sm:$0x1] %vm1121_vm9, %v6283_v15 }
 0x5e7   : > { %6347 = vst.msk [vmem:[%s9550_s7 + $0xe6] sm:$0x1] %vm1121_vm9, %v6268_v3  ;;  %6342 = vst.msk [vmem:[%s9550_s7 + $0xbe] sm:$0x1] %vm1121_vm9, %v6237_v44  ;;  %v6286_v30 = vcombine.high %v6282_v36, %v6282_v36 }
 0x5e8   : > { %6346 = vst.msk [vmem:[%s9550_s7 + $0xde] sm:$0x1] %vm1121_vm9, %v6285_v58  ;;  %6348 = vst.msk [vmem:[%s9550_s7 + $0xee] sm:$0x1] %vm1121_vm9, %v6282_v36 }
 0x5e9   : > { %6349 = vst.msk [vmem:[%s9550_s7 + $0xf6] sm:$0x1] %vm1121_vm9, %v6284_v17  ;;  %6350 = vst.msk [vmem:[%s9550_s7 + $0xfe] sm:$0x1] %vm1121_vm9, %v6286_v30 }
 0x614   : > { %v6938_v48 = vpop.f32.mrb[64].mxu0  ;;  %v6946_v22 = vpop.f32.mrb[56].mxu1 }
 0x615   : > { %v6939_v27 = vadd.f32 %v6938_v48, %v6890_v57  ;;  %v6947_v51 = vadd.f32 %v6946_v22, %v6898_v54  ;;  %v6940_v24 = vpop.f32.mrb[65].mxu0  ;;  %v6948_v53 = vpop.f32.mrb[57].mxu1 }
 0x616   : > { %v6941_v26 = vpop.f32.mrb[66].mxu0  ;;  %v6949_v56 = vpop.f32.mrb[58].mxu1 }
 0x617   : > { %v6953_v60 = vmax.f32 %v6939_v27, 0.0  ;;  %v6955_v34 = vmax.f32 %v6947_v51, 0.0  ;;  %v6942_v39 = vadd.f32 %v6941_v26, %v6893_v12  ;;  %v6950_v43 = vadd.f32 %v6949_v56, %v6901_v7  ;;  %v6943_v28 = vpop.f32.mrb[67].mxu0  ;;  %v6951_v38 = vpop.f32.mrb[59].mxu1 }
 0x619   : > { %v6961_v41 = vcombine.high %v6953_v60, %v6953_v60  ;;  %v6968_v63 = vrot.slane %v6953_v60, %v13009_v45  ;;  %v7059_v14 = vcombine.high %v6955_v34, %v6955_v34  ;;  %v7066_v31 = vrot.slane %v6955_v34, %v13009_v45 }
 0x61a   : > { %v6954_v42 = vmax.f32 %v6942_v39, 0.0  ;;  %v6956_v33 = vmax.f32 %v6950_v43, 0.0 }
 0x61b   : > { %v6975_v10 = vrot.slane %v6961_v41, %v13009_v45  ;;  %v6976_v29 = vcombine.high %v6968_v63, %v6968_v63  ;;  %v6984_v1 = vrot.slane %v6968_v63, %v13009_v45  ;;  %v7073_v0 = vrot.slane %v7059_v14, %v13009_v45 }
 0x61c   : > { %v7074_v9 = vcombine.high %v7066_v31, %v7066_v31  ;;  %v7082_v21 = vrot.slane %v7066_v31, %v13009_v45  ;;  %v7010_v20 = vcombine.high %v6954_v42, %v6954_v42  ;;  %v7017_v62 = vrot.slane %v6954_v42, %v13009_v45 }
 0x61d   : > { %v6977_v25 = vcombine.high %v6975_v10, %v6975_v10  ;;  %v6991_v37 = vrot.slane %v6975_v10, %v13009_v45  ;;  %v6998_v13 = vrot.slane %v6976_v29, %v13009_v45  ;;  %v7006_v5 = vcombine.high %v6984_v1, %v6984_v1  ;;  %7189 = vst.msk [vmem:[%s9550_s7 + $0x7] sm:$0x1] %vm1121_vm9, %v6984_v1 }
 0x61e   : > { %v7075_v59 = vcombine.high %v7073_v0, %v7073_v0  ;;  %v7089_v2 = vrot.slane %v7073_v0, %v13009_v45  ;;  %v7096_v61 = vrot.slane %v7074_v9, %v13009_v45  ;;  %v7104_v18 = vcombine.high %v7082_v21, %v7082_v21  ;;  %7205 = vst.msk [vmem:[%s9550_s7 + $0x87] sm:$0x1] %vm1121_vm9, %v7082_v21 }
 0x61f   : > { %v7005_v32 = vrot.slane %v6977_v25, %v13009_v45  ;;  %v7007_v35 = vcombine.high %v6991_v37, %v6991_v37  ;;  %v7008_v19 = vcombine.high %v6998_v13, %v6998_v13  ;;  %7190 = vst.msk [vmem:[%s9550_s7 + $0xf] sm:$0x1] %vm1121_vm9, %v6998_v13  ;;  %7191 = vst.msk [vmem:[%s9550_s7 + $0x17] sm:$0x1] %vm1121_vm9, %v7006_v5 }
 0x620   : > { %7193 = vst.msk [vmem:[%s9550_s7 + $0x27] sm:$0x1] %vm1121_vm9, %v6991_v37  ;;  %v7024_v49 = vrot.slane %v7010_v20, %v13009_v45  ;;  %v7103_v50 = vrot.slane %v7075_v59, %v13009_v45  ;;  %v7105_v16 = vcombine.high %v7089_v2, %v7089_v2  ;;  %v7106_v40 = vcombine.high %v7096_v61, %v7096_v61 }
 0x621   : > { %7206 = vst.msk [vmem:[%s9550_s7 + $0x8f] sm:$0x1] %vm1121_vm9, %v7096_v61  ;;  %7207 = vst.msk [vmem:[%s9550_s7 + $0x97] sm:$0x1] %vm1121_vm9, %v7104_v18  ;;  %v7025_v6 = vcombine.high %v7017_v62, %v7017_v62  ;;  %v7009_v47 = vcombine.high %v7005_v32, %v7005_v32  ;;  %v7033_v11 = vrot.slane %v7017_v62, %v13009_v45 }
 0x622   : > { %7209 = vst.msk [vmem:[%s9550_s7 + $0xa7] sm:$0x1] %vm1121_vm9, %v7089_v2  ;;  %7192 = vst.msk [vmem:[%s9550_s7 + $0x1f] sm:$0x1] %vm1121_vm9, %v7008_v19  ;;  %v7026_v23 = vcombine.high %v7024_v49, %v7024_v49  ;;  %v7040_v52 = vrot.slane %v7024_v49, %v13009_v45  ;;  %v7107_v46 = vcombine.high %v7103_v50, %v7103_v50 }
 0x623   : > { %7194 = vst.msk [vmem:[%s9550_s7 + $0x2f] sm:$0x1] %vm1121_vm9, %v7005_v32  ;;  %7195 = vst.msk [vmem:[%s9550_s7 + $0x37] sm:$0x1] %vm1121_vm9, %v7007_v35  ;;  %v7047_v4 = vrot.slane %v7025_v6, %v13009_v45  ;;  %v7108_v8 = vcombine.high %v6956_v33, %v6956_v33  ;;  %v7115_v3 = vrot.slane %v6956_v33, %v13009_v45 }
 0x624   : > { %7208 = vst.msk [vmem:[%s9550_s7 + $0x9f] sm:$0x1] %vm1121_vm9, %v7106_v40  ;;  %7210 = vst.msk [vmem:[%s9550_s7 + $0xaf] sm:$0x1] %vm1121_vm9, %v7103_v50  ;;  %v7054_v55 = vrot.slane %v7026_v23, %v13009_v45  ;;  %v7055_v15 = vcombine.high %v7033_v11, %v7033_v11  ;;  %v7056_v44 = vcombine.high %v7040_v52, %v7040_v52 }
 0x625   : > { %7211 = vst.msk [vmem:[%s9550_s7 + $0xb7] sm:$0x1] %vm1121_vm9, %v7105_v16  ;;  %7196 = vst.msk [vmem:[%s9550_s7 + $0x3f] sm:$0x1] %vm1121_vm9, %v7009_v47  ;;  %v7057_v36 = vcombine.high %v7047_v4, %v7047_v4  ;;  %v7122_v17 = vrot.slane %v7108_v8, %v13009_v45  ;;  %v7123_v58 = vcombine.high %v7115_v3, %v7115_v3 }
 0x626   : > { %7197 = vst.msk [vmem:[%s9550_s7 + $0x47] sm:$0x1] %vm1121_vm9, %v7033_v11  ;;  %7201 = vst.msk [vmem:[%s9550_s7 + $0x67] sm:$0x1] %vm1121_vm9, %v7040_v52  ;;  %v7131_v30 = vrot.slane %v7115_v3, %v13009_v45  ;;  %v7058_v57 = vcombine.high %v7054_v55, %v7054_v55 }
 0x627   : > { %7212 = vst.msk [vmem:[%s9550_s7 + $0xbf] sm:$0x1] %vm1121_vm9, %v7107_v46  ;;  %7198 = vst.msk [vmem:[%s9550_s7 + $0x4f] sm:$0x1] %vm1121_vm9, %v7047_v4  ;;  %v7124_v54 = vcombine.high %v7122_v17, %v7122_v17  ;;  %v7138_v48 = vrot.slane %v7122_v17, %v13009_v45  ;;  %v7145_v22 = vrot.slane %v7123_v58, %v13009_v45 }
 0x628   : > { %7199 = vst.msk [vmem:[%s9550_s7 + $0x57] sm:$0x1] %vm1121_vm9, %v7055_v15  ;;  %7202 = vst.msk [vmem:[%s9550_s7 + $0x6f] sm:$0x1] %vm1121_vm9, %v7054_v55  ;;  %v7153_v27 = vcombine.high %v7131_v30, %v7131_v30 }
 0x629   : > { %7203 = vst.msk [vmem:[%s9550_s7 + $0x77] sm:$0x1] %vm1121_vm9, %v7056_v44  ;;  %7200 = vst.msk [vmem:[%s9550_s7 + $0x5f] sm:$0x1] %vm1121_vm9, %v7057_v36  ;;  %v7152_v51 = vrot.slane %v7124_v54, %v13009_v45  ;;  %v7154_v24 = vcombine.high %v7138_v48, %v7138_v48  ;;  %v7155_v53 = vcombine.high %v7145_v22, %v7145_v22 }
 0x62a   : > { %7213 = vst.msk [vmem:[%s9550_s7 + $0xc7] sm:$0x1] %vm1121_vm9, %v7131_v30  ;;  %7204 = vst.msk [vmem:[%s9550_s7 + $0x7f] sm:$0x1] %vm1121_vm9, %v7058_v57 }
 0x62b   : > { %7214 = vst.msk [vmem:[%s9550_s7 + $0xcf] sm:$0x1] %vm1121_vm9, %v7145_v22  ;;  %7215 = vst.msk [vmem:[%s9550_s7 + $0xd7] sm:$0x1] %vm1121_vm9, %v7153_v27  ;;  %v7156_v45 = vcombine.high %v7152_v51, %v7152_v51 }
 0x62c   : > { %7217 = vst.msk [vmem:[%s9550_s7 + $0xe7] sm:$0x1] %vm1121_vm9, %v7138_v48  ;;  %7216 = vst.msk [vmem:[%s9550_s7 + $0xdf] sm:$0x1] %vm1121_vm9, %v7155_v53 }
 0x62d   : > { %7218 = vst.msk [vmem:[%s9550_s7 + $0xef] sm:$0x1] %vm1121_vm9, %v7152_v51  ;;  %7219 = vst.msk [vmem:[%s9550_s7 + $0xf7] sm:$0x1] %vm1121_vm9, %v7154_v24 }
 0x62e   : > { %7220 = vst.msk [vmem:[%s9550_s7 + $0xff] sm:$0x1] %vm1121_vm9, %v7156_v45 }
 0x62f   : > { %8259 = shalt.err (!%p8256_p7)
}
 0x630   : > { %s8260_s7 = scalar_lea.hbm %s12678_s6, 4096  ;;  %s8264_s8 = scalar_lea.hbm %s12747_s3, 32768 }
 0x631   : > { %p8261_p9 = scmp.ne.s32.totalorder %s12678_s6, %s8260_s7  ;;  %p8265_p12 = scmp.lt.u32.totalorder %s12678_s6, %s12747_s3 }
 0x632   : > { %p8266_p13 = scmp.lt.u32.totalorder %s8264_s8, %s8260_s7  ;;  %p8268_p1 = scmp.lt.u32.totalorder %s8260_s7, %s12678_s6 }
 0x633   : > { %p8262_p10 = pnand %p8261_p9, %p8429_p3 }
 0x634   : > { %p8267_p0 = por %p8266_p13, %p8265_p12 }
 0x635   : > { %p8263_p11 = pneg %p8262_p10 }
 0x636   : > { %p8269_p2 = por %p8268_p1, %p8267_p0 }
 0x638   : > { %p8270_p4 = pnand %p8269_p2, %p8263_p11 }
 0x63a   : > { %8273 = shalt.err (!%p8270_p4)
}
 0x63b   : > { %s8355_s29 = smov 128   ;;  %s8356_s5 = smov 512  }
 0x63c   : > { %s8357_s28 = smov 8  }
 0x63d   : > { %7856 = dma.vmem_to_hbm [thread:$0]  (%p8429_p3), %s12680_s27, 4096, %s12678_s6, %s12692_s4, %s8355_s29, %s8356_s5, %s8357_s28  }
 0x63e PF: > { %p7862_p5 = scmp.ge.s32.totalorder %s8340_s19, 2  ;;  %s7251_s21 = sand.u32 1, %s8312_s12  }
 0x63f   : > { %s7252_s20 = scalar_lea.sflag [#allocation3], %s7251_s21 }
 0x640   : > { %p7859_p6 = pnand %p7862_p5, %p8438_p8 }
 0x642   : > { %8307 = dma.done.wait (!%p7859_p6), %s7252_s20, 4096  }
 0x643   : > { %8309 = vsyncadd (!%p7859_p6), %s7252_s20, 4294963200  ;;  %s16_s19 = sadd.s32 1, %s8340_s19   ;;  %s13014_s12 = smov %s8316_s13 }
 0x644   : > { %p13_p7 = scmp.ge.s32.totalorder %s16_s19, 10   ;;  %s13015_s13 = smov %s8320_s14 }
 0x645   : > { %s13016_s14 = smov %s8447_s30  ;;  %s13017_s15 = smov %s8332_s17 }
 0x646   : > { %s13018_s16 = smov %s8336_s18  ;;  %s13019_s17 = smov %s13022_s22 }
 0x647   : > { %s13020_s18 = smov %s13026_s23  ;;  %15 = sbr.rel (!%p13_p7) target bundleno = 5 (0x5), region = 67 }
 0x64e   :  { %7257 = vsyncpa [#allocation3], 1 }
 0x64f   :  { %7259 = vsyncpa [#allocation3 + $0x1], 1 }

</bundles_post_ra>
